<compile_context>
chip_gen: v6e
topology: v6e:2x2x1
jax: 0.10.0
libtpu: 0.0.40
codegen_flags: <defaults>
</compile_context>

<pallas_src>
import functools

import jax
import jax.numpy as jnp
from jax.experimental import pallas as pl
from jax.experimental.pallas import tpu as pltpu

NEG_SLOPE = 0.01           # nn.LeakyReLU default
BN_EPS = 1e-5              # nn.BatchNorm2d default
CPAD = 128                 # lane-dense channel padding for conv activations
CIN1 = 16                  # stage-1 channels per tap (15 = 5 frames x 3 ch, +1 pad)
CONV_CH = [(3, 32), (32, 64), (64, 128), (128, 128)]
FRAME_COEF = (0.1, 0.2, 0.3, 0.4, 0.5)


def _round8(n):
    return ((n + 7) // 8) * 8


def _geometry(h):
    """(H_in, H_out) for the four k=3, s=2, p=1 convs (square images)."""
    dims = []
    cur = h
    for _ in range(4):
        nxt = (cur - 1) // 2 + 1
        dims.append((cur, nxt))
        cur = nxt
    return tuple(dims)


def _stage_rows(w_out):
    """Stored row-block width: 1 left pad + w_out + right pads, mult of 8."""
    return _round8(w_out + 2)


# --------------------------- in-kernel helpers ------------------------------

def _bn_lrelu_store(acc, out_ref, gamma, beta, h_out, w_out, w_al):
    """Training-mode BatchNorm2d + LeakyReLU on a conv result, then a single
    whole-buffer masked store into the next stage's padded layout."""
    m_rows = acc.shape[0]                       # h_out * w_al (pad rows are 0)
    n = float(h_out * w_out)                    # true position count
    pad_rows = float(m_rows - h_out * w_out)
    mean = jnp.sum(acc, axis=0, keepdims=True) / n
    d = acc - mean
    # Exact pad correction: pad rows contribute (0 - mean)^2 each.
    ssq = jnp.sum(d * d, axis=0, keepdims=True) - pad_rows * mean * mean
    var = jnp.maximum(ssq / n, 0.0)             # biased variance (torch train)
    scale = jax.lax.rsqrt(var + BN_EPS) * gamma
    shift = beta - mean * scale
    y = acc * scale + shift
    y = jnp.where(y >= 0.0, y, NEG_SLOPE * y)
    # Zero stored column 0 and columns > w_out so the next stage's stride-2
    # taps read exact conv zero padding.
    col = jax.lax.broadcasted_iota(jnp.int32, (m_rows, acc.shape[1]), 0) % w_al
    valid = (col >= 1) & (col <= w_out)
    out_ref[...] = jnp.where(valid, y, 0.0)


def _im2col(patch_ref, in_ref, h_in, w_in, w_al_in, h_out, w_out, w_al_out,
            cin):
    """Fill patch_ref[0:h_out*w_al_out, 0:9*cin] with stride-2 im2col taps of
    the previous activation.  Row oh*w_al_out + 1 + ow holds the 9*cin patch
    for output (oh, ow); pad rows / out-of-range taps stay zero."""
    m_rows = h_out * w_al_out
    patch_ref[0:m_rows, :] = jnp.zeros((m_rows, 9 * cin), jnp.float32)
    for oh in range(h_out):
        dst = oh * w_al_out + 1
        for di in range(3):
            hi = 2 * oh + di - 1
            if not (0 <= hi < h_in):
                continue                        # conv zero padding in H
            for dj in range(3):
                tap = di * 3 + dj
                # stored col = w+1, so tap dj (input col 2*ow+dj-1) = col 2*ow+dj
                src = in_ref[pl.ds(hi * w_al_in + dj, w_out, stride=2), :]
                patch_ref[pl.ds(dst, w_out), tap * cin:(tap + 1) * cin] = src


def _qpred_kernel(p1_ref, w1_ref, w2_ref, w3_ref, w4_ref, gam_ref, bet_ref,
                  wh_ref, bh_ref, out_ref, patch, b1, b2, b3, b4, *, dims):
    outs = (b1, b2, b3, b4)
    weights = (w1_ref, w2_ref, w3_ref, w4_ref)

    # ---- stage 1: host-built im2col patches (frames folded into w1) --------
    h1 = dims[0][1]
    acc = jnp.dot(p1_ref[...], w1_ref[...], preferred_element_type=jnp.float32)
    _bn_lrelu_store(acc, b1, gam_ref[0:1, :], bet_ref[0:1, :],
                    h1, h1, _stage_rows(h1))

    # ---- stages 2..4: stride-2 im2col -> one big matmul each ----------------
    for l in range(1, 4):
        h_in, h_out = dims[l]
        w_al_in = _stage_rows(h_in)
        w_al_out = _stage_rows(h_out)
        _im2col(patch, outs[l - 1], h_in, h_in, w_al_in,
                h_out, h_out, w_al_out, CPAD)
        m_rows = h_out * w_al_out
        acc = jnp.dot(patch[0:m_rows, :], weights[l][...],
                      preferred_element_type=jnp.float32)
        _bn_lrelu_store(acc, outs[l], gam_ref[l:l + 1, :], bet_ref[l:l + 1, :],
                        h_out, h_out, w_al_out)

    # ---- head: Flatten+Linear as 3 VPU dot-reductions, then ELU, +1 --------
    b4v = b4[...]                                           # [24, 128]
    lane = jax.lax.broadcasted_iota(jnp.int32, (1, CPAD), 1)
    y = bh_ref[...]
    for co in range(3):
        prod = b4v * wh_ref[co]
        s = jnp.sum(jnp.sum(prod, axis=0, keepdims=True),
                    axis=1, keepdims=True)                  # [1, 1]
        y = y + jnp.where(lane == co, s, 0.0)
    y = jnp.where(y > 0.0, y, jnp.exp(jnp.minimum(y, 0.0)) - 1.0)   # ELU
    out_ref[...] = y + 1.0


# --------------------------------- wrapper ----------------------------------

def qpred_forward(x, params):
    """x: [B, 5, 3, H, W]; only batch element 0 is used (as in the reference)."""
    _, nf, cin, h, w = x.shape
    assert nf == 5 and cin == 3 and h == w
    dims = _geometry(h)
    h1 = dims[0][1]
    w_al1 = _stage_rows(h1)

    # Host-side layout plumbing only: im2col (gather + zero pad) of the raw
    # 5-frame input.  The 0.1..0.5 frame weights live in w1, not here.
    xf = jnp.transpose(x[0], (2, 3, 0, 1)).reshape(h, w, nf * cin)   # [H,W,15]
    xf = jnp.pad(xf, ((1, 1), (1, 1), (0, CIN1 - nf * cin)))         # [H+2,W+2,16]
    taps = []
    for di in range(3):
        for dj in range(3):
            taps.append(xf[di:di + 2 * h1 - 1:2, dj:dj + 2 * h1 - 1:2, :])
    patch1 = jnp.concatenate(taps, axis=-1)                          # [h1,h1,144]
    patch1 = jnp.pad(patch1, ((0, 0), (1, w_al1 - h1 - 1), (0, 0)))
    patch1 = patch1.reshape(h1 * w_al1, 9 * CIN1)

    # Scratch: one shared im2col patch buffer + the four stage activations.
    max_rows = max(dims[l][1] * _stage_rows(dims[l][1]) for l in range(1, 4))
    scratch = [pltpu.VMEM((max_rows, 9 * CPAD), jnp.float32)]
    for (_, h_out) in dims:
        scratch.append(
            pltpu.VMEM((h_out * _stage_rows(h_out), CPAD), jnp.float32))

    # TODO(synk): at reference 897x897 scale, switch to a row-tiled grid with
    # BlockSpec pipelining per stage and a "parallel" axis for v7x's 2nd core;
    # at 33x33 the whole problem (~4 MiB) is VMEM-resident on one core.
    vspec = pl.BlockSpec(memory_space=pltpu.MemorySpace.VMEM)
    kernel = functools.partial(_qpred_kernel, dims=dims)
    out = pl.pallas_call(
        kernel,
        out_shape=jax.ShapeDtypeStruct((1, CPAD), jnp.float32),
        in_specs=[vspec] * 9,
        out_specs=vspec,
        scratch_shapes=scratch,
        compiler_params=pltpu.CompilerParams(
            vmem_limit_bytes=32 * 1024 * 1024),
    )(patch1, params["w1"], params["w2"], params["w3"], params["w4"],
      params["gammas"], params["betas"], params["whead"], params["bhead"])
    return out[:, :3]                                                # [1, 3]


def init_params(key, h):
    """Deterministic synthetic parameters, generated in PyTorch layouts and
    folded offline into kernel layouts (pure weight plumbing + frame fold)."""
    dims = _geometry(h)
    params = {}
    coefs = jnp.asarray(FRAME_COEF, jnp.float32)

    for idx, (cin, cout) in enumerate(CONV_CH):
        key, kw = jax.random.split(key)
        w_pt = 0.05 * jax.random.normal(kw, (cout, cin, 3, 3), jnp.float32)
        w_t = jnp.transpose(w_pt, (2, 3, 1, 0))              # [kh, kw, cin, cout]
        if idx == 0:
            # Fold the 5 frame weights into conv1; channel index = f*3 + c.
            w_t = coefs[None, None, :, None, None] * w_t[:, :, None, :, :]
            w_t = w_t.reshape(3, 3, 15, cout)
            w_t = jnp.pad(w_t, ((0, 0), (0, 0), (0, CIN1 - 15),
                                (0, CPAD - cout)))
            params["w1"] = w_t.reshape(9 * CIN1, CPAD)       # [144, 128]
        else:
            w_t = jnp.pad(w_t, ((0, 0), (0, 0), (0, CPAD - cin),
                                (0, CPAD - cout)))
            params[f"w{idx + 1}"] = w_t.reshape(9 * CPAD, CPAD)   # [1152, 128]
    # Conv2d biases omitted on purpose: training-mode BatchNorm subtracts the
    # batch mean, which contains the bias exactly.

    key, kg, kb = jax.random.split(key, 3)
    graw = 1.0 + 0.1 * jax.random.normal(kg, (4, CPAD), jnp.float32)
    braw = 0.1 * jax.random.normal(kb, (4, CPAD), jnp.float32)
    couts = jnp.array([c for _, c in CONV_CH])[:, None]
    ch = jnp.arange(CPAD)[None, :]
    # Padded channels: gamma=1, beta=0 so they stay exactly zero end-to-end.
    params["gammas"] = jnp.where(ch < couts, graw, 1.0)
    params["betas"] = jnp.where(ch < couts, braw, 0.0)

    s4 = dims[-1][1]
    w_al4 = _stage_rows(s4)
    lin_in = CPAD * s4 * s4
    key, kw, kb2 = jax.random.split(key, 3)
    w_lin = 0.02 * jax.random.normal(kw, (lin_in, 3), jnp.float32)
    b_lin = 0.02 * jax.random.normal(kb2, (3,), jnp.float32)
    # Fold the NCHW Flatten permutation (row = c*s4*s4 + hh*s4 + ww) into the
    # head weight, laid out to match b4's padded [s4*w_al4, 128] layout.
    w4d = w_lin.reshape(CPAD, s4, s4, 3)                     # [ci, hh, ww, co]
    vals = jnp.transpose(w4d, (3, 1, 2, 0)).reshape(3, s4 * s4, CPAD)
    rows = (jnp.arange(s4)[:, None] * w_al4 + 1
            + jnp.arange(s4)[None, :]).reshape(-1)
    wh = jnp.zeros((3, s4 * w_al4, CPAD), jnp.float32).at[:, rows, :].set(vals)
    params["whead"] = wh                                     # [3, 24, 128]
    params["bhead"] = jnp.pad(b_lin.reshape(1, 3), ((0, 0), (0, CPAD - 3)))
    return params


if __name__ == "__main__":
    key = jax.random.PRNGKey(0)
    H = W = 33            # scaled-down spatial size (reference implies 897)
    key, k_in = jax.random.split(key)
    x = jax.random.normal(k_in, (2, 5, 3, H, W), jnp.float32)
    params = init_params(key, H)

    fwd = jax.jit(qpred_forward)
    out = jax.block_until_ready(fwd(x, params))
    assert out.shape == (1, 3) and out.dtype == jnp.float32
    print("KERNEL_OK")
</pallas_src>

<mosaic_0001>
module attributes {stable_mosaic.version = 11 : i64} {
  func.func @_qpred_kernel(%arg0: memref<408x144xf32, #tpu.memory_space<vmem>>, %arg1: memref<144x128xf32, #tpu.memory_space<vmem>>, %arg2: memref<1152x128xf32, #tpu.memory_space<vmem>>, %arg3: memref<1152x128xf32, #tpu.memory_space<vmem>>, %arg4: memref<1152x128xf32, #tpu.memory_space<vmem>>, %arg5: memref<4x128xf32, #tpu.memory_space<vmem>>, %arg6: memref<4x128xf32, #tpu.memory_space<vmem>>, %arg7: memref<3x24x128xf32, #tpu.memory_space<vmem>>, %arg8: memref<1x128xf32, #tpu.memory_space<vmem>>, %arg9: memref<1x128xf32, #tpu.memory_space<vmem>>, %arg10: memref<144x1152xf32, #tpu.memory_space<vmem>>, %arg11: memref<408x128xf32, #tpu.memory_space<vmem>>, %arg12: memref<144x128xf32, #tpu.memory_space<vmem>>, %arg13: memref<40x128xf32, #tpu.memory_space<vmem>>, %arg14: memref<24x128xf32, #tpu.memory_space<vmem>>) attributes {dimension_semantics = [], scalar_prefetch = 0 : i64, scratch_operands = 5 : i64, tpu.core_type = #tpu.core_type<tc>} {
    %c0 = arith.constant 0 : index
    %c0_0 = arith.constant 0 : index
    %0 = vector.load %arg0[%c0, %c0_0] : memref<408x144xf32, #tpu.memory_space<vmem>>, vector<408x144xf32>
    %c0_1 = arith.constant 0 : index
    %c0_2 = arith.constant 0 : index
    %1 = vector.load %arg1[%c0_1, %c0_2] : memref<144x128xf32, #tpu.memory_space<vmem>>, vector<144x128xf32>
    %cst = arith.constant dense<0.000000e+00> : vector<408x128xf32>
    %2 = tpu.matmul %0, %1, %cst {dimension_numbers = #tpu.dot_dimension_numbers<[1], [0], [0], [1], [0, 0, 1, 1], [], []>} : vector<408x144xf32>, vector<144x128xf32>, vector<408x128xf32> -> vector<408x128xf32>
    %c0_3 = arith.constant 0 : index
    %c0_4 = arith.constant 0 : index
    %3 = vector.load %arg5[%c0_3, %c0_4] : memref<4x128xf32, #tpu.memory_space<vmem>>, vector<1x128xf32>
    %c0_5 = arith.constant 0 : index
    %c0_6 = arith.constant 0 : index
    %4 = vector.load %arg6[%c0_5, %c0_6] : memref<4x128xf32, #tpu.memory_space<vmem>>, vector<1x128xf32>
    %cst_7 = arith.constant dense<0.000000e+00> : vector<128xf32>
    %5 = vector.multi_reduction <add>, %2, %cst_7 [0] : vector<408x128xf32> to vector<128xf32>
    %6 = vector.shape_cast %5 : vector<128xf32> to vector<1x128xf32>
    %cst_8 = arith.constant 2.890000e+02 : f32
    %7 = vector.broadcast %cst_8 : f32 to vector<1x128xf32>
    %8 = arith.divf %6, %7 : vector<1x128xf32>
    %9 = vector.broadcast %8 : vector<1x128xf32> to vector<408x128xf32>
    %10 = arith.subf %2, %9 : vector<408x128xf32>
    %11 = arith.mulf %10, %10 : vector<408x128xf32>
    %cst_9 = arith.constant dense<0.000000e+00> : vector<128xf32>
    %12 = vector.multi_reduction <add>, %11, %cst_9 [0] : vector<408x128xf32> to vector<128xf32>
    %13 = vector.shape_cast %12 : vector<128xf32> to vector<1x128xf32>
    %cst_10 = arith.constant 1.190000e+02 : f32
    %14 = vector.broadcast %cst_10 : f32 to vector<1x128xf32>
    %15 = arith.mulf %14, %8 : vector<1x128xf32>
    %16 = arith.mulf %15, %8 : vector<1x128xf32>
    %17 = arith.subf %13, %16 : vector<1x128xf32>
    %cst_11 = arith.constant 2.890000e+02 : f32
    %18 = vector.broadcast %cst_11 : f32 to vector<1x128xf32>
    %19 = arith.divf %17, %18 : vector<1x128xf32>
    %cst_12 = arith.constant 0.000000e+00 : f32
    %20 = vector.broadcast %cst_12 : f32 to vector<1x128xf32>
    %21 = arith.maximumf %19, %20 : vector<1x128xf32>
    %cst_13 = arith.constant 9.99999974E-6 : f32
    %22 = vector.broadcast %cst_13 : f32 to vector<1x128xf32>
    %23 = arith.addf %21, %22 : vector<1x128xf32>
    %24 = math.rsqrt %23 : vector<1x128xf32>
    %25 = arith.mulf %24, %3 : vector<1x128xf32>
    %26 = arith.mulf %8, %25 : vector<1x128xf32>
    %27 = arith.subf %4, %26 : vector<1x128xf32>
    %28 = vector.broadcast %25 : vector<1x128xf32> to vector<408x128xf32>
    %29 = arith.mulf %2, %28 : vector<408x128xf32>
    %30 = vector.broadcast %27 : vector<1x128xf32> to vector<408x128xf32>
    %31 = arith.addf %29, %30 : vector<408x128xf32>
    %cst_14 = arith.constant 0.000000e+00 : f32
    %32 = vector.broadcast %cst_14 : f32 to vector<408x128xf32>
    %33 = arith.cmpf oge, %31, %32 : vector<408x128xf32>
    %cst_15 = arith.constant 0.00999999977 : f32
    %34 = vector.broadcast %cst_15 : f32 to vector<408x128xf32>
    %35 = arith.mulf %34, %31 : vector<408x128xf32>
    %36 = arith.select %33, %31, %35 : vector<408x128xi1>, vector<408x128xf32>
    %37 = tpu.iota {dimensions = array<i32: 0>} : vector<408x128xi32>
    %c24_i32 = arith.constant 24 : i32
    %c0_i32 = arith.constant 0 : i32
    %38 = arith.cmpi eq, %c24_i32, %c0_i32 : i32
    %c1_i32 = arith.constant 1 : i32
    %39 = arith.select %38, %c1_i32, %c24_i32 : i32
    %40 = vector.broadcast %39 : i32 to vector<408x128xi32>
    %41 = arith.remsi %37, %40 : vector<408x128xi32>
    %c0_i32_16 = arith.constant 0 : i32
    %42 = vector.broadcast %c0_i32_16 : i32 to vector<408x128xi32>
    %43 = arith.cmpi ne, %41, %42 : vector<408x128xi32>
    %c0_i32_17 = arith.constant 0 : i32
    %44 = vector.broadcast %c0_i32_17 : i32 to vector<408x128xi32>
    %45 = arith.cmpi slt, %41, %44 : vector<408x128xi32>
    %c0_i32_18 = arith.constant 0 : i32
    %46 = arith.cmpi slt, %39, %c0_i32_18 : i32
    %47 = vector.broadcast %46 : i1 to vector<408x128xi1>
    %48 = vector.broadcast %47 : vector<408x128xi1> to vector<408x128xi1>
    %49 = arith.xori %45, %48 : vector<408x128xi1>
    %50 = arith.andi %49, %43 : vector<408x128xi1>
    %51 = vector.broadcast %39 : i32 to vector<408x128xi32>
    %52 = arith.addi %41, %51 : vector<408x128xi32>
    %53 = arith.select %50, %52, %41 : vector<408x128xi1>, vector<408x128xi32>
    %c1_i32_19 = arith.constant 1 : i32
    %54 = vector.broadcast %c1_i32_19 : i32 to vector<408x128xi32>
    %55 = arith.cmpi sge, %53, %54 : vector<408x128xi32>
    %c17_i32 = arith.constant 17 : i32
    %56 = vector.broadcast %c17_i32 : i32 to vector<408x128xi32>
    %57 = arith.cmpi sle, %53, %56 : vector<408x128xi32>
    %58 = arith.andi %55, %57 : vector<408x128xi1>
    %cst_20 = arith.constant 0.000000e+00 : f32
    %59 = vector.broadcast %cst_20 : f32 to vector<408x128xf32>
    %60 = arith.select %58, %36, %59 : vector<408x128xi1>, vector<408x128xf32>
    %c0_21 = arith.constant 0 : index
    %c0_22 = arith.constant 0 : index
    %61 = vector.load %arg11[%c0_21, %c0_22] : memref<408x128xf32, #tpu.memory_space<vmem>>, vector<408x128xf32>
    tpu.vector_store %arg11[%c0_21, %c0_22], %60 {strides = array<i32>} : memref<408x128xf32, #tpu.memory_space<vmem>>, vector<408x128xf32>,
    %cst_23 = arith.constant 0.000000e+00 : f32
    %62 = vector.broadcast %cst_23 : f32 to vector<144x1152xf32>
    %c0_24 = arith.constant 0 : index
    %c0_25 = arith.constant 0 : index
    %63 = vector.load %arg10[%c0_24, %c0_25] : memref<144x1152xf32, #tpu.memory_space<vmem>>, vector<144x1152xf32>
    tpu.vector_store %arg10[%c0_24, %c0_25], %62 {strides = array<i32>} : memref<144x1152xf32, #tpu.memory_space<vmem>>, vector<144x1152xf32>,
    %c0_26 = arith.constant 0 : index
    %c0_27 = arith.constant 0 : index
    %64 = tpu.strided_load %arg11[%c0_26, %c0_27] {strides = array<i32: 2, 1>} : memref<408x128xf32, #tpu.memory_space<vmem>>, vector<9x128xf32>
    %c1 = arith.constant 1 : index
    %c384 = arith.constant 384 : index
    %65 = vector.load %arg10[%c1, %c384] : memref<144x1152xf32, #tpu.memory_space<vmem>>, vector<9x128xf32>
    tpu.vector_store %arg10[%c1, %c384], %64 {strides = array<i32>} : memref<144x1152xf32, #tpu.memory_space<vmem>>, vector<9x128xf32>,
    %c1_28 = arith.constant 1 : index
    %c0_29 = arith.constant 0 : index
    %66 = tpu.strided_load %arg11[%c1_28, %c0_29] {strides = array<i32: 2, 1>} : memref<408x128xf32, #tpu.memory_space<vmem>>, vector<9x128xf32>
    %c1_30 = arith.constant 1 : index
    %c512 = arith.constant 512 : index
    %67 = vector.load %arg10[%c1_30, %c512] : memref<144x1152xf32, #tpu.memory_space<vmem>>, vector<9x128xf32>
    tpu.vector_store %arg10[%c1_30, %c512], %66 {strides = array<i32>} : memref<144x1152xf32, #tpu.memory_space<vmem>>, vector<9x128xf32>,
    %c2 = arith.constant 2 : index
    %c0_31 = arith.constant 0 : index
    %68 = tpu.strided_load %arg11[%c2, %c0_31] {strides = array<i32: 2, 1>} : memref<408x128xf32, #tpu.memory_space<vmem>>, vector<9x128xf32>
    %c1_32 = arith.constant 1 : index
    %c640 = arith.constant 640 : index
    %69 = vector.load %arg10[%c1_32, %c640] : memref<144x1152xf32, #tpu.memory_space<vmem>>, vector<9x128xf32>
    tpu.vector_store %arg10[%c1_32, %c640], %68 {strides = array<i32>} : memref<144x1152xf32, #tpu.memory_space<vmem>>, vector<9x128xf32>,
    %c24 = arith.constant 24 : index
    %c0_33 = arith.constant 0 : index
    %70 = tpu.strided_load %arg11[%c24, %c0_33] {strides = array<i32: 2, 1>} : memref<408x128xf32, #tpu.memory_space<vmem>>, vector<9x128xf32>
    %c1_34 = arith.constant 1 : index
    %c768 = arith.constant 768 : index
    %71 = vector.load %arg10[%c1_34, %c768] : memref<144x1152xf32, #tpu.memory_space<vmem>>, vector<9x128xf32>
    tpu.vector_store %arg10[%c1_34, %c768], %70 {strides = array<i32>} : memref<144x1152xf32, #tpu.memory_space<vmem>>, vector<9x128xf32>,
    %c25 = arith.constant 25 : index
    %c0_35 = arith.constant 0 : index
    %72 = tpu.strided_load %arg11[%c25, %c0_35] {strides = array<i32: 2, 1>} : memref<408x128xf32, #tpu.memory_space<vmem>>, vector<9x128xf32>
    %c1_36 = arith.constant 1 : index
    %c896 = arith.constant 896 : index
    %73 = vector.load %arg10[%c1_36, %c896] : memref<144x1152xf32, #tpu.memory_space<vmem>>, vector<9x128xf32>
    tpu.vector_store %arg10[%c1_36, %c896], %72 {strides = array<i32>} : memref<144x1152xf32, #tpu.memory_space<vmem>>, vector<9x128xf32>,
    %c26 = arith.constant 26 : index
    %c0_37 = arith.constant 0 : index
    %74 = tpu.strided_load %arg11[%c26, %c0_37] {strides = array<i32: 2, 1>} : memref<408x128xf32, #tpu.memory_space<vmem>>, vector<9x128xf32>
    %c1_38 = arith.constant 1 : index
    %c1024 = arith.constant 1024 : index
    %75 = vector.load %arg10[%c1_38, %c1024] : memref<144x1152xf32, #tpu.memory_space<vmem>>, vector<9x128xf32>
    tpu.vector_store %arg10[%c1_38, %c1024], %74 {strides = array<i32>} : memref<144x1152xf32, #tpu.memory_space<vmem>>, vector<9x128xf32>,
    %c24_39 = arith.constant 24 : index
    %c0_40 = arith.constant 0 : index
    %76 = tpu.strided_load %arg11[%c24_39, %c0_40] {strides = array<i32: 2, 1>} : memref<408x128xf32, #tpu.memory_space<vmem>>, vector<9x128xf32>
    %c17 = arith.constant 17 : index
    %c0_41 = arith.constant 0 : index
    %77 = vector.load %arg10[%c17, %c0_41] : memref<144x1152xf32, #tpu.memory_space<vmem>>, vector<9x128xf32>
    tpu.vector_store %arg10[%c17, %c0_41], %76 {strides = array<i32>} : memref<144x1152xf32, #tpu.memory_space<vmem>>, vector<9x128xf32>,
    %c25_42 = arith.constant 25 : index
    %c0_43 = arith.constant 0 : index
    %78 = tpu.strided_load %arg11[%c25_42, %c0_43] {strides = array<i32: 2, 1>} : memref<408x128xf32, #tpu.memory_space<vmem>>, vector<9x128xf32>
    %c17_44 = arith.constant 17 : index
    %c128 = arith.constant 128 : index
    %79 = vector.load %arg10[%c17_44, %c128] : memref<144x1152xf32, #tpu.memory_space<vmem>>, vector<9x128xf32>
    tpu.vector_store %arg10[%c17_44, %c128], %78 {strides = array<i32>} : memref<144x1152xf32, #tpu.memory_space<vmem>>, vector<9x128xf32>,
    %c26_45 = arith.constant 26 : index
    %c0_46 = arith.constant 0 : index
    %80 = tpu.strided_load %arg11[%c26_45, %c0_46] {strides = array<i32: 2, 1>} : memref<408x128xf32, #tpu.memory_space<vmem>>, vector<9x128xf32>
    %c17_47 = arith.constant 17 : index
    %c256 = arith.constant 256 : index
    %81 = vector.load %arg10[%c17_47, %c256] : memref<144x1152xf32, #tpu.memory_space<vmem>>, vector<9x128xf32>
    tpu.vector_store %arg10[%c17_47, %c256], %80 {strides = array<i32>} : memref<144x1152xf32, #tpu.memory_space<vmem>>, vector<9x128xf32>,
    %c48 = arith.constant 48 : index
    %c0_48 = arith.constant 0 : index
    %82 = tpu.strided_load %arg11[%c48, %c0_48] {strides = array<i32: 2, 1>} : memref<408x128xf32, #tpu.memory_space<vmem>>, vector<9x128xf32>
    %c17_49 = arith.constant 17 : index
    %c384_50 = arith.constant 384 : index
    %83 = vector.load %arg10[%c17_49, %c384_50] : memref<144x1152xf32, #tpu.memory_space<vmem>>, vector<9x128xf32>
    tpu.vector_store %arg10[%c17_49, %c384_50], %82 {strides = array<i32>} : memref<144x1152xf32, #tpu.memory_space<vmem>>, vector<9x128xf32>,
    %c49 = arith.constant 49 : index
    %c0_51 = arith.constant 0 : index
    %84 = tpu.strided_load %arg11[%c49, %c0_51] {strides = array<i32: 2, 1>} : memref<408x128xf32, #tpu.memory_space<vmem>>, vector<9x128xf32>
    %c17_52 = arith.constant 17 : index
    %c512_53 = arith.constant 512 : index
    %85 = vector.load %arg10[%c17_52, %c512_53] : memref<144x1152xf32, #tpu.memory_space<vmem>>, vector<9x128xf32>
    tpu.vector_store %arg10[%c17_52, %c512_53], %84 {strides = array<i32>} : memref<144x1152xf32, #tpu.memory_space<vmem>>, vector<9x128xf32>,
    %c50 = arith.constant 50 : index
    %c0_54 = arith.constant 0 : index
    %86 = tpu.strided_load %arg11[%c50, %c0_54] {strides = array<i32: 2, 1>} : memref<408x128xf32, #tpu.memory_space<vmem>>, vector<9x128xf32>
    %c17_55 = arith.constant 17 : index
    %c640_56 = arith.constant 640 : index
    %87 = vector.load %arg10[%c17_55, %c640_56] : memref<144x1152xf32, #tpu.memory_space<vmem>>, vector<9x128xf32>
    tpu.vector_store %arg10[%c17_55, %c640_56], %86 {strides = array<i32>} : memref<144x1152xf32, #tpu.memory_space<vmem>>, vector<9x128xf32>,
    %c72 = arith.constant 72 : index
    %c0_57 = arith.constant 0 : index
    %88 = tpu.strided_load %arg11[%c72, %c0_57] {strides = array<i32: 2, 1>} : memref<408x128xf32, #tpu.memory_space<vmem>>, vector<9x128xf32>
    %c17_58 = arith.constant 17 : index
    %c768_59 = arith.constant 768 : index
    %89 = vector.load %arg10[%c17_58, %c768_59] : memref<144x1152xf32, #tpu.memory_space<vmem>>, vector<9x128xf32>
    tpu.vector_store %arg10[%c17_58, %c768_59], %88 {strides = array<i32>} : memref<144x1152xf32, #tpu.memory_space<vmem>>, vector<9x128xf32>,
    %c73 = arith.constant 73 : index
    %c0_60 = arith.constant 0 : index
    %90 = tpu.strided_load %arg11[%c73, %c0_60] {strides = array<i32: 2, 1>} : memref<408x128xf32, #tpu.memory_space<vmem>>, vector<9x128xf32>
    %c17_61 = arith.constant 17 : index
    %c896_62 = arith.constant 896 : index
    %91 = vector.load %arg10[%c17_61, %c896_62] : memref<144x1152xf32, #tpu.memory_space<vmem>>, vector<9x128xf32>
    tpu.vector_store %arg10[%c17_61, %c896_62], %90 {strides = array<i32>} : memref<144x1152xf32, #tpu.memory_space<vmem>>, vector<9x128xf32>,
    %c74 = arith.constant 74 : index
    %c0_63 = arith.constant 0 : index
    %92 = tpu.strided_load %arg11[%c74, %c0_63] {strides = array<i32: 2, 1>} : memref<408x128xf32, #tpu.memory_space<vmem>>, vector<9x128xf32>
    %c17_64 = arith.constant 17 : index
    %c1024_65 = arith.constant 1024 : index
    %93 = vector.load %arg10[%c17_64, %c1024_65] : memref<144x1152xf32, #tpu.memory_space<vmem>>, vector<9x128xf32>
    tpu.vector_store %arg10[%c17_64, %c1024_65], %92 {strides = array<i32>} : memref<144x1152xf32, #tpu.memory_space<vmem>>, vector<9x128xf32>,
    %c72_66 = arith.constant 72 : index
    %c0_67 = arith.constant 0 : index
    %94 = tpu.strided_load %arg11[%c72_66, %c0_67] {strides = array<i32: 2, 1>} : memref<408x128xf32, #tpu.memory_space<vmem>>, vector<9x128xf32>
    %c33 = arith.constant 33 : index
    %c0_68 = arith.constant 0 : index
    %95 = vector.load %arg10[%c33, %c0_68] : memref<144x1152xf32, #tpu.memory_space<vmem>>, vector<9x128xf32>
    tpu.vector_store %arg10[%c33, %c0_68], %94 {strides = array<i32>} : memref<144x1152xf32, #tpu.memory_space<vmem>>, vector<9x128xf32>,
    %c73_69 = arith.constant 73 : index
    %c0_70 = arith.constant 0 : index
    %96 = tpu.strided_load %arg11[%c73_69, %c0_70] {strides = array<i32: 2, 1>} : memref<408x128xf32, #tpu.memory_space<vmem>>, vector<9x128xf32>
    %c33_71 = arith.constant 33 : index
    %c128_72 = arith.constant 128 : index
    %97 = vector.load %arg10[%c33_71, %c128_72] : memref<144x1152xf32, #tpu.memory_space<vmem>>, vector<9x128xf32>
    tpu.vector_store %arg10[%c33_71, %c128_72], %96 {strides = array<i32>} : memref<144x1152xf32, #tpu.memory_space<vmem>>, vector<9x128xf32>,
    %c74_73 = arith.constant 74 : index
    %c0_74 = arith.constant 0 : index
    %98 = tpu.strided_load %arg11[%c74_73, %c0_74] {strides = array<i32: 2, 1>} : memref<408x128xf32, #tpu.memory_space<vmem>>, vector<9x128xf32>
    %c33_75 = arith.constant 33 : index
    %c256_76 = arith.constant 256 : index
    %99 = vector.load %arg10[%c33_75, %c256_76] : memref<144x1152xf32, #tpu.memory_space<vmem>>, vector<9x128xf32>
    tpu.vector_store %arg10[%c33_75, %c256_76], %98 {strides = array<i32>} : memref<144x1152xf32, #tpu.memory_space<vmem>>, vector<9x128xf32>,
    %c96 = arith.constant 96 : index
    %c0_77 = arith.constant 0 : index
    %100 = tpu.strided_load %arg11[%c96, %c0_77] {strides = array<i32: 2, 1>} : memref<408x128xf32, #tpu.memory_space<vmem>>, vector<9x128xf32>
    %c33_78 = arith.constant 33 : index
    %c384_79 = arith.constant 384 : index
    %101 = vector.load %arg10[%c33_78, %c384_79] : memref<144x1152xf32, #tpu.memory_space<vmem>>, vector<9x128xf32>
    tpu.vector_store %arg10[%c33_78, %c384_79], %100 {strides = array<i32>} : memref<144x1152xf32, #tpu.memory_space<vmem>>, vector<9x128xf32>,
    %c97 = arith.constant 97 : index
    %c0_80 = arith.constant 0 : index
    %102 = tpu.strided_load %arg11[%c97, %c0_80] {strides = array<i32: 2, 1>} : memref<408x128xf32, #tpu.memory_space<vmem>>, vector<9x128xf32>
    %c33_81 = arith.constant 33 : index
    %c512_82 = arith.constant 512 : index
    %103 = vector.load %arg10[%c33_81, %c512_82] : memref<144x1152xf32, #tpu.memory_space<vmem>>, vector<9x128xf32>
    tpu.vector_store %arg10[%c33_81, %c512_82], %102 {strides = array<i32>} : memref<144x1152xf32, #tpu.memory_space<vmem>>, vector<9x128xf32>,
    %c98 = arith.constant 98 : index
    %c0_83 = arith.constant 0 : index
    %104 = tpu.strided_load %arg11[%c98, %c0_83] {strides = array<i32: 2, 1>} : memref<408x128xf32, #tpu.memory_space<vmem>>, vector<9x128xf32>
    %c33_84 = arith.constant 33 : index
    %c640_85 = arith.constant 640 : index
    %105 = vector.load %arg10[%c33_84, %c640_85] : memref<144x1152xf32, #tpu.memory_space<vmem>>, vector<9x128xf32>
    tpu.vector_store %arg10[%c33_84, %c640_85], %104 {strides = array<i32>} : memref<144x1152xf32, #tpu.memory_space<vmem>>, vector<9x128xf32>,
    %c120 = arith.constant 120 : index
    %c0_86 = arith.constant 0 : index
    %106 = tpu.strided_load %arg11[%c120, %c0_86] {strides = array<i32: 2, 1>} : memref<408x128xf32, #tpu.memory_space<vmem>>, vector<9x128xf32>
    %c33_87 = arith.constant 33 : index
    %c768_88 = arith.constant 768 : index
    %107 = vector.load %arg10[%c33_87, %c768_88] : memref<144x1152xf32, #tpu.memory_space<vmem>>, vector<9x128xf32>
    tpu.vector_store %arg10[%c33_87, %c768_88], %106 {strides = array<i32>} : memref<144x1152xf32, #tpu.memory_space<vmem>>, vector<9x128xf32>,
    %c121 = arith.constant 121 : index
    %c0_89 = arith.constant 0 : index
    %108 = tpu.strided_load %arg11[%c121, %c0_89] {strides = array<i32: 2, 1>} : memref<408x128xf32, #tpu.memory_space<vmem>>, vector<9x128xf32>
    %c33_90 = arith.constant 33 : index
    %c896_91 = arith.constant 896 : index
    %109 = vector.load %arg10[%c33_90, %c896_91] : memref<144x1152xf32, #tpu.memory_space<vmem>>, vector<9x128xf32>
    tpu.vector_store %arg10[%c33_90, %c896_91], %108 {strides = array<i32>} : memref<144x1152xf32, #tpu.memory_space<vmem>>, vector<9x128xf32>,
    %c122 = arith.constant 122 : index
    %c0_92 = arith.constant 0 : index
    %110 = tpu.strided_load %arg11[%c122, %c0_92] {strides = array<i32: 2, 1>} : memref<408x128xf32, #tpu.memory_space<vmem>>, vector<9x128xf32>
    %c33_93 = arith.constant 33 : index
    %c1024_94 = arith.constant 1024 : index
    %111 = vector.load %arg10[%c33_93, %c1024_94] : memref<144x1152xf32, #tpu.memory_space<vmem>>, vector<9x128xf32>
    tpu.vector_store %arg10[%c33_93, %c1024_94], %110 {strides = array<i32>} : memref<144x1152xf32, #tpu.memory_space<vmem>>, vector<9x128xf32>,
    %c120_95 = arith.constant 120 : index
    %c0_96 = arith.constant 0 : index
    %112 = tpu.strided_load %arg11[%c120_95, %c0_96] {strides = array<i32: 2, 1>} : memref<408x128xf32, #tpu.memory_space<vmem>>, vector<9x128xf32>
    %c49_97 = arith.constant 49 : index
    %c0_98 = arith.constant 0 : index
    %113 = vector.load %arg10[%c49_97, %c0_98] : memref<144x1152xf32, #tpu.memory_space<vmem>>, vector<9x128xf32>
    tpu.vector_store %arg10[%c49_97, %c0_98], %112 {strides = array<i32>} : memref<144x1152xf32, #tpu.memory_space<vmem>>, vector<9x128xf32>,
    %c121_99 = arith.constant 121 : index
    %c0_100 = arith.constant 0 : index
    %114 = tpu.strided_load %arg11[%c121_99, %c0_100] {strides = array<i32: 2, 1>} : memref<408x128xf32, #tpu.memory_space<vmem>>, vector<9x128xf32>
    %c49_101 = arith.constant 49 : index
    %c128_102 = arith.constant 128 : index
    %115 = vector.load %arg10[%c49_101, %c128_102] : memref<144x1152xf32, #tpu.memory_space<vmem>>, vector<9x128xf32>
    tpu.vector_store %arg10[%c49_101, %c128_102], %114 {strides = array<i32>} : memref<144x1152xf32, #tpu.memory_space<vmem>>, vector<9x128xf32>,
    %c122_103 = arith.constant 122 : index
    %c0_104 = arith.constant 0 : index
    %116 = tpu.strided_load %arg11[%c122_103, %c0_104] {strides = array<i32: 2, 1>} : memref<408x128xf32, #tpu.memory_space<vmem>>, vector<9x128xf32>
    %c49_105 = arith.constant 49 : index
    %c256_106 = arith.constant 256 : index
    %117 = vector.load %arg10[%c49_105, %c256_106] : memref<144x1152xf32, #tpu.memory_space<vmem>>, vector<9x128xf32>
    tpu.vector_store %arg10[%c49_105, %c256_106], %116 {strides = array<i32>} : memref<144x1152xf32, #tpu.memory_space<vmem>>, vector<9x128xf32>,
    %c144 = arith.constant 144 : index
    %c0_107 = arith.constant 0 : index
    %118 = tpu.strided_load %arg11[%c144, %c0_107] {strides = array<i32: 2, 1>} : memref<408x128xf32, #tpu.memory_space<vmem>>, vector<9x128xf32>
    %c49_108 = arith.constant 49 : index
    %c384_109 = arith.constant 384 : index
    %119 = vector.load %arg10[%c49_108, %c384_109] : memref<144x1152xf32, #tpu.memory_space<vmem>>, vector<9x128xf32>
    tpu.vector_store %arg10[%c49_108, %c384_109], %118 {strides = array<i32>} : memref<144x1152xf32, #tpu.memory_space<vmem>>, vector<9x128xf32>,
    %c145 = arith.constant 145 : index
    %c0_110 = arith.constant 0 : index
    %120 = tpu.strided_load %arg11[%c145, %c0_110] {strides = array<i32: 2, 1>} : memref<408x128xf32, #tpu.memory_space<vmem>>, vector<9x128xf32>
    %c49_111 = arith.constant 49 : index
    %c512_112 = arith.constant 512 : index
    %121 = vector.load %arg10[%c49_111, %c512_112] : memref<144x1152xf32, #tpu.memory_space<vmem>>, vector<9x128xf32>
    tpu.vector_store %arg10[%c49_111, %c512_112], %120 {strides = array<i32>} : memref<144x1152xf32, #tpu.memory_space<vmem>>, vector<9x128xf32>,
    %c146 = arith.constant 146 : index
    %c0_113 = arith.constant 0 : index
    %122 = tpu.strided_load %arg11[%c146, %c0_113] {strides = array<i32: 2, 1>} : memref<408x128xf32, #tpu.memory_space<vmem>>, vector<9x128xf32>
    %c49_114 = arith.constant 49 : index
    %c640_115 = arith.constant 640 : index
    %123 = vector.load %arg10[%c49_114, %c640_115] : memref<144x1152xf32, #tpu.memory_space<vmem>>, vector<9x128xf32>
    tpu.vector_store %arg10[%c49_114, %c640_115], %122 {strides = array<i32>} : memref<144x1152xf32, #tpu.memory_space<vmem>>, vector<9x128xf32>,
    %c168 = arith.constant 168 : index
    %c0_116 = arith.constant 0 : index
    %124 = tpu.strided_load %arg11[%c168, %c0_116] {strides = array<i32: 2, 1>} : memref<408x128xf32, #tpu.memory_space<vmem>>, vector<9x128xf32>
    %c49_117 = arith.constant 49 : index
    %c768_118 = arith.constant 768 : index
    %125 = vector.load %arg10[%c49_117, %c768_118] : memref<144x1152xf32, #tpu.memory_space<vmem>>, vector<9x128xf32>
    tpu.vector_store %arg10[%c49_117, %c768_118], %124 {strides = array<i32>} : memref<144x1152xf32, #tpu.memory_space<vmem>>, vector<9x128xf32>,
    %c169 = arith.constant 169 : index
    %c0_119 = arith.constant 0 : index
    %126 = tpu.strided_load %arg11[%c169, %c0_119] {strides = array<i32: 2, 1>} : memref<408x128xf32, #tpu.memory_space<vmem>>, vector<9x128xf32>
    %c49_120 = arith.constant 49 : index
    %c896_121 = arith.constant 896 : index
    %127 = vector.load %arg10[%c49_120, %c896_121] : memref<144x1152xf32, #tpu.memory_space<vmem>>, vector<9x128xf32>
    tpu.vector_store %arg10[%c49_120, %c896_121], %126 {strides = array<i32>} : memref<144x1152xf32, #tpu.memory_space<vmem>>, vector<9x128xf32>,
    %c170 = arith.constant 170 : index
    %c0_122 = arith.constant 0 : index
    %128 = tpu.strided_load %arg11[%c170, %c0_122] {strides = array<i32: 2, 1>} : memref<408x128xf32, #tpu.memory_space<vmem>>, vector<9x128xf32>
    %c49_123 = arith.constant 49 : index
    %c1024_124 = arith.constant 1024 : index
    %129 = vector.load %arg10[%c49_123, %c1024_124] : memref<144x1152xf32, #tpu.memory_space<vmem>>, vector<9x128xf32>
    tpu.vector_store %arg10[%c49_123, %c1024_124], %128 {strides = array<i32>} : memref<144x1152xf32, #tpu.memory_space<vmem>>, vector<9x128xf32>,
    %c168_125 = arith.constant 168 : index
    %c0_126 = arith.constant 0 : index
    %130 = tpu.strided_load %arg11[%c168_125, %c0_126] {strides = array<i32: 2, 1>} : memref<408x128xf32, #tpu.memory_space<vmem>>, vector<9x128xf32>
    %c65 = arith.constant 65 : index
    %c0_127 = arith.constant 0 : index
    %131 = vector.load %arg10[%c65, %c0_127] : memref<144x1152xf32, #tpu.memory_space<vmem>>, vector<9x128xf32>
    tpu.vector_store %arg10[%c65, %c0_127], %130 {strides = array<i32>} : memref<144x1152xf32, #tpu.memory_space<vmem>>, vector<9x128xf32>,
    %c169_128 = arith.constant 169 : index
    %c0_129 = arith.constant 0 : index
    %132 = tpu.strided_load %arg11[%c169_128, %c0_129] {strides = array<i32: 2, 1>} : memref<408x128xf32, #tpu.memory_space<vmem>>, vector<9x128xf32>
    %c65_130 = arith.constant 65 : index
    %c128_131 = arith.constant 128 : index
    %133 = vector.load %arg10[%c65_130, %c128_131] : memref<144x1152xf32, #tpu.memory_space<vmem>>, vector<9x128xf32>
    tpu.vector_store %arg10[%c65_130, %c128_131], %132 {strides = array<i32>} : memref<144x1152xf32, #tpu.memory_space<vmem>>, vector<9x128xf32>,
    %c170_132 = arith.constant 170 : index
    %c0_133 = arith.constant 0 : index
    %134 = tpu.strided_load %arg11[%c170_132, %c0_133] {strides = array<i32: 2, 1>} : memref<408x128xf32, #tpu.memory_space<vmem>>, vector<9x128xf32>
    %c65_134 = arith.constant 65 : index
    %c256_135 = arith.constant 256 : index
    %135 = vector.load %arg10[%c65_134, %c256_135] : memref<144x1152xf32, #tpu.memory_space<vmem>>, vector<9x128xf32>
    tpu.vector_store %arg10[%c65_134, %c256_135], %134 {strides = array<i32>} : memref<144x1152xf32, #tpu.memory_space<vmem>>, vector<9x128xf32>,
    %c192 = arith.constant 192 : index
    %c0_136 = arith.constant 0 : index
    %136 = tpu.strided_load %arg11[%c192, %c0_136] {strides = array<i32: 2, 1>} : memref<408x128xf32, #tpu.memory_space<vmem>>, vector<9x128xf32>
    %c65_137 = arith.constant 65 : index
    %c384_138 = arith.constant 384 : index
    %137 = vector.load %arg10[%c65_137, %c384_138] : memref<144x1152xf32, #tpu.memory_space<vmem>>, vector<9x128xf32>
    tpu.vector_store %arg10[%c65_137, %c384_138], %136 {strides = array<i32>} : memref<144x1152xf32, #tpu.memory_space<vmem>>, vector<9x128xf32>,
    %c193 = arith.constant 193 : index
    %c0_139 = arith.constant 0 : index
    %138 = tpu.strided_load %arg11[%c193, %c0_139] {strides = array<i32: 2, 1>} : memref<408x128xf32, #tpu.memory_space<vmem>>, vector<9x128xf32>
    %c65_140 = arith.constant 65 : index
    %c512_141 = arith.constant 512 : index
    %139 = vector.load %arg10[%c65_140, %c512_141] : memref<144x1152xf32, #tpu.memory_space<vmem>>, vector<9x128xf32>
    tpu.vector_store %arg10[%c65_140, %c512_141], %138 {strides = array<i32>} : memref<144x1152xf32, #tpu.memory_space<vmem>>, vector<9x128xf32>,
    %c194 = arith.constant 194 : index
    %c0_142 = arith.constant 0 : index
    %140 = tpu.strided_load %arg11[%c194, %c0_142] {strides = array<i32: 2, 1>} : memref<408x128xf32, #tpu.memory_space<vmem>>, vector<9x128xf32>
    %c65_143 = arith.constant 65 : index
    %c640_144 = arith.constant 640 : index
    %141 = vector.load %arg10[%c65_143, %c640_144] : memref<144x1152xf32, #tpu.memory_space<vmem>>, vector<9x128xf32>
    tpu.vector_store %arg10[%c65_143, %c640_144], %140 {strides = array<i32>} : memref<144x1152xf32, #tpu.memory_space<vmem>>, vector<9x128xf32>,
    %c216 = arith.constant 216 : index
    %c0_145 = arith.constant 0 : index
    %142 = tpu.strided_load %arg11[%c216, %c0_145] {strides = array<i32: 2, 1>} : memref<408x128xf32, #tpu.memory_space<vmem>>, vector<9x128xf32>
    %c65_146 = arith.constant 65 : index
    %c768_147 = arith.constant 768 : index
    %143 = vector.load %arg10[%c65_146, %c768_147] : memref<144x1152xf32, #tpu.memory_space<vmem>>, vector<9x128xf32>
    tpu.vector_store %arg10[%c65_146, %c768_147], %142 {strides = array<i32>} : memref<144x1152xf32, #tpu.memory_space<vmem>>, vector<9x128xf32>,
    %c217 = arith.constant 217 : index
    %c0_148 = arith.constant 0 : index
    %144 = tpu.strided_load %arg11[%c217, %c0_148] {strides = array<i32: 2, 1>} : memref<408x128xf32, #tpu.memory_space<vmem>>, vector<9x128xf32>
    %c65_149 = arith.constant 65 : index
    %c896_150 = arith.constant 896 : index
    %145 = vector.load %arg10[%c65_149, %c896_150] : memref<144x1152xf32, #tpu.memory_space<vmem>>, vector<9x128xf32>
    tpu.vector_store %arg10[%c65_149, %c896_150], %144 {strides = array<i32>} : memref<144x1152xf32, #tpu.memory_space<vmem>>, vector<9x128xf32>,
    %c218 = arith.constant 218 : index
    %c0_151 = arith.constant 0 : index
    %146 = tpu.strided_load %arg11[%c218, %c0_151] {strides = array<i32: 2, 1>} : memref<408x128xf32, #tpu.memory_space<vmem>>, vector<9x128xf32>
    %c65_152 = arith.constant 65 : index
    %c1024_153 = arith.constant 1024 : index
    %147 = vector.load %arg10[%c65_152, %c1024_153] : memref<144x1152xf32, #tpu.memory_space<vmem>>, vector<9x128xf32>
    tpu.vector_store %arg10[%c65_152, %c1024_153], %146 {strides = array<i32>} : memref<144x1152xf32, #tpu.memory_space<vmem>>, vector<9x128xf32>,
    %c216_154 = arith.constant 216 : index
    %c0_155 = arith.constant 0 : index
    %148 = tpu.strided_load %arg11[%c216_154, %c0_155] {strides = array<i32: 2, 1>} : memref<408x128xf32, #tpu.memory_space<vmem>>, vector<9x128xf32>
    %c81 = arith.constant 81 : index
    %c0_156 = arith.constant 0 : index
    %149 = vector.load %arg10[%c81, %c0_156] : memref<144x1152xf32, #tpu.memory_space<vmem>>, vector<9x128xf32>
    tpu.vector_store %arg10[%c81, %c0_156], %148 {strides = array<i32>} : memref<144x1152xf32, #tpu.memory_space<vmem>>, vector<9x128xf32>,
    %c217_157 = arith.constant 217 : index
    %c0_158 = arith.constant 0 : index
    %150 = tpu.strided_load %arg11[%c217_157, %c0_158] {strides = array<i32: 2, 1>} : memref<408x128xf32, #tpu.memory_space<vmem>>, vector<9x128xf32>
    %c81_159 = arith.constant 81 : index
    %c128_160 = arith.constant 128 : index
    %151 = vector.load %arg10[%c81_159, %c128_160] : memref<144x1152xf32, #tpu.memory_space<vmem>>, vector<9x128xf32>
    tpu.vector_store %arg10[%c81_159, %c128_160], %150 {strides = array<i32>} : memref<144x1152xf32, #tpu.memory_space<vmem>>, vector<9x128xf32>,
    %c218_161 = arith.constant 218 : index
    %c0_162 = arith.constant 0 : index
    %152 = tpu.strided_load %arg11[%c218_161, %c0_162] {strides = array<i32: 2, 1>} : memref<408x128xf32, #tpu.memory_space<vmem>>, vector<9x128xf32>
    %c81_163 = arith.constant 81 : index
    %c256_164 = arith.constant 256 : index
    %153 = vector.load %arg10[%c81_163, %c256_164] : memref<144x1152xf32, #tpu.memory_space<vmem>>, vector<9x128xf32>
    tpu.vector_store %arg10[%c81_163, %c256_164], %152 {strides = array<i32>} : memref<144x1152xf32, #tpu.memory_space<vmem>>, vector<9x128xf32>,
    %c240 = arith.constant 240 : index
    %c0_165 = arith.constant 0 : index
    %154 = tpu.strided_load %arg11[%c240, %c0_165] {strides = array<i32: 2, 1>} : memref<408x128xf32, #tpu.memory_space<vmem>>, vector<9x128xf32>
    %c81_166 = arith.constant 81 : index
    %c384_167 = arith.constant 384 : index
    %155 = vector.load %arg10[%c81_166, %c384_167] : memref<144x1152xf32, #tpu.memory_space<vmem>>, vector<9x128xf32>
    tpu.vector_store %arg10[%c81_166, %c384_167], %154 {strides = array<i32>} : memref<144x1152xf32, #tpu.memory_space<vmem>>, vector<9x128xf32>,
    %c241 = arith.constant 241 : index
    %c0_168 = arith.constant 0 : index
    %156 = tpu.strided_load %arg11[%c241, %c0_168] {strides = array<i32: 2, 1>} : memref<408x128xf32, #tpu.memory_space<vmem>>, vector<9x128xf32>
    %c81_169 = arith.constant 81 : index
    %c512_170 = arith.constant 512 : index
    %157 = vector.load %arg10[%c81_169, %c512_170] : memref<144x1152xf32, #tpu.memory_space<vmem>>, vector<9x128xf32>
    tpu.vector_store %arg10[%c81_169, %c512_170], %156 {strides = array<i32>} : memref<144x1152xf32, #tpu.memory_space<vmem>>, vector<9x128xf32>,
    %c242 = arith.constant 242 : index
    %c0_171 = arith.constant 0 : index
    %158 = tpu.strided_load %arg11[%c242, %c0_171] {strides = array<i32: 2, 1>} : memref<408x128xf32, #tpu.memory_space<vmem>>, vector<9x128xf32>
    %c81_172 = arith.constant 81 : index
    %c640_173 = arith.constant 640 : index
    %159 = vector.load %arg10[%c81_172, %c640_173] : memref<144x1152xf32, #tpu.memory_space<vmem>>, vector<9x128xf32>
    tpu.vector_store %arg10[%c81_172, %c640_173], %158 {strides = array<i32>} : memref<144x1152xf32, #tpu.memory_space<vmem>>, vector<9x128xf32>,
    %c264 = arith.constant 264 : index
    %c0_174 = arith.constant 0 : index
    %160 = tpu.strided_load %arg11[%c264, %c0_174] {strides = array<i32: 2, 1>} : memref<408x128xf32, #tpu.memory_space<vmem>>, vector<9x128xf32>
    %c81_175 = arith.constant 81 : index
    %c768_176 = arith.constant 768 : index
    %161 = vector.load %arg10[%c81_175, %c768_176] : memref<144x1152xf32, #tpu.memory_space<vmem>>, vector<9x128xf32>
    tpu.vector_store %arg10[%c81_175, %c768_176], %160 {strides = array<i32>} : memref<144x1152xf32, #tpu.memory_space<vmem>>, vector<9x128xf32>,
    %c265 = arith.constant 265 : index
    %c0_177 = arith.constant 0 : index
    %162 = tpu.strided_load %arg11[%c265, %c0_177] {strides = array<i32: 2, 1>} : memref<408x128xf32, #tpu.memory_space<vmem>>, vector<9x128xf32>
    %c81_178 = arith.constant 81 : index
    %c896_179 = arith.constant 896 : index
    %163 = vector.load %arg10[%c81_178, %c896_179] : memref<144x1152xf32, #tpu.memory_space<vmem>>, vector<9x128xf32>
    tpu.vector_store %arg10[%c81_178, %c896_179], %162 {strides = array<i32>} : memref<144x1152xf32, #tpu.memory_space<vmem>>, vector<9x128xf32>,
    %c266 = arith.constant 266 : index
    %c0_180 = arith.constant 0 : index
    %164 = tpu.strided_load %arg11[%c266, %c0_180] {strides = array<i32: 2, 1>} : memref<408x128xf32, #tpu.memory_space<vmem>>, vector<9x128xf32>
    %c81_181 = arith.constant 81 : index
    %c1024_182 = arith.constant 1024 : index
    %165 = vector.load %arg10[%c81_181, %c1024_182] : memref<144x1152xf32, #tpu.memory_space<vmem>>, vector<9x128xf32>
    tpu.vector_store %arg10[%c81_181, %c1024_182], %164 {strides = array<i32>} : memref<144x1152xf32, #tpu.memory_space<vmem>>, vector<9x128xf32>,
    %c264_183 = arith.constant 264 : index
    %c0_184 = arith.constant 0 : index
    %166 = tpu.strided_load %arg11[%c264_183, %c0_184] {strides = array<i32: 2, 1>} : memref<408x128xf32, #tpu.memory_space<vmem>>, vector<9x128xf32>
    %c97_185 = arith.constant 97 : index
    %c0_186 = arith.constant 0 : index
    %167 = vector.load %arg10[%c97_185, %c0_186] : memref<144x1152xf32, #tpu.memory_space<vmem>>, vector<9x128xf32>
    tpu.vector_store %arg10[%c97_185, %c0_186], %166 {strides = array<i32>} : memref<144x1152xf32, #tpu.memory_space<vmem>>, vector<9x128xf32>,
    %c265_187 = arith.constant 265 : index
    %c0_188 = arith.constant 0 : index
    %168 = tpu.strided_load %arg11[%c265_187, %c0_188] {strides = array<i32: 2, 1>} : memref<408x128xf32, #tpu.memory_space<vmem>>, vector<9x128xf32>
    %c97_189 = arith.constant 97 : index
    %c128_190 = arith.constant 128 : index
    %169 = vector.load %arg10[%c97_189, %c128_190] : memref<144x1152xf32, #tpu.memory_space<vmem>>, vector<9x128xf32>
    tpu.vector_store %arg10[%c97_189, %c128_190], %168 {strides = array<i32>} : memref<144x1152xf32, #tpu.memory_space<vmem>>, vector<9x128xf32>,
    %c266_191 = arith.constant 266 : index
    %c0_192 = arith.constant 0 : index
    %170 = tpu.strided_load %arg11[%c266_191, %c0_192] {strides = array<i32: 2, 1>} : memref<408x128xf32, #tpu.memory_space<vmem>>, vector<9x128xf32>
    %c97_193 = arith.constant 97 : index
    %c256_194 = arith.constant 256 : index
    %171 = vector.load %arg10[%c97_193, %c256_194] : memref<144x1152xf32, #tpu.memory_space<vmem>>, vector<9x128xf32>
    tpu.vector_store %arg10[%c97_193, %c256_194], %170 {strides = array<i32>} : memref<144x1152xf32, #tpu.memory_space<vmem>>, vector<9x128xf32>,
    %c288 = arith.constant 288 : index
    %c0_195 = arith.constant 0 : index
    %172 = tpu.strided_load %arg11[%c288, %c0_195] {strides = array<i32: 2, 1>} : memref<408x128xf32, #tpu.memory_space<vmem>>, vector<9x128xf32>
    %c97_196 = arith.constant 97 : index
    %c384_197 = arith.constant 384 : index
    %173 = vector.load %arg10[%c97_196, %c384_197] : memref<144x1152xf32, #tpu.memory_space<vmem>>, vector<9x128xf32>
    tpu.vector_store %arg10[%c97_196, %c384_197], %172 {strides = array<i32>} : memref<144x1152xf32, #tpu.memory_space<vmem>>, vector<9x128xf32>,
    %c289 = arith.constant 289 : index
    %c0_198 = arith.constant 0 : index
    %174 = tpu.strided_load %arg11[%c289, %c0_198] {strides = array<i32: 2, 1>} : memref<408x128xf32, #tpu.memory_space<vmem>>, vector<9x128xf32>
    %c97_199 = arith.constant 97 : index
    %c512_200 = arith.constant 512 : index
    %175 = vector.load %arg10[%c97_199, %c512_200] : memref<144x1152xf32, #tpu.memory_space<vmem>>, vector<9x128xf32>
    tpu.vector_store %arg10[%c97_199, %c512_200], %174 {strides = array<i32>} : memref<144x1152xf32, #tpu.memory_space<vmem>>, vector<9x128xf32>,
    %c290 = arith.constant 290 : index
    %c0_201 = arith.constant 0 : index
    %176 = tpu.strided_load %arg11[%c290, %c0_201] {strides = array<i32: 2, 1>} : memref<408x128xf32, #tpu.memory_space<vmem>>, vector<9x128xf32>
    %c97_202 = arith.constant 97 : index
    %c640_203 = arith.constant 640 : index
    %177 = vector.load %arg10[%c97_202, %c640_203] : memref<144x1152xf32, #tpu.memory_space<vmem>>, vector<9x128xf32>
    tpu.vector_store %arg10[%c97_202, %c640_203], %176 {strides = array<i32>} : memref<144x1152xf32, #tpu.memory_space<vmem>>, vector<9x128xf32>,
    %c312 = arith.constant 312 : index
    %c0_204 = arith.constant 0 : index
    %178 = tpu.strided_load %arg11[%c312, %c0_204] {strides = array<i32: 2, 1>} : memref<408x128xf32, #tpu.memory_space<vmem>>, vector<9x128xf32>
    %c97_205 = arith.constant 97 : index
    %c768_206 = arith.constant 768 : index
    %179 = vector.load %arg10[%c97_205, %c768_206] : memref<144x1152xf32, #tpu.memory_space<vmem>>, vector<9x128xf32>
    tpu.vector_store %arg10[%c97_205, %c768_206], %178 {strides = array<i32>} : memref<144x1152xf32, #tpu.memory_space<vmem>>, vector<9x128xf32>,
    %c313 = arith.constant 313 : index
    %c0_207 = arith.constant 0 : index
    %180 = tpu.strided_load %arg11[%c313, %c0_207] {strides = array<i32: 2, 1>} : memref<408x128xf32, #tpu.memory_space<vmem>>, vector<9x128xf32>
    %c97_208 = arith.constant 97 : index
    %c896_209 = arith.constant 896 : index
    %181 = vector.load %arg10[%c97_208, %c896_209] : memref<144x1152xf32, #tpu.memory_space<vmem>>, vector<9x128xf32>
    tpu.vector_store %arg10[%c97_208, %c896_209], %180 {strides = array<i32>} : memref<144x1152xf32, #tpu.memory_space<vmem>>, vector<9x128xf32>,
    %c314 = arith.constant 314 : index
    %c0_210 = arith.constant 0 : index
    %182 = tpu.strided_load %arg11[%c314, %c0_210] {strides = array<i32: 2, 1>} : memref<408x128xf32, #tpu.memory_space<vmem>>, vector<9x128xf32>
    %c97_211 = arith.constant 97 : index
    %c1024_212 = arith.constant 1024 : index
    %183 = vector.load %arg10[%c97_211, %c1024_212] : memref<144x1152xf32, #tpu.memory_space<vmem>>, vector<9x128xf32>
    tpu.vector_store %arg10[%c97_211, %c1024_212], %182 {strides = array<i32>} : memref<144x1152xf32, #tpu.memory_space<vmem>>, vector<9x128xf32>,
    %c312_213 = arith.constant 312 : index
    %c0_214 = arith.constant 0 : index
    %184 = tpu.strided_load %arg11[%c312_213, %c0_214] {strides = array<i32: 2, 1>} : memref<408x128xf32, #tpu.memory_space<vmem>>, vector<9x128xf32>
    %c113 = arith.constant 113 : index
    %c0_215 = arith.constant 0 : index
    %185 = vector.load %arg10[%c113, %c0_215] : memref<144x1152xf32, #tpu.memory_space<vmem>>, vector<9x128xf32>
    tpu.vector_store %arg10[%c113, %c0_215], %184 {strides = array<i32>} : memref<144x1152xf32, #tpu.memory_space<vmem>>, vector<9x128xf32>,
    %c313_216 = arith.constant 313 : index
    %c0_217 = arith.constant 0 : index
    %186 = tpu.strided_load %arg11[%c313_216, %c0_217] {strides = array<i32: 2, 1>} : memref<408x128xf32, #tpu.memory_space<vmem>>, vector<9x128xf32>
    %c113_218 = arith.constant 113 : index
    %c128_219 = arith.constant 128 : index
    %187 = vector.load %arg10[%c113_218, %c128_219] : memref<144x1152xf32, #tpu.memory_space<vmem>>, vector<9x128xf32>
    tpu.vector_store %arg10[%c113_218, %c128_219], %186 {strides = array<i32>} : memref<144x1152xf32, #tpu.memory_space<vmem>>, vector<9x128xf32>,
    %c314_220 = arith.constant 314 : index
    %c0_221 = arith.constant 0 : index
    %188 = tpu.strided_load %arg11[%c314_220, %c0_221] {strides = array<i32: 2, 1>} : memref<408x128xf32, #tpu.memory_space<vmem>>, vector<9x128xf32>
    %c113_222 = arith.constant 113 : index
    %c256_223 = arith.constant 256 : index
    %189 = vector.load %arg10[%c113_222, %c256_223] : memref<144x1152xf32, #tpu.memory_space<vmem>>, vector<9x128xf32>
    tpu.vector_store %arg10[%c113_222, %c256_223], %188 {strides = array<i32>} : memref<144x1152xf32, #tpu.memory_space<vmem>>, vector<9x128xf32>,
    %c336 = arith.constant 336 : index
    %c0_224 = arith.constant 0 : index
    %190 = tpu.strided_load %arg11[%c336, %c0_224] {strides = array<i32: 2, 1>} : memref<408x128xf32, #tpu.memory_space<vmem>>, vector<9x128xf32>
    %c113_225 = arith.constant 113 : index
    %c384_226 = arith.constant 384 : index
    %191 = vector.load %arg10[%c113_225, %c384_226] : memref<144x1152xf32, #tpu.memory_space<vmem>>, vector<9x128xf32>
    tpu.vector_store %arg10[%c113_225, %c384_226], %190 {strides = array<i32>} : memref<144x1152xf32, #tpu.memory_space<vmem>>, vector<9x128xf32>,
    %c337 = arith.constant 337 : index
    %c0_227 = arith.constant 0 : index
    %192 = tpu.strided_load %arg11[%c337, %c0_227] {strides = array<i32: 2, 1>} : memref<408x128xf32, #tpu.memory_space<vmem>>, vector<9x128xf32>
    %c113_228 = arith.constant 113 : index
    %c512_229 = arith.constant 512 : index
    %193 = vector.load %arg10[%c113_228, %c512_229] : memref<144x1152xf32, #tpu.memory_space<vmem>>, vector<9x128xf32>
    tpu.vector_store %arg10[%c113_228, %c512_229], %192 {strides = array<i32>} : memref<144x1152xf32, #tpu.memory_space<vmem>>, vector<9x128xf32>,
    %c338 = arith.constant 338 : index
    %c0_230 = arith.constant 0 : index
    %194 = tpu.strided_load %arg11[%c338, %c0_230] {strides = array<i32: 2, 1>} : memref<408x128xf32, #tpu.memory_space<vmem>>, vector<9x128xf32>
    %c113_231 = arith.constant 113 : index
    %c640_232 = arith.constant 640 : index
    %195 = vector.load %arg10[%c113_231, %c640_232] : memref<144x1152xf32, #tpu.memory_space<vmem>>, vector<9x128xf32>
    tpu.vector_store %arg10[%c113_231, %c640_232], %194 {strides = array<i32>} : memref<144x1152xf32, #tpu.memory_space<vmem>>, vector<9x128xf32>,
    %c360 = arith.constant 360 : index
    %c0_233 = arith.constant 0 : index
    %196 = tpu.strided_load %arg11[%c360, %c0_233] {strides = array<i32: 2, 1>} : memref<408x128xf32, #tpu.memory_space<vmem>>, vector<9x128xf32>
    %c113_234 = arith.constant 113 : index
    %c768_235 = arith.constant 768 : index
    %197 = vector.load %arg10[%c113_234, %c768_235] : memref<144x1152xf32, #tpu.memory_space<vmem>>, vector<9x128xf32>
    tpu.vector_store %arg10[%c113_234, %c768_235], %196 {strides = array<i32>} : memref<144x1152xf32, #tpu.memory_space<vmem>>, vector<9x128xf32>,
    %c361 = arith.constant 361 : index
    %c0_236 = arith.constant 0 : index
    %198 = tpu.strided_load %arg11[%c361, %c0_236] {strides = array<i32: 2, 1>} : memref<408x128xf32, #tpu.memory_space<vmem>>, vector<9x128xf32>
    %c113_237 = arith.constant 113 : index
    %c896_238 = arith.constant 896 : index
    %199 = vector.load %arg10[%c113_237, %c896_238] : memref<144x1152xf32, #tpu.memory_space<vmem>>, vector<9x128xf32>
    tpu.vector_store %arg10[%c113_237, %c896_238], %198 {strides = array<i32>} : memref<144x1152xf32, #tpu.memory_space<vmem>>, vector<9x128xf32>,
    %c362 = arith.constant 362 : index
    %c0_239 = arith.constant 0 : index
    %200 = tpu.strided_load %arg11[%c362, %c0_239] {strides = array<i32: 2, 1>} : memref<408x128xf32, #tpu.memory_space<vmem>>, vector<9x128xf32>
    %c113_240 = arith.constant 113 : index
    %c1024_241 = arith.constant 1024 : index
    %201 = vector.load %arg10[%c113_240, %c1024_241] : memref<144x1152xf32, #tpu.memory_space<vmem>>, vector<9x128xf32>
    tpu.vector_store %arg10[%c113_240, %c1024_241], %200 {strides = array<i32>} : memref<144x1152xf32, #tpu.memory_space<vmem>>, vector<9x128xf32>,
    %c360_242 = arith.constant 360 : index
    %c0_243 = arith.constant 0 : index
    %202 = tpu.strided_load %arg11[%c360_242, %c0_243] {strides = array<i32: 2, 1>} : memref<408x128xf32, #tpu.memory_space<vmem>>, vector<9x128xf32>
    %c129 = arith.constant 129 : index
    %c0_244 = arith.constant 0 : index
    %203 = vector.load %arg10[%c129, %c0_244] : memref<144x1152xf32, #tpu.memory_space<vmem>>, vector<9x128xf32>
    tpu.vector_store %arg10[%c129, %c0_244], %202 {strides = array<i32>} : memref<144x1152xf32, #tpu.memory_space<vmem>>, vector<9x128xf32>,
    %c361_245 = arith.constant 361 : index
    %c0_246 = arith.constant 0 : index
    %204 = tpu.strided_load %arg11[%c361_245, %c0_246] {strides = array<i32: 2, 1>} : memref<408x128xf32, #tpu.memory_space<vmem>>, vector<9x128xf32>
    %c129_247 = arith.constant 129 : index
    %c128_248 = arith.constant 128 : index
    %205 = vector.load %arg10[%c129_247, %c128_248] : memref<144x1152xf32, #tpu.memory_space<vmem>>, vector<9x128xf32>
    tpu.vector_store %arg10[%c129_247, %c128_248], %204 {strides = array<i32>} : memref<144x1152xf32, #tpu.memory_space<vmem>>, vector<9x128xf32>,
    %c362_249 = arith.constant 362 : index
    %c0_250 = arith.constant 0 : index
    %206 = tpu.strided_load %arg11[%c362_249, %c0_250] {strides = array<i32: 2, 1>} : memref<408x128xf32, #tpu.memory_space<vmem>>, vector<9x128xf32>
    %c129_251 = arith.constant 129 : index
    %c256_252 = arith.constant 256 : index
    %207 = vector.load %arg10[%c129_251, %c256_252] : memref<144x1152xf32, #tpu.memory_space<vmem>>, vector<9x128xf32>
    tpu.vector_store %arg10[%c129_251, %c256_252], %206 {strides = array<i32>} : memref<144x1152xf32, #tpu.memory_space<vmem>>, vector<9x128xf32>,
    %c384_253 = arith.constant 384 : index
    %c0_254 = arith.constant 0 : index
    %208 = tpu.strided_load %arg11[%c384_253, %c0_254] {strides = array<i32: 2, 1>} : memref<408x128xf32, #tpu.memory_space<vmem>>, vector<9x128xf32>
    %c129_255 = arith.constant 129 : index
    %c384_256 = arith.constant 384 : index
    %209 = vector.load %arg10[%c129_255, %c384_256] : memref<144x1152xf32, #tpu.memory_space<vmem>>, vector<9x128xf32>
    tpu.vector_store %arg10[%c129_255, %c384_256], %208 {strides = array<i32>} : memref<144x1152xf32, #tpu.memory_space<vmem>>, vector<9x128xf32>,
    %c385 = arith.constant 385 : index
    %c0_257 = arith.constant 0 : index
    %210 = tpu.strided_load %arg11[%c385, %c0_257] {strides = array<i32: 2, 1>} : memref<408x128xf32, #tpu.memory_space<vmem>>, vector<9x128xf32>
    %c129_258 = arith.constant 129 : index
    %c512_259 = arith.constant 512 : index
    %211 = vector.load %arg10[%c129_258, %c512_259] : memref<144x1152xf32, #tpu.memory_space<vmem>>, vector<9x128xf32>
    tpu.vector_store %arg10[%c129_258, %c512_259], %210 {strides = array<i32>} : memref<144x1152xf32, #tpu.memory_space<vmem>>, vector<9x128xf32>,
    %c386 = arith.constant 386 : index
    %c0_260 = arith.constant 0 : index
    %212 = tpu.strided_load %arg11[%c386, %c0_260] {strides = array<i32: 2, 1>} : memref<408x128xf32, #tpu.memory_space<vmem>>, vector<9x128xf32>
    %c129_261 = arith.constant 129 : index
    %c640_262 = arith.constant 640 : index
    %213 = vector.load %arg10[%c129_261, %c640_262] : memref<144x1152xf32, #tpu.memory_space<vmem>>, vector<9x128xf32>
    tpu.vector_store %arg10[%c129_261, %c640_262], %212 {strides = array<i32>} : memref<144x1152xf32, #tpu.memory_space<vmem>>, vector<9x128xf32>,
    %c0_263 = arith.constant 0 : index
    %c0_264 = arith.constant 0 : index
    %214 = vector.load %arg10[%c0_263, %c0_264] : memref<144x1152xf32, #tpu.memory_space<vmem>>, vector<144x1152xf32>
    %c0_265 = arith.constant 0 : index
    %c0_266 = arith.constant 0 : index
    %215 = vector.load %arg2[%c0_265, %c0_266] : memref<1152x128xf32, #tpu.memory_space<vmem>>, vector<1152x128xf32>
    %cst_267 = arith.constant dense<0.000000e+00> : vector<144x128xf32>
    %216 = tpu.matmul %214, %215, %cst_267 {dimension_numbers = #tpu.dot_dimension_numbers<[1], [0], [0], [1], [0, 0, 1, 1], [], []>} : vector<144x1152xf32>, vector<1152x128xf32>, vector<144x128xf32> -> vector<144x128xf32>
    %c1_268 = arith.constant 1 : index
    %c0_269 = arith.constant 0 : index
    %217 = vector.load %arg5[%c1_268, %c0_269] : memref<4x128xf32, #tpu.memory_space<vmem>>, vector<1x128xf32>
    %c1_270 = arith.constant 1 : index
    %c0_271 = arith.constant 0 : index
    %218 = vector.load %arg6[%c1_270, %c0_271] : memref<4x128xf32, #tpu.memory_space<vmem>>, vector<1x128xf32>
    %cst_272 = arith.constant dense<0.000000e+00> : vector<128xf32>
    %219 = vector.multi_reduction <add>, %216, %cst_272 [0] : vector<144x128xf32> to vector<128xf32>
    %220 = vector.shape_cast %219 : vector<128xf32> to vector<1x128xf32>
    %cst_273 = arith.constant 8.100000e+01 : f32
    %221 = vector.broadcast %cst_273 : f32 to vector<1x128xf32>
    %222 = arith.divf %220, %221 : vector<1x128xf32>
    %223 = vector.broadcast %222 : vector<1x128xf32> to vector<144x128xf32>
    %224 = arith.subf %216, %223 : vector<144x128xf32>
    %225 = arith.mulf %224, %224 : vector<144x128xf32>
    %cst_274 = arith.constant dense<0.000000e+00> : vector<128xf32>
    %226 = vector.multi_reduction <add>, %225, %cst_274 [0] : vector<144x128xf32> to vector<128xf32>
    %227 = vector.shape_cast %226 : vector<128xf32> to vector<1x128xf32>
    %cst_275 = arith.constant 6.300000e+01 : f32
    %228 = vector.broadcast %cst_275 : f32 to vector<1x128xf32>
    %229 = arith.mulf %228, %222 : vector<1x128xf32>
    %230 = arith.mulf %229, %222 : vector<1x128xf32>
    %231 = arith.subf %227, %230 : vector<1x128xf32>
    %cst_276 = arith.constant 8.100000e+01 : f32
    %232 = vector.broadcast %cst_276 : f32 to vector<1x128xf32>
    %233 = arith.divf %231, %232 : vector<1x128xf32>
    %cst_277 = arith.constant 0.000000e+00 : f32
    %234 = vector.broadcast %cst_277 : f32 to vector<1x128xf32>
    %235 = arith.maximumf %233, %234 : vector<1x128xf32>
    %cst_278 = arith.constant 9.99999974E-6 : f32
    %236 = vector.broadcast %cst_278 : f32 to vector<1x128xf32>
    %237 = arith.addf %235, %236 : vector<1x128xf32>
    %238 = math.rsqrt %237 : vector<1x128xf32>
    %239 = arith.mulf %238, %217 : vector<1x128xf32>
    %240 = arith.mulf %222, %239 : vector<1x128xf32>
    %241 = arith.subf %218, %240 : vector<1x128xf32>
    %242 = vector.broadcast %239 : vector<1x128xf32> to vector<144x128xf32>
    %243 = arith.mulf %216, %242 : vector<144x128xf32>
    %244 = vector.broadcast %241 : vector<1x128xf32> to vector<144x128xf32>
    %245 = arith.addf %243, %244 : vector<144x128xf32>
    %cst_279 = arith.constant 0.000000e+00 : f32
    %246 = vector.broadcast %cst_279 : f32 to vector<144x128xf32>
    %247 = arith.cmpf oge, %245, %246 : vector<144x128xf32>
    %cst_280 = arith.constant 0.00999999977 : f32
    %248 = vector.broadcast %cst_280 : f32 to vector<144x128xf32>
    %249 = arith.mulf %248, %245 : vector<144x128xf32>
    %250 = arith.select %247, %245, %249 : vector<144x128xi1>, vector<144x128xf32>
    %251 = tpu.iota {dimensions = array<i32: 0>} : vector<144x128xi32>
    %c16_i32 = arith.constant 16 : i32
    %c0_i32_281 = arith.constant 0 : i32
    %252 = arith.cmpi eq, %c16_i32, %c0_i32_281 : i32
    %c1_i32_282 = arith.constant 1 : i32
    %253 = arith.select %252, %c1_i32_282, %c16_i32 : i32
    %254 = vector.broadcast %253 : i32 to vector<144x128xi32>
    %255 = arith.remsi %251, %254 : vector<144x128xi32>
    %c0_i32_283 = arith.constant 0 : i32
    %256 = vector.broadcast %c0_i32_283 : i32 to vector<144x128xi32>
    %257 = arith.cmpi ne, %255, %256 : vector<144x128xi32>
    %c0_i32_284 = arith.constant 0 : i32
    %258 = vector.broadcast %c0_i32_284 : i32 to vector<144x128xi32>
    %259 = arith.cmpi slt, %255, %258 : vector<144x128xi32>
    %c0_i32_285 = arith.constant 0 : i32
    %260 = arith.cmpi slt, %253, %c0_i32_285 : i32
    %261 = vector.broadcast %260 : i1 to vector<144x128xi1>
    %262 = vector.broadcast %261 : vector<144x128xi1> to vector<144x128xi1>
    %263 = arith.xori %259, %262 : vector<144x128xi1>
    %264 = arith.andi %263, %257 : vector<144x128xi1>
    %265 = vector.broadcast %253 : i32 to vector<144x128xi32>
    %266 = arith.addi %255, %265 : vector<144x128xi32>
    %267 = arith.select %264, %266, %255 : vector<144x128xi1>, vector<144x128xi32>
    %c1_i32_286 = arith.constant 1 : i32
    %268 = vector.broadcast %c1_i32_286 : i32 to vector<144x128xi32>
    %269 = arith.cmpi sge, %267, %268 : vector<144x128xi32>
    %c9_i32 = arith.constant 9 : i32
    %270 = vector.broadcast %c9_i32 : i32 to vector<144x128xi32>
    %271 = arith.cmpi sle, %267, %270 : vector<144x128xi32>
    %272 = arith.andi %269, %271 : vector<144x128xi1>
    %cst_287 = arith.constant 0.000000e+00 : f32
    %273 = vector.broadcast %cst_287 : f32 to vector<144x128xf32>
    %274 = arith.select %272, %250, %273 : vector<144x128xi1>, vector<144x128xf32>
    %c0_288 = arith.constant 0 : index
    %c0_289 = arith.constant 0 : index
    %275 = vector.load %arg12[%c0_288, %c0_289] : memref<144x128xf32, #tpu.memory_space<vmem>>, vector<144x128xf32>
    tpu.vector_store %arg12[%c0_288, %c0_289], %274 {strides = array<i32>} : memref<144x128xf32, #tpu.memory_space<vmem>>, vector<144x128xf32>,
    %cst_290 = arith.constant 0.000000e+00 : f32
    %276 = vector.broadcast %cst_290 : f32 to vector<40x1152xf32>
    %c0_291 = arith.constant 0 : index
    %c0_292 = arith.constant 0 : index
    %277 = vector.load %arg10[%c0_291, %c0_292] : memref<144x1152xf32, #tpu.memory_space<vmem>>, vector<40x1152xf32>
    tpu.vector_store %arg10[%c0_291, %c0_292], %276 {strides = array<i32>} : memref<144x1152xf32, #tpu.memory_space<vmem>>, vector<40x1152xf32>,
    %c0_293 = arith.constant 0 : index
    %c0_294 = arith.constant 0 : index
    %278 = tpu.strided_load %arg12[%c0_293, %c0_294] {strides = array<i32: 2, 1>} : memref<144x128xf32, #tpu.memory_space<vmem>>, vector<5x128xf32>
    %c1_295 = arith.constant 1 : index
    %c384_296 = arith.constant 384 : index
    %279 = vector.load %arg10[%c1_295, %c384_296] : memref<144x1152xf32, #tpu.memory_space<vmem>>, vector<5x128xf32>
    tpu.vector_store %arg10[%c1_295, %c384_296], %278 {strides = array<i32>} : memref<144x1152xf32, #tpu.memory_space<vmem>>, vector<5x128xf32>,
    %c1_297 = arith.constant 1 : index
    %c0_298 = arith.constant 0 : index
    %280 = tpu.strided_load %arg12[%c1_297, %c0_298] {strides = array<i32: 2, 1>} : memref<144x128xf32, #tpu.memory_space<vmem>>, vector<5x128xf32>
    %c1_299 = arith.constant 1 : index
    %c512_300 = arith.constant 512 : index
    %281 = vector.load %arg10[%c1_299, %c512_300] : memref<144x1152xf32, #tpu.memory_space<vmem>>, vector<5x128xf32>
    tpu.vector_store %arg10[%c1_299, %c512_300], %280 {strides = array<i32>} : memref<144x1152xf32, #tpu.memory_space<vmem>>, vector<5x128xf32>,
    %c2_301 = arith.constant 2 : index
    %c0_302 = arith.constant 0 : index
    %282 = tpu.strided_load %arg12[%c2_301, %c0_302] {strides = array<i32: 2, 1>} : memref<144x128xf32, #tpu.memory_space<vmem>>, vector<5x128xf32>
    %c1_303 = arith.constant 1 : index
    %c640_304 = arith.constant 640 : index
    %283 = vector.load %arg10[%c1_303, %c640_304] : memref<144x1152xf32, #tpu.memory_space<vmem>>, vector<5x128xf32>
    tpu.vector_store %arg10[%c1_303, %c640_304], %282 {strides = array<i32>} : memref<144x1152xf32, #tpu.memory_space<vmem>>, vector<5x128xf32>,
    %c16 = arith.constant 16 : index
    %c0_305 = arith.constant 0 : index
    %284 = tpu.strided_load %arg12[%c16, %c0_305] {strides = array<i32: 2, 1>} : memref<144x128xf32, #tpu.memory_space<vmem>>, vector<5x128xf32>
    %c1_306 = arith.constant 1 : index
    %c768_307 = arith.constant 768 : index
    %285 = vector.load %arg10[%c1_306, %c768_307] : memref<144x1152xf32, #tpu.memory_space<vmem>>, vector<5x128xf32>
    tpu.vector_store %arg10[%c1_306, %c768_307], %284 {strides = array<i32>} : memref<144x1152xf32, #tpu.memory_space<vmem>>, vector<5x128xf32>,
    %c17_308 = arith.constant 17 : index
    %c0_309 = arith.constant 0 : index
    %286 = tpu.strided_load %arg12[%c17_308, %c0_309] {strides = array<i32: 2, 1>} : memref<144x128xf32, #tpu.memory_space<vmem>>, vector<5x128xf32>
    %c1_310 = arith.constant 1 : index
    %c896_311 = arith.constant 896 : index
    %287 = vector.load %arg10[%c1_310, %c896_311] : memref<144x1152xf32, #tpu.memory_space<vmem>>, vector<5x128xf32>
    tpu.vector_store %arg10[%c1_310, %c896_311], %286 {strides = array<i32>} : memref<144x1152xf32, #tpu.memory_space<vmem>>, vector<5x128xf32>,
    %c18 = arith.constant 18 : index
    %c0_312 = arith.constant 0 : index
    %288 = tpu.strided_load %arg12[%c18, %c0_312] {strides = array<i32: 2, 1>} : memref<144x128xf32, #tpu.memory_space<vmem>>, vector<5x128xf32>
    %c1_313 = arith.constant 1 : index
    %c1024_314 = arith.constant 1024 : index
    %289 = vector.load %arg10[%c1_313, %c1024_314] : memref<144x1152xf32, #tpu.memory_space<vmem>>, vector<5x128xf32>
    tpu.vector_store %arg10[%c1_313, %c1024_314], %288 {strides = array<i32>} : memref<144x1152xf32, #tpu.memory_space<vmem>>, vector<5x128xf32>,
    %c16_315 = arith.constant 16 : index
    %c0_316 = arith.constant 0 : index
    %290 = tpu.strided_load %arg12[%c16_315, %c0_316] {strides = array<i32: 2, 1>} : memref<144x128xf32, #tpu.memory_space<vmem>>, vector<5x128xf32>
    %c9 = arith.constant 9 : index
    %c0_317 = arith.constant 0 : index
    %291 = vector.load %arg10[%c9, %c0_317] : memref<144x1152xf32, #tpu.memory_space<vmem>>, vector<5x128xf32>
    tpu.vector_store %arg10[%c9, %c0_317], %290 {strides = array<i32>} : memref<144x1152xf32, #tpu.memory_space<vmem>>, vector<5x128xf32>,
    %c17_318 = arith.constant 17 : index
    %c0_319 = arith.constant 0 : index
    %292 = tpu.strided_load %arg12[%c17_318, %c0_319] {strides = array<i32: 2, 1>} : memref<144x128xf32, #tpu.memory_space<vmem>>, vector<5x128xf32>
    %c9_320 = arith.constant 9 : index
    %c128_321 = arith.constant 128 : index
    %293 = vector.load %arg10[%c9_320, %c128_321] : memref<144x1152xf32, #tpu.memory_space<vmem>>, vector<5x128xf32>
    tpu.vector_store %arg10[%c9_320, %c128_321], %292 {strides = array<i32>} : memref<144x1152xf32, #tpu.memory_space<vmem>>, vector<5x128xf32>,
    %c18_322 = arith.constant 18 : index
    %c0_323 = arith.constant 0 : index
    %294 = tpu.strided_load %arg12[%c18_322, %c0_323] {strides = array<i32: 2, 1>} : memref<144x128xf32, #tpu.memory_space<vmem>>, vector<5x128xf32>
    %c9_324 = arith.constant 9 : index
    %c256_325 = arith.constant 256 : index
    %295 = vector.load %arg10[%c9_324, %c256_325] : memref<144x1152xf32, #tpu.memory_space<vmem>>, vector<5x128xf32>
    tpu.vector_store %arg10[%c9_324, %c256_325], %294 {strides = array<i32>} : memref<144x1152xf32, #tpu.memory_space<vmem>>, vector<5x128xf32>,
    %c32 = arith.constant 32 : index
    %c0_326 = arith.constant 0 : index
    %296 = tpu.strided_load %arg12[%c32, %c0_326] {strides = array<i32: 2, 1>} : memref<144x128xf32, #tpu.memory_space<vmem>>, vector<5x128xf32>
    %c9_327 = arith.constant 9 : index
    %c384_328 = arith.constant 384 : index
    %297 = vector.load %arg10[%c9_327, %c384_328] : memref<144x1152xf32, #tpu.memory_space<vmem>>, vector<5x128xf32>
    tpu.vector_store %arg10[%c9_327, %c384_328], %296 {strides = array<i32>} : memref<144x1152xf32, #tpu.memory_space<vmem>>, vector<5x128xf32>,
    %c33_329 = arith.constant 33 : index
    %c0_330 = arith.constant 0 : index
    %298 = tpu.strided_load %arg12[%c33_329, %c0_330] {strides = array<i32: 2, 1>} : memref<144x128xf32, #tpu.memory_space<vmem>>, vector<5x128xf32>
    %c9_331 = arith.constant 9 : index
    %c512_332 = arith.constant 512 : index
    %299 = vector.load %arg10[%c9_331, %c512_332] : memref<144x1152xf32, #tpu.memory_space<vmem>>, vector<5x128xf32>
    tpu.vector_store %arg10[%c9_331, %c512_332], %298 {strides = array<i32>} : memref<144x1152xf32, #tpu.memory_space<vmem>>, vector<5x128xf32>,
    %c34 = arith.constant 34 : index
    %c0_333 = arith.constant 0 : index
    %300 = tpu.strided_load %arg12[%c34, %c0_333] {strides = array<i32: 2, 1>} : memref<144x128xf32, #tpu.memory_space<vmem>>, vector<5x128xf32>
    %c9_334 = arith.constant 9 : index
    %c640_335 = arith.constant 640 : index
    %301 = vector.load %arg10[%c9_334, %c640_335] : memref<144x1152xf32, #tpu.memory_space<vmem>>, vector<5x128xf32>
    tpu.vector_store %arg10[%c9_334, %c640_335], %300 {strides = array<i32>} : memref<144x1152xf32, #tpu.memory_space<vmem>>, vector<5x128xf32>,
    %c48_336 = arith.constant 48 : index
    %c0_337 = arith.constant 0 : index
    %302 = tpu.strided_load %arg12[%c48_336, %c0_337] {strides = array<i32: 2, 1>} : memref<144x128xf32, #tpu.memory_space<vmem>>, vector<5x128xf32>
    %c9_338 = arith.constant 9 : index
    %c768_339 = arith.constant 768 : index
    %303 = vector.load %arg10[%c9_338, %c768_339] : memref<144x1152xf32, #tpu.memory_space<vmem>>, vector<5x128xf32>
    tpu.vector_store %arg10[%c9_338, %c768_339], %302 {strides = array<i32>} : memref<144x1152xf32, #tpu.memory_space<vmem>>, vector<5x128xf32>,
    %c49_340 = arith.constant 49 : index
    %c0_341 = arith.constant 0 : index
    %304 = tpu.strided_load %arg12[%c49_340, %c0_341] {strides = array<i32: 2, 1>} : memref<144x128xf32, #tpu.memory_space<vmem>>, vector<5x128xf32>
    %c9_342 = arith.constant 9 : index
    %c896_343 = arith.constant 896 : index
    %305 = vector.load %arg10[%c9_342, %c896_343] : memref<144x1152xf32, #tpu.memory_space<vmem>>, vector<5x128xf32>
    tpu.vector_store %arg10[%c9_342, %c896_343], %304 {strides = array<i32>} : memref<144x1152xf32, #tpu.memory_space<vmem>>, vector<5x128xf32>,
    %c50_344 = arith.constant 50 : index
    %c0_345 = arith.constant 0 : index
    %306 = tpu.strided_load %arg12[%c50_344, %c0_345] {strides = array<i32: 2, 1>} : memref<144x128xf32, #tpu.memory_space<vmem>>, vector<5x128xf32>
    %c9_346 = arith.constant 9 : index
    %c1024_347 = arith.constant 1024 : index
    %307 = vector.load %arg10[%c9_346, %c1024_347] : memref<144x1152xf32, #tpu.memory_space<vmem>>, vector<5x128xf32>
    tpu.vector_store %arg10[%c9_346, %c1024_347], %306 {strides = array<i32>} : memref<144x1152xf32, #tpu.memory_space<vmem>>, vector<5x128xf32>,
    %c48_348 = arith.constant 48 : index
    %c0_349 = arith.constant 0 : index
    %308 = tpu.strided_load %arg12[%c48_348, %c0_349] {strides = array<i32: 2, 1>} : memref<144x128xf32, #tpu.memory_space<vmem>>, vector<5x128xf32>
    %c17_350 = arith.constant 17 : index
    %c0_351 = arith.constant 0 : index
    %309 = vector.load %arg10[%c17_350, %c0_351] : memref<144x1152xf32, #tpu.memory_space<vmem>>, vector<5x128xf32>
    tpu.vector_store %arg10[%c17_350, %c0_351], %308 {strides = array<i32>} : memref<144x1152xf32, #tpu.memory_space<vmem>>, vector<5x128xf32>,
    %c49_352 = arith.constant 49 : index
    %c0_353 = arith.constant 0 : index
    %310 = tpu.strided_load %arg12[%c49_352, %c0_353] {strides = array<i32: 2, 1>} : memref<144x128xf32, #tpu.memory_space<vmem>>, vector<5x128xf32>
    %c17_354 = arith.constant 17 : index
    %c128_355 = arith.constant 128 : index
    %311 = vector.load %arg10[%c17_354, %c128_355] : memref<144x1152xf32, #tpu.memory_space<vmem>>, vector<5x128xf32>
    tpu.vector_store %arg10[%c17_354, %c128_355], %310 {strides = array<i32>} : memref<144x1152xf32, #tpu.memory_space<vmem>>, vector<5x128xf32>,
    %c50_356 = arith.constant 50 : index
    %c0_357 = arith.constant 0 : index
    %312 = tpu.strided_load %arg12[%c50_356, %c0_357] {strides = array<i32: 2, 1>} : memref<144x128xf32, #tpu.memory_space<vmem>>, vector<5x128xf32>
    %c17_358 = arith.constant 17 : index
    %c256_359 = arith.constant 256 : index
    %313 = vector.load %arg10[%c17_358, %c256_359] : memref<144x1152xf32, #tpu.memory_space<vmem>>, vector<5x128xf32>
    tpu.vector_store %arg10[%c17_358, %c256_359], %312 {strides = array<i32>} : memref<144x1152xf32, #tpu.memory_space<vmem>>, vector<5x128xf32>,
    %c64 = arith.constant 64 : index
    %c0_360 = arith.constant 0 : index
    %314 = tpu.strided_load %arg12[%c64, %c0_360] {strides = array<i32: 2, 1>} : memref<144x128xf32, #tpu.memory_space<vmem>>, vector<5x128xf32>
    %c17_361 = arith.constant 17 : index
    %c384_362 = arith.constant 384 : index
    %315 = vector.load %arg10[%c17_361, %c384_362] : memref<144x1152xf32, #tpu.memory_space<vmem>>, vector<5x128xf32>
    tpu.vector_store %arg10[%c17_361, %c384_362], %314 {strides = array<i32>} : memref<144x1152xf32, #tpu.memory_space<vmem>>, vector<5x128xf32>,
    %c65_363 = arith.constant 65 : index
    %c0_364 = arith.constant 0 : index
    %316 = tpu.strided_load %arg12[%c65_363, %c0_364] {strides = array<i32: 2, 1>} : memref<144x128xf32, #tpu.memory_space<vmem>>, vector<5x128xf32>
    %c17_365 = arith.constant 17 : index
    %c512_366 = arith.constant 512 : index
    %317 = vector.load %arg10[%c17_365, %c512_366] : memref<144x1152xf32, #tpu.memory_space<vmem>>, vector<5x128xf32>
    tpu.vector_store %arg10[%c17_365, %c512_366], %316 {strides = array<i32>} : memref<144x1152xf32, #tpu.memory_space<vmem>>, vector<5x128xf32>,
    %c66 = arith.constant 66 : index
    %c0_367 = arith.constant 0 : index
    %318 = tpu.strided_load %arg12[%c66, %c0_367] {strides = array<i32: 2, 1>} : memref<144x128xf32, #tpu.memory_space<vmem>>, vector<5x128xf32>
    %c17_368 = arith.constant 17 : index
    %c640_369 = arith.constant 640 : index
    %319 = vector.load %arg10[%c17_368, %c640_369] : memref<144x1152xf32, #tpu.memory_space<vmem>>, vector<5x128xf32>
    tpu.vector_store %arg10[%c17_368, %c640_369], %318 {strides = array<i32>} : memref<144x1152xf32, #tpu.memory_space<vmem>>, vector<5x128xf32>,
    %c80 = arith.constant 80 : index
    %c0_370 = arith.constant 0 : index
    %320 = tpu.strided_load %arg12[%c80, %c0_370] {strides = array<i32: 2, 1>} : memref<144x128xf32, #tpu.memory_space<vmem>>, vector<5x128xf32>
    %c17_371 = arith.constant 17 : index
    %c768_372 = arith.constant 768 : index
    %321 = vector.load %arg10[%c17_371, %c768_372] : memref<144x1152xf32, #tpu.memory_space<vmem>>, vector<5x128xf32>
    tpu.vector_store %arg10[%c17_371, %c768_372], %320 {strides = array<i32>} : memref<144x1152xf32, #tpu.memory_space<vmem>>, vector<5x128xf32>,
    %c81_373 = arith.constant 81 : index
    %c0_374 = arith.constant 0 : index
    %322 = tpu.strided_load %arg12[%c81_373, %c0_374] {strides = array<i32: 2, 1>} : memref<144x128xf32, #tpu.memory_space<vmem>>, vector<5x128xf32>
    %c17_375 = arith.constant 17 : index
    %c896_376 = arith.constant 896 : index
    %323 = vector.load %arg10[%c17_375, %c896_376] : memref<144x1152xf32, #tpu.memory_space<vmem>>, vector<5x128xf32>
    tpu.vector_store %arg10[%c17_375, %c896_376], %322 {strides = array<i32>} : memref<144x1152xf32, #tpu.memory_space<vmem>>, vector<5x128xf32>,
    %c82 = arith.constant 82 : index
    %c0_377 = arith.constant 0 : index
    %324 = tpu.strided_load %arg12[%c82, %c0_377] {strides = array<i32: 2, 1>} : memref<144x128xf32, #tpu.memory_space<vmem>>, vector<5x128xf32>
    %c17_378 = arith.constant 17 : index
    %c1024_379 = arith.constant 1024 : index
    %325 = vector.load %arg10[%c17_378, %c1024_379] : memref<144x1152xf32, #tpu.memory_space<vmem>>, vector<5x128xf32>
    tpu.vector_store %arg10[%c17_378, %c1024_379], %324 {strides = array<i32>} : memref<144x1152xf32, #tpu.memory_space<vmem>>, vector<5x128xf32>,
    %c80_380 = arith.constant 80 : index
    %c0_381 = arith.constant 0 : index
    %326 = tpu.strided_load %arg12[%c80_380, %c0_381] {strides = array<i32: 2, 1>} : memref<144x128xf32, #tpu.memory_space<vmem>>, vector<5x128xf32>
    %c25_382 = arith.constant 25 : index
    %c0_383 = arith.constant 0 : index
    %327 = vector.load %arg10[%c25_382, %c0_383] : memref<144x1152xf32, #tpu.memory_space<vmem>>, vector<5x128xf32>
    tpu.vector_store %arg10[%c25_382, %c0_383], %326 {strides = array<i32>} : memref<144x1152xf32, #tpu.memory_space<vmem>>, vector<5x128xf32>,
    %c81_384 = arith.constant 81 : index
    %c0_385 = arith.constant 0 : index
    %328 = tpu.strided_load %arg12[%c81_384, %c0_385] {strides = array<i32: 2, 1>} : memref<144x128xf32, #tpu.memory_space<vmem>>, vector<5x128xf32>
    %c25_386 = arith.constant 25 : index
    %c128_387 = arith.constant 128 : index
    %329 = vector.load %arg10[%c25_386, %c128_387] : memref<144x1152xf32, #tpu.memory_space<vmem>>, vector<5x128xf32>
    tpu.vector_store %arg10[%c25_386, %c128_387], %328 {strides = array<i32>} : memref<144x1152xf32, #tpu.memory_space<vmem>>, vector<5x128xf32>,
    %c82_388 = arith.constant 82 : index
    %c0_389 = arith.constant 0 : index
    %330 = tpu.strided_load %arg12[%c82_388, %c0_389] {strides = array<i32: 2, 1>} : memref<144x128xf32, #tpu.memory_space<vmem>>, vector<5x128xf32>
    %c25_390 = arith.constant 25 : index
    %c256_391 = arith.constant 256 : index
    %331 = vector.load %arg10[%c25_390, %c256_391] : memref<144x1152xf32, #tpu.memory_space<vmem>>, vector<5x128xf32>
    tpu.vector_store %arg10[%c25_390, %c256_391], %330 {strides = array<i32>} : memref<144x1152xf32, #tpu.memory_space<vmem>>, vector<5x128xf32>,
    %c96_392 = arith.constant 96 : index
    %c0_393 = arith.constant 0 : index
    %332 = tpu.strided_load %arg12[%c96_392, %c0_393] {strides = array<i32: 2, 1>} : memref<144x128xf32, #tpu.memory_space<vmem>>, vector<5x128xf32>
    %c25_394 = arith.constant 25 : index
    %c384_395 = arith.constant 384 : index
    %333 = vector.load %arg10[%c25_394, %c384_395] : memref<144x1152xf32, #tpu.memory_space<vmem>>, vector<5x128xf32>
    tpu.vector_store %arg10[%c25_394, %c384_395], %332 {strides = array<i32>} : memref<144x1152xf32, #tpu.memory_space<vmem>>, vector<5x128xf32>,
    %c97_396 = arith.constant 97 : index
    %c0_397 = arith.constant 0 : index
    %334 = tpu.strided_load %arg12[%c97_396, %c0_397] {strides = array<i32: 2, 1>} : memref<144x128xf32, #tpu.memory_space<vmem>>, vector<5x128xf32>
    %c25_398 = arith.constant 25 : index
    %c512_399 = arith.constant 512 : index
    %335 = vector.load %arg10[%c25_398, %c512_399] : memref<144x1152xf32, #tpu.memory_space<vmem>>, vector<5x128xf32>
    tpu.vector_store %arg10[%c25_398, %c512_399], %334 {strides = array<i32>} : memref<144x1152xf32, #tpu.memory_space<vmem>>, vector<5x128xf32>,
    %c98_400 = arith.constant 98 : index
    %c0_401 = arith.constant 0 : index
    %336 = tpu.strided_load %arg12[%c98_400, %c0_401] {strides = array<i32: 2, 1>} : memref<144x128xf32, #tpu.memory_space<vmem>>, vector<5x128xf32>
    %c25_402 = arith.constant 25 : index
    %c640_403 = arith.constant 640 : index
    %337 = vector.load %arg10[%c25_402, %c640_403] : memref<144x1152xf32, #tpu.memory_space<vmem>>, vector<5x128xf32>
    tpu.vector_store %arg10[%c25_402, %c640_403], %336 {strides = array<i32>} : memref<144x1152xf32, #tpu.memory_space<vmem>>, vector<5x128xf32>,
    %c112 = arith.constant 112 : index
    %c0_404 = arith.constant 0 : index
    %338 = tpu.strided_load %arg12[%c112, %c0_404] {strides = array<i32: 2, 1>} : memref<144x128xf32, #tpu.memory_space<vmem>>, vector<5x128xf32>
    %c25_405 = arith.constant 25 : index
    %c768_406 = arith.constant 768 : index
    %339 = vector.load %arg10[%c25_405, %c768_406] : memref<144x1152xf32, #tpu.memory_space<vmem>>, vector<5x128xf32>
    tpu.vector_store %arg10[%c25_405, %c768_406], %338 {strides = array<i32>} : memref<144x1152xf32, #tpu.memory_space<vmem>>, vector<5x128xf32>,
    %c113_407 = arith.constant 113 : index
    %c0_408 = arith.constant 0 : index
    %340 = tpu.strided_load %arg12[%c113_407, %c0_408] {strides = array<i32: 2, 1>} : memref<144x128xf32, #tpu.memory_space<vmem>>, vector<5x128xf32>
    %c25_409 = arith.constant 25 : index
    %c896_410 = arith.constant 896 : index
    %341 = vector.load %arg10[%c25_409, %c896_410] : memref<144x1152xf32, #tpu.memory_space<vmem>>, vector<5x128xf32>
    tpu.vector_store %arg10[%c25_409, %c896_410], %340 {strides = array<i32>} : memref<144x1152xf32, #tpu.memory_space<vmem>>, vector<5x128xf32>,
    %c114 = arith.constant 114 : index
    %c0_411 = arith.constant 0 : index
    %342 = tpu.strided_load %arg12[%c114, %c0_411] {strides = array<i32: 2, 1>} : memref<144x128xf32, #tpu.memory_space<vmem>>, vector<5x128xf32>
    %c25_412 = arith.constant 25 : index
    %c1024_413 = arith.constant 1024 : index
    %343 = vector.load %arg10[%c25_412, %c1024_413] : memref<144x1152xf32, #tpu.memory_space<vmem>>, vector<5x128xf32>
    tpu.vector_store %arg10[%c25_412, %c1024_413], %342 {strides = array<i32>} : memref<144x1152xf32, #tpu.memory_space<vmem>>, vector<5x128xf32>,
    %c112_414 = arith.constant 112 : index
    %c0_415 = arith.constant 0 : index
    %344 = tpu.strided_load %arg12[%c112_414, %c0_415] {strides = array<i32: 2, 1>} : memref<144x128xf32, #tpu.memory_space<vmem>>, vector<5x128xf32>
    %c33_416 = arith.constant 33 : index
    %c0_417 = arith.constant 0 : index
    %345 = vector.load %arg10[%c33_416, %c0_417] : memref<144x1152xf32, #tpu.memory_space<vmem>>, vector<5x128xf32>
    tpu.vector_store %arg10[%c33_416, %c0_417], %344 {strides = array<i32>} : memref<144x1152xf32, #tpu.memory_space<vmem>>, vector<5x128xf32>,
    %c113_418 = arith.constant 113 : index
    %c0_419 = arith.constant 0 : index
    %346 = tpu.strided_load %arg12[%c113_418, %c0_419] {strides = array<i32: 2, 1>} : memref<144x128xf32, #tpu.memory_space<vmem>>, vector<5x128xf32>
    %c33_420 = arith.constant 33 : index
    %c128_421 = arith.constant 128 : index
    %347 = vector.load %arg10[%c33_420, %c128_421] : memref<144x1152xf32, #tpu.memory_space<vmem>>, vector<5x128xf32>
    tpu.vector_store %arg10[%c33_420, %c128_421], %346 {strides = array<i32>} : memref<144x1152xf32, #tpu.memory_space<vmem>>, vector<5x128xf32>,
    %c114_422 = arith.constant 114 : index
    %c0_423 = arith.constant 0 : index
    %348 = tpu.strided_load %arg12[%c114_422, %c0_423] {strides = array<i32: 2, 1>} : memref<144x128xf32, #tpu.memory_space<vmem>>, vector<5x128xf32>
    %c33_424 = arith.constant 33 : index
    %c256_425 = arith.constant 256 : index
    %349 = vector.load %arg10[%c33_424, %c256_425] : memref<144x1152xf32, #tpu.memory_space<vmem>>, vector<5x128xf32>
    tpu.vector_store %arg10[%c33_424, %c256_425], %348 {strides = array<i32>} : memref<144x1152xf32, #tpu.memory_space<vmem>>, vector<5x128xf32>,
    %c128_426 = arith.constant 128 : index
    %c0_427 = arith.constant 0 : index
    %350 = tpu.strided_load %arg12[%c128_426, %c0_427] {strides = array<i32: 2, 1>} : memref<144x128xf32, #tpu.memory_space<vmem>>, vector<5x128xf32>
    %c33_428 = arith.constant 33 : index
    %c384_429 = arith.constant 384 : index
    %351 = vector.load %arg10[%c33_428, %c384_429] : memref<144x1152xf32, #tpu.memory_space<vmem>>, vector<5x128xf32>
    tpu.vector_store %arg10[%c33_428, %c384_429], %350 {strides = array<i32>} : memref<144x1152xf32, #tpu.memory_space<vmem>>, vector<5x128xf32>,
    %c129_430 = arith.constant 129 : index
    %c0_431 = arith.constant 0 : index
    %352 = tpu.strided_load %arg12[%c129_430, %c0_431] {strides = array<i32: 2, 1>} : memref<144x128xf32, #tpu.memory_space<vmem>>, vector<5x128xf32>
    %c33_432 = arith.constant 33 : index
    %c512_433 = arith.constant 512 : index
    %353 = vector.load %arg10[%c33_432, %c512_433] : memref<144x1152xf32, #tpu.memory_space<vmem>>, vector<5x128xf32>
    tpu.vector_store %arg10[%c33_432, %c512_433], %352 {strides = array<i32>} : memref<144x1152xf32, #tpu.memory_space<vmem>>, vector<5x128xf32>,
    %c130 = arith.constant 130 : index
    %c0_434 = arith.constant 0 : index
    %354 = tpu.strided_load %arg12[%c130, %c0_434] {strides = array<i32: 2, 1>} : memref<144x128xf32, #tpu.memory_space<vmem>>, vector<5x128xf32>
    %c33_435 = arith.constant 33 : index
    %c640_436 = arith.constant 640 : index
    %355 = vector.load %arg10[%c33_435, %c640_436] : memref<144x1152xf32, #tpu.memory_space<vmem>>, vector<5x128xf32>
    tpu.vector_store %arg10[%c33_435, %c640_436], %354 {strides = array<i32>} : memref<144x1152xf32, #tpu.memory_space<vmem>>, vector<5x128xf32>,
    %c0_437 = arith.constant 0 : index
    %c0_438 = arith.constant 0 : index
    %356 = vector.load %arg10[%c0_437, %c0_438] : memref<144x1152xf32, #tpu.memory_space<vmem>>, vector<40x1152xf32>
    %c0_439 = arith.constant 0 : index
    %c0_440 = arith.constant 0 : index
    %357 = vector.load %arg3[%c0_439, %c0_440] : memref<1152x128xf32, #tpu.memory_space<vmem>>, vector<1152x128xf32>
    %cst_441 = arith.constant dense<0.000000e+00> : vector<40x128xf32>
    %358 = tpu.matmul %356, %357, %cst_441 {dimension_numbers = #tpu.dot_dimension_numbers<[1], [0], [0], [1], [0, 0, 1, 1], [], []>} : vector<40x1152xf32>, vector<1152x128xf32>, vector<40x128xf32> -> vector<40x128xf32>
    %c2_442 = arith.constant 2 : index
    %c0_443 = arith.constant 0 : index
    %359 = vector.load %arg5[%c2_442, %c0_443] : memref<4x128xf32, #tpu.memory_space<vmem>>, vector<1x128xf32>
    %c2_444 = arith.constant 2 : index
    %c0_445 = arith.constant 0 : index
    %360 = vector.load %arg6[%c2_444, %c0_445] : memref<4x128xf32, #tpu.memory_space<vmem>>, vector<1x128xf32>
    %cst_446 = arith.constant dense<0.000000e+00> : vector<128xf32>
    %361 = vector.multi_reduction <add>, %358, %cst_446 [0] : vector<40x128xf32> to vector<128xf32>
    %362 = vector.shape_cast %361 : vector<128xf32> to vector<1x128xf32>
    %cst_447 = arith.constant 2.500000e+01 : f32
    %363 = vector.broadcast %cst_447 : f32 to vector<1x128xf32>
    %364 = arith.divf %362, %363 : vector<1x128xf32>
    %365 = vector.broadcast %364 : vector<1x128xf32> to vector<40x128xf32>
    %366 = arith.subf %358, %365 : vector<40x128xf32>
    %367 = arith.mulf %366, %366 : vector<40x128xf32>
    %cst_448 = arith.constant dense<0.000000e+00> : vector<128xf32>
    %368 = vector.multi_reduction <add>, %367, %cst_448 [0] : vector<40x128xf32> to vector<128xf32>
    %369 = vector.shape_cast %368 : vector<128xf32> to vector<1x128xf32>
    %cst_449 = arith.constant 1.500000e+01 : f32
    %370 = vector.broadcast %cst_449 : f32 to vector<1x128xf32>
    %371 = arith.mulf %370, %364 : vector<1x128xf32>
    %372 = arith.mulf %371, %364 : vector<1x128xf32>
    %373 = arith.subf %369, %372 : vector<1x128xf32>
    %cst_450 = arith.constant 2.500000e+01 : f32
    %374 = vector.broadcast %cst_450 : f32 to vector<1x128xf32>
    %375 = arith.divf %373, %374 : vector<1x128xf32>
    %cst_451 = arith.constant 0.000000e+00 : f32
    %376 = vector.broadcast %cst_451 : f32 to vector<1x128xf32>
    %377 = arith.maximumf %375, %376 : vector<1x128xf32>
    %cst_452 = arith.constant 9.99999974E-6 : f32
    %378 = vector.broadcast %cst_452 : f32 to vector<1x128xf32>
    %379 = arith.addf %377, %378 : vector<1x128xf32>
    %380 = math.rsqrt %379 : vector<1x128xf32>
    %381 = arith.mulf %380, %359 : vector<1x128xf32>
    %382 = arith.mulf %364, %381 : vector<1x128xf32>
    %383 = arith.subf %360, %382 : vector<1x128xf32>
    %384 = vector.broadcast %381 : vector<1x128xf32> to vector<40x128xf32>
    %385 = arith.mulf %358, %384 : vector<40x128xf32>
    %386 = vector.broadcast %383 : vector<1x128xf32> to vector<40x128xf32>
    %387 = arith.addf %385, %386 : vector<40x128xf32>
    %cst_453 = arith.constant 0.000000e+00 : f32
    %388 = vector.broadcast %cst_453 : f32 to vector<40x128xf32>
    %389 = arith.cmpf oge, %387, %388 : vector<40x128xf32>
    %cst_454 = arith.constant 0.00999999977 : f32
    %390 = vector.broadcast %cst_454 : f32 to vector<40x128xf32>
    %391 = arith.mulf %390, %387 : vector<40x128xf32>
    %392 = arith.select %389, %387, %391 : vector<40x128xi1>, vector<40x128xf32>
    %393 = tpu.iota {dimensions = array<i32: 0>} : vector<40x128xi32>
    %c8_i32 = arith.constant 8 : i32
    %c0_i32_455 = arith.constant 0 : i32
    %394 = arith.cmpi eq, %c8_i32, %c0_i32_455 : i32
    %c1_i32_456 = arith.constant 1 : i32
    %395 = arith.select %394, %c1_i32_456, %c8_i32 : i32
    %396 = vector.broadcast %395 : i32 to vector<40x128xi32>
    %397 = arith.remsi %393, %396 : vector<40x128xi32>
    %c0_i32_457 = arith.constant 0 : i32
    %398 = vector.broadcast %c0_i32_457 : i32 to vector<40x128xi32>
    %399 = arith.cmpi ne, %397, %398 : vector<40x128xi32>
    %c0_i32_458 = arith.constant 0 : i32
    %400 = vector.broadcast %c0_i32_458 : i32 to vector<40x128xi32>
    %401 = arith.cmpi slt, %397, %400 : vector<40x128xi32>
    %c0_i32_459 = arith.constant 0 : i32
    %402 = arith.cmpi slt, %395, %c0_i32_459 : i32
    %403 = vector.broadcast %402 : i1 to vector<40x128xi1>
    %404 = vector.broadcast %403 : vector<40x128xi1> to vector<40x128xi1>
    %405 = arith.xori %401, %404 : vector<40x128xi1>
    %406 = arith.andi %405, %399 : vector<40x128xi1>
    %407 = vector.broadcast %395 : i32 to vector<40x128xi32>
    %408 = arith.addi %397, %407 : vector<40x128xi32>
    %409 = arith.select %406, %408, %397 : vector<40x128xi1>, vector<40x128xi32>
    %c1_i32_460 = arith.constant 1 : i32
    %410 = vector.broadcast %c1_i32_460 : i32 to vector<40x128xi32>
    %411 = arith.cmpi sge, %409, %410 : vector<40x128xi32>
    %c5_i32 = arith.constant 5 : i32
    %412 = vector.broadcast %c5_i32 : i32 to vector<40x128xi32>
    %413 = arith.cmpi sle, %409, %412 : vector<40x128xi32>
    %414 = arith.andi %411, %413 : vector<40x128xi1>
    %cst_461 = arith.constant 0.000000e+00 : f32
    %415 = vector.broadcast %cst_461 : f32 to vector<40x128xf32>
    %416 = arith.select %414, %392, %415 : vector<40x128xi1>, vector<40x128xf32>
    %c0_462 = arith.constant 0 : index
    %c0_463 = arith.constant 0 : index
    %417 = vector.load %arg13[%c0_462, %c0_463] : memref<40x128xf32, #tpu.memory_space<vmem>>, vector<40x128xf32>
    tpu.vector_store %arg13[%c0_462, %c0_463], %416 {strides = array<i32>} : memref<40x128xf32, #tpu.memory_space<vmem>>, vector<40x128xf32>,
    %cst_464 = arith.constant 0.000000e+00 : f32
    %418 = vector.broadcast %cst_464 : f32 to vector<24x1152xf32>
    %c0_465 = arith.constant 0 : index
    %c0_466 = arith.constant 0 : index
    %419 = vector.load %arg10[%c0_465, %c0_466] : memref<144x1152xf32, #tpu.memory_space<vmem>>, vector<24x1152xf32>
    tpu.vector_store %arg10[%c0_465, %c0_466], %418 {strides = array<i32>} : memref<144x1152xf32, #tpu.memory_space<vmem>>, vector<24x1152xf32>,
    %c0_467 = arith.constant 0 : index
    %c0_468 = arith.constant 0 : index
    %420 = tpu.strided_load %arg13[%c0_467, %c0_468] {strides = array<i32: 2, 1>} : memref<40x128xf32, #tpu.memory_space<vmem>>, vector<3x128xf32>
    %c1_469 = arith.constant 1 : index
    %c384_470 = arith.constant 384 : index
    %421 = vector.load %arg10[%c1_469, %c384_470] : memref<144x1152xf32, #tpu.memory_space<vmem>>, vector<3x128xf32>
    tpu.vector_store %arg10[%c1_469, %c384_470], %420 {strides = array<i32>} : memref<144x1152xf32, #tpu.memory_space<vmem>>, vector<3x128xf32>,
    %c1_471 = arith.constant 1 : index
    %c0_472 = arith.constant 0 : index
    %422 = tpu.strided_load %arg13[%c1_471, %c0_472] {strides = array<i32: 2, 1>} : memref<40x128xf32, #tpu.memory_space<vmem>>, vector<3x128xf32>
    %c1_473 = arith.constant 1 : index
    %c512_474 = arith.constant 512 : index
    %423 = vector.load %arg10[%c1_473, %c512_474] : memref<144x1152xf32, #tpu.memory_space<vmem>>, vector<3x128xf32>
    tpu.vector_store %arg10[%c1_473, %c512_474], %422 {strides = array<i32>} : memref<144x1152xf32, #tpu.memory_space<vmem>>, vector<3x128xf32>,
    %c2_475 = arith.constant 2 : index
    %c0_476 = arith.constant 0 : index
    %424 = tpu.strided_load %arg13[%c2_475, %c0_476] {strides = array<i32: 2, 1>} : memref<40x128xf32, #tpu.memory_space<vmem>>, vector<3x128xf32>
    %c1_477 = arith.constant 1 : index
    %c640_478 = arith.constant 640 : index
    %425 = vector.load %arg10[%c1_477, %c640_478] : memref<144x1152xf32, #tpu.memory_space<vmem>>, vector<3x128xf32>
    tpu.vector_store %arg10[%c1_477, %c640_478], %424 {strides = array<i32>} : memref<144x1152xf32, #tpu.memory_space<vmem>>, vector<3x128xf32>,
    %c8 = arith.constant 8 : index
    %c0_479 = arith.constant 0 : index
    %426 = tpu.strided_load %arg13[%c8, %c0_479] {strides = array<i32: 2, 1>} : memref<40x128xf32, #tpu.memory_space<vmem>>, vector<3x128xf32>
    %c1_480 = arith.constant 1 : index
    %c768_481 = arith.constant 768 : index
    %427 = vector.load %arg10[%c1_480, %c768_481] : memref<144x1152xf32, #tpu.memory_space<vmem>>, vector<3x128xf32>
    tpu.vector_store %arg10[%c1_480, %c768_481], %426 {strides = array<i32>} : memref<144x1152xf32, #tpu.memory_space<vmem>>, vector<3x128xf32>,
    %c9_482 = arith.constant 9 : index
    %c0_483 = arith.constant 0 : index
    %428 = tpu.strided_load %arg13[%c9_482, %c0_483] {strides = array<i32: 2, 1>} : memref<40x128xf32, #tpu.memory_space<vmem>>, vector<3x128xf32>
    %c1_484 = arith.constant 1 : index
    %c896_485 = arith.constant 896 : index
    %429 = vector.load %arg10[%c1_484, %c896_485] : memref<144x1152xf32, #tpu.memory_space<vmem>>, vector<3x128xf32>
    tpu.vector_store %arg10[%c1_484, %c896_485], %428 {strides = array<i32>} : memref<144x1152xf32, #tpu.memory_space<vmem>>, vector<3x128xf32>,
    %c10 = arith.constant 10 : index
    %c0_486 = arith.constant 0 : index
    %430 = tpu.strided_load %arg13[%c10, %c0_486] {strides = array<i32: 2, 1>} : memref<40x128xf32, #tpu.memory_space<vmem>>, vector<3x128xf32>
    %c1_487 = arith.constant 1 : index
    %c1024_488 = arith.constant 1024 : index
    %431 = vector.load %arg10[%c1_487, %c1024_488] : memref<144x1152xf32, #tpu.memory_space<vmem>>, vector<3x128xf32>
    tpu.vector_store %arg10[%c1_487, %c1024_488], %430 {strides = array<i32>} : memref<144x1152xf32, #tpu.memory_space<vmem>>, vector<3x128xf32>,
    %c8_489 = arith.constant 8 : index
    %c0_490 = arith.constant 0 : index
    %432 = tpu.strided_load %arg13[%c8_489, %c0_490] {strides = array<i32: 2, 1>} : memref<40x128xf32, #tpu.memory_space<vmem>>, vector<3x128xf32>
    %c9_491 = arith.constant 9 : index
    %c0_492 = arith.constant 0 : index
    %433 = vector.load %arg10[%c9_491, %c0_492] : memref<144x1152xf32, #tpu.memory_space<vmem>>, vector<3x128xf32>
    tpu.vector_store %arg10[%c9_491, %c0_492], %432 {strides = array<i32>} : memref<144x1152xf32, #tpu.memory_space<vmem>>, vector<3x128xf32>,
    %c9_493 = arith.constant 9 : index
    %c0_494 = arith.constant 0 : index
    %434 = tpu.strided_load %arg13[%c9_493, %c0_494] {strides = array<i32: 2, 1>} : memref<40x128xf32, #tpu.memory_space<vmem>>, vector<3x128xf32>
    %c9_495 = arith.constant 9 : index
    %c128_496 = arith.constant 128 : index
    %435 = vector.load %arg10[%c9_495, %c128_496] : memref<144x1152xf32, #tpu.memory_space<vmem>>, vector<3x128xf32>
    tpu.vector_store %arg10[%c9_495, %c128_496], %434 {strides = array<i32>} : memref<144x1152xf32, #tpu.memory_space<vmem>>, vector<3x128xf32>,
    %c10_497 = arith.constant 10 : index
    %c0_498 = arith.constant 0 : index
    %436 = tpu.strided_load %arg13[%c10_497, %c0_498] {strides = array<i32: 2, 1>} : memref<40x128xf32, #tpu.memory_space<vmem>>, vector<3x128xf32>
    %c9_499 = arith.constant 9 : index
    %c256_500 = arith.constant 256 : index
    %437 = vector.load %arg10[%c9_499, %c256_500] : memref<144x1152xf32, #tpu.memory_space<vmem>>, vector<3x128xf32>
    tpu.vector_store %arg10[%c9_499, %c256_500], %436 {strides = array<i32>} : memref<144x1152xf32, #tpu.memory_space<vmem>>, vector<3x128xf32>,
    %c16_501 = arith.constant 16 : index
    %c0_502 = arith.constant 0 : index
    %438 = tpu.strided_load %arg13[%c16_501, %c0_502] {strides = array<i32: 2, 1>} : memref<40x128xf32, #tpu.memory_space<vmem>>, vector<3x128xf32>
    %c9_503 = arith.constant 9 : index
    %c384_504 = arith.constant 384 : index
    %439 = vector.load %arg10[%c9_503, %c384_504] : memref<144x1152xf32, #tpu.memory_space<vmem>>, vector<3x128xf32>
    tpu.vector_store %arg10[%c9_503, %c384_504], %438 {strides = array<i32>} : memref<144x1152xf32, #tpu.memory_space<vmem>>, vector<3x128xf32>,
    %c17_505 = arith.constant 17 : index
    %c0_506 = arith.constant 0 : index
    %440 = tpu.strided_load %arg13[%c17_505, %c0_506] {strides = array<i32: 2, 1>} : memref<40x128xf32, #tpu.memory_space<vmem>>, vector<3x128xf32>
    %c9_507 = arith.constant 9 : index
    %c512_508 = arith.constant 512 : index
    %441 = vector.load %arg10[%c9_507, %c512_508] : memref<144x1152xf32, #tpu.memory_space<vmem>>, vector<3x128xf32>
    tpu.vector_store %arg10[%c9_507, %c512_508], %440 {strides = array<i32>} : memref<144x1152xf32, #tpu.memory_space<vmem>>, vector<3x128xf32>,
    %c18_509 = arith.constant 18 : index
    %c0_510 = arith.constant 0 : index
    %442 = tpu.strided_load %arg13[%c18_509, %c0_510] {strides = array<i32: 2, 1>} : memref<40x128xf32, #tpu.memory_space<vmem>>, vector<3x128xf32>
    %c9_511 = arith.constant 9 : index
    %c640_512 = arith.constant 640 : index
    %443 = vector.load %arg10[%c9_511, %c640_512] : memref<144x1152xf32, #tpu.memory_space<vmem>>, vector<3x128xf32>
    tpu.vector_store %arg10[%c9_511, %c640_512], %442 {strides = array<i32>} : memref<144x1152xf32, #tpu.memory_space<vmem>>, vector<3x128xf32>,
    %c24_513 = arith.constant 24 : index
    %c0_514 = arith.constant 0 : index
    %444 = tpu.strided_load %arg13[%c24_513, %c0_514] {strides = array<i32: 2, 1>} : memref<40x128xf32, #tpu.memory_space<vmem>>, vector<3x128xf32>
    %c9_515 = arith.constant 9 : index
    %c768_516 = arith.constant 768 : index
    %445 = vector.load %arg10[%c9_515, %c768_516] : memref<144x1152xf32, #tpu.memory_space<vmem>>, vector<3x128xf32>
    tpu.vector_store %arg10[%c9_515, %c768_516], %444 {strides = array<i32>} : memref<144x1152xf32, #tpu.memory_space<vmem>>, vector<3x128xf32>,
    %c25_517 = arith.constant 25 : index
    %c0_518 = arith.constant 0 : index
    %446 = tpu.strided_load %arg13[%c25_517, %c0_518] {strides = array<i32: 2, 1>} : memref<40x128xf32, #tpu.memory_space<vmem>>, vector<3x128xf32>
    %c9_519 = arith.constant 9 : index
    %c896_520 = arith.constant 896 : index
    %447 = vector.load %arg10[%c9_519, %c896_520] : memref<144x1152xf32, #tpu.memory_space<vmem>>, vector<3x128xf32>
    tpu.vector_store %arg10[%c9_519, %c896_520], %446 {strides = array<i32>} : memref<144x1152xf32, #tpu.memory_space<vmem>>, vector<3x128xf32>,
    %c26_521 = arith.constant 26 : index
    %c0_522 = arith.constant 0 : index
    %448 = tpu.strided_load %arg13[%c26_521, %c0_522] {strides = array<i32: 2, 1>} : memref<40x128xf32, #tpu.memory_space<vmem>>, vector<3x128xf32>
    %c9_523 = arith.constant 9 : index
    %c1024_524 = arith.constant 1024 : index
    %449 = vector.load %arg10[%c9_523, %c1024_524] : memref<144x1152xf32, #tpu.memory_space<vmem>>, vector<3x128xf32>
    tpu.vector_store %arg10[%c9_523, %c1024_524], %448 {strides = array<i32>} : memref<144x1152xf32, #tpu.memory_space<vmem>>, vector<3x128xf32>,
    %c24_525 = arith.constant 24 : index
    %c0_526 = arith.constant 0 : index
    %450 = tpu.strided_load %arg13[%c24_525, %c0_526] {strides = array<i32: 2, 1>} : memref<40x128xf32, #tpu.memory_space<vmem>>, vector<3x128xf32>
    %c17_527 = arith.constant 17 : index
    %c0_528 = arith.constant 0 : index
    %451 = vector.load %arg10[%c17_527, %c0_528] : memref<144x1152xf32, #tpu.memory_space<vmem>>, vector<3x128xf32>
    tpu.vector_store %arg10[%c17_527, %c0_528], %450 {strides = array<i32>} : memref<144x1152xf32, #tpu.memory_space<vmem>>, vector<3x128xf32>,
    %c25_529 = arith.constant 25 : index
    %c0_530 = arith.constant 0 : index
    %452 = tpu.strided_load %arg13[%c25_529, %c0_530] {strides = array<i32: 2, 1>} : memref<40x128xf32, #tpu.memory_space<vmem>>, vector<3x128xf32>
    %c17_531 = arith.constant 17 : index
    %c128_532 = arith.constant 128 : index
    %453 = vector.load %arg10[%c17_531, %c128_532] : memref<144x1152xf32, #tpu.memory_space<vmem>>, vector<3x128xf32>
    tpu.vector_store %arg10[%c17_531, %c128_532], %452 {strides = array<i32>} : memref<144x1152xf32, #tpu.memory_space<vmem>>, vector<3x128xf32>,
    %c26_533 = arith.constant 26 : index
    %c0_534 = arith.constant 0 : index
    %454 = tpu.strided_load %arg13[%c26_533, %c0_534] {strides = array<i32: 2, 1>} : memref<40x128xf32, #tpu.memory_space<vmem>>, vector<3x128xf32>
    %c17_535 = arith.constant 17 : index
    %c256_536 = arith.constant 256 : index
    %455 = vector.load %arg10[%c17_535, %c256_536] : memref<144x1152xf32, #tpu.memory_space<vmem>>, vector<3x128xf32>
    tpu.vector_store %arg10[%c17_535, %c256_536], %454 {strides = array<i32>} : memref<144x1152xf32, #tpu.memory_space<vmem>>, vector<3x128xf32>,
    %c32_537 = arith.constant 32 : index
    %c0_538 = arith.constant 0 : index
    %456 = tpu.strided_load %arg13[%c32_537, %c0_538] {strides = array<i32: 2, 1>} : memref<40x128xf32, #tpu.memory_space<vmem>>, vector<3x128xf32>
    %c17_539 = arith.constant 17 : index
    %c384_540 = arith.constant 384 : index
    %457 = vector.load %arg10[%c17_539, %c384_540] : memref<144x1152xf32, #tpu.memory_space<vmem>>, vector<3x128xf32>
    tpu.vector_store %arg10[%c17_539, %c384_540], %456 {strides = array<i32>} : memref<144x1152xf32, #tpu.memory_space<vmem>>, vector<3x128xf32>,
    %c33_541 = arith.constant 33 : index
    %c0_542 = arith.constant 0 : index
    %458 = tpu.strided_load %arg13[%c33_541, %c0_542] {strides = array<i32: 2, 1>} : memref<40x128xf32, #tpu.memory_space<vmem>>, vector<3x128xf32>
    %c17_543 = arith.constant 17 : index
    %c512_544 = arith.constant 512 : index
    %459 = vector.load %arg10[%c17_543, %c512_544] : memref<144x1152xf32, #tpu.memory_space<vmem>>, vector<3x128xf32>
    tpu.vector_store %arg10[%c17_543, %c512_544], %458 {strides = array<i32>} : memref<144x1152xf32, #tpu.memory_space<vmem>>, vector<3x128xf32>,
    %c34_545 = arith.constant 34 : index
    %c0_546 = arith.constant 0 : index
    %460 = tpu.strided_load %arg13[%c34_545, %c0_546] {strides = array<i32: 2, 1>} : memref<40x128xf32, #tpu.memory_space<vmem>>, vector<3x128xf32>
    %c17_547 = arith.constant 17 : index
    %c640_548 = arith.constant 640 : index
    %461 = vector.load %arg10[%c17_547, %c640_548] : memref<144x1152xf32, #tpu.memory_space<vmem>>, vector<3x128xf32>
    tpu.vector_store %arg10[%c17_547, %c640_548], %460 {strides = array<i32>} : memref<144x1152xf32, #tpu.memory_space<vmem>>, vector<3x128xf32>,
    %c0_549 = arith.constant 0 : index
    %c0_550 = arith.constant 0 : index
    %462 = vector.load %arg10[%c0_549, %c0_550] : memref<144x1152xf32, #tpu.memory_space<vmem>>, vector<24x1152xf32>
    %c0_551 = arith.constant 0 : index
    %c0_552 = arith.constant 0 : index
    %463 = vector.load %arg4[%c0_551, %c0_552] : memref<1152x128xf32, #tpu.memory_space<vmem>>, vector<1152x128xf32>
    %cst_553 = arith.constant dense<0.000000e+00> : vector<24x128xf32>
    %464 = tpu.matmul %462, %463, %cst_553 {dimension_numbers = #tpu.dot_dimension_numbers<[1], [0], [0], [1], [0, 0, 1, 1], [], []>} : vector<24x1152xf32>, vector<1152x128xf32>, vector<24x128xf32> -> vector<24x128xf32>
    %c3 = arith.constant 3 : index
    %c0_554 = arith.constant 0 : index
    %465 = vector.load %arg5[%c3, %c0_554] : memref<4x128xf32, #tpu.memory_space<vmem>>, vector<1x128xf32>
    %c3_555 = arith.constant 3 : index
    %c0_556 = arith.constant 0 : index
    %466 = vector.load %arg6[%c3_555, %c0_556] : memref<4x128xf32, #tpu.memory_space<vmem>>, vector<1x128xf32>
    %cst_557 = arith.constant dense<0.000000e+00> : vector<128xf32>
    %467 = vector.multi_reduction <add>, %464, %cst_557 [0] : vector<24x128xf32> to vector<128xf32>
    %468 = vector.shape_cast %467 : vector<128xf32> to vector<1x128xf32>
    %cst_558 = arith.constant 9.000000e+00 : f32
    %469 = vector.broadcast %cst_558 : f32 to vector<1x128xf32>
    %470 = arith.divf %468, %469 : vector<1x128xf32>
    %471 = vector.broadcast %470 : vector<1x128xf32> to vector<24x128xf32>
    %472 = arith.subf %464, %471 : vector<24x128xf32>
    %473 = arith.mulf %472, %472 : vector<24x128xf32>
    %cst_559 = arith.constant dense<0.000000e+00> : vector<128xf32>
    %474 = vector.multi_reduction <add>, %473, %cst_559 [0] : vector<24x128xf32> to vector<128xf32>
    %475 = vector.shape_cast %474 : vector<128xf32> to vector<1x128xf32>
    %cst_560 = arith.constant 1.500000e+01 : f32
    %476 = vector.broadcast %cst_560 : f32 to vector<1x128xf32>
    %477 = arith.mulf %476, %470 : vector<1x128xf32>
    %478 = arith.mulf %477, %470 : vector<1x128xf32>
    %479 = arith.subf %475, %478 : vector<1x128xf32>
    %cst_561 = arith.constant 9.000000e+00 : f32
    %480 = vector.broadcast %cst_561 : f32 to vector<1x128xf32>
    %481 = arith.divf %479, %480 : vector<1x128xf32>
    %cst_562 = arith.constant 0.000000e+00 : f32
    %482 = vector.broadcast %cst_562 : f32 to vector<1x128xf32>
    %483 = arith.maximumf %481, %482 : vector<1x128xf32>
    %cst_563 = arith.constant 9.99999974E-6 : f32
    %484 = vector.broadcast %cst_563 : f32 to vector<1x128xf32>
    %485 = arith.addf %483, %484 : vector<1x128xf32>
    %486 = math.rsqrt %485 : vector<1x128xf32>
    %487 = arith.mulf %486, %465 : vector<1x128xf32>
    %488 = arith.mulf %470, %487 : vector<1x128xf32>
    %489 = arith.subf %466, %488 : vector<1x128xf32>
    %490 = vector.broadcast %487 : vector<1x128xf32> to vector<24x128xf32>
    %491 = arith.mulf %464, %490 : vector<24x128xf32>
    %492 = vector.broadcast %489 : vector<1x128xf32> to vector<24x128xf32>
    %493 = arith.addf %491, %492 : vector<24x128xf32>
    %cst_564 = arith.constant 0.000000e+00 : f32
    %494 = vector.broadcast %cst_564 : f32 to vector<24x128xf32>
    %495 = arith.cmpf oge, %493, %494 : vector<24x128xf32>
    %cst_565 = arith.constant 0.00999999977 : f32
    %496 = vector.broadcast %cst_565 : f32 to vector<24x128xf32>
    %497 = arith.mulf %496, %493 : vector<24x128xf32>
    %498 = arith.select %495, %493, %497 : vector<24x128xi1>, vector<24x128xf32>
    %499 = tpu.iota {dimensions = array<i32: 0>} : vector<24x128xi32>
    %c8_i32_566 = arith.constant 8 : i32
    %c0_i32_567 = arith.constant 0 : i32
    %500 = arith.cmpi eq, %c8_i32_566, %c0_i32_567 : i32
    %c1_i32_568 = arith.constant 1 : i32
    %501 = arith.select %500, %c1_i32_568, %c8_i32_566 : i32
    %502 = vector.broadcast %501 : i32 to vector<24x128xi32>
    %503 = arith.remsi %499, %502 : vector<24x128xi32>
    %c0_i32_569 = arith.constant 0 : i32
    %504 = vector.broadcast %c0_i32_569 : i32 to vector<24x128xi32>
    %505 = arith.cmpi ne, %503, %504 : vector<24x128xi32>
    %c0_i32_570 = arith.constant 0 : i32
    %506 = vector.broadcast %c0_i32_570 : i32 to vector<24x128xi32>
    %507 = arith.cmpi slt, %503, %506 : vector<24x128xi32>
    %c0_i32_571 = arith.constant 0 : i32
    %508 = arith.cmpi slt, %501, %c0_i32_571 : i32
    %509 = vector.broadcast %508 : i1 to vector<24x128xi1>
    %510 = vector.broadcast %509 : vector<24x128xi1> to vector<24x128xi1>
    %511 = arith.xori %507, %510 : vector<24x128xi1>
    %512 = arith.andi %511, %505 : vector<24x128xi1>
    %513 = vector.broadcast %501 : i32 to vector<24x128xi32>
    %514 = arith.addi %503, %513 : vector<24x128xi32>
    %515 = arith.select %512, %514, %503 : vector<24x128xi1>, vector<24x128xi32>
    %c1_i32_572 = arith.constant 1 : i32
    %516 = vector.broadcast %c1_i32_572 : i32 to vector<24x128xi32>
    %517 = arith.cmpi sge, %515, %516 : vector<24x128xi32>
    %c3_i32 = arith.constant 3 : i32
    %518 = vector.broadcast %c3_i32 : i32 to vector<24x128xi32>
    %519 = arith.cmpi sle, %515, %518 : vector<24x128xi32>
    %520 = arith.andi %517, %519 : vector<24x128xi1>
    %cst_573 = arith.constant 0.000000e+00 : f32
    %521 = vector.broadcast %cst_573 : f32 to vector<24x128xf32>
    %522 = arith.select %520, %498, %521 : vector<24x128xi1>, vector<24x128xf32>
    %c0_574 = arith.constant 0 : index
    %c0_575 = arith.constant 0 : index
    %523 = vector.load %arg14[%c0_574, %c0_575] : memref<24x128xf32, #tpu.memory_space<vmem>>, vector<24x128xf32>
    tpu.vector_store %arg14[%c0_574, %c0_575], %522 {strides = array<i32>} : memref<24x128xf32, #tpu.memory_space<vmem>>, vector<24x128xf32>,
    %c0_576 = arith.constant 0 : index
    %c0_577 = arith.constant 0 : index
    %524 = vector.load %arg14[%c0_576, %c0_577] : memref<24x128xf32, #tpu.memory_space<vmem>>, vector<24x128xf32>
    %525 = tpu.iota {dimensions = array<i32: 1>} : vector<1x128xi32>
    %c0_578 = arith.constant 0 : index
    %c0_579 = arith.constant 0 : index
    %526 = vector.load %arg8[%c0_578, %c0_579] : memref<1x128xf32, #tpu.memory_space<vmem>>, vector<1x128xf32>
    %c0_580 = arith.constant 0 : index
    %c0_581 = arith.constant 0 : index
    %c0_582 = arith.constant 0 : index
    %527 = vector.load %arg7[%c0_580, %c0_581, %c0_582] : memref<3x24x128xf32, #tpu.memory_space<vmem>>, vector<1x24x128xf32>
    %528 = vector.shape_cast %527 : vector<1x24x128xf32> to vector<24x128xf32>
    %529 = arith.mulf %524, %528 : vector<24x128xf32>
    %cst_583 = arith.constant dense<0.000000e+00> : vector<128xf32>
    %530 = vector.multi_reduction <add>, %529, %cst_583 [0] : vector<24x128xf32> to vector<128xf32>
    %531 = vector.shape_cast %530 : vector<128xf32> to vector<1x128xf32>
    %cst_584 = arith.constant dense<0.000000e+00> : vector<1xf32>
    %532 = vector.multi_reduction <add>, %531, %cst_584 [1] : vector<1x128xf32> to vector<1xf32>
    %533 = vector.shape_cast %532 : vector<1xf32> to vector<1x1xf32>
    %c0_i32_585 = arith.constant 0 : i32
    %534 = vector.broadcast %c0_i32_585 : i32 to vector<1x128xi32>
    %535 = arith.cmpi eq, %525, %534 : vector<1x128xi32>
    %cst_586 = arith.constant 0.000000e+00 : f32
    %536 = vector.shape_cast %533 : vector<1x1xf32> to vector<1x1xf32>
    %537 = vector.broadcast %536 : vector<1x1xf32> to vector<1x128xf32>
    %538 = vector.broadcast %cst_586 : f32 to vector<1x128xf32>
    %539 = arith.select %535, %537, %538 : vector<1x128xi1>, vector<1x128xf32>
    %540 = arith.addf %526, %539 : vector<1x128xf32>
    %c1_587 = arith.constant 1 : index
    %c0_588 = arith.constant 0 : index
    %c0_589 = arith.constant 0 : index
    %541 = vector.load %arg7[%c1_587, %c0_588, %c0_589] : memref<3x24x128xf32, #tpu.memory_space<vmem>>, vector<1x24x128xf32>
    %542 = vector.shape_cast %541 : vector<1x24x128xf32> to vector<24x128xf32>
    %543 = arith.mulf %524, %542 : vector<24x128xf32>
    %cst_590 = arith.constant dense<0.000000e+00> : vector<128xf32>
    %544 = vector.multi_reduction <add>, %543, %cst_590 [0] : vector<24x128xf32> to vector<128xf32>
    %545 = vector.shape_cast %544 : vector<128xf32> to vector<1x128xf32>
    %cst_591 = arith.constant dense<0.000000e+00> : vector<1xf32>
    %546 = vector.multi_reduction <add>, %545, %cst_591 [1] : vector<1x128xf32> to vector<1xf32>
    %547 = vector.shape_cast %546 : vector<1xf32> to vector<1x1xf32>
    %c1_i32_592 = arith.constant 1 : i32
    %548 = vector.broadcast %c1_i32_592 : i32 to vector<1x128xi32>
    %549 = arith.cmpi eq, %525, %548 : vector<1x128xi32>
    %cst_593 = arith.constant 0.000000e+00 : f32
    %550 = vector.shape_cast %547 : vector<1x1xf32> to vector<1x1xf32>
    %551 = vector.broadcast %550 : vector<1x1xf32> to vector<1x128xf32>
    %552 = vector.broadcast %cst_593 : f32 to vector<1x128xf32>
    %553 = arith.select %549, %551, %552 : vector<1x128xi1>, vector<1x128xf32>
    %554 = arith.addf %540, %553 : vector<1x128xf32>
    %c2_594 = arith.constant 2 : index
    %c0_595 = arith.constant 0 : index
    %c0_596 = arith.constant 0 : index
    %555 = vector.load %arg7[%c2_594, %c0_595, %c0_596] : memref<3x24x128xf32, #tpu.memory_space<vmem>>, vector<1x24x128xf32>
    %556 = vector.shape_cast %555 : vector<1x24x128xf32> to vector<24x128xf32>
    %557 = arith.mulf %524, %556 : vector<24x128xf32>
    %cst_597 = arith.constant dense<0.000000e+00> : vector<128xf32>
    %558 = vector.multi_reduction <add>, %557, %cst_597 [0] : vector<24x128xf32> to vector<128xf32>
    %559 = vector.shape_cast %558 : vector<128xf32> to vector<1x128xf32>
    %cst_598 = arith.constant dense<0.000000e+00> : vector<1xf32>
    %560 = vector.multi_reduction <add>, %559, %cst_598 [1] : vector<1x128xf32> to vector<1xf32>
    %561 = vector.shape_cast %560 : vector<1xf32> to vector<1x1xf32>
    %c2_i32 = arith.constant 2 : i32
    %562 = vector.broadcast %c2_i32 : i32 to vector<1x128xi32>
    %563 = arith.cmpi eq, %525, %562 : vector<1x128xi32>
    %cst_599 = arith.constant 0.000000e+00 : f32
    %564 = vector.shape_cast %561 : vector<1x1xf32> to vector<1x1xf32>
    %565 = vector.broadcast %564 : vector<1x1xf32> to vector<1x128xf32>
    %566 = vector.broadcast %cst_599 : f32 to vector<1x128xf32>
    %567 = arith.select %563, %565, %566 : vector<1x128xi1>, vector<1x128xf32>
    %568 = arith.addf %554, %567 : vector<1x128xf32>
    %cst_600 = arith.constant 0.000000e+00 : f32
    %569 = vector.broadcast %cst_600 : f32 to vector<1x128xf32>
    %570 = arith.cmpf ogt, %568, %569 : vector<1x128xf32>
    %cst_601 = arith.constant 0.000000e+00 : f32
    %571 = vector.broadcast %cst_601 : f32 to vector<1x128xf32>
    %572 = arith.minimumf %568, %571 : vector<1x128xf32>
    %573 = math.exp %572 : vector<1x128xf32>
    %cst_602 = arith.constant 1.000000e+00 : f32
    %574 = vector.broadcast %cst_602 : f32 to vector<1x128xf32>
    %575 = arith.subf %573, %574 : vector<1x128xf32>
    %576 = arith.select %570, %568, %575 : vector<1x128xi1>, vector<1x128xf32>
    %cst_603 = arith.constant 1.000000e+00 : f32
    %577 = vector.broadcast %cst_603 : f32 to vector<1x128xf32>
    %578 = arith.addf %576, %577 : vector<1x128xf32>
    %c0_604 = arith.constant 0 : index
    %c0_605 = arith.constant 0 : index
    %579 = vector.load %arg9[%c0_604, %c0_605] : memref<1x128xf32, #tpu.memory_space<vmem>>, vector<1x128xf32>
    tpu.vector_store %arg9[%c0_604, %c0_605], %578 {strides = array<i32>} : memref<1x128xf32, #tpu.memory_space<vmem>>, vector<1x128xf32>,
    return
  }
}

</mosaic_0001>

<bundles_post_ra>
// kernel: qpred_forward.1
= control target key start
LH: loop header
LB: loop body
LE: loop exit
PB: predicated region body
PF: predicated region fallthrough
CT: control target
= control target key end

     0   :  { %v7628_v1 = vmov 0.0   ;;  %vm153_vm0 = vcmask 130048   ;;  %s13796_s0 = inlined_call_operand.vmem [shape: f32[408,144], index: 0, kind: input, shape index: {}]   ;;  %s13797_s1 = inlined_call_operand.vmem [shape: f32[144,128], index: 1, kind: input, shape index: {}]   ;;  %s13798_s2 = inlined_call_operand.vmem [shape: f32[1152,128], index: 2, kind: input, shape index: {}]   ;;  %s13799_s3 = inlined_call_operand.vmem [shape: f32[1152,128], index: 3, kind: input, shape index: {}]   ;;  %s13800_s4 = inlined_call_operand.vmem [shape: f32[1152,128], index: 4, kind: input, shape index: {}]   ;;  %s13801_s5 = inlined_call_operand.vmem [shape: f32[4,128], index: 5, kind: input, shape index: {}]   ;;  %s13802_s6 = inlined_call_operand.vmem [shape: f32[4,128], index: 6, kind: input, shape index: {}]   ;;  %s13803_s7 = inlined_call_operand.vmem [shape: f32[3,24,128], index: 7, kind: input, shape index: {}]   ;;  %s13804_s8 = inlined_call_operand.vmem [shape: f32[1,128], index: 8, kind: input, shape index: {}]   ;;  %s13805_s9 = inlined_call_operand.hbm [shape: f32[1,128], index: 9, kind: output, shape index: {}]  }
   0x1   :  { %v7684_v0 = vld [vmem:[%s13797_s1 + $0x78] sm:$0xff]  ;;  %307 = vmatprep.subr.mxu0 %v7628_v1  ;;  %2244 = vst [vmem:[#allocation2 + $0x18] sm:$0xff] %v7628_v1  ;;  %2245 = vst [vmem:[#allocation2 + $0x450] sm:$0xff] %v7628_v1  ;;  %v149_v2 = vld [vmem:[%s13797_s1 + $0x70] sm:$0xff]  ;;  %3636 = vmatprep.subr.mxu1 %v7628_v1 }
   0x2   :  { %2246 = vst [vmem:[#allocation2 + $0x328] sm:$0xff] %v7628_v1  ;;  %2247 = vst [vmem:[#allocation2 + $0x440] sm:$0xff] %v7628_v1  ;;  %308 = vmatpush1.msra.mxu0 %v7684_v0  ;;  %3700 = vmatprep.mubr.f32.mxu1 %v7628_v1  ;;  %v148_v3 = vld [vmem:[%s13797_s1 + $0x68] sm:$0xff]  ;;  %v147_v4 = vld [vmem:[%s13797_s1 + $0x60] sm:$0xff] }
   0x3   :  { %2248 = vst [vmem:[#allocation2 + $0x378] sm:$0xff] %v7628_v1  ;;  %2249 = vst [vmem:[#allocation2 + $0x108] sm:$0xff] %v7628_v1  ;;  %309 = vmatprep.subr.mxu0 %v7628_v1  ;;  %v34_v5 = vld [vmem:[%s13796_s0 + $0x8] sm:$0xff]  ;;  %v146_v6 = vld [vmem:[%s13797_s1 + $0x58] sm:$0xff] }
   0x4   :  { %2253 = vst [vmem:[#allocation2 + $0x308] sm:$0xff] %v7628_v1  ;;  %2254 = vst [vmem:[#allocation2 + $0x2a8] sm:$0xff] %v7628_v1  ;;  %310 = vmatpush1.msra.mxu0 %v149_v2  ;;  %6853 = vmatprep.mubr.msk.f32.mxu0 %vm153_vm0, %v34_v5  ;;  %v145_v7 = vld [vmem:[%s13797_s1 + $0x50] sm:$0xff]  ;;  %v144_v8 = vld [vmem:[%s13797_s1 + $0x48] sm:$0xff] }
   0x5   :  { %2255 = vst [vmem:[#allocation2 + $0x398] sm:$0xff] %v7628_v1  ;;  %2256 = vst [vmem:[#allocation2 + $0x60] sm:$0xff] %v7628_v1  ;;  %311 = vmatprep.subr.mxu0 %v7628_v1  ;;  %v143_v9 = vld [vmem:[%s13797_s1 + $0x40] sm:$0xff]  ;;  %v142_v10 = vld [vmem:[%s13797_s1 + $0x38] sm:$0xff] }
   0x6   :  { %2257 = vst [vmem:[#allocation2 + $0xd8] sm:$0xff] %v7628_v1  ;;  %2258 = vst [vmem:[#allocation2 + $0x388] sm:$0xff] %v7628_v1  ;;  %312 = vmatpush1.msra.mxu0 %v148_v3  ;;  %v141_v11 = vld [vmem:[%s13797_s1 + $0x30] sm:$0xff]  ;;  %v140_v12 = vld [vmem:[%s13797_s1 + $0x28] sm:$0xff] }
   0x7   :  { %2259 = vst [vmem:[#allocation2 + $0x160] sm:$0xff] %v7628_v1  ;;  %2260 = vst [vmem:[#allocation2 + $0x220] sm:$0xff] %v7628_v1  ;;  %313 = vmatprep.subr.mxu0 %v7628_v1  ;;  %v139_v13 = vld [vmem:[%s13797_s1 + $0x20] sm:$0xff]  ;;  %v138_v14 = vld [vmem:[%s13797_s1 + $0x18] sm:$0xff] }
   0x8   :  { %2261 = vst [vmem:[#allocation2 + $0xa0] sm:$0xff] %v7628_v1  ;;  %2262 = vst [vmem:[#allocation2 + $0x360] sm:$0xff] %v7628_v1  ;;  %314 = vmatpush1.msra.mxu0 %v147_v4  ;;  %v137_v15 = vld [vmem:[%s13797_s1 + $0x10] sm:$0xff] }
   0x9   :  { %2263 = vst [vmem:[#allocation2 + $0x4f8] sm:$0xff] %v7628_v1  ;;  %2264 = vst [vmem:[#allocation2 + $0x380] sm:$0xff] %v7628_v1  ;;  %315 = vmatprep.subr.mxu0 %v7628_v1 }
   0xa   :  { %2265 = vst [vmem:[#allocation2 + $0x458] sm:$0xff] %v7628_v1  ;;  %2266 = vst [vmem:[#allocation2 + $0x4a0] sm:$0xff] %v7628_v1  ;;  %316 = vmatpush1.msra.mxu0 %v146_v6 }
   0xb   :  { %2267 = vst [vmem:[#allocation2 + $0x390] sm:$0xff] %v7628_v1  ;;  %2268 = vst [vmem:[#allocation2 + $0xb8] sm:$0xff] %v7628_v1  ;;  %317 = vmatprep.subr.mxu0 %v7628_v1 }
   0xc   :  { %2269 = vst [vmem:[#allocation2 + $0x270] sm:$0xff] %v7628_v1  ;;  %2270 = vst [vmem:[#allocation2 + $0x480] sm:$0xff] %v7628_v1  ;;  %318 = vmatpush1.msra.mxu0 %v145_v7 }
   0xd   :  { %2271 = vst [vmem:[#allocation2 + $0x1a8] sm:$0xff] %v7628_v1  ;;  %2272 = vst [vmem:[#allocation2 + $0x2a0] sm:$0xff] %v7628_v1  ;;  %319 = vmatprep.subr.mxu0 %v7628_v1 }
   0xe   :  { %2273 = vst [vmem:[#allocation2 + $0x38] sm:$0xff] %v7628_v1  ;;  %2274 = vst [vmem:[#allocation2 + $0x2e0] sm:$0xff] %v7628_v1  ;;  %320 = vmatpush1.msra.mxu0 %v144_v8 }
   0xf   :  { %2275 = vst [vmem:[#allocation2 + $0x428] sm:$0xff] %v7628_v1  ;;  %2276 = vst [vmem:[#allocation2 + $0x3a0] sm:$0xff] %v7628_v1  ;;  %321 = vmatprep.subr.mxu0 %v7628_v1 }
  0x10   :  { %2277 = vst [vmem:[#allocation2 + $0x258] sm:$0xff] %v7628_v1  ;;  %2278 = vst [vmem:[#allocation2 + $0xd0] sm:$0xff] %v7628_v1  ;;  %322 = vmatpush1.msra.mxu0 %v143_v9 }
  0x11   :  { %2279 = vst [vmem:[#allocation2 + $0x88] sm:$0xff] %v7628_v1  ;;  %2280 = vst [vmem:[#allocation2 + $0x460] sm:$0xff] %v7628_v1  ;;  %323 = vmatprep.subr.mxu0 %v7628_v1 }
  0x12   :  { %2281 = vst [vmem:[#allocation2 + $0x2d8] sm:$0xff] %v7628_v1  ;;  %2282 = vst [vmem:[#allocation2 + $0xe8] sm:$0xff] %v7628_v1  ;;  %324 = vmatpush1.msra.mxu0 %v142_v10 }
  0x13   :  { %2283 = vst [vmem:[#allocation2 + $0x1f0] sm:$0xff] %v7628_v1  ;;  %2284 = vst [vmem:[#allocation2 + $0x140] sm:$0xff] %v7628_v1  ;;  %325 = vmatprep.subr.mxu0 %v7628_v1 }
  0x14   :  { %2285 = vst [vmem:[#allocation2 + $0x1c8] sm:$0xff] %v7628_v1  ;;  %2286 = vst [vmem:[#allocation2 + $0x4b0] sm:$0xff] %v7628_v1  ;;  %326 = vmatpush1.msra.mxu0 %v141_v11 }
  0x15   :  { %2287 = vst [vmem:[#allocation2 + $0x1d0] sm:$0xff] %v7628_v1  ;;  %2288 = vst [vmem:[#allocation2 + $0x2c0] sm:$0xff] %v7628_v1  ;;  %327 = vmatprep.subr.mxu0 %v7628_v1 }
  0x16   :  { %2289 = vst [vmem:[#allocation2 + $0x230] sm:$0xff] %v7628_v1  ;;  %2290 = vst [vmem:[#allocation2 + $0x238] sm:$0xff] %v7628_v1  ;;  %328 = vmatpush1.msra.mxu0 %v140_v12 }
  0x17   :  { %2291 = vst [vmem:[#allocation2 + $0x298] sm:$0xff] %v7628_v1  ;;  %2292 = vst [vmem:[#allocation2 + $0x118] sm:$0xff] %v7628_v1  ;;  %329 = vmatprep.subr.mxu0 %v7628_v1 }
  0x18   :  { %2293 = vst [vmem:[#allocation2 + $0x278] sm:$0xff] %v7628_v1  ;;  %2294 = vst [vmem:[#allocation2 + $0x370] sm:$0xff] %v7628_v1  ;;  %330 = vmatpush1.msra.mxu0 %v139_v13 }
  0x19   :  { %2295 = vst [vmem:[#allocation2 + $0x4e0] sm:$0xff] %v7628_v1  ;;  %2296 = vst [vmem:[#allocation2 + $0xc8] sm:$0xff] %v7628_v1  ;;  %331 = vmatprep.subr.mxu0 %v7628_v1 }
  0x1a   :  { %2297 = vst [vmem:[#allocation2 + $0x3d8] sm:$0xff] %v7628_v1  ;;  %2298 = vst [vmem:[#allocation2 + $0x330] sm:$0xff] %v7628_v1  ;;  %332 = vmatpush1.msra.mxu0 %v138_v14 }
  0x1b   :  { %2299 = vst [vmem:[#allocation2 + $0x180] sm:$0xff] %v7628_v1  ;;  %2300 = vst [vmem:[#allocation2 + $0x1c0] sm:$0xff] %v7628_v1 }
  0x1c   :  { %2301 = vst [vmem:[#allocation2 + $0x2f8] sm:$0xff] %v7628_v1  ;;  %2302 = vst [vmem:[#allocation2 + $0x80] sm:$0xff] %v7628_v1 }
  0x1d   :  { %2303 = vst [vmem:[#allocation2 + $0xa8] sm:$0xff] %v7628_v1  ;;  %2304 = vst [vmem:[#allocation2 + $0x3e0] sm:$0xff] %v7628_v1 }
  0x1e   :  { %2305 = vst [vmem:[#allocation2 + $0x208] sm:$0xff] %v7628_v1  ;;  %2306 = vst [vmem:[#allocation2 + $0x28] sm:$0xff] %v7628_v1 }
  0x1f   :  { %2307 = vst [vmem:[#allocation2 + $0x268] sm:$0xff] %v7628_v1  ;;  %2308 = vst [vmem:[#allocation2 + $0x30] sm:$0xff] %v7628_v1 }
  0x20   :  { %2309 = vst [vmem:[#allocation2 + $0x490] sm:$0xff] %v7628_v1  ;;  %2310 = vst [vmem:[#allocation2 + $0x1b8] sm:$0xff] %v7628_v1 }
  0x21   :  { %2311 = vst [vmem:[#allocation2 + $0x1e0] sm:$0xff] %v7628_v1  ;;  %2312 = vst [vmem:[#allocation2 + $0x2f0] sm:$0xff] %v7628_v1 }
  0x22   :  { %2313 = vst [vmem:[#allocation2 + $0x240] sm:$0xff] %v7628_v1  ;;  %2314 = vst [vmem:[#allocation2 + $0x70] sm:$0xff] %v7628_v1 }
  0x23   :  { %2315 = vst [vmem:[#allocation2 + $0x4c8] sm:$0xff] %v7628_v1  ;;  %2316 = vst [vmem:[#allocation2 + $0x4b8] sm:$0xff] %v7628_v1 }
  0x24   :  { %2317 = vst [vmem:[#allocation2 + $0x3f8] sm:$0xff] %v7628_v1  ;;  %2318 = vst [vmem:[#allocation2 + $0x318] sm:$0xff] %v7628_v1 }
  0x25   :  { %2319 = vst [vmem:[#allocation2 + $0x338] sm:$0xff] %v7628_v1  ;;  %2320 = vst [vmem:[#allocation2 + $0x128] sm:$0xff] %v7628_v1 }
  0x26   :  { %2321 = vst [vmem:[#allocation2 + $0x508] sm:$0xff] %v7628_v1  ;;  %2322 = vst [vmem:[#allocation2 + $0x500] sm:$0xff] %v7628_v1 }
  0x27   :  { %2323 = vst [vmem:[#allocation2 + $0x100] sm:$0xff] %v7628_v1  ;;  %2324 = vst [vmem:[#allocation2 + $0x438] sm:$0xff] %v7628_v1 }
  0x28   :  { %2325 = vst [vmem:[#allocation2 + $0xf8] sm:$0xff] %v7628_v1  ;;  %2326 = vst [vmem:[#allocation2 + $0x178] sm:$0xff] %v7628_v1 }
  0x29   :  { %2327 = vst [vmem:[#allocation2 + $0x250] sm:$0xff] %v7628_v1  ;;  %2328 = vst [vmem:[#allocation2 + $0x468] sm:$0xff] %v7628_v1 }
  0x2a   :  { %2329 = vst [vmem:[#allocation2 + $0x478] sm:$0xff] %v7628_v1  ;;  %2330 = vst [vmem:[#allocation2 + $0x218] sm:$0xff] %v7628_v1 }
  0x2b   :  { %2331 = vst [vmem:[#allocation2 + $0x110] sm:$0xff] %v7628_v1  ;;  %2332 = vst [vmem:[#allocation2 + $0x2b8] sm:$0xff] %v7628_v1 }
  0x2c   :  { %2333 = vst [vmem:[#allocation2 + $0x3d0] sm:$0xff] %v7628_v1  ;;  %2334 = vst [vmem:[#allocation2 + $0x170] sm:$0xff] %v7628_v1 }
  0x2d   :  { %2335 = vst [vmem:[#allocation2 + $0x198] sm:$0xff] %v7628_v1  ;;  %2336 = vst [vmem:[#allocation2 + $0xb0] sm:$0xff] %v7628_v1 }
  0x2e   :  { %2337 = vst [vmem:[#allocation2 + $0x348] sm:$0xff] %v7628_v1  ;;  %2338 = vst [vmem:[#allocation2 + $0x418] sm:$0xff] %v7628_v1 }
  0x2f   :  { %2339 = vst [vmem:[#allocation2 + $0x130] sm:$0xff] %v7628_v1  ;;  %2340 = vst [vmem:[#allocation2 + $0x368] sm:$0xff] %v7628_v1 }
  0x30   :  { %2341 = vst [vmem:[#allocation2 + $0x3b8] sm:$0xff] %v7628_v1  ;;  %2342 = vst [vmem:[#allocation2 + $0x3e8] sm:$0xff] %v7628_v1 }
  0x31   :  { %2343 = vst [vmem:[#allocation2 + $0x138] sm:$0xff] %v7628_v1  ;;  %2344 = vst [vmem:[#allocation2 + $0x200] sm:$0xff] %v7628_v1 }
  0x32   :  { %2345 = vst [vmem:[#allocation2 + $0x3f0] sm:$0xff] %v7628_v1  ;;  %2346 = vst [vmem:[#allocation2 + $0x2e8] sm:$0xff] %v7628_v1 }
  0x33   :  { %2347 = vst [vmem:[#allocation2 + $0x48] sm:$0xff] %v7628_v1  ;;  %2348 = vst [vmem:[#allocation2 + $0x408] sm:$0xff] %v7628_v1 }
  0x34   :  { %2349 = vst [vmem:[#allocation2 + $0x420] sm:$0xff] %v7628_v1  ;;  %2350 = vst [vmem:[#allocation2 + $0x340] sm:$0xff] %v7628_v1 }
  0x35   :  { %2351 = vst [vmem:[#allocation2 + $0x1a0] sm:$0xff] %v7628_v1  ;;  %2352 = vst [vmem:[#allocation2 + $0x350] sm:$0xff] %v7628_v1 }
  0x36   :  { %2353 = vst [vmem:[#allocation2 + $0x68] sm:$0xff] %v7628_v1  ;;  %2354 = vst [vmem:[#allocation2 + $0x168] sm:$0xff] %v7628_v1 }
  0x37   :  { %2355 = vst [vmem:[#allocation2 + $0x3a8] sm:$0xff] %v7628_v1  ;;  %2356 = vst [vmem:[#allocation2 + $0x1e8] sm:$0xff] %v7628_v1 }
  0x38   :  { %2357 = vst [vmem:[#allocation2 + $0x50] sm:$0xff] %v7628_v1  ;;  %2358 = vst [vmem:[#allocation2 + $0x260] sm:$0xff] %v7628_v1 }
  0x39   :  { %2359 = vst [vmem:[#allocation2 + $0x410] sm:$0xff] %v7628_v1  ;;  %2360 = vst [vmem:[#allocation2 + $0x188] sm:$0xff] %v7628_v1 }
  0x3a   :  { %2361 = vst [vmem:[#allocation2 + $0x248] sm:$0xff] %v7628_v1  ;;  %2362 = vst [vmem:[#allocation2 + $0x228] sm:$0xff] %v7628_v1 }
  0x3b   :  { %2363 = vst [vmem:[#allocation2 + $0xe0] sm:$0xff] %v7628_v1  ;;  %2364 = vst [vmem:[#allocation2 + $0x158] sm:$0xff] %v7628_v1 }
  0x3c   :  { %2365 = vst [vmem:[#allocation2 + $0x4e8] sm:$0xff] %v7628_v1  ;;  %2366 = vst [vmem:[#allocation2 + $0x4a8] sm:$0xff] %v7628_v1 }
  0x3d   :  { %2367 = vst [vmem:[#allocation2 + $0x470] sm:$0xff] %v7628_v1  ;;  %2368 = vst [vmem:[#allocation2 + $0x3c8] sm:$0xff] %v7628_v1 }
  0x3e   :  { %2369 = vst [vmem:[#allocation2 + $0x2d0] sm:$0xff] %v7628_v1  ;;  %2370 = vst [vmem:[#allocation2 + $0xf0] sm:$0xff] %v7628_v1 }
  0x3f   :  { %2371 = vst [vmem:[#allocation2 + $0x1d8] sm:$0xff] %v7628_v1  ;;  %2372 = vst [vmem:[#allocation2 + $0x148] sm:$0xff] %v7628_v1 }
  0x40   :  { %2373 = vst [vmem:[#allocation2 + $0x358] sm:$0xff] %v7628_v1  ;;  %2374 = vst [vmem:[#allocation2 + $0x150] sm:$0xff] %v7628_v1 }
  0x41   :  { %2375 = vst [vmem:[#allocation2 + $0x320] sm:$0xff] %v7628_v1  ;;  %2376 = vst [vmem:[#allocation2 + $0x8] sm:$0xff] %v7628_v1 }
  0x42   :  { %2377 = vst [vmem:[#allocation2 + $0xc0] sm:$0xff] %v7628_v1  ;;  %2378 = vst [vmem:[#allocation2 + $0x58] sm:$0xff] %v7628_v1 }
  0x43   :  { %2379 = vst [vmem:[#allocation2 + $0x288] sm:$0xff] %v7628_v1  ;;  %2380 = vst [vmem:[#allocation2 + $0x4c0] sm:$0xff] %v7628_v1 }
  0x44   :  { %2381 = vst [vmem:[#allocation2 + $0x300] sm:$0xff] %v7628_v1  ;;  %2382 = vst [vmem:[#allocation2] sm:$0xff] %v7628_v1 }
  0x45   :  { %2383 = vst [vmem:[#allocation2 + $0x4d0] sm:$0xff] %v7628_v1  ;;  %2384 = vst [vmem:[#allocation2 + $0x40] sm:$0xff] %v7628_v1 }
  0x46   :  { %2385 = vst [vmem:[#allocation2 + $0x210] sm:$0xff] %v7628_v1  ;;  %2386 = vst [vmem:[#allocation2 + $0x90] sm:$0xff] %v7628_v1 }
  0x47   :  { %2387 = vst [vmem:[#allocation2 + $0x430] sm:$0xff] %v7628_v1  ;;  %2388 = vst [vmem:[#allocation2 + $0x98] sm:$0xff] %v7628_v1 }
  0x48   :  { %2389 = vst [vmem:[#allocation2 + $0x78] sm:$0xff] %v7628_v1  ;;  %2390 = vst [vmem:[#allocation2 + $0x20] sm:$0xff] %v7628_v1 }
  0x49   :  { %2391 = vst [vmem:[#allocation2 + $0x10] sm:$0xff] %v7628_v1  ;;  %2394 = vst [vmem:[#allocation2 + $0x498] sm:$0xff] %v7628_v1 }
  0x4a   :  { %2395 = vst [vmem:[#allocation2 + $0x448] sm:$0xff] %v7628_v1  ;;  %2396 = vst [vmem:[#allocation2 + $0x1b0] sm:$0xff] %v7628_v1 }
  0x4b   :  { %2397 = vst [vmem:[#allocation2 + $0x290] sm:$0xff] %v7628_v1  ;;  %2398 = vst [vmem:[#allocation2 + $0x400] sm:$0xff] %v7628_v1 }
  0x4c   :  { %2399 = vst [vmem:[#allocation2 + $0x280] sm:$0xff] %v7628_v1  ;;  %4921 = vst [vmem:[#allocation2 + $0x310] sm:$0xff] %v7628_v1 }
  0x4d   :  { %4920 = vst [vmem:[#allocation2 + $0x488] sm:$0xff] %v7628_v1  ;;  %4922 = vst [vmem:[#allocation2 + $0x4f0] sm:$0xff] %v7628_v1 }
  0x4e   :  { %14 = vsyncpa [#allocation8], 0  ;;  %333 = vmatprep.subr.mxu0 %v7628_v1  ;;  %v136_v16 = vld [vmem:[%s13797_s1 + $0x8] sm:$0xff]  ;;  %v135_v17 = vld [vmem:[%s13797_s1] sm:$0xff]  ;;  %s7630_s14 = smov [#allocation7]  }
  0x4f   :  { %334 = vmatpush1.msra.mxu0 %v137_v15  ;;  %v152_v18 = vld [vmem:[%s13797_s1 + $0x88] sm:$0xff]  ;;  %v151_v19 = vld [vmem:[%s13797_s1 + $0x80] sm:$0xff]  ;;  %v36_v21 = vld [vmem:[%s13796_s0 + $0x18] sm:$0xff]  ;;  %s6845_s15 = sshll.u32 %s7630_s14, 4  ;;  %s6846_s15 = int_to_ptr.vmem [resolvable:$true] %s6845_s15 }
  0x50   :  { %335 = vmatprep.subr.mxu0 %v7628_v1  ;;  %v33_v20 = vld [vmem:[%s13796_s0] sm:$0xff]  ;;  %v35_v22 = vld [vmem:[%s13796_s0 + $0x10] sm:$0xff]  ;;  %v38_v23 = vld [vmem:[%s13796_s0 + $0x28] sm:$0xff]  ;;  %s7610_s16 = scalar_lea.vmem %s6846_s15, 32  ;;  %p7611_p1 = scmp.lt.s32.totalorder %s6846_s15, %s6846_s15 }
  0x51   :  { %336 = vmatpush1.msra.mxu0 %v136_v16  ;;  %v37_v24 = vld [vmem:[%s13796_s0 + $0x20] sm:$0xff]  ;;  %v40_v25 = vld [vmem:[%s13796_s0 + $0x38] sm:$0xff]  ;;  %v39_v26 = vld [vmem:[%s13796_s0 + $0x30] sm:$0xff] }
  0x52   :  { %337 = vmatprep.subr.mxu0 %v7628_v1  ;;  %v42_v27 = vld [vmem:[%s13796_s0 + $0x48] sm:$0xff]  ;;  %v41_v28 = vld [vmem:[%s13796_s0 + $0x40] sm:$0xff]  ;;  %v44_v29 = vld [vmem:[%s13796_s0 + $0x58] sm:$0xff] }
  0x53   :  { %338 = vmatpush1.msra.mxu0 %v135_v17  ;;  %v43_v30 = vld [vmem:[%s13796_s0 + $0x50] sm:$0xff]  ;;  %v46_v31 = vld [vmem:[%s13796_s0 + $0x68] sm:$0xff]  ;;  %v45_v32 = vld [vmem:[%s13796_s0 + $0x60] sm:$0xff] }
  0x54   :  { %367 = vmatprep.subr.mxu0 %v7628_v1  ;;  %v48_v33 = vld [vmem:[%s13796_s0 + $0x78] sm:$0xff]  ;;  %v47_v34 = vld [vmem:[%s13796_s0 + $0x70] sm:$0xff]  ;;  %v50_v35 = vld [vmem:[%s13796_s0 + $0x88] sm:$0xff] }
  0x55   :  { %368 = vmatpush2.msra.mxu0 %v152_v18  ;;  %v49_v36 = vld [vmem:[%s13796_s0 + $0x80] sm:$0xff]  ;;  %v52_v37 = vld [vmem:[%s13796_s0 + $0x98] sm:$0xff]  ;;  %v51_v38 = vld [vmem:[%s13796_s0 + $0x90] sm:$0xff] }
  0x56   :  { %369 = vmatprep.subr.mxu0 %v7628_v1  ;;  %v54_v39 = vld [vmem:[%s13796_s0 + $0xa8] sm:$0xff]  ;;  %v53_v40 = vld [vmem:[%s13796_s0 + $0xa0] sm:$0xff]  ;;  %v56_v41 = vld [vmem:[%s13796_s0 + $0xb8] sm:$0xff] }
  0x57   :  { %370 = vmatpush2.msra.mxu0 %v151_v19  ;;  %v55_v42 = vld [vmem:[%s13796_s0 + $0xb0] sm:$0xff]  ;;  %v58_v43 = vld [vmem:[%s13796_s0 + $0xc8] sm:$0xff]  ;;  %v57_v44 = vld [vmem:[%s13796_s0 + $0xc0] sm:$0xff] }
  0x58   :  { %372 = vmatmul.mubr.f32.vlgmr.msra.gmra.mxu0 %v33_v20  ;;  %4101 = vmatprep.subr.mxu0 %v7628_v1  ;;  %v60_v45 = vld [vmem:[%s13796_s0 + $0xd8] sm:$0xff]  ;;  %v59_v46 = vld [vmem:[%s13796_s0 + $0xd0] sm:$0xff]  ;;  %v62_v47 = vld [vmem:[%s13796_s0 + $0xe8] sm:$0xff] }
  0x59   :  { %6854 = vmatprep.mubr.msk.f32.mxu0 %vm153_vm0, %v36_v21  ;;  %v61_v48 = vld [vmem:[%s13796_s0 + $0xe0] sm:$0xff]  ;;  %v64_v49 = vld [vmem:[%s13796_s0 + $0xf8] sm:$0xff]  ;;  %v63_v50 = vld [vmem:[%s13796_s0 + $0xf0] sm:$0xff] }
  0x5a   :  { %v66_v51 = vld [vmem:[%s13796_s0 + $0x108] sm:$0xff]  ;;  %v65_v52 = vld [vmem:[%s13796_s0 + $0x100] sm:$0xff]  ;;  %v68_v53 = vld [vmem:[%s13796_s0 + $0x118] sm:$0xff] }
  0x5b   :  { %v67_v54 = vld [vmem:[%s13796_s0 + $0x110] sm:$0xff]  ;;  %v70_v55 = vld [vmem:[%s13796_s0 + $0x128] sm:$0xff]  ;;  %v69_v56 = vld [vmem:[%s13796_s0 + $0x120] sm:$0xff] }
  0x5c   :  { %377 = vmatmul.mubr.f32.gmra.mxu0 %v35_v22  ;;  %v72_v57 = vld [vmem:[%s13796_s0 + $0x138] sm:$0xff]  ;;  %v71_v58 = vld [vmem:[%s13796_s0 + $0x130] sm:$0xff]  ;;  %v74_v59 = vld [vmem:[%s13796_s0 + $0x148] sm:$0xff] }
  0x5d   :  { %6855 = vmatprep.mubr.msk.f32.mxu0 %vm153_vm0, %v38_v23  ;;  %v73_v60 = vld [vmem:[%s13796_s0 + $0x140] sm:$0xff]  ;;  %v76_v61 = vld [vmem:[%s13796_s0 + $0x158] sm:$0xff]  ;;  %v75_v62 = vld [vmem:[%s13796_s0 + $0x150] sm:$0xff] }
  0x5e   :  { %v78_v63 = vld [vmem:[%s13796_s0 + $0x168] sm:$0xff]  ;;  %v77_v0 = vld [vmem:[%s13796_s0 + $0x160] sm:$0xff]  ;;  %v80_v1 = vld [vmem:[%s13796_s0 + $0x178] sm:$0xff] }
  0x5f   :  { %v79_v2 = vld [vmem:[%s13796_s0 + $0x170] sm:$0xff]  ;;  %v82_v3 = vld [vmem:[%s13796_s0 + $0x188] sm:$0xff]  ;;  %v81_v4 = vld [vmem:[%s13796_s0 + $0x180] sm:$0xff] }
  0x60   :  { %382 = vmatmul.mubr.f32.gmra.mxu0 %v37_v24  ;;  %v84_v5 = vld [vmem:[%s13796_s0 + $0x198] sm:$0xff]  ;;  %v83_v6 = vld [vmem:[%s13796_s0 + $0x190] sm:$0xff]  ;;  %v86_v7 = vld [vmem:[%s13796_s0 + $0x1a8] sm:$0xff] }
  0x61   :  { %6856 = vmatprep.mubr.msk.f32.mxu0 %vm153_vm0, %v40_v25  ;;  %v85_v8 = vld [vmem:[%s13796_s0 + $0x1a0] sm:$0xff]  ;;  %v88_v9 = vld [vmem:[%s13796_s0 + $0x1b8] sm:$0xff]  ;;  %v87_v10 = vld [vmem:[%s13796_s0 + $0x1b0] sm:$0xff] }
  0x62   :  { %v90_v11 = vld [vmem:[%s13796_s0 + $0x1c8] sm:$0xff]  ;;  %v89_v12 = vld [vmem:[%s13796_s0 + $0x1c0] sm:$0xff]  ;;  %v92_v13 = vld [vmem:[%s13796_s0 + $0x1d8] sm:$0xff] }
  0x63   :  { %v91_v14 = vld [vmem:[%s13796_s0 + $0x1d0] sm:$0xff]  ;;  %v94_v15 = vld [vmem:[%s13796_s0 + $0x1e8] sm:$0xff]  ;;  %v93_v16 = vld [vmem:[%s13796_s0 + $0x1e0] sm:$0xff] }
  0x64   :  { %387 = vmatmul.mubr.f32.gmra.mxu0 %v39_v26  ;;  %v96_v17 = vld [vmem:[%s13796_s0 + $0x1f8] sm:$0xff]  ;;  %v95_v18 = vld [vmem:[%s13796_s0 + $0x1f0] sm:$0xff]  ;;  %v98_v19 = vld [vmem:[%s13796_s0 + $0x208] sm:$0xff] }
  0x65   :  { %6857 = vmatprep.mubr.msk.f32.mxu0 %vm153_vm0, %v42_v27  ;;  %v97_v20 = vld [vmem:[%s13796_s0 + $0x200] sm:$0xff]  ;;  %v100_v21 = vld [vmem:[%s13796_s0 + $0x218] sm:$0xff]  ;;  %v99_v22 = vld [vmem:[%s13796_s0 + $0x210] sm:$0xff] }
  0x66   :  { %v102_v23 = vld [vmem:[%s13796_s0 + $0x228] sm:$0xff]  ;;  %v101_v24 = vld [vmem:[%s13796_s0 + $0x220] sm:$0xff]  ;;  %v104_v25 = vld [vmem:[%s13796_s0 + $0x238] sm:$0xff] }
  0x67   :  { %v103_v26 = vld [vmem:[%s13796_s0 + $0x230] sm:$0xff]  ;;  %v106_v27 = vld [vmem:[%s13796_s0 + $0x248] sm:$0xff] }
  0x68   :  { %392 = vmatmul.mubr.f32.gmra.mxu0 %v41_v28  ;;  %v105_v28 = vld [vmem:[%s13796_s0 + $0x240] sm:$0xff] }
  0x69   :  { %6858 = vmatprep.mubr.msk.f32.mxu0 %vm153_vm0, %v44_v29  ;;  %v108_v29 = vld [vmem:[%s13796_s0 + $0x258] sm:$0xff] }
  0x6c   :  { %397 = vmatmul.mubr.f32.gmra.mxu0 %v43_v30  ;;  %v107_v30 = vld [vmem:[%s13796_s0 + $0x250] sm:$0xff] }
  0x6d   :  { %6859 = vmatprep.mubr.msk.f32.mxu0 %vm153_vm0, %v46_v31  ;;  %v110_v31 = vld [vmem:[%s13796_s0 + $0x268] sm:$0xff] }
  0x70   :  { %402 = vmatmul.mubr.f32.gmra.mxu0 %v45_v32  ;;  %v109_v32 = vld [vmem:[%s13796_s0 + $0x260] sm:$0xff] }
  0x71   :  { %6860 = vmatprep.mubr.msk.f32.mxu0 %vm153_vm0, %v48_v33  ;;  %v112_v33 = vld [vmem:[%s13796_s0 + $0x278] sm:$0xff] }
  0x74   :  { %407 = vmatmul.mubr.f32.gmra.mxu0 %v47_v34  ;;  %v111_v34 = vld [vmem:[%s13796_s0 + $0x270] sm:$0xff] }
  0x75   :  { %6861 = vmatprep.mubr.msk.f32.mxu0 %vm153_vm0, %v50_v35  ;;  %v114_v35 = vld [vmem:[%s13796_s0 + $0x288] sm:$0xff] }
  0x78   :  { %412 = vmatmul.mubr.f32.gmra.mxu0 %v49_v36  ;;  %v113_v36 = vld [vmem:[%s13796_s0 + $0x280] sm:$0xff] }
  0x79   :  { %6862 = vmatprep.mubr.msk.f32.mxu0 %vm153_vm0, %v52_v37  ;;  %v116_v37 = vld [vmem:[%s13796_s0 + $0x298] sm:$0xff] }
  0x7c   :  { %417 = vmatmul.mubr.f32.gmra.mxu0 %v51_v38  ;;  %v115_v38 = vld [vmem:[%s13796_s0 + $0x290] sm:$0xff] }
  0x7d   :  { %6863 = vmatprep.mubr.msk.f32.mxu0 %vm153_vm0, %v54_v39  ;;  %v118_v39 = vld [vmem:[%s13796_s0 + $0x2a8] sm:$0xff] }
  0x80   :  { %422 = vmatmul.mubr.f32.gmra.mxu0 %v53_v40  ;;  %v117_v40 = vld [vmem:[%s13796_s0 + $0x2a0] sm:$0xff] }
  0x81   :  { %6864 = vmatprep.mubr.msk.f32.mxu0 %vm153_vm0, %v56_v41  ;;  %v120_v41 = vld [vmem:[%s13796_s0 + $0x2b8] sm:$0xff] }
  0x84   :  { %427 = vmatmul.mubr.f32.gmra.mxu0 %v55_v42  ;;  %v119_v42 = vld [vmem:[%s13796_s0 + $0x2b0] sm:$0xff] }
  0x85   :  { %6865 = vmatprep.mubr.msk.f32.mxu0 %vm153_vm0, %v58_v43  ;;  %v122_v43 = vld [vmem:[%s13796_s0 + $0x2c8] sm:$0xff] }
  0x88   :  { %432 = vmatmul.mubr.f32.gmra.mxu0 %v57_v44  ;;  %v121_v44 = vld [vmem:[%s13796_s0 + $0x2c0] sm:$0xff] }
  0x89   :  { %6866 = vmatprep.mubr.msk.f32.mxu0 %vm153_vm0, %v60_v45  ;;  %v124_v45 = vld [vmem:[%s13796_s0 + $0x2d8] sm:$0xff] }
  0x8c   :  { %437 = vmatmul.mubr.f32.gmra.mxu0 %v59_v46  ;;  %v123_v46 = vld [vmem:[%s13796_s0 + $0x2d0] sm:$0xff] }
  0x8d   :  { %6867 = vmatprep.mubr.msk.f32.mxu0 %vm153_vm0, %v62_v47  ;;  %v126_v47 = vld [vmem:[%s13796_s0 + $0x2e8] sm:$0xff] }
  0x90   :  { %442 = vmatmul.mubr.f32.gmra.mxu0 %v61_v48  ;;  %v125_v48 = vld [vmem:[%s13796_s0 + $0x2e0] sm:$0xff] }
  0x91   :  { %6868 = vmatprep.mubr.msk.f32.mxu0 %vm153_vm0, %v64_v49  ;;  %v128_v49 = vld [vmem:[%s13796_s0 + $0x2f8] sm:$0xff] }
  0x94   :  { %447 = vmatmul.mubr.f32.gmra.mxu0 %v63_v50  ;;  %v127_v50 = vld [vmem:[%s13796_s0 + $0x2f0] sm:$0xff] }
  0x95   :  { %6869 = vmatprep.mubr.msk.f32.mxu0 %vm153_vm0, %v66_v51  ;;  %v130_v51 = vld [vmem:[%s13796_s0 + $0x308] sm:$0xff] }
  0x98   :  { %452 = vmatmul.mubr.f32.gmra.mxu0 %v65_v52  ;;  %v129_v52 = vld [vmem:[%s13796_s0 + $0x300] sm:$0xff] }
  0x99   :  { %6870 = vmatprep.mubr.msk.f32.mxu0 %vm153_vm0, %v68_v53  ;;  %v132_v53 = vld [vmem:[%s13796_s0 + $0x318] sm:$0xff] }
  0x9c   :  { %457 = vmatmul.mubr.f32.gmra.mxu0 %v67_v54 }
  0x9d   :  { %6871 = vmatprep.mubr.msk.f32.mxu0 %vm153_vm0, %v70_v55  ;;  %v131_v55 = vld [vmem:[%s13796_s0 + $0x310] sm:$0xff] }
  0xa0   :  { %462 = vmatmul.mubr.f32.gmra.mxu0 %v69_v56 }
  0xa1   :  { %6872 = vmatprep.mubr.msk.f32.mxu0 %vm153_vm0, %v72_v57  ;;  %v134_v57 = vld [vmem:[%s13796_s0 + $0x328] sm:$0xff] }
  0xa4   :  { %467 = vmatmul.mubr.f32.gmra.mxu0 %v71_v58 }
  0xa5   :  { %6873 = vmatprep.mubr.msk.f32.mxu0 %vm153_vm0, %v74_v59  ;;  %v133_v59 = vld [vmem:[%s13796_s0 + $0x320] sm:$0xff] }
  0xa8   :  { %472 = vmatmul.mubr.f32.gmra.mxu0 %v73_v60 }
  0xa9   :  { %6874 = vmatprep.mubr.msk.f32.mxu0 %vm153_vm0, %v76_v61 }
  0xac   :  { %477 = vmatmul.mubr.f32.gmra.mxu0 %v75_v62 }
  0xad   :  { %6875 = vmatprep.mubr.msk.f32.mxu0 %vm153_vm0, %v78_v63 }
  0xb0   :  { %482 = vmatmul.mubr.f32.gmra.mxu0 %v77_v0 }
  0xb1   :  { %6876 = vmatprep.mubr.msk.f32.mxu0 %vm153_vm0, %v80_v1 }
  0xb4   :  { %487 = vmatmul.mubr.f32.gmra.mxu0 %v79_v2 }
  0xb5   :  { %6877 = vmatprep.mubr.msk.f32.mxu0 %vm153_vm0, %v82_v3 }
  0xb8   :  { %492 = vmatmul.mubr.f32.gmra.mxu0 %v81_v4 }
  0xb9   :  { %6878 = vmatprep.mubr.msk.f32.mxu0 %vm153_vm0, %v84_v5 }
  0xbc   :  { %497 = vmatmul.mubr.f32.gmra.mxu0 %v83_v6 }
  0xbd   :  { %6879 = vmatprep.mubr.msk.f32.mxu0 %vm153_vm0, %v86_v7 }
  0xc0   :  { %502 = vmatmul.mubr.f32.gmra.mxu0 %v85_v8 }
  0xc1   :  { %6880 = vmatprep.mubr.msk.f32.mxu0 %vm153_vm0, %v88_v9 }
  0xc4   :  { %507 = vmatmul.mubr.f32.gmra.mxu0 %v87_v10 }
  0xc5   :  { %6881 = vmatprep.mubr.msk.f32.mxu0 %vm153_vm0, %v90_v11 }
  0xc8   :  { %512 = vmatmul.mubr.f32.gmra.mxu0 %v89_v12 }
  0xc9   :  { %6882 = vmatprep.mubr.msk.f32.mxu0 %vm153_vm0, %v92_v13 }
  0xcc   :  { %517 = vmatmul.mubr.f32.gmra.mxu0 %v91_v14 }
  0xcd   :  { %6883 = vmatprep.mubr.msk.f32.mxu0 %vm153_vm0, %v94_v15 }
  0xd0   :  { %522 = vmatmul.mubr.f32.gmra.mxu0 %v93_v16 }
  0xd1   :  { %6884 = vmatprep.mubr.msk.f32.mxu0 %vm153_vm0, %v96_v17 }
  0xd4   :  { %527 = vmatmul.mubr.f32.gmra.mxu0 %v95_v18 }
  0xd5   :  { %6885 = vmatprep.mubr.msk.f32.mxu0 %vm153_vm0, %v98_v19 }
  0xd8   :  { %532 = vmatmul.mubr.f32.gmra.mxu0 %v97_v20 }
  0xd9   :  { %6886 = vmatprep.mubr.msk.f32.mxu0 %vm153_vm0, %v100_v21 }
  0xdc   :  { %537 = vmatmul.mubr.f32.gmra.mxu0 %v99_v22 }
  0xdd   :  { %6887 = vmatprep.mubr.msk.f32.mxu0 %vm153_vm0, %v102_v23 }
  0xe0   :  { %542 = vmatmul.mubr.f32.gmra.mxu0 %v101_v24 }
  0xe1   :  { %6888 = vmatprep.mubr.msk.f32.mxu0 %vm153_vm0, %v104_v25 }
  0xe4   :  { %547 = vmatmul.mubr.f32.gmra.mxu0 %v103_v26 }
  0xe5   :  { %6889 = vmatprep.mubr.msk.f32.mxu0 %vm153_vm0, %v106_v27 }
  0xe8   :  { %552 = vmatmul.mubr.f32.gmra.mxu0 %v105_v28 }
  0xe9   :  { %6890 = vmatprep.mubr.msk.f32.mxu0 %vm153_vm0, %v108_v29 }
  0xec   :  { %557 = vmatmul.mubr.f32.gmra.mxu0 %v107_v30 }
  0xed   :  { %6891 = vmatprep.mubr.msk.f32.mxu0 %vm153_vm0, %v110_v31 }
  0xf0   :  { %562 = vmatmul.mubr.f32.gmra.mxu0 %v109_v32 }
  0xf1   :  { %6892 = vmatprep.mubr.msk.f32.mxu0 %vm153_vm0, %v112_v33 }
  0xf4   :  { %567 = vmatmul.mubr.f32.gmra.mxu0 %v111_v34 }
  0xf5   :  { %6893 = vmatprep.mubr.msk.f32.mxu0 %vm153_vm0, %v114_v35 }
  0xf8   :  { %572 = vmatmul.mubr.f32.gmra.mxu0 %v113_v36 }
  0xf9   :  { %6894 = vmatprep.mubr.msk.f32.mxu0 %vm153_vm0, %v116_v37 }
  0xfc   :  { %577 = vmatmul.mubr.f32.gmra.mxu0 %v115_v38 }
  0xfd   :  { %6895 = vmatprep.mubr.msk.f32.mxu0 %vm153_vm0, %v118_v39 }
 0x100   :  { %582 = vmatmul.mubr.f32.gmra.mxu0 %v117_v40 }
 0x101   :  { %6896 = vmatprep.mubr.msk.f32.mxu0 %vm153_vm0, %v120_v41 }
 0x104   :  { %587 = vmatmul.mubr.f32.gmra.mxu0 %v119_v42 }
 0x105   :  { %6897 = vmatprep.mubr.msk.f32.mxu0 %vm153_vm0, %v122_v43 }
 0x108   :  { %592 = vmatmul.mubr.f32.gmra.mxu0 %v121_v44 }
 0x109   :  { %6898 = vmatprep.mubr.msk.f32.mxu0 %vm153_vm0, %v124_v45 }
 0x10c   :  { %597 = vmatmul.mubr.f32.gmra.mxu0 %v123_v46 }
 0x10d   :  { %6899 = vmatprep.mubr.msk.f32.mxu0 %vm153_vm0, %v126_v47 }
 0x110   :  { %602 = vmatmul.mubr.f32.gmra.mxu0 %v125_v48 }
 0x111   :  { %6900 = vmatprep.mubr.msk.f32.mxu0 %vm153_vm0, %v128_v49 }
 0x114   :  { %607 = vmatmul.mubr.f32.gmra.mxu0 %v127_v50 }
 0x115   :  { %6901 = vmatprep.mubr.msk.f32.mxu0 %vm153_vm0, %v130_v51 }
 0x118   :  { %v8259_v54 = vpop.f32.mrf.mxu0  ;;  %612 = vmatmul.mubr.f32.gmra.mxu0 %v129_v52 }
 0x119   :  { %14041 = vst [vmem:[#allocation10_spill] sm:$0xff] %v8259_v54  ;;  %6902 = vmatprep.mubr.msk.f32.mxu0 %vm153_vm0, %v132_v53 }
 0x11a   :  { %v375_v56 = vpop.f32.mrf.mxu0 }
 0x11c   :  { %v8268_v58 = vpop.f32.mrf.mxu0  ;;  %617 = vmatmul.mubr.f32.gmra.mxu0 %v131_v55 }
 0x11d   :  { %14042 = vst [vmem:[#allocation11_spill] sm:$0xff] %v8268_v58  ;;  %6903 = vmatprep.mubr.msk.f32.mxu0 %vm153_vm0, %v134_v57  ;;  %v629_v45 = vadd.f32 %v8268_v58, %v8259_v54 }
 0x11e   :  { %v380_v60 = vpop.f32.mrf.mxu0 }
 0x120   :  { %v8274_v61 = vpop.f32.mrf.mxu0  ;;  %622 = vmatmul.mubr.f32.gmra.mxu0 %v133_v59 }
 0x121   :  { %14043 = vst [vmem:[#allocation12_spill] sm:$0xff] %v8274_v61  ;;  %v630_v47 = vadd.f32 %v629_v45, %v8274_v61 }
 0x122   :  { %v385_v62 = vpop.f32.mrf.mxu0 }
 0x124   :  { %v8276_v63 = vpop.f32.mrf.mxu0 }
 0x125   :  { %v631_v49 = vadd.f32 %v630_v47, %v8276_v63 }
 0x126   :  { %v390_v0 = vpop.f32.mrf.mxu0 }
 0x128   :  { %v8278_v1 = vpop.f32.mrf.mxu0 }
 0x129   :  { %v632_v51 = vadd.f32 %v631_v49, %v8278_v1 }
 0x12a   :  { %v395_v2 = vpop.f32.mrf.mxu0 }
 0x12c   :  { %v8280_v3 = vpop.f32.mrf.mxu0 }
 0x12d   :  { %v633_v53 = vadd.f32 %v632_v51, %v8280_v3 }
 0x12e   :  { %v400_v4 = vpop.f32.mrf.mxu0 }
 0x130   :  { %v8282_v5 = vpop.f32.mrf.mxu0 }
 0x131   :  { %v634_v56 = vadd.f32 %v633_v53, %v8282_v5 }
 0x132   :  { %v405_v6 = vpop.f32.mrf.mxu0 }
 0x134   :  { %v8284_v7 = vpop.f32.mrf.mxu0 }
 0x135   :  { %v635_v59 = vadd.f32 %v634_v56, %v8284_v7 }
 0x136   :  { %v410_v8 = vpop.f32.mrf.mxu0 }
 0x138   :  { %v8286_v9 = vpop.f32.mrf.mxu0 }
 0x139   :  { %v636_v62 = vadd.f32 %v635_v59, %v8286_v9 }
 0x13a   :  { %v415_v10 = vpop.f32.mrf.mxu0 }
 0x13c   :  { %v8288_v11 = vpop.f32.mrf.mxu0 }
 0x13d   :  { %v637_v2 = vadd.f32 %v636_v62, %v8288_v11 }
 0x13e   :  { %v420_v12 = vpop.f32.mrf.mxu0 }
 0x140   :  { %v8290_v13 = vpop.f32.mrf.mxu0 }
 0x141   :  { %v638_v6 = vadd.f32 %v637_v2, %v8290_v13 }
 0x142   :  { %v425_v14 = vpop.f32.mrf.mxu0 }
 0x144   :  { %v8292_v15 = vpop.f32.mrf.mxu0 }
 0x145   :  { %v639_v10 = vadd.f32 %v638_v6, %v8292_v15 }
 0x146   :  { %v430_v16 = vpop.f32.mrf.mxu0 }
 0x148   :  { %v8294_v17 = vpop.f32.mrf.mxu0 }
 0x149   :  { %v640_v14 = vadd.f32 %v639_v10, %v8294_v17 }
 0x14a   :  { %v435_v18 = vpop.f32.mrf.mxu0 }
 0x14c   :  { %v8296_v19 = vpop.f32.mrf.mxu0 }
 0x14d   :  { %v641_v18 = vadd.f32 %v640_v14, %v8296_v19 }
 0x14e   :  { %v440_v20 = vpop.f32.mrf.mxu0 }
 0x150   :  { %v8298_v21 = vpop.f32.mrf.mxu0 }
 0x152   :  { %v445_v22 = vpop.f32.mrf.mxu0 }
 0x153   :  { %v642_v22 = vadd.f32 %v641_v18, %v8298_v21 }
 0x154   :  { %v8300_v23 = vpop.f32.mrf.mxu0 }
 0x156   :  { %v450_v24 = vpop.f32.mrf.mxu0 }
 0x158   :  { %v8302_v25 = vpop.f32.mrf.mxu0 }
 0x159   :  { %14044 = vst [vmem:[#allocation13_spill] sm:$0xff] %v8302_v25 }
 0x15a   :  { %v455_v26 = vpop.f32.mrf.mxu0 }
 0x15b   :  { %v643_v26 = vadd.f32 %v642_v22, %v8300_v23 }
 0x15c   :  { %v8304_v27 = vpop.f32.mrf.mxu0 }
 0x15d   :  { %14045 = vst [vmem:[#allocation14_spill] sm:$0xff] %v8304_v27 }
 0x15e   :  { %v460_v28 = vpop.f32.mrf.mxu0 }
 0x160   :  { %v8306_v29 = vpop.f32.mrf.mxu0 }
 0x161   :  { %14046 = vst [vmem:[#allocation15_spill] sm:$0xff] %v8306_v29 }
 0x162   :  { %v465_v30 = vpop.f32.mrf.mxu0 }
 0x163   :  { %v644_v30 = vadd.f32 %v643_v26, %v8302_v25 }
 0x164   :  { %v8308_v31 = vpop.f32.mrf.mxu0 }
 0x165   :  { %14047 = vst [vmem:[#allocation16_spill] sm:$0xff] %v8308_v31 }
 0x166   :  { %v470_v32 = vpop.f32.mrf.mxu0 }
 0x168   :  { %v8310_v33 = vpop.f32.mrf.mxu0 }
 0x169   :  { %14048 = vst [vmem:[#allocation17_spill] sm:$0xff] %v8310_v33 }
 0x16a   :  { %v475_v34 = vpop.f32.mrf.mxu0 }
 0x16b   :  { %v645_v34 = vadd.f32 %v644_v30, %v8304_v27 }
 0x16c   :  { %v8312_v35 = vpop.f32.mrf.mxu0 }
 0x16d   :  { %14049 = vst [vmem:[#allocation18_spill] sm:$0xff] %v8312_v35 }
 0x16e   :  { %v480_v36 = vpop.f32.mrf.mxu0 }
 0x170   :  { %v8314_v37 = vpop.f32.mrf.mxu0 }
 0x171   :  { %14050 = vst [vmem:[#allocation19_spill] sm:$0xff] %v8314_v37 }
 0x172   :  { %v485_v38 = vpop.f32.mrf.mxu0 }
 0x173   :  { %v646_v38 = vadd.f32 %v645_v34, %v8306_v29 }
 0x174   :  { %v8316_v39 = vpop.f32.mrf.mxu0 }
 0x175   :  { %14051 = vst [vmem:[#allocation20_spill] sm:$0xff] %v8316_v39 }
 0x176   :  { %v490_v40 = vpop.f32.mrf.mxu0 }
 0x178   :  { %v8318_v41 = vpop.f32.mrf.mxu0 }
 0x179   :  { %14052 = vst [vmem:[#allocation21_spill] sm:$0xff] %v8318_v41 }
 0x17a   :  { %v495_v42 = vpop.f32.mrf.mxu0 }
 0x17b   :  { %v647_v42 = vadd.f32 %v646_v38, %v8308_v31 }
 0x17c   :  { %v8320_v43 = vpop.f32.mrf.mxu0 }
 0x17d   :  { %14053 = vst [vmem:[#allocation22_spill] sm:$0xff] %v8320_v43  ;;  %v648_v45 = vadd.f32 %v647_v42, %v8310_v33 }
 0x17e   :  { %v500_v44 = vpop.f32.mrf.mxu0 }
 0x180   :  { %v8324_v46 = vpop.f32.mrf.mxu0 }
 0x181   :  { %14054 = vst [vmem:[#allocation23_spill] sm:$0xff] %v8324_v46 }
 0x182   :  { %v505_v48 = vpop.f32.mrf.mxu0 }
 0x183   :  { %v649_v48 = vadd.f32 %v648_v45, %v8312_v35 }
 0x184   :  { %v8328_v50 = vpop.f32.mrf.mxu0 }
 0x185   :  { %14055 = vst [vmem:[#allocation24_spill] sm:$0xff] %v8328_v50  ;;  %v650_v51 = vadd.f32 %v649_v48, %v8314_v37 }
 0x186   :  { %v510_v52 = vpop.f32.mrf.mxu0 }
 0x187   :  { %v651_v53 = vadd.f32 %v650_v51, %v8316_v39 }
 0x188   :  { %v8332_v55 = vpop.f32.mrf.mxu0 }
 0x189   :  { %14056 = vst [vmem:[#allocation25_spill] sm:$0xff] %v8332_v55 }
 0x18a   :  { %v515_v57 = vpop.f32.mrf.mxu0 }
 0x18b   :  { %v652_v57 = vadd.f32 %v651_v53, %v8318_v41 }
 0x18c   :  { %v8336_v60 = vpop.f32.mrf.mxu0 }
 0x18d   :  { %14057 = vst [vmem:[#allocation26_spill] sm:$0xff] %v8336_v60  ;;  %v653_v62 = vadd.f32 %v652_v57, %v8320_v43 }
 0x18e   :  { %v520_v0 = vpop.f32.mrf.mxu0 }
 0x18f   :  { %v654_v2 = vadd.f32 %v653_v62, %v8324_v46 }
 0x190   :  { %v8340_v4 = vpop.f32.mrf.mxu0 }
 0x191   :  { %14058 = vst [vmem:[#allocation27_spill] sm:$0xff] %v8340_v4 }
 0x192   :  { %v525_v8 = vpop.f32.mrf.mxu0 }
 0x193   :  { %v655_v8 = vadd.f32 %v654_v2, %v8328_v50 }
 0x194   :  { %v8344_v12 = vpop.f32.mrf.mxu0 }
 0x195   :  { %14059 = vst [vmem:[#allocation28_spill] sm:$0xff] %v8344_v12  ;;  %v656_v14 = vadd.f32 %v655_v8, %v8332_v55 }
 0x196   :  { %v530_v16 = vpop.f32.mrf.mxu0 }
 0x197   :  { %v657_v18 = vadd.f32 %v656_v14, %v8336_v60 }
 0x198   :  { %v8348_v20 = vpop.f32.mrf.mxu0 }
 0x199   :  { %14060 = vst [vmem:[#allocation29_spill] sm:$0xff] %v8348_v20 }
 0x19a   :  { %v535_v24 = vpop.f32.mrf.mxu0 }
 0x19b   :  { %v658_v24 = vadd.f32 %v657_v18, %v8340_v4 }
 0x19c   :  { %v8352_v28 = vpop.f32.mrf.mxu0 }
 0x19d   :  { %14061 = vst [vmem:[#allocation30_spill] sm:$0xff] %v8352_v28  ;;  %v659_v30 = vadd.f32 %v658_v24, %v8344_v12 }
 0x19e   :  { %v540_v32 = vpop.f32.mrf.mxu0 }
 0x19f   :  { %v660_v34 = vadd.f32 %v659_v30, %v8348_v20 }
 0x1a0   :  { %v8356_v36 = vpop.f32.mrf.mxu0 }
 0x1a1   :  { %14062 = vst [vmem:[#allocation31_spill] sm:$0xff] %v8356_v36 }
 0x1a2   :  { %v545_v40 = vpop.f32.mrf.mxu0 }
 0x1a3   :  { %v661_v40 = vadd.f32 %v660_v34, %v8352_v28 }
 0x1a4   :  { %v8360_v44 = vpop.f32.mrf.mxu0 }
 0x1a5   :  { %14063 = vst [vmem:[#allocation32_spill] sm:$0xff] %v8360_v44  ;;  %v662_v45 = vadd.f32 %v661_v40, %v8356_v36 }
 0x1a6   :  { %v550_v47 = vpop.f32.mrf.mxu0 }
 0x1a7   :  { %v663_v48 = vadd.f32 %v662_v45, %v8360_v44 }
 0x1a8   :  { %v8364_v49 = vpop.f32.mrf.mxu0 }
 0x1a9   :  { %14064 = vst [vmem:[#allocation33_spill] sm:$0xff] %v8364_v49 }
 0x1aa   :  { %v555_v52 = vpop.f32.mrf.mxu0 }
 0x1ab   :  { %v664_v52 = vadd.f32 %v663_v48, %v8364_v49 }
 0x1ac   :  { %v8368_v56 = vpop.f32.mrf.mxu0 }
 0x1ad   :  { %14065 = vst [vmem:[#allocation34_spill] sm:$0xff] %v8368_v56  ;;  %v665_v57 = vadd.f32 %v664_v52, %v8368_v56 }
 0x1ae   :  { %v560_v59 = vpop.f32.mrf.mxu0 }
 0x1b0   :  { %v8372_v0 = vpop.f32.mrf.mxu0 }
 0x1b1   :  { %14066 = vst [vmem:[#allocation35_spill] sm:$0xff] %v8372_v0  ;;  %v666_v62 = vadd.f32 %v665_v57, %v8372_v0  ;;  %v13806_v57 = vlaneseq }
 0x1b2   :  { %v565_v6 = vpop.f32.mrf.mxu0 }
 0x1b4   :  { %v8376_v10 = vpop.f32.mrf.mxu0 }
 0x1b5   :  { %14067 = vst [vmem:[#allocation36_spill] sm:$0xff] %v8376_v10  ;;  %v667_v6 = vadd.f32 %v666_v62, %v8376_v10 }
 0x1b6   :  { %v570_v16 = vpop.f32.mrf.mxu0 }
 0x1b8   :  { %v8380_v22 = vpop.f32.mrf.mxu0 }
 0x1b9   :  { %14068 = vst [vmem:[#allocation37_spill] sm:$0xff] %v8380_v22  ;;  %v668_v14 = vadd.f32 %v667_v6, %v8380_v22 }
 0x1ba   :  { %v575_v26 = vpop.f32.mrf.mxu0 }
 0x1bc   :  { %v8384_v32 = vpop.f32.mrf.mxu0 }
 0x1bd   :  { %14069 = vst [vmem:[#allocation38_spill] sm:$0xff] %v8384_v32  ;;  %v669_v18 = vadd.f32 %v668_v14, %v8384_v32 }
 0x1be   :  { %v580_v38 = vpop.f32.mrf.mxu0 }
 0x1c0   :  { %v8388_v42 = vpop.f32.mrf.mxu0 }
 0x1c1   :  { %14070 = vst [vmem:[#allocation39_spill] sm:$0xff] %v8388_v42  ;;  %v670_v26 = vadd.f32 %v669_v18, %v8388_v42 }
 0x1c2   :  { %v585_v47 = vpop.f32.mrf.mxu0 }
 0x1c4   :  { %v8392_v51 = vpop.f32.mrf.mxu0 }
 0x1c5   :  { %14071 = vst [vmem:[#allocation40_spill] sm:$0xff] %v8392_v51  ;;  %v671_v34 = vadd.f32 %v670_v26, %v8392_v51 }
 0x1c6   :  { %v590_v53 = vpop.f32.mrf.mxu0 }
 0x1c8   :  { %v8396_v59 = vpop.f32.mrf.mxu0 }
 0x1c9   :  { %14072 = vst [vmem:[#allocation41_spill] sm:$0xff] %v8396_v59  ;;  %v672_v40 = vadd.f32 %v671_v34, %v8396_v59 }
 0x1ca   :  { %v595_v2 = vpop.f32.mrf.mxu0 }
 0x1cc   :  { %v8400_v8 = vpop.f32.mrf.mxu0 }
 0x1cd   :  { %14073 = vst [vmem:[#allocation42_spill] sm:$0xff] %v8400_v8  ;;  %v673_v47 = vadd.f32 %v672_v40, %v8400_v8 }
 0x1ce   :  { %v600_v16 = vpop.f32.mrf.mxu0 }
 0x1cf   :  { %v8420_v16 = vshrl.u32 %v13806_v57, 7 }
 0x1d0   :  { %v8404_v24 = vpop.f32.mrf.mxu0 }
 0x1d1   :  { %14074 = vst [vmem:[#allocation43_spill] sm:$0xff] %v8404_v24  ;;  %v674_v52 = vadd.f32 %v673_v47, %v8404_v24  ;;  %14078 = vst [vmem:[#allocation47_spill] sm:$0xff] %v8420_v16  ;;  %v8427_v40 = vadd.s32 8, %v8420_v16 }
 0x1d2   :  { %v605_v30 = vpop.f32.mrf.mxu0 }
 0x1d3   :  { %14080 = vst [vmem:[#allocation49_spill] sm:$0xff] %v8427_v40 }
 0x1d4   :  { %v8408_v38 = vpop.f32.mrf.mxu0 }
 0x1d5   :  { %14075 = vst [vmem:[#allocation44_spill] sm:$0xff] %v8408_v38  ;;  %v675_v62 = vadd.f32 %v674_v52, %v8408_v38  ;;  %v8434_v52 = vadd.s32 16, %v8420_v16 }
 0x1d6   :  { %v610_v45 = vpop.f32.mrf.mxu0 }
 0x1d7   :  { %v8430_v45 = vmul.u32.u64.low 2863311531, %v8420_v16  ;;  %v8431_v47 = vmul.u32.u64.high 2863311531, %v8420_v16, %v8430_v45  ;;  %14081 = vst [vmem:[#allocation50_spill] sm:$0xff] %v8434_v52 }
 0x1d8   :  { %v8412_v48 = vpop.f32.mrf.mxu0 }
 0x1d9   :  { %14076 = vst [vmem:[#allocation45_spill] sm:$0xff] %v8412_v48  ;;  %v676_v6 = vadd.f32 %v675_v62, %v8412_v48  ;;  %v8455_v48 = vadd.s32 40, %v8420_v16  ;;  %v1176_v38 = vshrl.u32 %v8431_v47, 4 }
 0x1da   :  { %v615_v53 = vpop.f32.mrf.mxu0 }
 0x1db   :  { %14084 = vst [vmem:[#allocation53_spill] sm:$0xff] %v8455_v48  ;;  %v1177_v32 = vmul.u32 24, %v1176_v38 }
 0x1dc   :  { %v8416_v2 = vpop.f32.mrf.mxu0 }
 0x1dd   :  { %14077 = vst [vmem:[#allocation46_spill] sm:$0xff] %v8416_v2  ;;  %v677_v18 = vadd.f32 %v676_v6, %v8416_v2  ;;  %v8441_v6 = vadd.s32 24, %v8420_v16 }
 0x1de   :  { %v620_v14 = vpop.f32.mrf.mxu0 }
 0x1df   :  { %v8437_v62 = vmul.u32.u64.low 2863311531, %v8427_v40  ;;  %v8438_v14 = vmul.u32.u64.high 2863311531, %v8427_v40, %v8437_v62  ;;  %14082 = vst [vmem:[#allocation51_spill] sm:$0xff] %v8441_v6  ;;  %v8451_v45 = vmul.u32.u64.low 2863311531, %v8441_v6  ;;  %v8452_v2 = vmul.u32.u64.high 2863311531, %v8441_v6, %v8451_v45 }
 0x1e0   :  { %v8423_v26 = vpop.f32.mrf.mxu0  ;;  %v8458_v62 = vadd.s32 48, %v8420_v16  ;;  %v8470_v45 = vmul.u32.u64.low 2863311531, %v8455_v48  ;;  %v8471_v59 = vmul.u32.u64.high 2863311531, %v8455_v48, %v8470_v45 }
 0x1e1   :  { %14079 = vst [vmem:[#allocation48_spill] sm:$0xff] %v8423_v26  ;;  %v678_v30 = vadd.f32 %v677_v18, %v8423_v26  ;;  %v8448_v26 = vadd.s32 32, %v8420_v16  ;;  %v1209_v56 = vshrl.u32 %v8452_v2, 4 }
 0x1e2   :  { %v625_v34 = vpop.f32.mrf.mxu0  ;;  %14085 = vst [vmem:[#allocation54_spill] sm:$0xff] %v8458_v62  ;;  %v8474_v51 = vmul.u32.u64.low 2863311531, %v8458_v62  ;;  %v8475_v42 = vmul.u32.u64.high 2863311531, %v8458_v62, %v8474_v51 }
 0x1e3   :  { %v679_v53 = vrot.slane %v678_v30, 4  ;;  %v8444_v18 = vmul.u32.u64.low 2863311531, %v8434_v52  ;;  %v8445_v34 = vmul.u32.u64.high 2863311531, %v8434_v52, %v8444_v18  ;;  %14083 = vst [vmem:[#allocation52_spill] sm:$0xff] %v8448_v26  ;;  %v1210_v38 = vmul.u32 24, %v1209_v56 }
 0x1e4   :  { %v8462_v8 = vmul.u32.u64.low 2863311531, %v8448_v26  ;;  %v8463_v18 = vmul.u32.u64.high 2863311531, %v8448_v26, %v8462_v8 }
 0x1e5   :  { %v680_v57 = vadd.f32 %v679_v53, %v678_v30  ;;  %v8466_v30 = vadd.s32 56, %v8420_v16  ;;  %v1187_v53 = vshrl.u32 %v8438_v14, 4  ;;  %v1198_v47 = vshrl.u32 %v8445_v34, 4 }
 0x1e6   :  { %v8484_v14 = vsub.s32 %v8420_v16, %v1177_v32  ;;  %v1220_v44 = vshrl.u32 %v8463_v18, 4  ;;  %v8507_v18 = vadd.s32 72, %v8420_v16 }
 0x1e7   :  { %v681_v24 = vrot.slane %v680_v57, 2  ;;  %14086 = vst [vmem:[#allocation55_spill] sm:$0xff] %v8466_v30  ;;  %v8479_v10 = vmul.u32.u64.low 2863311531, %v8466_v30  ;;  %v8480_v8 = vmul.u32.u64.high 2863311531, %v8466_v30, %v8479_v10  ;;  %v1188_v0 = vmul.u32 24, %v1187_v53 }
 0x1e8   :  { %v1199_v49 = vmul.u32 24, %v1198_v47  ;;  %v8493_v10 = vadd.s32 64, %v8420_v16  ;;  %vm1731_vm1 = vcmp.ne.s32.totalorder %v8484_v14, 0  ;;  %vm1782_vm2 = vcmp.lt.s32.totalorder %v8484_v14, 0  ;;  %14088 = vst [vmem:[#allocation57_spill] sm:$0xff] %v8507_v18 }
 0x1e9   :  { %v682_v22 = vadd.f32 %v681_v24, %v680_v57  ;;  %v8488_v51 = vsub.s32 %v8427_v40, %v1188_v0  ;;  %v1231_v24 = vshrl.u32 %v8471_v59, 4  ;;  %v1242_v57 = vshrl.u32 %v8475_v42, 4  ;;  %vm8548_vm9 = vmand %vm1782_vm2, %vm1731_vm1 }
 0x1ea   :  { %14087 = vst [vmem:[#allocation56_spill] sm:$0xff] %v8493_v10  ;;  %v8497_v32 = vsub.s32 %v8434_v52, %v1199_v49  ;;  %v1884_v34 = vadd.s32 24, %v8484_v14  ;;  %v1221_v0 = vmul.u32 24, %v1220_v44  ;;  %v1253_v56 = vshrl.u32 %v8480_v8, 4 }
 0x1eb   :  { %v683_v45 = vrot.slane %v682_v22, 1  ;;  %vm1732_vm3 = vcmp.ne.s32.totalorder %v8488_v51, 0  ;;  %v8504_v42 = vsub.s32 %v8441_v6, %v1210_v38  ;;  %v1232_v59 = vmul.u32 24, %v1231_v24 }
 0x1ec   :  { %vm1783_vm4 = vcmp.lt.s32.totalorder %v8488_v51, 0  ;;  %v1243_v49 = vmul.u32 24, %v1242_v57  ;;  %v1885_v44 = vadd.s32 24, %v8488_v51  ;;  %vm1733_vm5 = vcmp.ne.s32.totalorder %v8497_v32, 0 }
 0x1ed   :  { %v684_v2 = vadd.f32 %v683_v45, %v682_v22  ;;  %v8511_v22 = vmul.u32.u64.low 2863311531, %v8493_v10  ;;  %v8512_v53 = vmul.u32.u64.high 2863311531, %v8493_v10, %v8511_v22  ;;  %v8517_v47 = vadd.s32 80, %v8420_v16  ;;  %vm8560_vm12 = vmand %vm1783_vm4, %vm1732_vm3 }
 0x1ee   :  { %vm1784_vm6 = vcmp.lt.s32.totalorder %v8497_v32, 0  ;;  %v1886_v45 = vadd.s32 24, %v8497_v32  ;;  %v1222_v38 = vsub.s32 %v8448_v26, %v1221_v0  ;;  %v1254_v24 = vmul.u32 24, %v1253_v56 }
 0x1ef   :  { %14089 = vst [vmem:[#allocation58_spill] sm:$0xff] %v8517_v47  ;;  %v8519_v8 = vmul.f32 0.0034602077, %v684_v2  ;;  %vm1734_vm7 = vcmp.ne.s32.totalorder %v8504_v42, 0  ;;  %v1233_v57 = vsub.s32 %v8455_v48, %v1232_v59  ;;  %vm1785_vm8 = vcmp.lt.s32.totalorder %v8504_v42, 0  ;;  %vm8568_vm15 = vmand %vm1784_vm6, %vm1733_vm5 }
 0x1f0   :  { %v8527_v22 = vmul.u32.u64.low 2863311531, %v8507_v18  ;;  %v8528_v40 = vmul.u32.u64.high 2863311531, %v8507_v18, %v8527_v22  ;;  %v1887_v2 = vadd.s32 24, %v8504_v42  ;;  %v1244_v6 = vsub.s32 %v8458_v62, %v1243_v49  ;;  %vm8581_vm1 = vmand %vm1785_vm8, %vm1734_vm7 }
 0x1f1   :  { %v8534_v52 = vadd.s32 88, %v8420_v16  ;;  %v8537_v0 = vmul.u32.u64.low 2863311531, %v8517_v47  ;;  %v8538_v56 = vmul.u32.u64.high 2863311531, %v8517_v47, %v8537_v0  ;;  %v687_v59 = vsub.f32 %v8259_v54, %v8519_v8 }
 0x1f2   :  { %v688_v26 = vsub.f32 %v8268_v58, %v8519_v8  ;;  %vm1735_vm10 = vcmp.ne.s32.totalorder %v1222_v38, 0  ;;  %vm1786_vm11 = vcmp.lt.s32.totalorder %v1222_v38, 0  ;;  %v1255_v49 = vsub.s32 %v8466_v30, %v1254_v24 }
 0x1f3   :  { %14090 = vst [vmem:[#allocation59_spill] sm:$0xff] %v8534_v52  ;;  %v8554_v0 = vadd.s32 96, %v8420_v16  ;;  %v1888_v48 = vadd.s32 24, %v1222_v38  ;;  %vm1736_vm13 = vcmp.ne.s32.totalorder %v1233_v57, 0  ;;  %vm1787_vm14 = vcmp.lt.s32.totalorder %v1233_v57, 0  ;;  %vm8589_vm3 = vmand %vm1786_vm11, %vm1735_vm10 }
 0x1f4   :  { %v1889_v58 = vadd.s32 24, %v1233_v57  ;;  %vm1737_vm0 = vcmp.ne.s32.totalorder %v1244_v6, 0  ;;  %v1264_v30 = vshrl.u32 %v8512_v53, 4  ;;  %vm1788_vm2 = vcmp.lt.s32.totalorder %v1244_v6, 0  ;;  %vm8609_vm6 = vmand %vm1787_vm14, %vm1736_vm13 }
 0x1f5   :  { %14093 = vst [vmem:[#allocation60_spill] sm:$0xff] %v8554_v0  ;;  %v8574_v54 = vmul.u32.u64.low 2863311531, %v8534_v52  ;;  %v8575_v36 = vmul.u32.u64.high 2863311531, %v8534_v52, %v8574_v54  ;;  %v689_v20 = vsub.f32 %v8274_v61, %v8519_v8  ;;  %v738_v12 = vmul.f32 %v687_v59, %v687_v59  ;;  %vm8623_vm7 = vmand %vm1788_vm2, %vm1737_vm0 }
 0x1f6   :  { %v739_v4 = vmul.f32 %v688_v26, %v688_v26  ;;  %vm1738_vm4 = vcmp.ne.s32.totalorder %v1255_v49, 0  ;;  %vm1789_vm5 = vcmp.lt.s32.totalorder %v1255_v49, 0  ;;  %v8600_v55 = vsel %vm8548_vm9, %v1884_v34, %v8484_v14 }
 0x1f7   :  { %v8594_v54 = vmul.u32.u64.low 2863311531, %v8554_v0  ;;  %v8595_v60 = vmul.u32.u64.high 2863311531, %v8554_v0, %v8594_v54  ;;  %14102 = vst [vmem:[#allocation61_spill] sm:$0xff] %v8600_v55  ;;  %v8605_v26 = vsel %vm8560_vm12, %v1885_v44, %v8488_v51  ;;  %v1275_v61 = vshrl.u32 %v8528_v40, 4  ;;  %vm1840_vm8 = vmand %vm1789_vm5, %vm1738_vm4 }
 0x1f8   :  { %14103 = vst [vmem:[#allocation62_spill] sm:$0xff] %v8605_v26  ;;  %v690_v54 = vsub.f32 %v8276_v63, %v8519_v8  ;;  %v8619_v14 = vsel %vm8568_vm15, %v1886_v45, %v8497_v32  ;;  %v1890_v51 = vadd.s32 24, %v1244_v6  ;;  %v1891_v34 = vadd.s32 24, %v1255_v49 }
 0x1f9   :  { %14106 = vst [vmem:[#allocation63_spill] sm:$0xff] %v8619_v14  ;;  %v1265_v44 = vmul.u32 24, %v1264_v30  ;;  %v1286_v40 = vshrl.u32 %v8538_v56, 4  ;;  %v691_v22 = vsub.f32 %v8278_v1, %v8519_v8  ;;  %v740_v26 = vmul.f32 %v689_v20, %v689_v20 }
 0x1fa   :  { %v789_v55 = vadd.f32 %v739_v4, %v738_v12  ;;  %v8633_v32 = vsel %vm8581_vm1, %v1887_v2, %v8504_v42  ;;  %v8637_v45 = vsel %vm8589_vm3, %v1888_v48, %v1222_v38  ;;  %v8641_v30 = vsel %vm8609_vm6, %v1889_v58, %v1233_v57 }
 0x1fb   :  { %14109 = vst [vmem:[#allocation64_spill] sm:$0xff] %v8633_v32  ;;  %14110 = vst [vmem:[#allocation65_spill] sm:$0xff] %v8637_v45  ;;  %v8644_v56 = vadd.s32 104, %v8420_v16  ;;  %v1276_v24 = vmul.u32 24, %v1275_v61  ;;  %v692_v4 = vsub.f32 %v8280_v3, %v8519_v8  ;;  %v741_v12 = vmul.f32 %v690_v54, %v690_v54 }
 0x1fc   :  { %14111 = vst [vmem:[#allocation66_spill] sm:$0xff] %v8641_v30  ;;  %v790_v20 = vadd.f32 %v789_v55, %v740_v26  ;;  %v8650_v28 = vsel %vm8623_vm7, %v1890_v51, %v1244_v6  ;;  %v8652_v42 = vsel %vm1840_vm8, %v1891_v34, %v1255_v49  ;;  %v8655_v48 = vsub.s32 %v8493_v10, %v1265_v44 }
 0x1fd   :  { %14112 = vst [vmem:[#allocation67_spill] sm:$0xff] %v8644_v56  ;;  %14113 = vst [vmem:[#allocation68_spill] sm:$0xff] %v8650_v28  ;;  %v1297_v58 = vshrl.u32 %v8575_v36, 4  ;;  %v1287_v38 = vmul.u32 24, %v1286_v40  ;;  %v693_v61 = vsub.f32 %v8282_v5, %v8519_v8  ;;  %v742_v57 = vmul.f32 %v691_v22, %v691_v22 }
 0x1fe   :  { %14114 = vst [vmem:[#allocation69_spill] sm:$0xff] %v8652_v42  ;;  %v791_v2 = vadd.f32 %v790_v20, %v741_v12  ;;  %v1308_v53 = vshrl.u32 %v8595_v60, 4  ;;  %v8662_v55 = vmul.u32.u64.low 2863311531, %v8644_v56  ;;  %v8663_v26 = vmul.u32.u64.high 2863311531, %v8644_v56, %v8662_v55 }
 0x1ff   :  { %v8666_v6 = vadd.s32 112, %v8420_v16  ;;  %v8669_v49 = vsub.s32 %v8507_v18, %v1276_v24  ;;  %v694_v36 = vsub.f32 %v8284_v7, %v8519_v8  ;;  %v743_v59 = vmul.f32 %v692_v4, %v692_v4 }
 0x200   :  { %v792_v54 = vadd.f32 %v791_v2, %v742_v57  ;;  %vm1739_vm9 = vcmp.ne.s32.totalorder %v8655_v48, 0  ;;  %vm1790_vm10 = vcmp.lt.s32.totalorder %v8655_v48, 0  ;;  %v8676_v60 = vadd.s32 24, %v8655_v48 }
 0x201   :  { %14115 = vst [vmem:[#allocation70_spill] sm:$0xff] %v8666_v6  ;;  %v1298_v62 = vmul.u32 24, %v1297_v58  ;;  %v8679_v51 = vadd.s32 120, %v8420_v16  ;;  %v8682_v34 = vsub.s32 %v8517_v47, %v1287_v38  ;;  %v695_v44 = vsub.f32 %v8286_v9, %v8519_v8  ;;  %vm8729_vm2 = vmand %vm1790_vm10, %vm1739_vm9 }
 0x202   :  { %v744_v40 = vmul.f32 %v693_v61, %v693_v61  ;;  %v793_v22 = vadd.f32 %v792_v54, %v743_v59  ;;  %v1309_v24 = vmul.u32 24, %v1308_v53  ;;  %v8691_v20 = vadd.s32 128, %v8420_v16 }
 0x203   :  { %14116 = vst [vmem:[#allocation71_spill] sm:$0xff] %v8679_v51  ;;  %v8687_v4 = vmul.u32.u64.low 2863311531, %v8666_v6  ;;  %v8688_v12 = vmul.u32.u64.high 2863311531, %v8666_v6, %v8687_v4  ;;  %vm1740_vm11 = vcmp.ne.s32.totalorder %v8669_v49, 0  ;;  %v696_v58 = vsub.f32 %v8288_v11, %v8519_v8 }
 0x204   :  { %14117 = vst [vmem:[#allocation72_spill] sm:$0xff] %v8691_v20  ;;  %v745_v38 = vmul.f32 %v694_v36, %v694_v36  ;;  %v794_v57 = vadd.f32 %v793_v22, %v744_v40  ;;  %vm1791_vm12 = vcmp.lt.s32.totalorder %v8669_v49, 0  ;;  %v1299_v61 = vsub.s32 %v8534_v52, %v1298_v62 }
 0x205   :  { %v8699_v2 = vmul.u32.u64.low 2863311531, %v8679_v51  ;;  %v8700_v53 = vmul.u32.u64.high 2863311531, %v8679_v51, %v8699_v2  ;;  %v1893_v55 = vadd.s32 24, %v8669_v49  ;;  %v697_v59 = vsub.f32 %v8290_v13, %v8519_v8  ;;  %vm8739_vm3 = vmand %vm1791_vm12, %vm1740_vm11 }
 0x206   :  { %v746_v54 = vmul.f32 %v695_v44, %v695_v44  ;;  %v795_v4 = vadd.f32 %v794_v57, %v745_v38  ;;  %vm1741_vm13 = vcmp.ne.s32.totalorder %v8682_v34, 0  ;;  %v1310_v36 = vsub.s32 %v8554_v0, %v1309_v24 }
 0x207   :  { %v8708_v40 = vmul.u32.u64.low 2863311531, %v8691_v20  ;;  %v8709_v22 = vmul.u32.u64.high 2863311531, %v8691_v20, %v8708_v40  ;;  %v1319_v62 = vshrl.u32 %v8663_v26, 4  ;;  %v698_v2 = vsub.f32 %v8292_v15, %v8519_v8 }
 0x208   :  { %v747_v52 = vmul.f32 %v696_v58, %v696_v58  ;;  %v796_v47 = vadd.f32 %v795_v4, %v746_v54  ;;  %vm1792_vm14 = vcmp.lt.s32.totalorder %v8682_v34, 0  ;;  %v1894_v44 = vadd.s32 24, %v8682_v34 }
 0x209   :  { %vm1742_vm15 = vcmp.ne.s32.totalorder %v1299_v61, 0  ;;  %v8717_v38 = vadd.s32 136, %v8420_v16  ;;  %vm1793_vm0 = vcmp.lt.s32.totalorder %v1299_v61, 0  ;;  %v699_v24 = vsub.f32 %v8294_v17, %v8519_v8  ;;  %vm8751_vm5 = vmand %vm1792_vm14, %vm1741_vm13 }
 0x20a   :  { %v748_v57 = vmul.f32 %v697_v59, %v697_v59  ;;  %v797_v40 = vadd.f32 %v796_v47, %v747_v52  ;;  %v1895_v26 = vadd.s32 24, %v1299_v61  ;;  %vm1743_vm1 = vcmp.ne.s32.totalorder %v1310_v36, 0  ;;  %vm8760_vm6 = vmand %vm1793_vm0, %vm1742_vm15 }
 0x20b   :  { %14118 = vst [vmem:[#allocation73_spill] sm:$0xff] %v8717_v38  ;;  %v1330_v0 = vshrl.u32 %v8688_v12, 4  ;;  %v8723_v58 = vadd.s32 144, %v8420_v16  ;;  %v1320_v4 = vmul.u32 24, %v1319_v62  ;;  %v700_v59 = vsub.f32 %v8296_v19, %v8519_v8 }
 0x20c   :  { %v749_v52 = vmul.f32 %v698_v2, %v698_v2  ;;  %v798_v47 = vadd.f32 %v797_v40, %v748_v57  ;;  %vm1794_vm4 = vcmp.lt.s32.totalorder %v1310_v36, 0  ;;  %v1896_v18 = vadd.s32 24, %v1310_v36 }
 0x20d   :  { %v8744_v10 = vmul.u32.u64.low 2863311531, %v8717_v38  ;;  %v8745_v42 = vmul.u32.u64.high 2863311531, %v8717_v38, %v8744_v10  ;;  %v1341_v2 = vshrl.u32 %v8700_v53, 4  ;;  %v701_v57 = vsub.f32 %v8298_v21, %v8519_v8  ;;  %vm1845_vm7 = vmand %vm1794_vm4, %vm1743_vm1 }
 0x20e   :  { %v750_v40 = vmul.f32 %v699_v24, %v699_v24  ;;  %v799_v28 = vadd.f32 %v798_v47, %v749_v52  ;;  %v1331_v10 = vmul.u32 24, %v1330_v0  ;;  %v1352_v45 = vshrl.u32 %v8709_v22, 4 }
 0x20f   :  { %v8766_v32 = vmul.u32.u64.low 2863311531, %v8723_v58  ;;  %v8767_v14 = vmul.u32.u64.high 2863311531, %v8723_v58, %v8766_v32  ;;  %v8771_v53 = vsub.s32 %v8644_v56, %v1320_v4  ;;  %v702_v24 = vsub.f32 %v8300_v23, %v8519_v8 }
 0x210   :  { %v751_v52 = vmul.f32 %v700_v59, %v700_v59  ;;  %v800_v47 = vadd.f32 %v799_v28, %v750_v40  ;;  %v8779_v0 = vsel %vm8729_vm2, %v8676_v60, %v8655_v48  ;;  %v8784_v32 = vsel %vm8739_vm3, %v1893_v55, %v8669_v49 }
 0x211   :  { %14127 = vst [vmem:[#allocation74_spill] sm:$0xff] %v8779_v0  ;;  %14128 = vst [vmem:[#allocation75_spill] sm:$0xff] %v8784_v32  ;;  %v8789_v22 = vsel %vm8751_vm5, %v1894_v44, %v8682_v34  ;;  %v8792_v4 = vadd.s32 152, %v8420_v16  ;;  %v1342_v28 = vmul.u32 24, %v1341_v2  ;;  %v703_v59 = vsub.f32 %v8302_v25, %v8519_v8 }
 0x212   :  { %14129 = vst [vmem:[#allocation76_spill] sm:$0xff] %v8789_v22  ;;  %v752_v54 = vmul.f32 %v701_v57, %v701_v57  ;;  %v801_v48 = vadd.f32 %v800_v47, %v751_v52  ;;  %v8798_v60 = vsel %vm8760_vm6, %v1895_v26, %v1299_v61  ;;  %v8800_v49 = vsel %vm1845_vm7, %v1896_v18, %v1310_v36 }
 0x213   :  { %14130 = vst [vmem:[#allocation77_spill] sm:$0xff] %v8798_v60  ;;  %14131 = vst [vmem:[#allocation78_spill] sm:$0xff] %v8800_v49  ;;  %v8803_v55 = vsub.s32 %v8666_v6, %v1331_v10  ;;  %v1353_v34 = vmul.u32 24, %v1352_v45  ;;  %vm1744_vm8 = vcmp.ne.s32.totalorder %v8771_v53, 0  ;;  %v704_v44 = vsub.f32 %v8304_v27, %v8519_v8 }
 0x214   :  { %v753_v12 = vmul.f32 %v702_v24, %v702_v24  ;;  %v802_v62 = vadd.f32 %v801_v48, %v752_v54  ;;  %vm1795_vm9 = vcmp.lt.s32.totalorder %v8771_v53, 0  ;;  %v8814_v18 = vadd.s32 160, %v8420_v16 }
 0x215   :  { %v8810_v2 = vmul.u32.u64.low 2863311531, %v8792_v4  ;;  %v8811_v30 = vmul.u32.u64.high 2863311531, %v8792_v4, %v8810_v2  ;;  %v8817_v61 = vsub.s32 %v8679_v51, %v1342_v28  ;;  %v705_v45 = vsub.f32 %v8306_v29, %v8519_v8  ;;  %vm8851_vm0 = vmand %vm1795_vm9, %vm1744_vm8  ;;  %v8865_v51 = vld [vmem:[#allocation2 + $0x18] sm:$0xff] }
 0x216   :  { %v754_v36 = vmul.f32 %v703_v59, %v703_v59  ;;  %v803_v26 = vadd.f32 %v802_v62, %v753_v12  ;;  %v1897_v57 = vadd.s32 24, %v8771_v53  ;;  %vm1745_vm10 = vcmp.ne.s32.totalorder %v8803_v55, 0  ;;  %v3507_v12 = vld [vmem:[%s13798_s2 + $0x78] sm:$0xff] }
 0x217   :  { %v8824_v40 = vsub.s32 %v8691_v20, %v1353_v34  ;;  %v1363_v10 = vshrl.u32 %v8745_v42, 4  ;;  %v1374_v24 = vshrl.u32 %v8767_v14, 4  ;;  %v706_v52 = vsub.f32 %v8308_v31, %v8519_v8  ;;  %3637 = vmatpush1.msra.mxu1 %v3507_v12 }
 0x218   :  { %v755_v47 = vmul.f32 %v704_v44, %v704_v44  ;;  %v804_v28 = vadd.f32 %v803_v26, %v754_v36  ;;  %vm1796_vm11 = vcmp.lt.s32.totalorder %v8803_v55, 0  ;;  %v8836_v48 = vadd.s32 168, %v8420_v16  ;;  %3638 = vmatprep.subr.mxu1 %v8865_v51 }
 0x219   :  { %v8832_v59 = vmul.u32.u64.low 2863311531, %v8814_v18  ;;  %v8833_v54 = vmul.u32.u64.high 2863311531, %v8814_v18, %v8832_v59  ;;  %vm1746_vm12 = vcmp.ne.s32.totalorder %v8817_v61, 0  ;;  %v707_v42 = vsub.f32 %v8310_v33, %v8519_v8  ;;  %vm8875_vm1 = vmand %vm1796_vm11, %vm1745_vm10 }
 0x21a   :  { %v756_v14 = vmul.f32 %v705_v45, %v705_v45  ;;  %v805_v34 = vadd.f32 %v804_v28, %v755_v47  ;;  %vm1797_vm13 = vcmp.lt.s32.totalorder %v8817_v61, 0  ;;  %vm1747_vm14 = vcmp.ne.s32.totalorder %v8824_v40, 0 }
 0x21b   :  { %vm1798_vm15 = vcmp.lt.s32.totalorder %v8824_v40, 0  ;;  %v1364_v44 = vmul.u32 24, %v1363_v10  ;;  %v1375_v2 = vmul.u32 24, %v1374_v24  ;;  %v708_v45 = vsub.f32 %v8312_v35, %v8519_v8  ;;  %v3506_v24 = vld [vmem:[%s13798_s2 + $0x70] sm:$0xff]  ;;  %vm8891_vm2 = vmand %vm1797_vm13, %vm1746_vm12 }
 0x21c   :  { %v757_v36 = vmul.f32 %v706_v52, %v706_v52  ;;  %v806_v26 = vadd.f32 %v805_v34, %v756_v14  ;;  %v1385_v10 = vshrl.u32 %v8811_v30, 4  ;;  %v8863_v59 = vadd.s32 176, %v8420_v16  ;;  %3639 = vmatpush1.msra.mxu1 %v3506_v24  ;;  %vm8908_vm3 = vmand %vm1798_vm15, %vm1747_vm14  ;;  %v3503_v30 = vld [vmem:[%s13798_s2 + $0x58] sm:$0xff]  ;;  %v3518_v35 = vld [vmem:[%s13798_s2 + $0xd0] sm:$0xff] }
 0x21d   :  { %v8859_v47 = vmul.u32.u64.low 2863311531, %v8836_v48  ;;  %v8860_v28 = vmul.u32.u64.high 2863311531, %v8836_v48, %v8859_v47  ;;  %v1898_v52 = vadd.s32 24, %v8803_v55  ;;  %v709_v14 = vsub.f32 %v8314_v37, %v8519_v8  ;;  %3640 = vmatprep.subr.mxu1 %v8865_v51 }
 0x21e   :  { %v758_v34 = vmul.f32 %v707_v42, %v707_v42  ;;  %v807_v12 = vadd.f32 %v806_v26, %v757_v36  ;;  %v8885_v47 = vsel %vm8851_vm0, %v1897_v57, %v8771_v53  ;;  %v1899_v56 = vadd.s32 24, %v8817_v61  ;;  %v3505_v53 = vld [vmem:[%s13798_s2 + $0x68] sm:$0xff] }
 0x21f   :  { %14136 = vst [vmem:[#allocation79_spill] sm:$0xff] %v8885_v47  ;;  %v1900_v20 = vadd.s32 24, %v8824_v40  ;;  %v8898_v42 = vsub.s32 %v8717_v38, %v1364_v44  ;;  %v8913_v62 = vsub.s32 %v8723_v58, %v1375_v2  ;;  %v710_v44 = vsub.f32 %v8316_v39, %v8519_v8  ;;  %3641 = vmatpush1.msra.mxu1 %v3505_v53  ;;  %v3504_v58 = vld [vmem:[%s13798_s2 + $0x60] sm:$0xff] }
 0x220   :  { %v759_v36 = vmul.f32 %v708_v45, %v708_v45  ;;  %v808_v26 = vadd.f32 %v807_v12, %v758_v34  ;;  %v1386_v24 = vmul.u32 24, %v1385_v10  ;;  %v1396_v38 = vshrl.u32 %v8833_v54, 4  ;;  %3642 = vmatprep.subr.mxu1 %v8865_v51 }
 0x221   :  { %v8919_v47 = vmul.u32.u64.low 2863311531, %v8863_v59  ;;  %v8920_v49 = vmul.u32.u64.high 2863311531, %v8863_v59, %v8919_v47  ;;  %v8929_v2 = vsel %vm8875_vm1, %v1898_v52, %v8803_v55  ;;  %v711_v45 = vsub.f32 %v8318_v41, %v8519_v8  ;;  %3643 = vmatpush1.msra.mxu1 %v3504_v58  ;;  %v3602_v58 = vld [vmem:[%s13798_s2 + $0x370] sm:$0xff] }
 0x222   :  { %14141 = vst [vmem:[#allocation80_spill] sm:$0xff] %v8929_v2  ;;  %v760_v10 = vmul.f32 %v709_v14, %v709_v14  ;;  %v809_v54 = vadd.f32 %v808_v26, %v759_v36  ;;  %v8936_v34 = vsel %vm8891_vm2, %v1899_v56, %v8817_v61  ;;  %v8941_v12 = vsel %vm8908_vm3, %v1900_v20, %v8824_v40  ;;  %v3502_v14 = vld [vmem:[%s13798_s2 + $0x50] sm:$0xff]  ;;  %v3603_v47 = vld [vmem:[%s13798_s2 + $0x378] sm:$0xff] }
 0x223   :  { %14142 = vst [vmem:[#allocation81_spill] sm:$0xff] %v8936_v34  ;;  %14143 = vst [vmem:[#allocation82_spill] sm:$0xff] %v8941_v12  ;;  %vm1748_vm4 = vcmp.ne.s32.totalorder %v8898_v42, 0  ;;  %v8945_v55 = vadd.s32 184, %v8420_v16  ;;  %3644 = vmatprep.subr.mxu1 %v8865_v51  ;;  %vm1799_vm5 = vcmp.lt.s32.totalorder %v8898_v42, 0  ;;  %v712_v56 = vsub.f32 %v8320_v43, %v8519_v8  ;;  %4102 = vmatpush1.msra.mxu0 %v3603_v47  ;;  %v14144_v47 = vld [vmem:[#allocation25_spill] sm:$0xff] }
 0x224   :  { %v761_v6 = vmul.f32 %v710_v44, %v710_v44  ;;  %v810_v61 = vadd.f32 %v809_v54, %v760_v10  ;;  %3645 = vmatpush1.msra.mxu1 %v3503_v30  ;;  %v8955_v20 = vadd.s32 24, %v8898_v42  ;;  %vm1749_vm6 = vcmp.ne.s32.totalorder %v8913_v62, 0  ;;  %4103 = vmatprep.subr.mxu0 %v8865_v51  ;;  %vm9028_vm10 = vmand %vm1799_vm5, %vm1748_vm4 }
 0x225   :  { %v8959_v40 = vsub.s32 %v8792_v4, %v1386_v24  ;;  %v1397_v52 = vmul.u32 24, %v1396_v38  ;;  %3646 = vmatprep.subr.mxu1 %v8865_v51  ;;  %v1407_v53 = vshrl.u32 %v8860_v28, 4  ;;  %v713_v57 = vsub.f32 %v8324_v46, %v8519_v8  ;;  %v3501_v28 = vld [vmem:[%s13798_s2 + $0x48] sm:$0xff]  ;;  %4104 = vmatpush1.msra.mxu0 %v3602_v58 }
 0x226   :  { %v762_v44 = vmul.f32 %v711_v45, %v711_v45  ;;  %v811_v36 = vadd.f32 %v810_v61, %v761_v6  ;;  %3647 = vmatpush1.msra.mxu1 %v3502_v14  ;;  %v8972_v38 = vmul.u32.u64.low 2863311531, %v8945_v55  ;;  %v8973_v4 = vmul.u32.u64.high 2863311531, %v8945_v55, %v8972_v38  ;;  %4105 = vmatprep.subr.mxu0 %v8865_v51  ;;  %v3601_v61 = vld [vmem:[%s13798_s2 + $0x368] sm:$0xff] }
 0x227   :  { %v8976_v26 = vadd.s32 192, %v8420_v16  ;;  %v8979_v24 = vadd.s32 200, %v8420_v16  ;;  %3648 = vmatprep.subr.mxu1 %v8865_v51  ;;  %vm1800_vm7 = vcmp.lt.s32.totalorder %v8913_v62, 0  ;;  %v714_v45 = vsub.f32 %v8328_v50, %v8519_v8  ;;  %4106 = vmatpush1.msra.mxu0 %v3601_v61 }
 0x228   :  { %v763_v10 = vmul.f32 %v712_v56, %v712_v56  ;;  %v812_v54 = vadd.f32 %v811_v36, %v762_v44  ;;  %3649 = vmatpush1.msra.mxu1 %v3501_v28  ;;  %vm1750_vm8 = vcmp.ne.s32.totalorder %v8959_v40, 0  ;;  %vm1801_vm9 = vcmp.lt.s32.totalorder %v8959_v40, 0  ;;  %v3500_v56 = vld [vmem:[%s13798_s2 + $0x40] sm:$0xff]  ;;  %4107 = vmatprep.subr.mxu0 %v8865_v51  ;;  %vm9039_vm11 = vmand %vm1800_vm7, %vm1749_vm6 }
 0x229   :  { %v8995_v30 = vsub.s32 %v8814_v18, %v1397_v52  ;;  %v1418_v6 = vshrl.u32 %v8920_v49, 4  ;;  %3650 = vmatprep.subr.mxu1 %v8865_v51  ;;  %v1408_v14 = vmul.u32 24, %v1407_v53  ;;  %v715_v44 = vsub.f32 %v14144_v47, %v8519_v8  ;;  %v3499_v53 = vld [vmem:[%s13798_s2 + $0x38] sm:$0xff]  ;;  %vm9058_vm14 = vmand %vm1801_vm9, %vm1750_vm8 }
 0x22a   :  { %v764_v18 = vmul.f32 %v713_v57, %v713_v57  ;;  %v813_v52 = vadd.f32 %v812_v54, %v763_v10  ;;  %3651 = vmatpush1.msra.mxu1 %v3500_v56  ;;  %v9009_v49 = vmul.u32.u64.low 2863311531, %v8976_v26  ;;  %v9010_v36 = vmul.u32.u64.high 2863311531, %v8976_v26, %v9009_v49  ;;  %v3600_v57 = vld [vmem:[%s13798_s2 + $0x360] sm:$0xff] }
 0x22b   :  { %v9013_v38 = vmul.u32.u64.low 2863311531, %v8979_v24  ;;  %v9014_v28 = vmul.u32.u64.high 2863311531, %v8979_v24, %v9013_v38  ;;  %3652 = vmatprep.subr.mxu1 %v8865_v51  ;;  %v1902_v10 = vadd.s32 24, %v8913_v62  ;;  %v14147_v54 = vld [vmem:[#allocation26_spill] sm:$0xff]  ;;  %v765_v61 = vmul.f32 %v714_v45, %v714_v45  ;;  %4108 = vmatpush1.msra.mxu0 %v3600_v57  ;;  %v3498_v45 = vld [vmem:[%s13798_s2 + $0x30] sm:$0xff] }
 0x22c   :  { %v716_v56 = vsub.f32 %v14147_v54, %v8519_v8  ;;  %v814_v49 = vadd.f32 %v813_v52, %v764_v18  ;;  %3653 = vmatpush1.msra.mxu1 %v3499_v53  ;;  %v1903_v12 = vadd.s32 24, %v8959_v40  ;;  %vm1751_vm12 = vcmp.ne.s32.totalorder %v8995_v30, 0  ;;  %4109 = vmatprep.subr.mxu0 %v8865_v51  ;;  %v3599_v18 = vld [vmem:[%s13798_s2 + $0x358] sm:$0xff] }
 0x22d   :  { %vm1802_vm13 = vcmp.lt.s32.totalorder %v8995_v30, 0  ;;  %v1419_v34 = vmul.u32 24, %v1418_v6  ;;  %3654 = vmatprep.subr.mxu1 %v8865_v51  ;;  %v14152_v6 = vld [vmem:[#allocation27_spill] sm:$0xff]  ;;  %v766_v57 = vmul.f32 %v715_v44, %v715_v44  ;;  %4110 = vmatpush1.msra.mxu0 %v3599_v18  ;;  %v9068_v60 = vsel %vm9028_vm10, %v8955_v20, %v8898_v42  ;;  %v14156_v20 = vld [vmem:[#allocation28_spill] sm:$0xff] }
 0x22e   :  { %v717_v53 = vsub.f32 %v14152_v6, %v8519_v8  ;;  %v815_v2 = vadd.f32 %v814_v49, %v765_v61  ;;  %3655 = vmatpush1.msra.mxu1 %v3498_v45  ;;  %14153 = vst [vmem:[#allocation83_spill] sm:$0xff] %v9068_v60  ;;  %v1904_v22 = vadd.s32 24, %v8995_v30  ;;  %v9072_v32 = vsub.s32 %v8836_v48, %v1408_v14  ;;  %v3497_v44 = vld [vmem:[%s13798_s2 + $0x28] sm:$0xff]  ;;  %v3598_v42 = vld [vmem:[%s13798_s2 + $0x350] sm:$0xff]  ;;  %vm9087_vm15 = vmand %vm1802_vm13, %vm1751_vm12 }
 0x22f   :  { %v1429_v0 = vshrl.u32 %v8973_v4, 4  ;;  %3656 = vmatprep.subr.mxu1 %v8865_v51  ;;  %4111 = vmatprep.subr.mxu0 %v8865_v51  ;;  %v718_v4 = vsub.f32 %v14156_v20, %v8519_v8  ;;  %v767_v14 = vmul.f32 %v716_v56, %v716_v56  ;;  %v9096_v61 = vsel %vm9039_vm11, %v1902_v10, %v8913_v62  ;;  %v3597_v62 = vld [vmem:[%s13798_s2 + $0x348] sm:$0xff]  ;;  %v14159_v10 = vld [vmem:[#allocation29_spill] sm:$0xff] }
 0x230   :  { %v816_v58 = vadd.f32 %v815_v2, %v766_v57  ;;  %3657 = vmatpush1.msra.mxu1 %v3497_v44  ;;  %4112 = vmatpush1.msra.mxu0 %v3598_v42  ;;  %14157 = vst [vmem:[#allocation84_spill] sm:$0xff] %v9096_v61  ;;  %v9101_v49 = vsel %vm9058_vm14, %v1903_v12, %v8959_v40  ;;  %v3496_v2 = vld [vmem:[%s13798_s2 + $0x20] sm:$0xff]  ;;  %v1440_v38 = vshrl.u32 %v9010_v36, 4  ;;  %v1451_v18 = vshrl.u32 %v9014_v28, 4  ;;  %v3495_v52 = vld [vmem:[%s13798_s2 + $0x18] sm:$0xff]  ;;  %v3494_v42 = vld [vmem:[%s13798_s2 + $0x10] sm:$0xff] }
 0x231   :  { %14158 = vst [vmem:[#allocation85_spill] sm:$0xff] %v9101_v49  ;;  %v9104_v45 = vsub.s32 %v8863_v59, %v1419_v34  ;;  %3658 = vmatprep.subr.mxu1 %v8865_v51  ;;  %4113 = vmatprep.subr.mxu0 %v8865_v51  ;;  %v719_v56 = vsub.f32 %v14159_v10, %v8519_v8  ;;  %v1430_v34 = vmul.u32 24, %v1429_v0  ;;  %vm1752_vm0 = vcmp.ne.s32.totalorder %v9072_v32, 0  ;;  %v14161_v0 = vld [vmem:[#allocation30_spill] sm:$0xff]  ;;  %v3595_v48 = vld [vmem:[%s13798_s2 + $0x338] sm:$0xff] }
 0x232   :  { %v768_v12 = vmul.f32 %v717_v53, %v717_v53  ;;  %v817_v40 = vadd.f32 %v816_v58, %v767_v14  ;;  %3659 = vmatpush1.msra.mxu1 %v3496_v2  ;;  %4114 = vmatpush1.msra.mxu0 %v3597_v62  ;;  %v9119_v59 = vsel %vm9087_vm15, %v1904_v22, %v8995_v30  ;;  %v3596_v53 = vld [vmem:[%s13798_s2 + $0x340] sm:$0xff]  ;;  %vm1803_vm1 = vcmp.lt.s32.totalorder %v9072_v32, 0 }
 0x233   :  { %14160 = vst [vmem:[#allocation86_spill] sm:$0xff] %v9119_v59  ;;  %3660 = vmatprep.subr.mxu1 %v8865_v51  ;;  %4115 = vmatprep.subr.mxu0 %v8865_v51  ;;  %v720_v22 = vsub.f32 %v14161_v0, %v8519_v8  ;;  %v769_v30 = vmul.f32 %v718_v4, %v718_v4  ;;  %v1905_v28 = vadd.s32 24, %v9072_v32  ;;  %v9137_v57 = vadd.s32 208, %v8420_v16  ;;  %v14162_v4 = vld [vmem:[#allocation31_spill] sm:$0xff]  ;;  %vm9169_vm4 = vmand %vm1803_vm1, %vm1752_vm0  ;;  %v3492_v49 = vld [vmem:[%s13798_s2] sm:$0xff] }
 0x234   :  { %v818_v36 = vadd.f32 %v817_v40, %v768_v12  ;;  %3661 = vmatpush1.msra.mxu1 %v3495_v52  ;;  %4116 = vmatpush1.msra.mxu0 %v3596_v53  ;;  %v9140_v44 = vadd.s32 216, %v8420_v16  ;;  %vm1753_vm2 = vcmp.ne.s32.totalorder %v9104_v45, 0  ;;  %v721_v14 = vsub.f32 %v14162_v4, %v8519_v8  ;;  %v3493_v52 = vld [vmem:[%s13798_s2 + $0x8] sm:$0xff] }
 0x235   :  { %3662 = vmatprep.subr.mxu1 %v8865_v51  ;;  %4117 = vmatprep.subr.mxu0 %v8865_v51  ;;  %v770_v58 = vmul.f32 %v719_v56, %v719_v56  ;;  %vm1804_vm3 = vcmp.lt.s32.totalorder %v9104_v45, 0  ;;  %v9155_v62 = vsub.s32 %v8945_v55, %v1430_v34  ;;  %v1441_v12 = vmul.u32 24, %v1440_v38  ;;  %v3594_v56 = vld [vmem:[%s13798_s2 + $0x330] sm:$0xff] }
 0x236   :  { %v819_v2 = vadd.f32 %v818_v36, %v769_v30  ;;  %3663 = vmatpush1.msra.mxu1 %v3494_v42  ;;  %4118 = vmatpush1.msra.mxu0 %v3595_v48  ;;  %v1452_v40 = vmul.u32 24, %v1451_v18  ;;  %v1906_v34 = vadd.s32 24, %v9104_v45  ;;  %v14165_v38 = vld [vmem:[#allocation32_spill] sm:$0xff]  ;;  %v771_v53 = vmul.f32 %v720_v22, %v720_v22  ;;  %v3593_v22 = vld [vmem:[%s13798_s2 + $0x328] sm:$0xff]  ;;  %vm9196_vm5 = vmand %vm1804_vm3, %vm1753_vm2 }
 0x237   :  { %3664 = vmatprep.subr.mxu1 %v8865_v51  ;;  %4119 = vmatprep.subr.mxu0 %v8865_v51  ;;  %v722_v18 = vsub.f32 %v14165_v38, %v8519_v8  ;;  %v9177_v36 = vmul.u32.u64.low 2863311531, %v9137_v57  ;;  %v9178_v42 = vmul.u32.u64.high 2863311531, %v9137_v57, %v9177_v36  ;;  %v9208_v61 = vsub.s32 %v8976_v26, %v1441_v12  ;;  %v3522_v55 = vld [vmem:[%s13798_s2 + $0xf0] sm:$0xff] }
 0x238   :  { %v820_v30 = vadd.f32 %v819_v2, %v770_v58  ;;  %3665 = vmatpush1.msra.mxu1 %v3493_v52  ;;  %4120 = vmatpush1.msra.mxu0 %v3594_v56  ;;  %v9181_v48 = vmul.u32.u64.low 2863311531, %v9140_v44  ;;  %v9182_v59 = vmul.u32.u64.high 2863311531, %v9140_v44, %v9181_v48  ;;  %v14168_v2 = vld [vmem:[#allocation33_spill] sm:$0xff]  ;;  %v772_v56 = vmul.f32 %v721_v14, %v721_v14 }
 0x239   :  { %3666 = vmatprep.subr.mxu1 %v8865_v51  ;;  %4121 = vmatprep.subr.mxu0 %v8865_v51  ;;  %v723_v52 = vsub.f32 %v14168_v2, %v8519_v8  ;;  %v9205_v48 = vsel %vm9169_vm4, %v1905_v28, %v9072_v32  ;;  %v9211_v60 = vsub.s32 %v8979_v24, %v1452_v40  ;;  %v3592_v14 = vld [vmem:[%s13798_s2 + $0x320] sm:$0xff]  ;;  %vm1754_vm6 = vcmp.ne.s32.totalorder %v9155_v62, 0 }
 0x23a   :  { %v821_v36 = vadd.f32 %v820_v30, %v771_v53  ;;  %3667 = vmatpush1.msra.mxu1 %v3492_v49  ;;  %4122 = vmatpush1.msra.mxu0 %v3593_v22  ;;  %14169 = vst [vmem:[#allocation87_spill] sm:$0xff] %v9205_v48  ;;  %v3523_v49 = vld [vmem:[%s13798_s2 + $0xf8] sm:$0xff]  ;;  %v14170_v32 = vld [vmem:[#allocation34_spill] sm:$0xff]  ;;  %v773_v26 = vmul.f32 %v722_v18, %v722_v18  ;;  %vm1805_vm7 = vcmp.lt.s32.totalorder %v9155_v62, 0  ;;  %v9231_v40 = vadd.s32 224, %v8420_v16  ;;  %v14172_v18 = vld [vmem:[#allocation35_spill] sm:$0xff] }
 0x23b   :  { %3668 = vmatprep.subr.mxu1 %v8865_v51  ;;  %4123 = vmatprep.subr.mxu0 %v8865_v51  ;;  %v724_v28 = vsub.f32 %v14170_v32, %v8519_v8  ;;  %v9226_v24 = vsel %vm9196_vm5, %v1906_v34, %v9104_v45  ;;  %v3591_v45 = vld [vmem:[%s13798_s2 + $0x318] sm:$0xff]  ;;  %v1907_v34 = vadd.s32 24, %v9155_v62  ;;  %v725_v53 = vsub.f32 %v14172_v18, %v8519_v8  ;;  %vm9302_vm11 = vmand %vm1805_vm7, %vm1754_vm6 }
 0x23c   :  { %v822_v12 = vadd.f32 %v821_v36, %v772_v56  ;;  %3669 = vmatpush2.msra.mxu1 %v3523_v49  ;;  %4124 = vmatpush1.msra.mxu0 %v3592_v14  ;;  %14171 = vst [vmem:[#allocation88_spill] sm:$0xff] %v9226_v24  ;;  %v774_v30 = vmul.f32 %v723_v52, %v723_v52  ;;  %vm1755_vm8 = vcmp.ne.s32.totalorder %v9208_v61, 0  ;;  %vm1806_vm9 = vcmp.lt.s32.totalorder %v9208_v61, 0  ;;  %v3521_v52 = vld [vmem:[%s13798_s2 + $0xe8] sm:$0xff]  ;;  %v3590_v36 = vld [vmem:[%s13798_s2 + $0x310] sm:$0xff] }
 0x23d   :  { %3670 = vmatprep.subr.mxu1 %v8865_v51  ;;  %4125 = vmatprep.subr.mxu0 %v8865_v51  ;;  %v9247_v58 = vadd.s32 232, %v8420_v16  ;;  %v9250_v56 = vadd.s32 240, %v8420_v16  ;;  %vm1756_vm10 = vcmp.ne.s32.totalorder %v9211_v60, 0  ;;  %v14173_v49 = vld [vmem:[#allocation36_spill] sm:$0xff]  ;;  %v9269_v48 = vadd.s32 248, %v8420_v16  ;;  %vm9335_vm13 = vmand %vm1806_vm9, %vm1755_vm8 }
 0x23e   :  { %v823_v22 = vadd.f32 %v822_v12, %v773_v26  ;;  %3671 = vmatpush2.msra.mxu1 %v3522_v55  ;;  %4126 = vmatpush1.msra.mxu0 %v3591_v45  ;;  %v726_v14 = vsub.f32 %v14173_v49, %v8519_v8  ;;  %v775_v26 = vmul.f32 %v724_v28, %v724_v28  ;;  %v1462_v55 = vshrl.u32 %v9178_v42, 4  ;;  %v3520_v28 = vld [vmem:[%s13798_s2 + $0xe0] sm:$0xff] }
 0x23f   :  { %3672 = vmatprep.subr.mxu1 %v8865_v51  ;;  %4127 = vmatprep.subr.mxu0 %v8865_v51  ;;  %v9265_v45 = vmul.u32.u64.low 2863311531, %v9231_v40  ;;  %v9266_v24 = vmul.u32.u64.high 2863311531, %v9231_v40, %v9265_v45  ;;  %v1473_v42 = vshrl.u32 %v9182_v59, 4  ;;  %v3519_v59 = vld [vmem:[%s13798_s2 + $0xd8] sm:$0xff]  ;;  %vm1807_vm12 = vcmp.lt.s32.totalorder %v9211_v60, 0 }
 0x240   :  { %v824_v12 = vadd.f32 %v823_v22, %v774_v30  ;;  %3673 = vmatpush2.msra.mxu1 %v3521_v52  ;;  %4128 = vmatpush1.msra.mxu0 %v3590_v36  ;;  %v3589_v30 = vld [vmem:[%s13798_s2 + $0x308] sm:$0xff]  ;;  %v14174_v22 = vld [vmem:[#allocation37_spill] sm:$0xff]  ;;  %v776_v36 = vmul.f32 %v725_v53, %v725_v53  ;;  %v9283_v47 = vmul.u32.u64.low 2863311531, %v9247_v58  ;;  %v9284_v50 = vmul.u32.u64.high 2863311531, %v9247_v58, %v9283_v47  ;;  %vm9353_vm14 = vmand %vm1807_vm12, %vm1756_vm10 }
 0x241   :  { %3674 = vmatprep.subr.mxu1 %v8865_v51  ;;  %4129 = vmatprep.subr.mxu0 %v8865_v51  ;;  %v727_v52 = vsub.f32 %v14174_v22, %v8519_v8  ;;  %v9287_v46 = vmul.u32.u64.low 2863311531, %v9250_v56  ;;  %v9288_v43 = vmul.u32.u64.high 2863311531, %v9250_v56, %v9287_v46  ;;  %v3588_v53 = vld [vmem:[%s13798_s2 + $0x300] sm:$0xff]  ;;  %v9314_v37 = vadd.s32 256, %v8420_v16 }
 0x242   :  { %v825_v45 = vadd.f32 %v824_v12, %v775_v26  ;;  %3675 = vmatpush2.msra.mxu1 %v3520_v28  ;;  %4130 = vmatpush1.msra.mxu0 %v3589_v30  ;;  %v14177_v46 = vld [vmem:[#allocation38_spill] sm:$0xff]  ;;  %v777_v12 = vmul.f32 %v726_v14, %v726_v14  ;;  %v1463_v30 = vmul.u32 24, %v1462_v55  ;;  %v3619_v14 = vld [vmem:[%s13798_s2 + $0x3f8] sm:$0xff]  ;;  %v14178_v55 = vld [vmem:[#allocation39_spill] sm:$0xff]  ;;  %v1908_v33 = vadd.s32 24, %v9208_v61 }
 0x243   :  { %3676 = vmatprep.subr.mxu1 %v8865_v51  ;;  %4131 = vmatprep.subr.mxu0 %v8865_v51  ;;  %v728_v26 = vsub.f32 %v14177_v46, %v8519_v8  ;;  %v9310_v41 = vmul.u32.u64.low 2863311531, %v9269_v48  ;;  %v9311_v39 = vmul.u32.u64.high 2863311531, %v9269_v48, %v9310_v41  ;;  %v1484_v31 = vshrl.u32 %v9266_v24, 4  ;;  %v3530_v46 = vld [vmem:[%s13798_s2 + $0x130] sm:$0xff] }
 0x244   :  { %v826_v28 = vadd.f32 %v825_v45, %v776_v36  ;;  %3677 = vmatpush2.msra.mxu1 %v3519_v59  ;;  %4132 = vmatpush1.msra.mxu0 %v3588_v53  ;;  %v729_v36 = vsub.f32 %v14178_v55, %v8519_v8  ;;  %v778_v45 = vmul.f32 %v727_v52, %v727_v52  ;;  %v1909_v52 = vadd.s32 24, %v9211_v60 }
 0x245   :  { %3678 = vmatprep.subr.mxu1 %v8865_v51  ;;  %4133 = vmatprep.subr.mxu0 %v8865_v51  ;;  %v9329_v59 = vsel %vm9302_vm11, %v1907_v34, %v9155_v62  ;;  %v3618_v62 = vld [vmem:[%s13798_s2 + $0x3f0] sm:$0xff]  ;;  %v9364_v29 = vmul.u32.u64.low 2863311531, %v9314_v37  ;;  %v9365_v27 = vmul.u32.u64.high 2863311531, %v9314_v37, %v9364_v29  ;;  %v1506_v34 = vshrl.u32 %v9288_v43, 4 }
 0x246   :  { %v827_v41 = vadd.f32 %v826_v28, %v777_v12  ;;  %3679 = vmatpush2.msra.mxu1 %v3518_v35  ;;  %4134 = vmatpush2.msra.mxu0 %v3619_v14  ;;  %14179 = vst [vmem:[#allocation89_spill] sm:$0xff] %v9329_v59  ;;  %v1474_v12 = vmul.u32 24, %v1473_v42  ;;  %v3517_v35 = vld [vmem:[%s13798_s2 + $0xc8] sm:$0xff]  ;;  %v14184_v42 = vld [vmem:[#allocation40_spill] sm:$0xff]  ;;  %v779_v28 = vmul.f32 %v728_v26, %v728_v26  ;;  %v3516_v26 = vld [vmem:[%s13798_s2 + $0xc0] sm:$0xff]  ;;  %v9771_v55 = vadd.s32 368, %v8420_v16 }
 0x247   :  { %3680 = vmatprep.subr.mxu1 %v8865_v51  ;;  %4135 = vmatprep.subr.mxu0 %v8865_v51  ;;  %v730_v47 = vsub.f32 %v14184_v42, %v8519_v8  ;;  %v9360_v59 = vsub.s32 %v9137_v57, %v1463_v30  ;;  %v14185_v57 = vld [vmem:[#allocation41_spill] sm:$0xff]  ;;  %v780_v24 = vmul.f32 %v729_v36, %v729_v36  ;;  %v9391_v42 = vadd.s32 264, %v8420_v16 }
 0x248   :  { %v828_v14 = vadd.f32 %v827_v41, %v778_v45  ;;  %3681 = vmatpush2.msra.mxu1 %v3517_v35  ;;  %4136 = vmatpush2.msra.mxu0 %v3618_v62  ;;  %v3617_v45 = vld [vmem:[%s13798_s2 + $0x3e8] sm:$0xff]  ;;  %v731_v30 = vsub.f32 %v14185_v57, %v8519_v8  ;;  %v9380_v29 = vsel %vm9335_vm13, %v1908_v33, %v9208_v61  ;;  %v3515_v33 = vld [vmem:[%s13798_s2 + $0xb8] sm:$0xff]  ;;  %v3616_v61 = vld [vmem:[%s13798_s2 + $0x3e0] sm:$0xff]  ;;  %v9823_v4 = vadd.s32 384, %v8420_v16 }
 0x249   :  { %3682 = vmatprep.subr.mxu1 %v8865_v51  ;;  %4137 = vmatprep.subr.mxu0 %v8865_v51  ;;  %14186 = vst [vmem:[#allocation90_spill] sm:$0xff] %v9380_v29  ;;  %v9385_v35 = vsel %vm9353_vm14, %v1909_v52, %v9211_v60  ;;  %v9388_v62 = vsub.s32 %v9140_v44, %v1474_v12  ;;  %v14188_v60 = vld [vmem:[#allocation42_spill] sm:$0xff]  ;;  %vm1757_vm15 = vcmp.ne.s32.totalorder %v9360_v59, 0  ;;  %v1485_v52 = vmul.u32 24, %v1484_v31  ;;  %v14189_v31 = vld [vmem:[#allocation43_spill] sm:$0xff] }
 0x24a   :  { %v829_v41 = vadd.f32 %v828_v14, %v779_v28  ;;  %3683 = vmatpush2.msra.mxu1 %v3516_v26  ;;  %4138 = vmatpush2.msra.mxu0 %v3617_v45  ;;  %14187 = vst [vmem:[#allocation91_spill] sm:$0xff] %v9385_v35  ;;  %v732_v36 = vsub.f32 %v14188_v60, %v8519_v8  ;;  %v1495_v12 = vshrl.u32 %v9284_v50, 4  ;;  %v3514_v28 = vld [vmem:[%s13798_s2 + $0xb0] sm:$0xff]  ;;  %v1517_v14 = vshrl.u32 %v9311_v39, 4  ;;  %v3513_v39 = vld [vmem:[%s13798_s2 + $0xa8] sm:$0xff] }
 0x24b   :  { %3684 = vmatprep.subr.mxu1 %v8865_v51  ;;  %4139 = vmatprep.subr.mxu0 %v8865_v51  ;;  %v781_v44 = vmul.f32 %v730_v47, %v730_v47  ;;  %v3615_v47 = vld [vmem:[%s13798_s2 + $0x3d8] sm:$0xff]  ;;  %v733_v26 = vsub.f32 %v14189_v31, %v8519_v8  ;;  %v782_v50 = vmul.f32 %v731_v30, %v731_v30  ;;  %v3614_v30 = vld [vmem:[%s13798_s2 + $0x3d0] sm:$0xff]  ;;  %vm1808_vm0 = vcmp.lt.s32.totalorder %v9360_v59, 0  ;;  %v3512_v31 = vld [vmem:[%s13798_s2 + $0xa0] sm:$0xff] }
 0x24c   :  { %v830_v53 = vadd.f32 %v829_v41, %v780_v24  ;;  %3685 = vmatpush2.msra.mxu1 %v3515_v33  ;;  %4140 = vmatpush2.msra.mxu0 %v3616_v61  ;;  %v9418_v43 = vmul.u32.u64.low 2863311531, %v9391_v42  ;;  %v9419_v24 = vmul.u32.u64.high 2863311531, %v9391_v42, %v9418_v43  ;;  %v9422_v41 = vadd.s32 272, %v8420_v16  ;;  %v14190_v61 = vld [vmem:[#allocation44_spill] sm:$0xff]  ;;  %vm9495_vm1 = vmand %vm1808_vm0, %vm1757_vm15 }
 0x24d   :  { %3686 = vmatprep.subr.mxu1 %v8865_v51  ;;  %4141 = vmatprep.subr.mxu0 %v8865_v51  ;;  %v9425_v33 = vadd.s32 280, %v8420_v16  ;;  %v1496_v43 = vmul.u32 24, %v1495_v12  ;;  %v1507_v35 = vmul.u32 24, %v1506_v34  ;;  %v1528_v29 = vshrl.u32 %v9365_v27, 4  ;;  %v3511_v27 = vld [vmem:[%s13798_s2 + $0x98] sm:$0xff] }
 0x24e   :  { %v831_v45 = vadd.f32 %v830_v53, %v781_v44  ;;  %3687 = vmatpush2.msra.mxu1 %v3514_v28  ;;  %4142 = vmatpush2.msra.mxu0 %v3615_v47  ;;  %v734_v44 = vsub.f32 %v14190_v61, %v8519_v8  ;;  %v783_v53 = vmul.f32 %v732_v36, %v732_v36  ;;  %v3613_v36 = vld [vmem:[%s13798_s2 + $0x3c8] sm:$0xff]  ;;  %vm1758_vm2 = vcmp.ne.s32.totalorder %v9388_v62, 0 }
 0x24f   :  { %3688 = vmatprep.subr.mxu1 %v8865_v51  ;;  %4143 = vmatprep.subr.mxu0 %v8865_v51  ;;  %v9439_v47 = vsub.s32 %v9231_v40, %v1485_v52  ;;  %v14191_v40 = vld [vmem:[#allocation45_spill] sm:$0xff]  ;;  %v784_v12 = vmul.f32 %v733_v26, %v733_v26  ;;  %v9481_v60 = vsub.s32 %v9250_v56, %v1507_v35  ;;  %v1529_v57 = vmul.u32 24, %v1528_v29  ;;  %v14195_v56 = vld [vmem:[#allocation48_spill] sm:$0xff] }
 0x250   :  { %v832_v28 = vadd.f32 %v831_v45, %v782_v50  ;;  %3689 = vmatpush2.msra.mxu1 %v3513_v39  ;;  %4144 = vmatpush2.msra.mxu0 %v3614_v30  ;;  %v1518_v50 = vmul.u32 24, %v1517_v14  ;;  %v735_v52 = vsub.f32 %v14191_v40, %v8519_v8  ;;  %v3612_v45 = vld [vmem:[%s13798_s2 + $0x3c0] sm:$0xff]  ;;  %v3611_v26 = vld [vmem:[%s13798_s2 + $0x3b8] sm:$0xff]  ;;  %v9478_v40 = vsub.s32 %v9247_v58, %v1496_v43 }
 0x251   :  { %3690 = vmatprep.subr.mxu1 %v8865_v51  ;;  %4145 = vmatprep.subr.mxu0 %v8865_v51  ;;  %v9459_v39 = vmul.u32.u64.low 2863311531, %v9422_v41  ;;  %v9460_v30 = vmul.u32.u64.high 2863311531, %v9422_v41, %v9459_v39  ;;  %v9463_v14 = vmul.u32.u64.low 2863311531, %v9425_v33  ;;  %v9464_v61 = vmul.u32.u64.high 2863311531, %v9425_v33, %v9463_v14  ;;  %v3607_v58 = vld [vmem:[%s13798_s2 + $0x398] sm:$0xff] }
 0x252   :  { %v833_v34 = vadd.f32 %v832_v28, %v783_v53  ;;  %3691 = vmatpush2.msra.mxu1 %v3512_v31  ;;  %4146 = vmatpush2.msra.mxu0 %v3613_v36  ;;  %v3510_v31 = vld [vmem:[%s13798_s2 + $0x90] sm:$0xff]  ;;  %v14192_v53 = vld [vmem:[#allocation46_spill] sm:$0xff]  ;;  %v785_v36 = vmul.f32 %v734_v44, %v734_v44  ;;  %v1910_v14 = vadd.s32 24, %v9360_v59  ;;  %v737_v29 = vsub.f32 %v14195_v56, %v8519_v8 }
 0x253   :  { %3692 = vmatprep.subr.mxu1 %v8865_v51  ;;  %4147 = vmatprep.subr.mxu0 %v8865_v51  ;;  %v736_v28 = vsub.f32 %v14192_v53, %v8519_v8  ;;  %v3509_v44 = vld [vmem:[%s13798_s2 + $0x88] sm:$0xff]  ;;  %v786_v35 = vmul.f32 %v735_v52, %v735_v52  ;;  %vm1809_vm3 = vcmp.lt.s32.totalorder %v9388_v62, 0  ;;  %v3508_v52 = vld [vmem:[%s13798_s2 + $0x80] sm:$0xff]  ;;  %vm1759_vm4 = vcmp.ne.s32.totalorder %v9439_v47, 0 }
 0x254   :  { %v834_v39 = vadd.f32 %v833_v34, %v784_v12  ;;  %3693 = vmatpush2.msra.mxu1 %v3511_v27  ;;  %4148 = vmatpush2.msra.mxu0 %v3612_v45  ;;  %v3610_v12 = vld [vmem:[%s13798_s2 + $0x3b0] sm:$0xff]  ;;  %v1911_v34 = vadd.s32 24, %v9388_v62  ;;  %v9505_v27 = vsub.s32 %v9269_v48, %v1518_v50  ;;  %v1539_v45 = vshrl.u32 %v9419_v24, 4  ;;  %vm9537_vm7 = vmand %vm1809_vm3, %vm1758_vm2 }
 0x255   :  { %3694 = vmatprep.subr.mxu1 %v8865_v51  ;;  %4149 = vmatprep.subr.mxu0 %v8865_v51  ;;  %vm1810_vm5 = vcmp.lt.s32.totalorder %v9439_v47, 0  ;;  %v787_v48 = vmul.f32 %v736_v28, %v736_v28  ;;  %v9521_v24 = vsel %vm9495_vm1, %v1910_v14, %v9360_v59  ;;  %vm1760_vm6 = vcmp.ne.s32.totalorder %v9478_v40, 0  ;;  %v3608_v28 = vld [vmem:[%s13798_s2 + $0x3a0] sm:$0xff] }
 0x256   :  { %v835_v43 = vadd.f32 %v834_v39, %v785_v36  ;;  %3695 = vmatpush2.msra.mxu1 %v3510_v31  ;;  %4150 = vmatpush2.msra.mxu0 %v3611_v26  ;;  %v3609_v31 = vld [vmem:[%s13798_s2 + $0x3a8] sm:$0xff]  ;;  %14196 = vst [vmem:[#allocation48_spill] sm:$0xff] %v9521_v24  ;;  %v1912_v26 = vadd.s32 24, %v9439_v47  ;;  %v9526_v36 = vsub.s32 %v9314_v37, %v1529_v57  ;;  %vm1811_vm8 = vcmp.lt.s32.totalorder %v9478_v40, 0  ;;  %v3539_v39 = vld [vmem:[%s13798_s2 + $0x178] sm:$0xff]  ;;  %vm9550_vm10 = vmand %vm1810_vm5, %vm1759_vm4 }
 0x257   :  { %3696 = vmatprep.subr.mxu1 %v8865_v51  ;;  %4151 = vmatprep.subr.mxu0 %v8865_v51  ;;  %vm1761_vm9 = vcmp.ne.s32.totalorder %v9481_v60, 0  ;;  %v788_v37 = vmul.f32 %v737_v29, %v737_v29  ;;  %vm1812_vm11 = vcmp.lt.s32.totalorder %v9481_v60, 0  ;;  %vm1762_vm12 = vcmp.ne.s32.totalorder %v9505_v27, 0  ;;  %vm9577_vm14 = vmand %vm1811_vm8, %vm1760_vm6 }
 0x258   :  { %v836_v50 = vadd.f32 %v835_v43, %v786_v35  ;;  %3697 = vmatpush2.msra.mxu1 %v3509_v44  ;;  %4152 = vmatpush2.msra.mxu0 %v3610_v12  ;;  %v1540_v44 = vmul.u32 24, %v1539_v45  ;;  %v1550_v12 = vshrl.u32 %v9460_v30, 4  ;;  %vm1813_vm13 = vcmp.lt.s32.totalorder %v9505_v27, 0  ;;  %vm9600_vm1 = vmand %vm1812_vm11, %vm1761_vm9 }
 0x259   :  { %3698 = vmatprep.subr.mxu1 %v8865_v51  ;;  %4153 = vmatprep.subr.mxu0 %v8865_v51  ;;  %v1561_v29 = vshrl.u32 %v9464_v61, 4  ;;  %v9565_v35 = vadd.s32 288, %v8420_v16  ;;  %v9571_v30 = vsel %vm9537_vm7, %v1911_v34, %v9388_v62  ;;  %vm1763_vm15 = vcmp.ne.s32.totalorder %v9526_v36, 0  ;;  %v3538_v62 = vld [vmem:[%s13798_s2 + $0x170] sm:$0xff]  ;;  %vm9613_vm2 = vmand %vm1813_vm13, %vm1762_vm12 }
 0x25a   :  { %v837_v57 = vadd.f32 %v836_v50, %v787_v48  ;;  %3699 = vmatpush2.msra.mxu1 %v3508_v52  ;;  %4154 = vmatpush2.msra.mxu0 %v3609_v31  ;;  %14201 = vst [vmem:[#allocation92_spill] sm:$0xff] %v9571_v30  ;;  %vm1814_vm0 = vcmp.lt.s32.totalorder %v9526_v36, 0  ;;  %v9584_v61 = vadd.s32 296, %v8420_v16  ;;  %v9593_v34 = vsel %vm9550_vm10, %v1912_v26, %v9439_v47  ;;  %v3606_v47 = vld [vmem:[%s13798_s2 + $0x390] sm:$0xff] }
 0x25b   :  { %3701 = vmatmul.mubr.f32.vlgmr.msra.gmra.mxu1 %v8865_v51  ;;  %4155 = vmatprep.subr.mxu0 %v8865_v51  ;;  %14204 = vst [vmem:[#allocation93_spill] sm:$0xff] %v9593_v34  ;;  %v1913_v52 = vadd.s32 24, %v9478_v40  ;;  %v1914_v48 = vadd.s32 24, %v9481_v60  ;;  %v1916_v59 = vadd.s32 24, %v9526_v36  ;;  %vm9631_vm3 = vmand %vm1814_vm0, %vm1763_vm15  ;;  %v3605_v34 = vld [vmem:[%s13798_s2 + $0x388] sm:$0xff]  ;;  %v9648_v53 = vadd.s32 304, %v8420_v16 }
 0x25c   :  { %v838_v43 = vadd.f32 %v837_v57, %v788_v37  ;;  %3791 = vmatprep.subr.mxu1 %v8865_v51  ;;  %4156 = vmatpush2.msra.mxu0 %v3608_v28  ;;  %v1915_v28 = vadd.s32 24, %v9505_v27  ;;  %v9620_v37 = vsub.s32 %v9391_v42, %v1540_v44  ;;  %v1551_v57 = vmul.u32 24, %v1550_v12 }
 0x25d   :  { %3792 = vmatpush1.msra.mxu1 %v3539_v39  ;;  %4157 = vmatprep.subr.mxu0 %v8865_v51  ;;  %v3537_v39 = vld [vmem:[%s13798_s2 + $0x168] sm:$0xff]  ;;  %v9636_v42 = vmul.u32.u64.low 2863311531, %v9565_v35  ;;  %v9637_v44 = vmul.u32.u64.high 2863311531, %v9565_v35, %v9636_v42  ;;  %v9644_v30 = vmul.u32.u64.low 2863311531, %v9584_v61  ;;  %v9645_v24 = vmul.u32.u64.high 2863311531, %v9584_v61, %v9644_v30 }
 0x25e   :  { %v839_v50 = vrot.slane %v838_v43, 4  ;;  %3705 = vmatprep.mubr.f32.mxu1 %v8865_v51  ;;  %4158 = vmatpush2.msra.mxu0 %v3607_v58  ;;  %v1562_v58 = vmul.u32 24, %v1561_v29  ;;  %v9651_v29 = vadd.s32 312, %v8420_v16  ;;  %v9665_v30 = vsel %vm9600_vm1, %v1914_v48, %v9481_v60  ;;  %v3604_v42 = vld [vmem:[%s13798_s2 + $0x380] sm:$0xff] }
 0x25f   :  { %3706 = vmatmul.mubr.f32.gmra.mxu1 %v8865_v51  ;;  %3793 = vmatprep.subr.mxu1 %v8865_v51  ;;  %14212 = vst [vmem:[#allocation95_spill] sm:$0xff] %v9665_v30  ;;  %v9682_v60 = vsel %vm9631_vm3, %v1916_v59, %v9526_v36  ;;  %v9685_v45 = vsub.s32 %v9422_v41, %v1551_v57  ;;  %vm1764_vm4 = vcmp.ne.s32.totalorder %v9620_v37, 0  ;;  %v845_v48 = vmul.f32 119.0, %v8519_v8 }
 0x260   :  { %v840_v12 = vadd.f32 %v839_v50, %v838_v43  ;;  %4159 = vmatprep.subr.mxu0 %v8865_v51  ;;  %3794 = vmatpush1.msra.mxu1 %v3538_v62  ;;  %v3536_v43 = vld [vmem:[%s13798_s2 + $0x160] sm:$0xff]  ;;  %v9660_v62 = vsel %vm9577_vm14, %v1913_v52, %v9478_v40  ;;  %v9668_v50 = vadd.s32 320, %v8420_v16  ;;  %v9677_v40 = vsel %vm9613_vm2, %v1915_v28, %v9505_v27  ;;  %v3535_v52 = vld [vmem:[%s13798_s2 + $0x158] sm:$0xff] }
 0x261   :  { %4160 = vmatpush2.msra.mxu0 %v3606_v47  ;;  %3795 = vmatprep.subr.mxu1 %v8865_v51  ;;  %14211 = vst [vmem:[#allocation94_spill] sm:$0xff] %v9660_v62  ;;  %14213 = vst [vmem:[#allocation96_spill] sm:$0xff] %v9677_v40  ;;  %v9693_v27 = vsub.s32 %v9425_v33, %v1562_v58  ;;  %v9698_v41 = vmul.u32.u64.low 2863311531, %v9648_v53  ;;  %v9699_v36 = vmul.u32.u64.high 2863311531, %v9648_v53, %v9698_v41  ;;  %v3534_v33 = vld [vmem:[%s13798_s2 + $0x150] sm:$0xff]  ;;  %vm1815_vm5 = vcmp.lt.s32.totalorder %v9620_v37, 0 }
 0x262   :  { %v841_v47 = vrot.slane %v840_v12, 2  ;;  %4161 = vmatprep.subr.mxu0 %v8865_v51  ;;  %3796 = vmatpush1.msra.mxu1 %v3537_v39  ;;  %14214 = vst [vmem:[#allocation97_spill] sm:$0xff] %v9682_v60  ;;  %v9710_v28 = vmul.u32.u64.low 2863311531, %v9668_v50  ;;  %v9711_v59 = vmul.u32.u64.high 2863311531, %v9668_v50, %v9710_v28  ;;  %v9714_v39 = vadd.s32 400, %v8420_v16  ;;  %vm9784_vm10 = vmand %vm1815_vm5, %vm1764_vm4 }
 0x263   :  { %4162 = vmatpush2.msra.mxu0 %v3605_v34  ;;  %3797 = vmatprep.subr.mxu1 %v8865_v51  ;;  %v9702_v34 = vmul.u32.u64.low 2863311531, %v9651_v29  ;;  %v9703_v26 = vmul.u32.u64.high 2863311531, %v9651_v29, %v9702_v34  ;;  %v9718_v14 = vadd.s32 24, %v9620_v37  ;;  %vm1765_vm6 = vcmp.ne.s32.totalorder %v9685_v45, 0 }
 0x264   :  { %v842_v31 = vadd.f32 %v841_v47, %v840_v12  ;;  %4163 = vmatprep.subr.mxu0 %v8865_v51  ;;  %3798 = vmatpush1.msra.mxu1 %v3536_v43  ;;  %v9722_v58 = vadd.s32 328, %v8420_v16  ;;  %v3533_v12 = vld [vmem:[%s13798_s2 + $0x148] sm:$0xff]  ;;  %vm1816_vm7 = vcmp.lt.s32.totalorder %v9685_v45, 0  ;;  %v1572_v43 = vshrl.u32 %v9637_v44, 4  ;;  %v9737_v34 = vld [vmem:[#allocation2 + $0x18] sm:$0xff]  ;;  %v3532_v44 = vld [vmem:[%s13798_s2 + $0x140] sm:$0xff] }
 0x265   :  { %4164 = vmatpush2.msra.mxu0 %v3604_v42  ;;  %3799 = vmatprep.subr.mxu1 %v8865_v51  ;;  %v846_v42 = vmul.f32 %v845_v48, %v8519_v8  ;;  %vm1766_vm8 = vcmp.ne.s32.totalorder %v9693_v27, 0  ;;  %v1583_v41 = vshrl.u32 %v9645_v24, 4  ;;  %vm1817_vm9 = vcmp.lt.s32.totalorder %v9693_v27, 0  ;;  %vm9804_vm11 = vmand %vm1816_vm7, %vm1765_vm6 }
 0x266   :  { %v843_v57 = vrot.slane %v842_v31, 1  ;;  %3800 = vmatpush1.msra.mxu1 %v3535_v52  ;;  %v1918_v52 = vadd.s32 24, %v9685_v45  ;;  %v9749_v24 = vmul.u32.u64.low 2863311531, %v9722_v58  ;;  %v9750_v28 = vmul.u32.u64.high 2863311531, %v9722_v58, %v9749_v24  ;;  %vm9833_vm12 = vmand %vm1817_vm9, %vm1766_vm8 }
 0x267   :  { %3801 = vmatprep.subr.mxu1 %v8865_v51  ;;  %v9735_v51 = vadd.s32 336, %v8420_v16  ;;  %v9756_v60 = vadd.s32 352, %v8420_v16  ;;  %v1584_v24 = vmul.u32 24, %v1583_v41  ;;  %v1605_v22 = vshrl.u32 %v9703_v26, 4 }
 0x268   :  { %v844_v47 = vadd.f32 %v843_v57, %v842_v31  ;;  %3802 = vmatpush1.msra.mxu1 %v3534_v33  ;;  %v9745_v48 = vmul.u32.u64.low 2863311531, %v9714_v39  ;;  %v9746_v33 = vmul.u32.u64.high 2863311531, %v9714_v39, %v9745_v48  ;;  %v9753_v57 = vadd.s32 344, %v8420_v16 }
 0x269   :  { %3803 = vmatprep.subr.mxu1 %v9737_v34  ;;  %v1573_v48 = vmul.u32 24, %v1572_v43  ;;  %v9767_v30 = vmul.u32.u64.low 2863311531, %v9735_v51  ;;  %v9768_v62 = vmul.u32.u64.high 2863311531, %v9735_v51, %v9767_v30  ;;  %v1594_v43 = vshrl.u32 %v9699_v36, 4 }
 0x26a   :  { %v847_v31 = vsub.f32 %v844_v47, %v846_v42  ;;  %3804 = vmatpush1.msra.mxu1 %v3533_v12  ;;  %v3531_v47 = vld [vmem:[%s13798_s2 + $0x138] sm:$0xff]  ;;  %v1919_v42 = vadd.s32 24, %v9693_v27  ;;  %v9764_v12 = vadd.s32 360, %v8420_v16  ;;  %v9850_v0 = vsel %vm9804_vm11, %v1918_v52, %v9685_v45 }
 0x26b   :  { %3805 = vmatprep.subr.mxu1 %v9737_v34  ;;  %v9793_v36 = vmul.u32.u64.low 2863311531, %v9756_v60  ;;  %v9794_v18 = vmul.u32.u64.high 2863311531, %v9756_v60, %v9793_v36  ;;  %v9816_v32 = vsub.s32 %v9565_v35, %v1573_v48  ;;  %v1595_v35 = vmul.u32 24, %v1594_v43  ;;  %14222 = vst [vmem:[#allocation99_spill] sm:$0xff] %v9850_v0 }
 0x26c   :  { %v848_v40 = vmul.f32 0.0034602077, %v847_v31  ;;  %3806 = vmatpush1.msra.mxu1 %v3532_v44  ;;  %v1616_v44 = vshrl.u32 %v9711_v59, 4  ;;  %v9789_v31 = vmul.u32.u64.low 2863311531, %v9753_v57  ;;  %v9790_v49 = vmul.u32.u64.high 2863311531, %v9753_v57, %v9789_v31 }
 0x26d   :  { %3807 = vmatprep.subr.mxu1 %v9737_v34  ;;  %v9813_v31 = vadd.s32 376, %v8420_v16  ;;  %v9819_v2 = vmul.u32.u64.low 2863311531, %v9771_v55  ;;  %v9820_v38 = vmul.u32.u64.high 2863311531, %v9771_v55, %v9819_v2  ;;  %v1726_v48 = vshrl.u32 %v9746_v33, 4  ;;  %v3527_v33 = vld [vmem:[%s13798_s2 + $0x118] sm:$0xff] }
 0x26e   :  { %v849_v41 = vmax.f32 %v848_v40, 0.0  ;;  %3808 = vmatpush1.msra.mxu1 %v3531_v47  ;;  %v3529_v40 = vld [vmem:[%s13798_s2 + $0x128] sm:$0xff]  ;;  %v9809_v59 = vmul.u32.u64.low 2863311531, %v9764_v12  ;;  %v9810_v47 = vmul.u32.u64.high 2863311531, %v9764_v12, %v9809_v59  ;;  %v9838_v2 = vadd.s32 392, %v8420_v16 }
 0x26f   :  { %3809 = vmatprep.subr.mxu1 %v9737_v34  ;;  %v3528_v59 = vld [vmem:[%s13798_s2 + $0x120] sm:$0xff]  ;;  %v1606_v10 = vmul.u32 24, %v1605_v22  ;;  %v1627_v43 = vshrl.u32 %v9750_v28, 4  ;;  %v1617_v30 = vmul.u32 24, %v1616_v44  ;;  %v9867_v22 = vsel %vm9833_vm12, %v1919_v42, %v9693_v27 }
 0x270   :  { %v850_v36 = vadd.f32 1e-05, %v849_v41  ;;  %3810 = vmatpush1.msra.mxu1 %v3530_v46  ;;  %v9845_v41 = vsel %vm9784_vm10, %v9718_v14, %v9620_v37  ;;  %v9861_v37 = vmul.u32.u64.low 2863311531, %v9813_v31  ;;  %v9862_v14 = vmul.u32.u64.high 2863311531, %v9813_v31, %v9861_v37  ;;  %14223 = vst [vmem:[#allocation100_spill] sm:$0xff] %v9867_v22 }
 0x271   :  { %3811 = vmatprep.subr.mxu1 %v9737_v34  ;;  %14221 = vst [vmem:[#allocation98_spill] sm:$0xff] %v9845_v41  ;;  %v1638_v45 = vshrl.u32 %v9768_v62, 4  ;;  %v9871_v52 = vmul.u32.u64.low 2863311531, %v9823_v4  ;;  %v9872_v28 = vmul.u32.u64.high 2863311531, %v9823_v4, %v9871_v52  ;;  %vm1767_vm13 = vcmp.ne.s32.totalorder %v9816_v32, 0 }
 0x272   :  { %7589 = vrsqrt.f32 %v850_v36  ;;  %3812 = vmatpush1.msra.mxu1 %v3529_v40  ;;  %v9858_v40 = vsub.s32 %v9584_v61, %v1584_v24  ;;  %v3526_v61 = vld [vmem:[%s13798_s2 + $0x110] sm:$0xff]  ;;  %v9880_v24 = vsub.s32 %v9648_v53, %v1595_v35  ;;  %v1727_v62 = vmul.u32 24, %v1726_v48  ;;  %v3525_v53 = vld [vmem:[%s13798_s2 + $0x108] sm:$0xff] }
 0x273   :  { %3813 = vmatprep.subr.mxu1 %v9737_v34  ;;  %v9883_v27 = vmul.u32.u64.low 2863311531, %v9838_v2  ;;  %v9884_v42 = vmul.u32.u64.high 2863311531, %v9838_v2, %v9883_v27  ;;  %vm1818_vm14 = vcmp.lt.s32.totalorder %v9816_v32, 0  ;;  %v1628_v44 = vmul.u32 24, %v1627_v43  ;;  %v3524_v43 = vld [vmem:[%s13798_s2 + $0x100] sm:$0xff] }
 0x274   :  { %3814 = vmatpush1.msra.mxu1 %v3528_v59  ;;  %v1649_v26 = vshrl.u32 %v9790_v49, 4  ;;  %v1660_v36 = vshrl.u32 %v9794_v18, 4  ;;  %v9894_v59 = vadd.s32 24, %v9816_v32  ;;  %vm1768_vm15 = vcmp.ne.s32.totalorder %v9858_v40, 0  ;;  %v3554_v27 = vld [vmem:[%s13798_s2 + $0x1f0] sm:$0xff]  ;;  %vm9967_vm11 = vmand %vm1818_vm14, %vm1767_vm13 }
 0x275   :  { %3815 = vmatprep.subr.mxu1 %v9737_v34  ;;  %v9898_v46 = vsub.s32 %v9651_v29, %v1606_v10  ;;  %v9901_v35 = vsub.s32 %v9668_v50, %v1617_v30  ;;  %vm1819_vm0 = vcmp.lt.s32.totalorder %v9858_v40, 0  ;;  %v1639_v18 = vmul.u32 24, %v1638_v45  ;;  %v3555_v30 = vld [vmem:[%s13798_s2 + $0x1f8] sm:$0xff] }
 0x276   :  { %3816 = vmatpush1.msra.mxu1 %v3527_v33  ;;  %v1671_v49 = vshrl.u32 %v9810_v47, 4  ;;  %v1682_v48 = vshrl.u32 %v9820_v38, 4  ;;  %v9911_v10 = vadd.s32 24, %v9858_v40  ;;  %vm1769_vm1 = vcmp.ne.s32.totalorder %v9880_v24, 0  ;;  %vm9975_vm12 = vmand %vm1819_vm0, %vm1768_vm15 }
 0x277   :  { %3817 = vmatprep.subr.mxu1 %v9737_v34  ;;  %vm1820_vm2 = vcmp.lt.s32.totalorder %v9880_v24, 0  ;;  %v9916_v29 = vsub.s32 %v9714_v39, %v1727_v62  ;;  %v9919_v50 = vadd.s32 24, %v9880_v24  ;;  %v9922_v38 = vsub.s32 %v9722_v58, %v1628_v44 }
 0x278   :  { %3818 = vmatpush1.msra.mxu1 %v3526_v61  ;;  %v1650_v47 = vmul.u32 24, %v1649_v26  ;;  %v1661_v33 = vmul.u32 24, %v1660_v36  ;;  %vm1770_vm3 = vcmp.ne.s32.totalorder %v9898_v46, 0  ;;  %vm1821_vm4 = vcmp.lt.s32.totalorder %v9898_v46, 0  ;;  %v627_v61 = vld [vmem:[%s13801_s5] sm:$0x1]  ;;  %vm10005_vm14 = vmand %vm1820_vm2, %vm1769_vm1 }
 0x279   :  { %3819 = vmatprep.subr.mxu1 %v9737_v34  ;;  %vm1771_vm5 = vcmp.ne.s32.totalorder %v9901_v35, 0  ;;  %v1693_v39 = vshrl.u32 %v9862_v14, 4  ;;  %v9933_v58 = vsub.s32 %v9735_v51, %v1639_v18  ;;  %v1672_v37 = vmul.u32 24, %v1671_v49  ;;  %vm10013_vm15 = vmand %vm1821_vm4, %vm1770_vm3 }
 0x27a   :  { %3820 = vmatpush1.msra.mxu1 %v3525_v53  ;;  %v1683_v45 = vmul.u32 24, %v1682_v48  ;;  %v1704_v52 = vshrl.u32 %v9872_v28, 4  ;;  %v1715_v14 = vshrl.u32 %v9884_v42, 4  ;;  %v9945_v62 = vsub.s32 0, %v8420_v16  ;;  %v3553_v42 = vld [vmem:[%s13798_s2 + $0x1e8] sm:$0xff] }
 0x27b   :  { %3821 = vmatprep.subr.mxu1 %v9737_v34  ;;  %vm1781_vm6 = vcmp.ne.s32.totalorder %v9916_v29, 0  ;;  %vm1832_vm7 = vcmp.lt.s32.totalorder %v9916_v29, 0  ;;  %vm1822_vm8 = vcmp.lt.s32.totalorder %v9901_v35, 0  ;;  %vm1772_vm9 = vcmp.ne.s32.totalorder %v9922_v38, 0 }
 0x27c   :  { %3822 = vmatpush1.msra.mxu1 %v3524_v43  ;;  %14224 = vst [vmem:[#allocation101_spill] sm:$0xff] %v9945_v62  ;;  %v9952_v28 = vsub.s32 %v9753_v57, %v1650_v47  ;;  %v9955_v44 = vsub.s32 %v9756_v60, %v1661_v33  ;;  %v1694_v26 = vmul.u32 24, %v1693_v39  ;;  %v1934_v53 = vadd.s32 24, %v9916_v29  ;;  %v628_v43 = vld [vmem:[%s13802_s6] sm:$0x1]  ;;  %vm9993_vm13 = vmand %vm1832_vm7, %vm1781_vm6  ;;  %v14286_v60 = vld [vmem:[#allocation10_spill] sm:$0xff] }
 0x27d   :  { %3823 = vmatprep.subr.mxu1 %v9737_v34  ;;  %vm1773_vm10 = vcmp.ne.s32.totalorder %v9933_v58, 0  ;;  %v9981_v18 = vsub.s32 %v9764_v12, %v1672_v37  ;;  %v9984_v49 = vsub.s32 %v9771_v55, %v1683_v45  ;;  %v1705_v48 = vmul.u32 24, %v1704_v52  ;;  %v3552_v55 = vld [vmem:[%s13798_s2 + $0x1e0] sm:$0xff]  ;;  %vm10029_vm1 = vmand %vm1822_vm8, %vm1771_vm5  ;;  %v14288_v57 = vld [vmem:[#allocation12_spill] sm:$0xff] }
 0x27e   :  { %3824 = vmatpush2.msra.mxu1 %v3555_v30  ;;  %vm1824_vm0 = vcmp.lt.s32.totalorder %v9933_v58, 0  ;;  %v1716_v30 = vmul.u32 24, %v1715_v14  ;;  %v10023_v45 = vadd.s32 24, %v9898_v46  ;;  %vm1774_vm2 = vcmp.ne.s32.totalorder %v9952_v28, 0 }
 0x27f   :  { %v7590_v51 = vpop.eup %7589  ;;  %3825 = vmatprep.subr.mxu1 %v9737_v34  ;;  %vm1825_vm3 = vcmp.lt.s32.totalorder %v9952_v28, 0  ;;  %vm1775_vm4 = vcmp.ne.s32.totalorder %v9955_v44, 0  ;;  %vm14237_vm6 = vcmp.lt.s32.totalorder %v9922_v38, 0  ;;  %vm10059_vm8 = vmand %vm1824_vm0, %vm1773_vm10  ;;  %vm14245_vm0 = vcmp.lt.s32.totalorder %v9955_v44, 0 }
 0x280   :  { %v852_v36 = vmul.f32 %v7590_v51, %v627_v61  ;;  %3826 = vmatpush2.msra.mxu1 %v3554_v27  ;;  %vm10044_vm5 = vmand %vm14237_vm6, %vm1772_vm9  ;;  %v10050_v27 = vsub.s32 %v9813_v31, %v1694_v26  ;;  %v1985_v51 = vsel %vm9993_vm13, %v1934_v53, %v9916_v29  ;;  %vm1776_vm9 = vcmp.ne.s32.totalorder %v9981_v18, 0  ;;  %v3550_v29 = vld [vmem:[%s13798_s2 + $0x1d0] sm:$0xff] }
 0x281   :  { %3827 = vmatprep.subr.mxu1 %v9737_v34  ;;  %vm1827_vm6 = vcmp.lt.s32.totalorder %v9981_v18, 0  ;;  %v10067_v31 = vsub.s32 %v9823_v4, %v1705_v48  ;;  %vm10077_vm10 = vmand %vm1825_vm3, %vm1774_vm2  ;;  %v14242_v26 = vmov 0  ;;  %v1924_v48 = vadd.s32 24, %v9901_v35 }
 0x282   :  { %v853_v39 = vmul.f32 %v852_v36, %v8519_v8  ;;  %v10020_v37 = vrot.slane %v852_v36, %v9945_v62  ;;  %3828 = vmatpush2.msra.mxu1 %v3553_v42  ;;  %v3551_v8 = vld [vmem:[%s13798_s2 + $0x1d8] sm:$0xff]  ;;  %v14243_v26 = vsel %vm10077_vm10, 4294967295, %v14242_v26  ;;  %v10083_v36 = vsub.s32 %v9838_v2, %v1716_v30  ;;  %vm10096_vm2 = vmand %vm14245_vm0, %vm1775_vm4  ;;  %v14291_v42 = vld [vmem:[#allocation27_spill] sm:$0xff] }
 0x283   :  { %3829 = vmatprep.subr.mxu1 %v9737_v34  ;;  %v14246_v47 = vmov 0  ;;  %v1926_v2 = vadd.s32 24, %v9933_v58  ;;  %vm10109_vm7 = vmand %vm1827_vm6, %vm1776_vm9  ;;  %vm14250_vm3 = vcmp.ne.s32.totalorder %v9984_v49, 0  ;;  %vm14251_vm13 = vcmp.lt.s32.totalorder %v9984_v49, 0 }
 0x284   :  { %v854_v14 = vsub.f32 %v628_v43, %v853_v39  ;;  %3830 = vmatpush2.msra.mxu1 %v3552_v55  ;;  %v909_v4 = vmul.f32 %v10020_v37, %v14195_v56  ;;  %v1925_v43 = vadd.s32 24, %v9922_v38  ;;  %v14247_v47 = vsel %vm10096_vm2, 4294967295, %v14246_v47  ;;  %v3549_v56 = vld [vmem:[%s13798_s2 + $0x1c8] sm:$0xff]  ;;  %vm10122_vm2 = vmand %vm14251_vm13, %vm14250_vm3 }
 0x285   :  { %3831 = vmatprep.subr.mxu1 %v9737_v34  ;;  %v14248_v55 = vmov 0  ;;  %v1927_v39 = vadd.s32 24, %v9952_v28  ;;  %vm1831_vm4 = vcmp.lt.s32.totalorder %v10083_v36, 0  ;;  %vm14254_vm13 = vcmp.le.s32.totalorder %v1985_v51, 17 }
 0x286   :  { %v10088_v53 = vrot.slane %v854_v14, %v9945_v62  ;;  %3832 = vmatpush2.msra.mxu1 %v3551_v8  ;;  %v14249_v55 = vsel %vm10109_vm7, 4294967295, %v14248_v55  ;;  %v1928_v8 = vadd.s32 24, %v9955_v44  ;;  %vm14255_vm3 = vcmp.ge.s32.totalorder %v1985_v51, 1  ;;  %v14298_v14 = vld [vmem:[#allocation34_spill] sm:$0xff] }
 0x287   :  { %3833 = vmatprep.subr.mxu1 %v9737_v34  ;;  %vm10136_vm10 = vmand %vm14255_vm3, %vm14254_vm13  ;;  %v1929_v16 = vadd.s32 24, %v9981_v18  ;;  %v1930_v22 = vadd.s32 24, %v9984_v49  ;;  %vm14258_vm6 = vcmp.ne.s32.totalorder %v10050_v27, 0  ;;  %vm14259_vm9 = vcmp.lt.s32.totalorder %v10050_v27, 0 }
 0x288   :  { %14244 = vst [vmem:[#allocation102_spill] sm:$0xff] %v10088_v53  ;;  %v964_v30 = vadd.f32 %v10088_v53, %v909_v4  ;;  %3834 = vmatpush2.msra.mxu1 %v3550_v29  ;;  %v3548_v29 = vld [vmem:[%s13798_s2 + $0x1c0] sm:$0xff]  ;;  %vm10146_vm0 = vmand %vm14259_vm9, %vm14258_vm6  ;;  %v1931_v41 = vadd.s32 24, %v10050_v27  ;;  %v1932_v51 = vadd.s32 24, %v10067_v31  ;;  %v10160_v53 = vsel %vm9967_vm11, %v9894_v59, %v9816_v32 }
 0x289   :  { %3835 = vmatprep.subr.mxu1 %v9737_v34  ;;  %14262 = vst [vmem:[#allocation103_spill] sm:$0xff] %v10160_v53  ;;  %v10166_v20 = vsel %vm9975_vm12, %v9911_v10, %v9858_v40  ;;  %vm14264_vm9 = vcmp.ne.s32.totalorder %v10067_v31, 0  ;;  %vm14265_vm6 = vcmp.lt.s32.totalorder %v10067_v31, 0  ;;  %v1933_v54 = vadd.s32 24, %v10083_v36  ;;  %v14300_v10 = vld [vmem:[#allocation36_spill] sm:$0xff] }
 0x28a   :  { %vm1015_vm7 = vcmp.ge.f32.partialorder %v964_v30, 0.0  ;;  %v1066_v4 = vmul.f32 0.01, %v964_v30  ;;  %3836 = vmatpush2.msra.mxu1 %v3549_v56  ;;  %v3547_v56 = vld [vmem:[%s13798_s2 + $0x1b8] sm:$0xff]  ;;  %14263 = vst [vmem:[#allocation104_spill] sm:$0xff] %v10166_v20  ;;  %vm10172_vm13 = vmand %vm14265_vm6, %vm14264_vm9  ;;  %v10181_v32 = vsel %vm10005_vm14, %v9919_v50, %v9880_v24  ;;  %v10187_v40 = vsel %vm10013_vm15, %v10023_v45, %v9898_v46  ;;  %v3546_v46 = vld [vmem:[%s13798_s2 + $0x1b0] sm:$0xff] }
 0x28b   :  { %3837 = vmatprep.subr.mxu1 %v9737_v34  ;;  %14268 = vst [vmem:[#allocation105_spill] sm:$0xff] %v10181_v32  ;;  %14269 = vst [vmem:[#allocation106_spill] sm:$0xff] %v10187_v40  ;;  %v10192_v59 = vsel %vm10029_vm1, %v1924_v48, %v9901_v35  ;;  %vm14271_vm11 = vcmp.ne.s32.totalorder %v10083_v36, 0  ;;  %v10211_v35 = vsel %vm10044_vm5, %v1925_v43, %v9922_v38  ;;  %vm14276_vm14 = vnez %v14243_v26  ;;  %v3544_v45 = vld [vmem:[%s13798_s2 + $0x1a0] sm:$0xff] }
 0x28c   :  { %v1117_v25 = vsel %vm1015_vm7, %v964_v30, %v1066_v4  ;;  %3838 = vmatpush2.msra.mxu1 %v3548_v29  ;;  %14270 = vst [vmem:[#allocation107_spill] sm:$0xff] %v10192_v59  ;;  %vm10198_vm12 = vmand %vm1831_vm4, %vm14271_vm11  ;;  %v10216_v50 = vsel %vm10059_vm8, %v1926_v2, %v9933_v58  ;;  %vm14278_vm15 = vnez %v14247_v47  ;;  %vm14280_vm1 = vnez %v14249_v55  ;;  %v14294_v43 = vld [vmem:[#allocation30_spill] sm:$0xff]  ;;  %v14295_v47 = vld [vmem:[#allocation31_spill] sm:$0xff] }
 0x28d   :  { %v2189_v24 = vsel %vm10136_vm10, %v1117_v25, 0.0  ;;  %3839 = vmatprep.subr.mxu1 %v9737_v34  ;;  %14274 = vst [vmem:[#allocation108_spill] sm:$0xff] %v10211_v35  ;;  %14275 = vst [vmem:[#allocation109_spill] sm:$0xff] %v10216_v50  ;;  %v10221_v25 = vsel %vm14276_vm14, %v1927_v39, %v9952_v28  ;;  %v10226_v62 = vsel %vm14278_vm15, %v1928_v8, %v9955_v44  ;;  %v14296_v55 = vld [vmem:[#allocation32_spill] sm:$0xff]  ;;  %v14297_v39 = vld [vmem:[#allocation33_spill] sm:$0xff]  ;;  %v14404_v20 = vmov 0 }
 0x28e   :  { %14277 = vst [vmem:[#allocation110_spill] sm:$0xff] %v10221_v25  ;;  %14279 = vst [vmem:[#allocation111_spill] sm:$0xff] %v10226_v62  ;;  %3840 = vmatpush2.msra.mxu1 %v3547_v56  ;;  %v10231_v38 = vsel %vm14280_vm1, %v1929_v16, %v9981_v18  ;;  %v10236_v58 = vsel %vm10122_vm2, %v1930_v22, %v9984_v49  ;;  %v10241_v28 = vsel %vm10146_vm0, %v1931_v41, %v10050_v27  ;;  %v3545_v16 = vld [vmem:[%s13798_s2 + $0x1a8] sm:$0xff]  ;;  %v3542_v56 = vld [vmem:[%s13798_s2 + $0x190] sm:$0xff] }
 0x28f   :  { %2240 = vst [vmem:[#allocation3 + $0x190] sm:$0xff] %v2189_v24  ;;  %14281 = vst [vmem:[#allocation112_spill] sm:$0xff] %v10231_v38  ;;  %v10246_v44 = vsel %vm10172_vm13, %v1932_v51, %v10067_v31  ;;  %3841 = vmatprep.subr.mxu1 %v9737_v34  ;;  %v10255_v22 = vsel %vm10198_vm12, %v1933_v54, %v10083_v36  ;;  %v10259_v0 = vmul.f32 %v10020_v37, %v14286_v60  ;;  %v14287_v41 = vld [vmem:[#allocation11_spill] sm:$0xff]  ;;  %v14292_v31 = vld [vmem:[#allocation28_spill] sm:$0xff] }
 0x290   :  { %14282 = vst [vmem:[#allocation113_spill] sm:$0xff] %v10236_v58  ;;  %14283 = vst [vmem:[#allocation114_spill] sm:$0xff] %v10241_v28  ;;  %v10263_v6 = vmul.f32 %v10020_v37, %v14287_v41  ;;  %v10267_v18 = vmul.f32 %v10020_v37, %v14288_v57  ;;  %3842 = vmatpush2.msra.mxu1 %v3546_v46  ;;  %v10271_v49 = vmul.f32 %v10020_v37, %v8276_v63  ;;  %v14293_v36 = vld [vmem:[#allocation29_spill] sm:$0xff]  ;;  %v14299_v4 = vld [vmem:[#allocation35_spill] sm:$0xff] }
 0x291   :  { %14284 = vst [vmem:[#allocation115_spill] sm:$0xff] %v10246_v44  ;;  %14285 = vst [vmem:[#allocation116_spill] sm:$0xff] %v10255_v22  ;;  %v10275_v54 = vmul.f32 %v10020_v37, %v8278_v1  ;;  %v10279_v12 = vmul.f32 %v10020_v37, %v8280_v3  ;;  %v10283_v33 = vmul.f32 %v10020_v37, %v8282_v5  ;;  %3843 = vmatprep.subr.mxu1 %v9737_v34  ;;  %v14301_v46 = vld [vmem:[#allocation37_spill] sm:$0xff]  ;;  %v14302_v60 = vld [vmem:[#allocation38_spill] sm:$0xff] }
 0x292   :  { %v10291_v63 = vmul.f32 %v10020_v37, %v8284_v7  ;;  %v10295_v1 = vmul.f32 %v10020_v37, %v8286_v9  ;;  %v10299_v3 = vmul.f32 %v10020_v37, %v8288_v11  ;;  %v10303_v5 = vmul.f32 %v10020_v37, %v8290_v13  ;;  %3844 = vmatpush2.msra.mxu1 %v3545_v16  ;;  %v3543_v13 = vld [vmem:[%s13798_s2 + $0x198] sm:$0xff]  ;;  %v14303_v57 = vld [vmem:[#allocation39_spill] sm:$0xff]  ;;  %v14328_v62 = vld [vmem:[#allocation22_spill] sm:$0xff] }
 0x293   :  { %v10307_v52 = vmul.f32 %v10020_v37, %v8292_v15  ;;  %v10311_v7 = vmul.f32 %v10020_v37, %v8294_v17  ;;  %v10315_v9 = vmul.f32 %v10020_v37, %v8296_v19  ;;  %v10319_v11 = vmul.f32 %v10020_v37, %v8298_v21  ;;  %3845 = vmatprep.subr.mxu1 %v9737_v34  ;;  %v14289_v17 = vld [vmem:[#allocation13_spill] sm:$0xff]  ;;  %v14290_v19 = vld [vmem:[#allocation26_spill] sm:$0xff]  ;;  %v14329_v25 = vld [vmem:[#allocation23_spill] sm:$0xff] }
 0x294   :  { %v10327_v15 = vmul.f32 %v10020_v37, %v8300_v23  ;;  %v10331_v61 = vmul.f32 %v10020_v37, %v14289_v17  ;;  %v888_v27 = vmul.f32 %v10020_v37, %v14290_v19  ;;  %v889_v21 = vmul.f32 %v10020_v37, %v14291_v42  ;;  %3846 = vmatpush2.msra.mxu1 %v3544_v45  ;;  %v14304_v17 = vld [vmem:[#allocation40_spill] sm:$0xff]  ;;  %v14305_v19 = vld [vmem:[#allocation41_spill] sm:$0xff] }
 0x295   :  { %v890_v26 = vmul.f32 %v10020_v37, %v14292_v31  ;;  %v891_v48 = vmul.f32 %v10020_v37, %v14293_v36  ;;  %v892_v23 = vmul.f32 %v10020_v37, %v14294_v43  ;;  %v893_v2 = vmul.f32 %v10020_v37, %v14295_v47  ;;  %3847 = vmatprep.subr.mxu1 %v9737_v34  ;;  %v14306_v31 = vld [vmem:[#allocation42_spill] sm:$0xff]  ;;  %v14307_v43 = vld [vmem:[#allocation43_spill] sm:$0xff]  ;;  %v14327_v38 = vld [vmem:[#allocation21_spill] sm:$0xff] }
 0x296   :  { %v894_v30 = vmul.f32 %v10020_v37, %v14296_v55  ;;  %v895_v8 = vmul.f32 %v10020_v37, %v14297_v39  ;;  %v896_v29 = vmul.f32 %v10020_v37, %v14298_v14  ;;  %v897_v51 = vmul.f32 %v10020_v37, %v14299_v4  ;;  %3848 = vmatpush2.msra.mxu1 %v3543_v13  ;;  %v3541_v55 = vld [vmem:[%s13798_s2 + $0x188] sm:$0xff]  ;;  %v14308_v39 = vld [vmem:[#allocation44_spill] sm:$0xff]  ;;  %v14309_v4 = vld [vmem:[#allocation45_spill] sm:$0xff] }
 0x297   :  { %v898_v24 = vmul.f32 %v10020_v37, %v14300_v10  ;;  %v899_v16 = vmul.f32 %v10020_v37, %v14301_v46  ;;  %v900_v41 = vmul.f32 %v10020_v37, %v14302_v60  ;;  %v901_v45 = vmul.f32 %v10020_v37, %v14303_v57  ;;  %3849 = vmatprep.subr.mxu1 %v9737_v34  ;;  %v14310_v46 = vld [vmem:[#allocation46_spill] sm:$0xff]  ;;  %v14330_v50 = vld [vmem:[#allocation24_spill] sm:$0xff]  ;;  %v14331_v35 = vld [vmem:[#allocation25_spill] sm:$0xff] }
 0x298   :  { %v902_v13 = vmul.f32 %v10020_v37, %v14304_v17  ;;  %v903_v42 = vmul.f32 %v10020_v37, %v14305_v19  ;;  %v904_v36 = vmul.f32 %v10020_v37, %v14306_v31  ;;  %v905_v47 = vmul.f32 %v10020_v37, %v14307_v43  ;;  %3850 = vmatpush2.msra.mxu1 %v3542_v56  ;;  %v14311_v57 = vld [vmem:[#allocation102_spill] sm:$0xff]  ;;  %v14401_v32 = vld [vmem:[#allocation61_spill] sm:$0xff] }
 0x299   :  { %v906_v14 = vmul.f32 %v10020_v37, %v14308_v39  ;;  %v907_v10 = vmul.f32 %v10020_v37, %v14309_v4  ;;  %v908_v60 = vmul.f32 %v10020_v37, %v14310_v46  ;;  %v10384_v17 = vadd.f32 %v14311_v57, %v888_v27  ;;  %3851 = vmatprep.subr.mxu1 %v9737_v34  ;;  %v3540_v56 = vld [vmem:[%s13798_s2 + $0x180] sm:$0xff] }
 0x29a   :  { %v10391_v19 = vadd.f32 %v14311_v57, %v889_v21  ;;  %v10394_v31 = vadd.f32 %v14311_v57, %v890_v26  ;;  %v10397_v43 = vadd.f32 %v14311_v57, %v891_v48  ;;  %v10400_v39 = vadd.f32 %v14311_v57, %v892_v23  ;;  %3852 = vmatpush2.msra.mxu1 %v3541_v55  ;;  %v14321_v55 = vld [vmem:[#allocation15_spill] sm:$0xff] }
 0x29b   :  { %v10403_v27 = vadd.f32 %v14311_v57, %v893_v2  ;;  %v10406_v4 = vadd.f32 %v14311_v57, %v894_v30  ;;  %v10409_v46 = vadd.f32 %v14311_v57, %v895_v8  ;;  %v10412_v21 = vadd.f32 %v14311_v57, %v896_v29  ;;  %3853 = vmatprep.subr.mxu1 %v9737_v34 }
 0x29c   :  { %14312 = vst [vmem:[#allocation10_spill] sm:$0xff] %v10394_v31  ;;  %v10416_v26 = vadd.f32 %v14311_v57, %v897_v51  ;;  %v10419_v48 = vadd.f32 %v14311_v57, %v898_v24  ;;  %v10422_v23 = vadd.f32 %v14311_v57, %v899_v16  ;;  %v10425_v2 = vadd.f32 %v14311_v57, %v900_v41 }
 0x29d   :  { %3854 = vmatpush2.msra.mxu1 %v3540_v56  ;;  %v10428_v30 = vadd.f32 %v14311_v57, %v901_v45  ;;  %v10431_v8 = vadd.f32 %v14311_v57, %v902_v13  ;;  %v10434_v29 = vadd.f32 %v14311_v57, %v903_v42  ;;  %v10437_v51 = vadd.f32 %v14311_v57, %v904_v36  ;;  %v14320_v13 = vld [vmem:[#allocation14_spill] sm:$0xff]  ;;  %v14322_v56 = vld [vmem:[#allocation16_spill] sm:$0xff] }
 0x29e   :  { %14313 = vst [vmem:[#allocation11_spill] sm:$0xff] %v10419_v48  ;;  %14314 = vst [vmem:[#allocation12_spill] sm:$0xff] %v10422_v23  ;;  %3946 = vmatprep.subr.mxu1 %v9737_v34  ;;  %v10441_v24 = vadd.f32 %v14311_v57, %v905_v47  ;;  %v10444_v16 = vadd.f32 %v14311_v57, %v906_v14  ;;  %v10447_v41 = vadd.f32 %v14311_v57, %v907_v10  ;;  %v14323_v47 = vld [vmem:[#allocation17_spill] sm:$0xff]  ;;  %v14324_v14 = vld [vmem:[#allocation18_spill] sm:$0xff] }
 0x29f   :  { %14315 = vst [vmem:[#allocation13_spill] sm:$0xff] %v10425_v2  ;;  %14316 = vst [vmem:[#allocation26_spill] sm:$0xff] %v10431_v8  ;;  %v10450_v45 = vadd.f32 %v14311_v57, %v908_v60  ;;  %v876_v42 = vmul.f32 %v10020_v37, %v14320_v13  ;;  %v877_v36 = vmul.f32 %v10020_v37, %v14321_v55  ;;  %v14325_v10 = vld [vmem:[#allocation19_spill] sm:$0xff]  ;;  %v14326_v60 = vld [vmem:[#allocation20_spill] sm:$0xff]  ;;  %vm14403_vm6 = vcmp.ge.s32.totalorder %v14401_v32, 1 }
 0x2a0   :  { %14317 = vst [vmem:[#allocation27_spill] sm:$0xff] %v10444_v16  ;;  %14318 = vst [vmem:[#allocation28_spill] sm:$0xff] %v10447_v41  ;;  %v878_v34 = vmul.f32 %v10020_v37, %v14322_v56  ;;  %v879_v22 = vmul.f32 %v10020_v37, %v14323_v47  ;;  %v880_v44 = vmul.f32 %v10020_v37, %v14324_v14 }
 0x2a1   :  { %14319 = vst [vmem:[#allocation29_spill] sm:$0xff] %v10450_v45  ;;  %v881_v28 = vmul.f32 %v10020_v37, %v14325_v10  ;;  %v882_v58 = vmul.f32 %v10020_v37, %v14326_v60  ;;  %v883_v13 = vmul.f32 %v10020_v37, %v14327_v38  ;;  %v884_v55 = vmul.f32 %v10020_v37, %v14328_v62 }
 0x2a2   :  { %v885_v56 = vmul.f32 %v10020_v37, %v14329_v25  ;;  %v886_v47 = vmul.f32 %v10020_v37, %v14330_v50  ;;  %v887_v14 = vmul.f32 %v10020_v37, %v14331_v35  ;;  %v914_v10 = vadd.f32 %v14311_v57, %v10259_v0 }
 0x2a3   :  { %v915_v60 = vadd.f32 %v14311_v57, %v10263_v6  ;;  %v10482_v38 = vadd.f32 %v14311_v57, %v10267_v18  ;;  %v10486_v62 = vadd.f32 %v14311_v57, %v10271_v49  ;;  %v10490_v50 = vadd.f32 %v14311_v57, %v10275_v54 }
 0x2a4   :  { %v10494_v37 = vadd.f32 %v14311_v57, %v10279_v12  ;;  %v10498_v35 = vadd.f32 %v14311_v57, %v10283_v33  ;;  %v10502_v25 = vadd.f32 %v14311_v57, %v10291_v63  ;;  %v10506_v0 = vadd.f32 %v14311_v57, %v10295_v1 }
 0x2a5   :  { %v10510_v6 = vadd.f32 %v14311_v57, %v10299_v3  ;;  %v10514_v18 = vadd.f32 %v14311_v57, %v10303_v5  ;;  %v10518_v49 = vadd.f32 %v14311_v57, %v10307_v52  ;;  %v10522_v54 = vadd.f32 %v14311_v57, %v10311_v7 }
 0x2a6   :  { %v10526_v12 = vadd.f32 %v14311_v57, %v10315_v9  ;;  %v10530_v33 = vadd.f32 %v14311_v57, %v10319_v11  ;;  %v10534_v63 = vadd.f32 %v14311_v57, %v10327_v15  ;;  %v10538_v1 = vadd.f32 %v14311_v57, %v10331_v61 }
 0x2a7   :  { %14332 = vst [vmem:[#allocation30_spill] sm:$0xff] %v10522_v54  ;;  %v10541_v3 = vadd.f32 %v14311_v57, %v876_v42  ;;  %v10544_v5 = vadd.f32 %v14311_v57, %v877_v36  ;;  %v10547_v52 = vadd.f32 %v14311_v57, %v878_v34  ;;  %v10550_v7 = vadd.f32 %v14311_v57, %v879_v22 }
 0x2a8   :  { %14333 = vst [vmem:[#allocation31_spill] sm:$0xff] %v10530_v33  ;;  %14334 = vst [vmem:[#allocation32_spill] sm:$0xff] %v10534_v63  ;;  %v10553_v9 = vadd.f32 %v14311_v57, %v880_v44  ;;  %v10556_v11 = vadd.f32 %v14311_v57, %v881_v28  ;;  %v10559_v15 = vadd.f32 %v14311_v57, %v882_v58  ;;  %vm965_vm5 = vcmp.ge.f32.partialorder %v914_v10, 0.0 }
 0x2a9   :  { %14335 = vst [vmem:[#allocation33_spill] sm:$0xff] %v10538_v1  ;;  %14336 = vst [vmem:[#allocation34_spill] sm:$0xff] %v10541_v3  ;;  %v10562_v61 = vadd.f32 %v14311_v57, %v883_v13  ;;  %v10565_v42 = vadd.f32 %v14311_v57, %v884_v55  ;;  %v10568_v36 = vadd.f32 %v14311_v57, %v885_v56  ;;  %vm966_vm7 = vcmp.ge.f32.partialorder %v915_v60, 0.0 }
 0x2aa   :  { %14337 = vst [vmem:[#allocation35_spill] sm:$0xff] %v10544_v5  ;;  %14338 = vst [vmem:[#allocation36_spill] sm:$0xff] %v10547_v52  ;;  %v10571_v22 = vadd.f32 %v14311_v57, %v886_v47  ;;  %vm967_vm8 = vcmp.ge.f32.partialorder %v10482_v38, 0.0  ;;  %vm968_vm10 = vcmp.ge.f32.partialorder %v10486_v62, 0.0  ;;  %vm969_vm2 = vcmp.ge.f32.partialorder %v10490_v50, 0.0 }
 0x2ab   :  { %14339 = vst [vmem:[#allocation37_spill] sm:$0xff] %v10550_v7  ;;  %14340 = vst [vmem:[#allocation38_spill] sm:$0xff] %v10556_v11  ;;  %vm970_vm4 = vcmp.ge.f32.partialorder %v10494_v37, 0.0  ;;  %vm971_vm0 = vcmp.ge.f32.partialorder %v10498_v35, 0.0  ;;  %vm972_vm3 = vcmp.ge.f32.partialorder %v10502_v25, 0.0  ;;  %v10582_v44 = vadd.f32 %v14311_v57, %v887_v14 }
 0x2ac   :  { %14341 = vst [vmem:[#allocation39_spill] sm:$0xff] %v10559_v15  ;;  %14342 = vst [vmem:[#allocation40_spill] sm:$0xff] %v10565_v42  ;;  %v1016_v58 = vmul.f32 0.01, %v914_v10  ;;  %v1017_v28 = vmul.f32 0.01, %v915_v60 }
 0x2ad   :  { %14343 = vst [vmem:[#allocation41_spill] sm:$0xff] %v10582_v44  ;;  %v1018_v34 = vmul.f32 0.01, %v10482_v38  ;;  %v1019_v13 = vmul.f32 0.01, %v10486_v62  ;;  %vm14384_vm9 = vcmp.ge.f32.partialorder %v10506_v0, 0.0 }
 0x2ae   :  { %v1020_v55 = vmul.f32 0.01, %v10490_v50  ;;  %v10590_v56 = vmul.f32 0.01, %v10494_v37  ;;  %v10593_v47 = vmul.f32 0.01, %v10498_v35  ;;  %v10599_v57 = vsel %vm965_vm5, %v914_v10, %v1016_v58 }
 0x2af   :  { %v10596_v59 = vmul.f32 0.01, %v10502_v25  ;;  %14344 = vst [vmem:[#allocation42_spill] sm:$0xff] %v10599_v57  ;;  %v10605_v45 = vmul.f32 0.01, %v10506_v0  ;;  %v10614_v40 = vsel %vm966_vm7, %v915_v60, %v1017_v28  ;;  %v14347_v10 = vld [vmem:[#allocation62_spill] sm:$0xff]  ;;  %v10637_v58 = vsel %vm967_vm8, %v10482_v38, %v1018_v34 }
 0x2b0   :  { %v10608_v41 = vmul.f32 0.01, %v10510_v6  ;;  %v10611_v16 = vmul.f32 0.01, %v10514_v18  ;;  %14346 = vst [vmem:[#allocation43_spill] sm:$0xff] %v10614_v40  ;;  %vm2038_vm5 = vcmp.le.s32.totalorder %v14347_v10, 17  ;;  %v10660_v14 = vsel %vm968_vm10, %v10486_v62, %v1019_v13 }
 0x2b1   :  { %v10626_v60 = vmul.f32 0.01, %v10518_v49  ;;  %v10629_v28 = vmul.f32 0.01, %v10522_v54  ;;  %v10632_v40 = vmul.f32 0.01, %v10526_v12 }
 0x2b2   :  { %14351 = vst [vmem:[#allocation44_spill] sm:$0xff] %v10637_v58  ;;  %v14352_v57 = vld [vmem:[#allocation66_spill] sm:$0xff]  ;;  %v10649_v38 = vmul.f32 0.01, %v10530_v33  ;;  %v10652_v34 = vmul.f32 0.01, %v10534_v63 }
 0x2b3   :  { %vm2042_vm13 = vcmp.le.s32.totalorder %v14352_v57, 17  ;;  %v10655_v58 = vmul.f32 0.01, %v10538_v1  ;;  %14358 = vst [vmem:[#allocation102_spill] sm:$0xff] %v10660_v14  ;;  %v14359_v10 = vld [vmem:[#allocation75_spill] sm:$0xff]  ;;  %v14360_v54 = vld [vmem:[#allocation76_spill] sm:$0xff] }
 0x2b4   :  { %14356 = vst [vmem:[#allocation45_spill] sm:$0xff] %v10652_v34  ;;  %vm2047_vm15 = vcmp.le.s32.totalorder %v14360_v54, 17  ;;  %v14361_v33 = vld [vmem:[#allocation77_spill] sm:$0xff]  ;;  %v14362_v34 = vld [vmem:[#allocation78_spill] sm:$0xff]  ;;  %v10675_v62 = vmul.f32 0.01, %v10541_v3 }
 0x2b5   :  { %14357 = vst [vmem:[#allocation46_spill] sm:$0xff] %v10655_v58  ;;  %v10678_v13 = vmul.f32 0.01, %v10544_v5  ;;  %v10681_v14 = vmul.f32 0.01, %v10547_v52  ;;  %v10686_v58 = vsel %vm969_vm2, %v10490_v50, %v1020_v55  ;;  %v14365_v63 = vld [vmem:[#allocation79_spill] sm:$0xff]  ;;  %v10713_v52 = vsel %vm970_vm4, %v10494_v37, %v10590_v56 }
 0x2b6   :  { %14364 = vst [vmem:[#allocation15_spill] sm:$0xff] %v10686_v58  ;;  %v14366_v1 = vld [vmem:[#allocation80_spill] sm:$0xff]  ;;  %v14367_v3 = vld [vmem:[#allocation81_spill] sm:$0xff]  ;;  %v10701_v50 = vmul.f32 0.01, %v10550_v7  ;;  %14369 = vst [vmem:[#allocation16_spill] sm:$0xff] %v10713_v52 }
 0x2b7   :  { %14363 = vst [vmem:[#allocation14_spill] sm:$0xff] %v10681_v14  ;;  %v10704_v55 = vmul.f32 0.01, %v10553_v9  ;;  %v10707_v58 = vmul.f32 0.01, %v10556_v11  ;;  %v14370_v14 = vld [vmem:[#allocation83_spill] sm:$0xff]  ;;  %v10740_v11 = vsel %vm971_vm0, %v10498_v35, %v10593_v47 }
 0x2b8   :  { %v10728_v37 = vmul.f32 0.01, %v10559_v15  ;;  %v10731_v56 = vmul.f32 0.01, %v10562_v61  ;;  %v10734_v52 = vmul.f32 0.01, %v10565_v42  ;;  %v10767_v42 = vsel %vm972_vm3, %v10502_v25, %v10596_v59 }
 0x2b9   :  { %14374 = vst [vmem:[#allocation17_spill] sm:$0xff] %v10740_v11  ;;  %v10755_v35 = vmul.f32 0.01, %v10568_v36  ;;  %v10758_v47 = vmul.f32 0.01, %v10571_v22  ;;  %14379 = vst [vmem:[#allocation18_spill] sm:$0xff] %v10767_v42 }
 0x2ba   :  { %v10761_v11 = vmul.f32 0.01, %v10582_v44  ;;  %v10782_v59 = vmul.f32 0.01, %v10384_v17  ;;  %v10785_v25 = vmul.f32 0.01, %v10391_v19  ;;  %v10794_v44 = vsel %vm14384_vm9, %v10506_v0, %v10605_v45 }
 0x2bb   :  { %v10788_v42 = vmul.f32 0.01, %v10394_v31  ;;  %14385 = vst [vmem:[#allocation19_spill] sm:$0xff] %v10794_v44  ;;  %v10809_v45 = vmul.f32 0.01, %v10397_v43  ;;  %vm14390_vm11 = vcmp.ge.f32.partialorder %v10510_v6, 0.0 }
 0x2bc   :  { %v10812_v0 = vmul.f32 0.01, %v10400_v39  ;;  %v10815_v44 = vmul.f32 0.01, %v10403_v27  ;;  %v10821_v31 = vsel %vm14390_vm11, %v10510_v6, %v10608_v41  ;;  %v14392_v15 = vld [vmem:[#allocation98_spill] sm:$0xff]  ;;  %vm14395_vm14 = vcmp.ge.f32.partialorder %v10514_v18, 0.0 }
 0x2bd   :  { %14391 = vst [vmem:[#allocation20_spill] sm:$0xff] %v10821_v31  ;;  %v10836_v41 = vmul.f32 0.01, %v10406_v4  ;;  %v10839_v6 = vmul.f32 0.01, %v10409_v46  ;;  %v10848_v53 = vsel %vm14395_vm14, %v10514_v18, %v10611_v16  ;;  %vm14399_vm14 = vcmp.ge.f32.partialorder %v10518_v49, 0.0 }
 0x2be   :  { %v10842_v31 = vmul.f32 0.01, %v10412_v21  ;;  %14396 = vst [vmem:[#allocation21_spill] sm:$0xff] %v10848_v53  ;;  %v10859_v7 = vmul.f32 0.01, %v10416_v26  ;;  %v10871_v53 = vsel %vm14399_vm14, %v10518_v49, %v10626_v60  ;;  %vm14402_vm2 = vcmp.le.s32.totalorder %v14401_v32, 17 }
 0x2bf   :  { %v10862_v16 = vmul.f32 0.01, %v10419_v48  ;;  %v10865_v18 = vmul.f32 0.01, %v10422_v23  ;;  %14400 = vst [vmem:[#allocation24_spill] sm:$0xff] %v10871_v53  ;;  %vm10877_vm0 = vmand %vm14403_vm6, %vm14402_vm2  ;;  %v14408_v23 = vld [vmem:[#allocation27_spill] sm:$0xff] }
 0x2c0   :  { %v14405_v20 = vsel %vm10877_vm0, 4294967295, %v14404_v20  ;;  %v14410_v48 = vld [vmem:[#allocation29_spill] sm:$0xff]  ;;  %v10887_v49 = vmul.f32 0.01, %v10425_v2  ;;  %v10890_v60 = vmul.f32 0.01, %v10428_v30 }
 0x2c1   :  { %14397 = vst [vmem:[#allocation22_spill] sm:$0xff] %v10862_v16  ;;  %14398 = vst [vmem:[#allocation23_spill] sm:$0xff] %v10865_v18  ;;  %v14409_v18 = vld [vmem:[#allocation28_spill] sm:$0xff]  ;;  %v10893_v32 = vmul.f32 0.01, %v10431_v8  ;;  %v14412_v53 = vld [vmem:[#allocation30_spill] sm:$0xff] }
 0x2c2   :  { %14406 = vst [vmem:[#allocation25_spill] sm:$0xff] %v14405_v20  ;;  %vm14413_vm6 = vcmp.ge.f32.partialorder %v14412_v53, 0.0  ;;  %v14415_v5 = vld [vmem:[#allocation62_spill] sm:$0xff]  ;;  %v14417_v16 = vmov 0  ;;  %v14420_v2 = vld [vmem:[#allocation63_spill] sm:$0xff]  ;;  %v14423_v8 = vmov 0 }
 0x2c3   :  { %14411 = vst [vmem:[#allocation66_spill] sm:$0xff] %v10893_v32  ;;  %v10899_v20 = vsel %vm14413_vm6, %v14412_v53, %v10629_v28  ;;  %vm14416_vm2 = vcmp.ge.s32.totalorder %v14415_v5, 1  ;;  %vm14421_vm9 = vcmp.le.s32.totalorder %v14420_v2, 17  ;;  %vm14422_vm11 = vcmp.ge.s32.totalorder %v14420_v2, 1  ;;  %v14426_v32 = vld [vmem:[#allocation64_spill] sm:$0xff]  ;;  %v14432_v5 = vld [vmem:[#allocation65_spill] sm:$0xff] }
 0x2c4   :  { %14414 = vst [vmem:[#allocation75_spill] sm:$0xff] %v10899_v20  ;;  %vm10905_vm14 = vmand %vm14416_vm2, %vm2038_vm5  ;;  %vm14427_vm4 = vcmp.le.s32.totalorder %v14426_v32, 17  ;;  %vm14428_vm6 = vcmp.ge.s32.totalorder %v14426_v32, 1  ;;  %v14429_v53 = vmov 0  ;;  %vm14433_vm5 = vcmp.le.s32.totalorder %v14432_v5, 17  ;;  %v14451_v2 = vld [vmem:[#allocation69_spill] sm:$0xff] }
 0x2c5   :  { %v14418_v16 = vsel %vm10905_vm14, 4294967295, %v14417_v16  ;;  %vm10913_vm10 = vmand %vm14422_vm11, %vm14421_vm9  ;;  %vm14434_vm2 = vcmp.ge.s32.totalorder %v14432_v5, 1  ;;  %v14435_v28 = vmov 0  ;;  %v10936_v20 = vmul.f32 0.01, %v10434_v29 }
 0x2c6   :  { %14419 = vst [vmem:[#allocation76_spill] sm:$0xff] %v14418_v16  ;;  %v14424_v8 = vsel %vm10913_vm10, 4294967295, %v14423_v8  ;;  %vm10921_vm3 = vmand %vm14428_vm6, %vm14427_vm4  ;;  %v10939_v32 = vmul.f32 0.01, %v10437_v51  ;;  %vm14439_vm4 = vcmp.ge.f32.partialorder %v10526_v12, 0.0  ;;  %vm14441_vm6 = vcmp.ge.s32.totalorder %v14352_v57, 1 }
 0x2c7   :  { %14425 = vst [vmem:[#allocation77_spill] sm:$0xff] %v14424_v8  ;;  %v14430_v53 = vsel %vm10921_vm3, 4294967295, %v14429_v53  ;;  %vm10929_vm8 = vmand %vm14434_vm2, %vm14433_vm5  ;;  %v10948_v5 = vsel %vm14439_vm4, %v10526_v12, %v10632_v40  ;;  %v14445_v8 = vld [vmem:[#allocation68_spill] sm:$0xff]  ;;  %v14448_v16 = vmov 0  ;;  %vm14452_vm12 = vcmp.le.s32.totalorder %v14451_v2, 17  ;;  %v14457_v12 = vld [vmem:[#allocation74_spill] sm:$0xff] }
 0x2c8   :  { %14431 = vst [vmem:[#allocation78_spill] sm:$0xff] %v14430_v53  ;;  %v14436_v28 = vsel %vm10929_vm8, 4294967295, %v14435_v28  ;;  %v10942_v53 = vmul.f32 0.01, %v10441_v24  ;;  %14440 = vst [vmem:[#allocation80_spill] sm:$0xff] %v10948_v5  ;;  %vm14446_vm2 = vcmp.le.s32.totalorder %v14445_v8, 17 }
 0x2c9   :  { %14437 = vst [vmem:[#allocation79_spill] sm:$0xff] %v14436_v28  ;;  %vm10954_vm5 = vmand %vm14441_vm6, %vm2042_vm13  ;;  %v14442_v28 = vmov 0  ;;  %vm14447_vm9 = vcmp.ge.s32.totalorder %v14445_v8, 1  ;;  %vm14453_vm4 = vcmp.ge.s32.totalorder %v14451_v2, 1  ;;  %v14454_v40 = vmov 0 }
 0x2ca   :  { %v14443_v28 = vsel %vm10954_vm5, 4294967295, %v14442_v28  ;;  %vm10962_vm11 = vmand %vm14447_vm9, %vm14446_vm2  ;;  %vm14458_vm13 = vcmp.le.s32.totalorder %v14457_v12, 17  ;;  %vm14459_vm6 = vcmp.ge.s32.totalorder %v14457_v12, 1  ;;  %v14460_v57 = vmov 0 }
 0x2cb   :  { %14444 = vst [vmem:[#allocation81_spill] sm:$0xff] %v14443_v28  ;;  %v14449_v16 = vsel %vm10962_vm11, 4294967295, %v14448_v16  ;;  %vm10970_vm1 = vmand %vm14453_vm4, %vm14452_vm12  ;;  %v10985_v5 = vmul.f32 0.01, %v14408_v23  ;;  %v10988_v2 = vmul.f32 0.01, %v14409_v18 }
 0x2cc   :  { %14450 = vst [vmem:[#allocation83_spill] sm:$0xff] %v14449_v16  ;;  %v14455_v40 = vsel %vm10970_vm1, 4294967295, %v14454_v40  ;;  %vm10978_vm7 = vmand %vm14459_vm6, %vm14458_vm13  ;;  %v14464_v16 = vld [vmem:[#allocation31_spill] sm:$0xff]  ;;  %vm14467_vm4 = vcmp.le.s32.totalorder %v14359_v10, 17  ;;  %vm14468_vm13 = vcmp.ge.s32.totalorder %v14359_v10, 1  ;;  %vm14472_vm9 = vcmp.ge.s32.totalorder %v14360_v54, 1 }
 0x2cd   :  { %14456 = vst [vmem:[#allocation98_spill] sm:$0xff] %v14455_v40  ;;  %v14461_v57 = vsel %vm10978_vm7, 4294967295, %v14460_v57  ;;  %v10991_v40 = vmul.f32 0.01, %v14410_v48  ;;  %vm14465_vm12 = vcmp.ge.f32.partialorder %v14464_v16, 0.0  ;;  %vm11003_vm6 = vmand %vm14468_vm13, %vm14467_vm4  ;;  %v14473_v28 = vmov 0 }
 0x2ce   :  { %14462 = vst [vmem:[#allocation61_spill] sm:$0xff] %v14461_v57  ;;  %v10997_v12 = vsel %vm14465_vm12, %v14464_v16, %v10649_v38  ;;  %v14469_v57 = vmov 0  ;;  %vm11011_vm2 = vmand %vm14472_vm9, %vm2047_vm15  ;;  %vm14476_vm7 = vcmp.le.s32.totalorder %v14361_v33, 17  ;;  %vm14477_vm12 = vcmp.ge.s32.totalorder %v14361_v33, 1  ;;  %v14487_v16 = vld [vmem:[#allocation45_spill] sm:$0xff]  ;;  %v14496_v54 = vld [vmem:[#allocation35_spill] sm:$0xff] }
 0x2cf   :  { %14466 = vst [vmem:[#allocation27_spill] sm:$0xff] %v10997_v12  ;;  %v14470_v57 = vsel %vm11003_vm6, 4294967295, %v14469_v57  ;;  %v14474_v28 = vsel %vm11011_vm2, 4294967295, %v14473_v28  ;;  %vm11019_vm1 = vmand %vm14477_vm12, %vm14476_vm7  ;;  %v14478_v38 = vmov 0  ;;  %vm14481_vm4 = vcmp.le.s32.totalorder %v14362_v34, 17  ;;  %v14488_v12 = vld [vmem:[#allocation32_spill] sm:$0xff] }
 0x2d0   :  { %14471 = vst [vmem:[#allocation28_spill] sm:$0xff] %v14470_v57  ;;  %14475 = vst [vmem:[#allocation29_spill] sm:$0xff] %v14474_v28  ;;  %v14479_v38 = vsel %vm11019_vm1, 4294967295, %v14478_v38  ;;  %vm14482_vm13 = vcmp.ge.s32.totalorder %v14362_v34, 1  ;;  %v14483_v10 = vmov 0  ;;  %vm14489_vm2 = vcmp.ge.f32.partialorder %v14488_v12, 0.0 }
 0x2d1   :  { %14480 = vst [vmem:[#allocation30_spill] sm:$0xff] %v14479_v38  ;;  %vm11027_vm6 = vmand %vm14482_vm13, %vm14481_vm4  ;;  %v11037_v33 = vsel %vm14489_vm2, %v14488_v12, %v14487_v16  ;;  %v14490_v28 = vld [vmem:[#allocation46_spill] sm:$0xff]  ;;  %v14491_v38 = vld [vmem:[#allocation33_spill] sm:$0xff]  ;;  %vm14497_vm4 = vcmp.ge.f32.partialorder %v14496_v54, 0.0  ;;  %vm14499_vm2 = vcmp.le.s32.totalorder %v14365_v63, 17  ;;  %vm14500_vm13 = vcmp.ge.s32.totalorder %v14365_v63, 1 }
 0x2d2   :  { %v14484_v10 = vsel %vm11027_vm6, 4294967295, %v14483_v10  ;;  %vm14492_vm7 = vcmp.ge.f32.partialorder %v14491_v38, 0.0  ;;  %v14493_v34 = vld [vmem:[#allocation34_spill] sm:$0xff]  ;;  %v11055_v8 = vsel %vm14497_vm4, %v14496_v54, %v10678_v13  ;;  %vm11061_vm15 = vmand %vm14500_vm13, %vm14499_vm2  ;;  %v14501_v12 = vmov 0  ;;  %v14518_v54 = vld [vmem:[#allocation36_spill] sm:$0xff] }
 0x2d3   :  { %14485 = vst [vmem:[#allocation62_spill] sm:$0xff] %v14484_v10  ;;  %v11043_v57 = vsel %vm14492_vm7, %v14491_v38, %v14490_v28  ;;  %vm14494_vm12 = vcmp.ge.f32.partialorder %v14493_v34, 0.0  ;;  %14498 = vst [vmem:[#allocation64_spill] sm:$0xff] %v11055_v8  ;;  %v14502_v12 = vsel %vm11061_vm15, 4294967295, %v14501_v12  ;;  %vm14503_vm7 = vcmp.le.s32.totalorder %v14366_v1, 17  ;;  %v14511_v63 = vld [vmem:[#allocation82_spill] sm:$0xff] }
 0x2d4   :  { %v11049_v10 = vsel %vm14494_vm12, %v14493_v34, %v10675_v62  ;;  %vm14504_vm9 = vcmp.ge.s32.totalorder %v14366_v1, 1  ;;  %v14505_v62 = vmov 0  ;;  %vm14507_vm6 = vcmp.le.s32.totalorder %v14367_v3, 17  ;;  %v14516_v1 = vld [vmem:[#allocation110_spill] sm:$0xff]  ;;  %v14520_v16 = vld [vmem:[#allocation37_spill] sm:$0xff] }
 0x2d5   :  { %14495 = vst [vmem:[#allocation63_spill] sm:$0xff] %v11049_v10  ;;  %vm11069_vm12 = vmand %vm14504_vm9, %vm14503_vm7  ;;  %vm14508_vm4 = vcmp.ge.s32.totalorder %v14367_v3, 1  ;;  %v14509_v13 = vmov 0  ;;  %vm14512_vm2 = vcmp.le.s32.totalorder %v14511_v63, 17  ;;  %vm14513_vm13 = vcmp.ge.s32.totalorder %v14511_v63, 1  ;;  %v14517_v38 = vld [vmem:[#allocation14_spill] sm:$0xff] }
 0x2d6   :  { %v14506_v62 = vsel %vm11069_vm12, 4294967295, %v14505_v62  ;;  %vm11077_vm1 = vmand %vm14508_vm4, %vm14507_vm6  ;;  %v14514_v28 = vmov 0  ;;  %vm14519_vm12 = vcmp.ge.f32.partialorder %v14518_v54, 0.0  ;;  %vm14521_vm6 = vcmp.ge.f32.partialorder %v14520_v16, 0.0  ;;  %v14524_v8 = vld [vmem:[#allocation38_spill] sm:$0xff] }
 0x2d7   :  { %v14510_v13 = vsel %vm11077_vm1, 4294967295, %v14509_v13  ;;  %vm11085_vm15 = vmand %vm14513_vm13, %vm14512_vm2  ;;  %v11095_v3 = vsel %vm14519_vm12, %v14518_v54, %v14517_v38  ;;  %v11101_v34 = vsel %vm14521_vm6, %v14520_v16, %v10701_v50  ;;  %vm14522_vm4 = vcmp.ge.f32.partialorder %v10553_v9, 0.0  ;;  %v14531_v50 = vld [vmem:[#allocation84_spill] sm:$0xff]  ;;  %v14546_v54 = vld [vmem:[#allocation111_spill] sm:$0xff] }
 0x2d8   :  { %v14515_v28 = vsel %vm11085_vm15, 4294967295, %v14514_v28  ;;  %v11107_v63 = vsel %vm14522_vm4, %v10553_v9, %v10704_v55  ;;  %vm14525_vm2 = vcmp.ge.f32.partialorder %v14524_v8, 0.0  ;;  %vm14527_vm12 = vcmp.le.s32.totalorder %v14370_v14, 17  ;;  %v14536_v55 = vld [vmem:[#allocation85_spill] sm:$0xff]  ;;  %v14547_v16 = vld [vmem:[#allocation39_spill] sm:$0xff] }
 0x2d9   :  { %14523 = vst [vmem:[#allocation65_spill] sm:$0xff] %v11107_v63  ;;  %v11113_v10 = vsel %vm14525_vm2, %v14524_v8, %v10707_v58  ;;  %vm14528_vm13 = vcmp.ge.s32.totalorder %v14370_v14, 1  ;;  %v14529_v38 = vmov 0  ;;  %vm14532_vm6 = vcmp.le.s32.totalorder %v14531_v50, 17  ;;  %v14541_v14 = vld [vmem:[#allocation86_spill] sm:$0xff] }
 0x2da   :  { %14526 = vst [vmem:[#allocation68_spill] sm:$0xff] %v11113_v10  ;;  %vm11119_vm9 = vmand %vm14528_vm13, %vm14527_vm12  ;;  %vm14533_vm7 = vcmp.ge.s32.totalorder %v14531_v50, 1  ;;  %v14534_v9 = vmov 0  ;;  %vm14537_vm15 = vcmp.le.s32.totalorder %v14536_v55, 17  ;;  %vm14538_vm2 = vcmp.ge.s32.totalorder %v14536_v55, 1 }
 0x2db   :  { %v14530_v38 = vsel %vm11119_vm9, 4294967295, %v14529_v38  ;;  %vm11127_vm4 = vmand %vm14533_vm7, %vm14532_vm6  ;;  %v14539_v58 = vmov 0  ;;  %vm14542_vm12 = vcmp.le.s32.totalorder %v14541_v14, 17  ;;  %vm14543_vm13 = vcmp.ge.s32.totalorder %v14541_v14, 1  ;;  %v14550_v14 = vld [vmem:[#allocation40_spill] sm:$0xff] }
 0x2dc   :  { %v14535_v9 = vsel %vm11127_vm4, 4294967295, %v14534_v9  ;;  %vm11135_vm1 = vmand %vm14538_vm2, %vm14537_vm15  ;;  %v14544_v8 = vmov 0  ;;  %vm14548_vm4 = vcmp.ge.f32.partialorder %v14547_v16, 0.0  ;;  %vm14549_vm15 = vcmp.ge.f32.partialorder %v10562_v61, 0.0 }
 0x2dd   :  { %v14540_v58 = vsel %vm11135_vm1, 4294967295, %v14539_v58  ;;  %vm11143_vm9 = vmand %vm14543_vm13, %vm14542_vm12  ;;  %v11153_v50 = vsel %vm14548_vm4, %v14547_v16, %v10728_v37  ;;  %v11159_v55 = vsel %vm14549_vm15, %v10562_v61, %v10731_v56  ;;  %vm14551_vm2 = vcmp.ge.f32.partialorder %v14550_v14, 0.0  ;;  %v14555_v37 = vld [vmem:[#allocation87_spill] sm:$0xff]  ;;  %v14560_v61 = vld [vmem:[#allocation88_spill] sm:$0xff] }
 0x2de   :  { %v14545_v8 = vsel %vm11143_vm9, 4294967295, %v14544_v8  ;;  %v11165_v10 = vsel %vm14551_vm2, %v14550_v14, %v10734_v52  ;;  %vm14553_vm12 = vcmp.ge.f32.partialorder %v10568_v36, 0.0  ;;  %vm14556_vm4 = vcmp.le.s32.totalorder %v14555_v37, 17  ;;  %v14565_v56 = vld [vmem:[#allocation89_spill] sm:$0xff] }
 0x2df   :  { %14552 = vst [vmem:[#allocation69_spill] sm:$0xff] %v11165_v10  ;;  %v11171_v63 = vsel %vm14553_vm12, %v10568_v36, %v10755_v35  ;;  %vm14557_vm13 = vcmp.ge.s32.totalorder %v14555_v37, 1  ;;  %v14558_v16 = vmov 0  ;;  %vm14561_vm15 = vcmp.le.s32.totalorder %v14560_v61, 17  ;;  %v14570_v35 = vld [vmem:[#allocation90_spill] sm:$0xff]  ;;  %v14575_v37 = vld [vmem:[#allocation112_spill] sm:$0xff] }
 0x2e0   :  { %14554 = vst [vmem:[#allocation74_spill] sm:$0xff] %v11171_v63  ;;  %vm11177_vm7 = vmand %vm14557_vm13, %vm14556_vm4  ;;  %vm14562_vm6 = vcmp.ge.s32.totalorder %v14560_v61, 1  ;;  %v14563_v52 = vmov 0  ;;  %vm14566_vm9 = vcmp.le.s32.totalorder %v14565_v56, 17  ;;  %vm14567_vm12 = vcmp.ge.s32.totalorder %v14565_v56, 1  ;;  %v14577_v56 = vld [vmem:[#allocation41_spill] sm:$0xff] }
 0x2e1   :  { %v14559_v16 = vsel %vm11177_vm7, 4294967295, %v14558_v16  ;;  %vm11185_vm2 = vmand %vm14562_vm6, %vm14561_vm15  ;;  %v14568_v36 = vmov 0  ;;  %vm14571_vm4 = vcmp.le.s32.totalorder %v14570_v35, 17  ;;  %vm14572_vm13 = vcmp.ge.s32.totalorder %v14570_v35, 1 }
 0x2e2   :  { %v14564_v52 = vsel %vm11185_vm2, 4294967295, %v14563_v52  ;;  %vm11193_vm1 = vmand %vm14567_vm12, %vm14566_vm9  ;;  %v14573_v14 = vmov 0  ;;  %vm14576_vm2 = vcmp.ge.f32.partialorder %v10571_v22, 0.0  ;;  %vm14578_vm9 = vcmp.ge.f32.partialorder %v14577_v56, 0.0 }
 0x2e3   :  { %v14569_v36 = vsel %vm11193_vm1, 4294967295, %v14568_v36  ;;  %vm11201_vm7 = vmand %vm14572_vm13, %vm14571_vm4  ;;  %v11211_v61 = vsel %vm14576_vm2, %v10571_v22, %v10758_v47  ;;  %v11217_v63 = vsel %vm14578_vm9, %v14577_v56, %v10761_v11  ;;  %vm14579_vm12 = vcmp.ge.f32.partialorder %v10384_v17, 0.0  ;;  %v14583_v22 = vld [vmem:[#allocation91_spill] sm:$0xff]  ;;  %v14588_v11 = vld [vmem:[#allocation48_spill] sm:$0xff] }
 0x2e4   :  { %v14574_v14 = vsel %vm11201_vm7, 4294967295, %v14573_v14  ;;  %v11223_v35 = vsel %vm14579_vm12, %v10384_v17, %v10782_v59  ;;  %vm14581_vm4 = vcmp.ge.f32.partialorder %v10391_v19, 0.0  ;;  %vm14584_vm2 = vcmp.le.s32.totalorder %v14583_v22, 17  ;;  %v14593_v59 = vld [vmem:[#allocation92_spill] sm:$0xff] }
 0x2e5   :  { %14580 = vst [vmem:[#allocation31_spill] sm:$0xff] %v11223_v35  ;;  %v11229_v10 = vsel %vm14581_vm4, %v10391_v19, %v10785_v25  ;;  %vm14585_vm13 = vcmp.ge.s32.totalorder %v14583_v22, 1  ;;  %v14586_v47 = vmov 0  ;;  %vm14589_vm9 = vcmp.le.s32.totalorder %v14588_v11, 17  ;;  %v14598_v25 = vld [vmem:[#allocation93_spill] sm:$0xff] }
 0x2e6   :  { %14582 = vst [vmem:[#allocation45_spill] sm:$0xff] %v11229_v10  ;;  %vm11235_vm6 = vmand %vm14585_vm13, %vm14584_vm2  ;;  %vm14590_vm15 = vcmp.ge.s32.totalorder %v14588_v11, 1  ;;  %v14591_v17 = vmov 0  ;;  %vm14594_vm7 = vcmp.le.s32.totalorder %v14593_v59, 17  ;;  %vm14595_vm4 = vcmp.ge.s32.totalorder %v14593_v59, 1  ;;  %v14603_v22 = vld [vmem:[#allocation113_spill] sm:$0xff] }
 0x2e7   :  { %v14587_v47 = vsel %vm11235_vm6, 4294967295, %v14586_v47  ;;  %vm11243_vm12 = vmand %vm14590_vm15, %vm14589_vm9  ;;  %v14596_v19 = vmov 0  ;;  %vm14599_vm2 = vcmp.le.s32.totalorder %v14598_v25, 17  ;;  %vm14600_vm13 = vcmp.ge.s32.totalorder %v14598_v25, 1  ;;  %v14604_v11 = vld [vmem:[#allocation10_spill] sm:$0xff] }
 0x2e8   :  { %v14592_v17 = vsel %vm11243_vm12, 4294967295, %v14591_v17  ;;  %vm11251_vm1 = vmand %vm14595_vm4, %vm14594_vm7  ;;  %v14601_v56 = vmov 0  ;;  %vm14605_vm12 = vcmp.ge.f32.partialorder %v14604_v11, 0.0  ;;  %vm14606_vm7 = vcmp.ge.f32.partialorder %v10397_v43, 0.0 }
 0x2e9   :  { %v14597_v19 = vsel %vm11251_vm1, 4294967295, %v14596_v19  ;;  %vm11259_vm6 = vmand %vm14600_vm13, %vm14599_vm2  ;;  %v11269_v59 = vsel %vm14605_vm12, %v14604_v11, %v10788_v42  ;;  %v11275_v10 = vsel %vm14606_vm7, %v10397_v43, %v10809_v45  ;;  %vm14607_vm4 = vcmp.ge.f32.partialorder %v10400_v39, 0.0  ;;  %v14610_v42 = vld [vmem:[#allocation94_spill] sm:$0xff]  ;;  %v14615_v43 = vld [vmem:[#allocation95_spill] sm:$0xff] }
 0x2ea   :  { %v14602_v56 = vsel %vm11259_vm6, 4294967295, %v14601_v56  ;;  %v11281_v25 = vsel %vm14607_vm4, %v10400_v39, %v10812_v0  ;;  %vm14608_vm2 = vcmp.ge.f32.partialorder %v10403_v27, 0.0  ;;  %vm14611_vm12 = vcmp.le.s32.totalorder %v14610_v42, 17  ;;  %v14620_v45 = vld [vmem:[#allocation96_spill] sm:$0xff] }
 0x2eb   :  { %v11287_v35 = vsel %vm14608_vm2, %v10403_v27, %v10815_v44  ;;  %vm14612_vm13 = vcmp.ge.s32.totalorder %v14610_v42, 1  ;;  %v14613_v11 = vmov 0  ;;  %vm14616_vm7 = vcmp.le.s32.totalorder %v14615_v43, 17  ;;  %v14625_v44 = vld [vmem:[#allocation97_spill] sm:$0xff]  ;;  %v14630_v42 = vld [vmem:[#allocation114_spill] sm:$0xff] }
 0x2ec   :  { %14609 = vst [vmem:[#allocation32_spill] sm:$0xff] %v11287_v35  ;;  %vm11293_vm15 = vmand %vm14612_vm13, %vm14611_vm12  ;;  %vm14617_vm9 = vcmp.ge.s32.totalorder %v14615_v43, 1  ;;  %v14618_v39 = vmov 0  ;;  %vm14621_vm6 = vcmp.le.s32.totalorder %v14620_v45, 17  ;;  %vm14622_vm2 = vcmp.ge.s32.totalorder %v14620_v45, 1 }
 0x2ed   :  { %v14614_v11 = vsel %vm11293_vm15, 4294967295, %v14613_v11  ;;  %vm11301_vm4 = vmand %vm14617_vm9, %vm14616_vm7  ;;  %v14623_v27 = vmov 0  ;;  %vm14626_vm12 = vcmp.le.s32.totalorder %v14625_v44, 17  ;;  %vm14627_vm13 = vcmp.ge.s32.totalorder %v14625_v44, 1 }
 0x2ee   :  { %v14619_v39 = vsel %vm11301_vm4, 4294967295, %v14618_v39  ;;  %vm11309_vm1 = vmand %vm14622_vm2, %vm14621_vm6  ;;  %v14628_v0 = vmov 0  ;;  %vm14631_vm4 = vcmp.ge.f32.partialorder %v10406_v4, 0.0  ;;  %vm14632_vm6 = vcmp.ge.f32.partialorder %v10409_v46, 0.0 }
 0x2ef   :  { %v14624_v27 = vsel %vm11309_vm1, 4294967295, %v14623_v27  ;;  %vm11317_vm15 = vmand %vm14627_vm13, %vm14626_vm12  ;;  %v11327_v43 = vsel %vm14631_vm4, %v10406_v4, %v10836_v41  ;;  %v11333_v45 = vsel %vm14632_vm6, %v10409_v46, %v10839_v6  ;;  %vm14634_vm2 = vcmp.ge.f32.partialorder %v10412_v21, 0.0  ;;  %v14642_v46 = vld [vmem:[#allocation99_spill] sm:$0xff]  ;;  %v14660_v6 = vld [vmem:[#allocation22_spill] sm:$0xff] }
 0x2f0   :  { %v14629_v0 = vsel %vm11317_vm15, 4294967295, %v14628_v0  ;;  %14633 = vst [vmem:[#allocation46_spill] sm:$0xff] %v11333_v45  ;;  %v11339_v44 = vsel %vm14634_vm2, %v10412_v21, %v10842_v31  ;;  %vm14636_vm12 = vcmp.ge.f32.partialorder %v10416_v26, 0.0  ;;  %vm14638_vm4 = vcmp.le.s32.totalorder %v14392_v15, 17  ;;  %v14647_v21 = vld [vmem:[#allocation100_spill] sm:$0xff]  ;;  %v14659_v41 = vld [vmem:[#allocation115_spill] sm:$0xff] }
 0x2f1   :  { %14635 = vst [vmem:[#allocation33_spill] sm:$0xff] %v11339_v44  ;;  %v11345_v35 = vsel %vm14636_vm12, %v10416_v26, %v10859_v7  ;;  %vm14639_vm13 = vcmp.ge.s32.totalorder %v14392_v15, 1  ;;  %v14640_v4 = vmov 0  ;;  %vm14643_vm6 = vcmp.le.s32.totalorder %v14642_v46, 17  ;;  %v14653_v7 = vld [vmem:[#allocation103_spill] sm:$0xff]  ;;  %v14664_v44 = vld [vmem:[#allocation12_spill] sm:$0xff] }
 0x2f2   :  { %14637 = vst [vmem:[#allocation34_spill] sm:$0xff] %v11345_v35  ;;  %vm11351_vm9 = vmand %vm14639_vm13, %vm14638_vm4  ;;  %vm14644_vm7 = vcmp.ge.s32.totalorder %v14642_v46, 1  ;;  %v14645_v31 = vmov 0  ;;  %vm14648_vm15 = vcmp.le.s32.totalorder %v14647_v21, 17  ;;  %vm14649_vm12 = vcmp.ge.s32.totalorder %v14647_v21, 1  ;;  %v14661_v46 = vld [vmem:[#allocation11_spill] sm:$0xff] }
 0x2f3   :  { %v14641_v4 = vsel %vm11351_vm9, 4294967295, %v14640_v4  ;;  %vm11359_vm2 = vmand %vm14644_vm7, %vm14643_vm6  ;;  %v14650_v26 = vmov 0  ;;  %vm14654_vm4 = vcmp.le.s32.totalorder %v14653_v7, 17  ;;  %vm14655_vm13 = vcmp.ge.s32.totalorder %v14653_v7, 1  ;;  %v14663_v35 = vld [vmem:[#allocation23_spill] sm:$0xff]  ;;  %v14666_v7 = vld [vmem:[#allocation13_spill] sm:$0xff] }
 0x2f4   :  { %v14646_v31 = vsel %vm11359_vm2, 4294967295, %v14645_v31  ;;  %vm11367_vm1 = vmand %vm14649_vm12, %vm14648_vm15  ;;  %v14656_v15 = vmov 0  ;;  %vm14662_vm2 = vcmp.ge.f32.partialorder %v14661_v46, 0.0  ;;  %vm14665_vm15 = vcmp.ge.f32.partialorder %v14664_v44, 0.0 }
 0x2f5   :  { %v14651_v26 = vsel %vm11367_vm1, 4294967295, %v14650_v26  ;;  %vm11375_vm9 = vmand %vm14655_vm13, %vm14654_vm4  ;;  %v11385_v21 = vsel %vm14662_vm2, %v14661_v46, %v14660_v6  ;;  %v11391_v45 = vsel %vm14665_vm15, %v14664_v44, %v14663_v35  ;;  %vm14667_vm12 = vcmp.ge.f32.partialorder %v14666_v7, 0.0  ;;  %v14671_v6 = vld [vmem:[#allocation104_spill] sm:$0xff]  ;;  %v14676_v35 = vld [vmem:[#allocation105_spill] sm:$0xff] }
 0x2f6   :  { %14652 = vst [vmem:[#allocation35_spill] sm:$0xff] %v14651_v26  ;;  %v14657_v15 = vsel %vm11375_vm9, 4294967295, %v14656_v15  ;;  %vm14669_vm4 = vcmp.ge.f32.partialorder %v10428_v30, 0.0  ;;  %vm14672_vm2 = vcmp.le.s32.totalorder %v14671_v6, 17  ;;  %vm14673_vm13 = vcmp.ge.s32.totalorder %v14671_v6, 1  ;;  %v14681_v44 = vld [vmem:[#allocation116_spill] sm:$0xff] }
 0x2f7   :  { %14658 = vst [vmem:[#allocation82_spill] sm:$0xff] %v14657_v15  ;;  %v11397_v15 = vsel %vm14667_vm12, %v14666_v7, %v10887_v49  ;;  %v11403_v26 = vsel %vm14669_vm4, %v10428_v30, %v10890_v60  ;;  %vm11409_vm7 = vmand %vm14673_vm13, %vm14672_vm2  ;;  %vm14677_vm15 = vcmp.le.s32.totalorder %v14676_v35, 17  ;;  %vm14678_vm6 = vcmp.ge.s32.totalorder %v14676_v35, 1  ;;  %v14682_v30 = vld [vmem:[#allocation66_spill] sm:$0xff] }
 0x2f8   :  { %14668 = vst [vmem:[#allocation110_spill] sm:$0xff] %v11397_v15  ;;  %14670 = vst [vmem:[#allocation14_spill] sm:$0xff] %v11403_v26  ;;  %v14683_v60 = vld [vmem:[#allocation26_spill] sm:$0xff]  ;;  %vm14686_vm2 = vcmp.ge.f32.partialorder %v10434_v29, 0.0  ;;  %vm14690_vm13 = vcmp.ge.f32.partialorder %v10441_v24, 0.0  ;;  %v14732_v15 = vld [vmem:[#allocation61_spill] sm:$0xff]  ;;  %vm14790_vm4 = vnez %v14602_v56 }
 0x2f9   :  { %vm11417_vm12 = vmand %vm14678_vm6, %vm14677_vm15  ;;  %vm14684_vm1 = vcmp.ge.f32.partialorder %v14683_v60, 0.0  ;;  %v11433_v6 = vsel %vm14686_vm2, %v10434_v29, %v10936_v20  ;;  %vm14688_vm6 = vcmp.ge.f32.partialorder %v10437_v51, 0.0  ;;  %v11445_v26 = vsel %vm14690_vm13, %v10441_v24, %v10942_v53  ;;  %v14703_v24 = vld [vmem:[#allocation42_spill] sm:$0xff]  ;;  %v14716_v53 = vld [vmem:[#allocation15_spill] sm:$0xff] }
 0x2fa   :  { %v11427_v7 = vsel %vm14684_vm1, %v14683_v60, %v14682_v30  ;;  %14687 = vst [vmem:[#allocation37_spill] sm:$0xff] %v11433_v6  ;;  %v11439_v35 = vsel %vm14688_vm6, %v10437_v51, %v10939_v32  ;;  %14691 = vst [vmem:[#allocation84_spill] sm:$0xff] %v11445_v26  ;;  %v14692_v30 = vld [vmem:[#allocation106_spill] sm:$0xff]  ;;  %vm14697_vm2 = vcmp.ge.f32.partialorder %v14408_v23, 0.0  ;;  %vm14699_vm6 = vcmp.ge.f32.partialorder %v14409_v18, 0.0  ;;  %v14726_v6 = vld [vmem:[#allocation17_spill] sm:$0xff] }
 0x2fb   :  { %14685 = vst [vmem:[#allocation36_spill] sm:$0xff] %v11427_v7  ;;  %14689 = vst [vmem:[#allocation38_spill] sm:$0xff] %v11439_v35  ;;  %vm14693_vm1 = vcmp.le.s32.totalorder %v14692_v30, 17  ;;  %vm14694_vm15 = vcmp.ge.s32.totalorder %v14692_v30, 1  ;;  %v11459_v20 = vsel %vm14697_vm2, %v14408_v23, %v10985_v5  ;;  %v11465_v29 = vsel %vm14699_vm6, %v14409_v18, %v10988_v2  ;;  %v14705_v30 = vld [vmem:[#allocation107_spill] sm:$0xff]  ;;  %v14718_v35 = vld [vmem:[#allocation108_spill] sm:$0xff] }
 0x2fc   :  { %vm11451_vm9 = vmand %vm14694_vm15, %vm14693_vm1  ;;  %14698 = vst [vmem:[#allocation85_spill] sm:$0xff] %v11459_v20  ;;  %vm14701_vm13 = vcmp.ge.f32.partialorder %v14410_v48, 0.0  ;;  %v2139_v32 = vsel %vm10877_vm0, %v14703_v24, 0.0  ;;  %vm14706_vm1 = vcmp.le.s32.totalorder %v14705_v30, 17  ;;  %vm14707_vm15 = vcmp.ge.s32.totalorder %v14705_v30, 1  ;;  %v14710_v18 = vld [vmem:[#allocation43_spill] sm:$0xff] }
 0x2fd   :  { %14700 = vst [vmem:[#allocation86_spill] sm:$0xff] %v11465_v29  ;;  %v11471_v51 = vsel %vm14701_vm13, %v14410_v48, %v10991_v40  ;;  %vm11480_vm2 = vmand %vm14707_vm15, %vm14706_vm1  ;;  %v2140_v2 = vsel %vm10905_vm14, %v14710_v18, 0.0  ;;  %v14712_v29 = vld [vmem:[#allocation44_spill] sm:$0xff]  ;;  %v14714_v40 = vld [vmem:[#allocation102_spill] sm:$0xff]  ;;  %v2143_v30 = vsel %vm10929_vm8, %v14716_v53, 0.0  ;;  %vm14719_vm0 = vcmp.le.s32.totalorder %v14718_v35, 17 }
 0x2fe   :  { %14702 = vst [vmem:[#allocation111_spill] sm:$0xff] %v11471_v51  ;;  %v2141_v48 = vsel %vm10913_vm10, %v14712_v29, 0.0  ;;  %v2142_v24 = vsel %vm10921_vm3, %v14714_v40, 0.0  ;;  %2190 = vst [vmem:[#allocation3] sm:$0xff] %v2139_v32  ;;  %vm14720_vm6 = vcmp.ge.s32.totalorder %v14718_v35, 1  ;;  %v14721_v5 = vmov 0 }
 0x2ff   :  { %vm11500_vm13 = vmand %vm14720_vm6, %vm14719_vm0  ;;  %v14724_v18 = vld [vmem:[#allocation16_spill] sm:$0xff]  ;;  %v2145_v40 = vsel %vm10962_vm11, %v14726_v6, 0.0  ;;  %v14728_v7 = vld [vmem:[#allocation18_spill] sm:$0xff]  ;;  %vm14733_vm10 = vnez %v14732_v15  ;;  %2191 = vst [vmem:[#allocation3 + $0x8] sm:$0xff] %v2140_v2  ;;  %vm14751_vm6 = vcmp.le.s32.totalorder %v14516_v1, 17 }
 0x300   :  { %v14722_v5 = vsel %vm11500_vm13, 4294967295, %v14721_v5  ;;  %v2144_v29 = vsel %vm10954_vm5, %v14724_v18, 0.0  ;;  %v14729_v26 = vld [vmem:[#allocation98_spill] sm:$0xff]  ;;  %v14731_v53 = vld [vmem:[#allocation19_spill] sm:$0xff]  ;;  %2192 = vst [vmem:[#allocation3 + $0x10] sm:$0xff] %v2141_v48  ;;  %2193 = vst [vmem:[#allocation3 + $0x18] sm:$0xff] %v2142_v24 }
 0x301   :  { %14723 = vst [vmem:[#allocation39_spill] sm:$0xff] %v14722_v5  ;;  %vm14730_vm8 = vnez %v14729_v26  ;;  %v2147_v35 = vsel %vm14733_vm10, %v14731_v53, 0.0  ;;  %2194 = vst [vmem:[#allocation3 + $0x20] sm:$0xff] %v2143_v30  ;;  %v14734_v5 = vld [vmem:[#allocation109_spill] sm:$0xff]  ;;  %v14739_v6 = vld [vmem:[#allocation20_spill] sm:$0xff] }
 0x302   :  { %v2146_v32 = vsel %vm14730_vm8, %v14728_v7, 0.0  ;;  %vm14735_vm3 = vcmp.le.s32.totalorder %v14734_v5, 17  ;;  %vm14736_vm14 = vcmp.ge.s32.totalorder %v14734_v5, 1  ;;  %v14740_v20 = vld [vmem:[#allocation28_spill] sm:$0xff]  ;;  %v14742_v51 = vld [vmem:[#allocation21_spill] sm:$0xff]  ;;  %v14746_v48 = vld [vmem:[#allocation30_spill] sm:$0xff] }
 0x303   :  { %vm11520_vm5 = vmand %vm14736_vm14, %vm14735_vm3  ;;  %vm14741_vm11 = vnez %v14740_v20  ;;  %v14743_v26 = vld [vmem:[#allocation29_spill] sm:$0xff]  ;;  %v14745_v2 = vld [vmem:[#allocation24_spill] sm:$0xff]  ;;  %vm14747_vm15 = vnez %v14746_v48  ;;  %2195 = vst [vmem:[#allocation3 + $0x28] sm:$0xff] %v2144_v29  ;;  %vm14752_vm8 = vcmp.ge.s32.totalorder %v14516_v1, 1  ;;  %vm14756_vm3 = vnez %v14502_v12 }
 0x304   :  { %v2148_v7 = vsel %vm14741_vm11, %v14739_v6, 0.0  ;;  %vm14744_vm1 = vnez %v14743_v26  ;;  %v2150_v24 = vsel %vm14747_vm15, %v14745_v2, 0.0  ;;  %v14748_v30 = vld [vmem:[#allocation75_spill] sm:$0xff]  ;;  %v14749_v53 = vld [vmem:[#allocation62_spill] sm:$0xff]  ;;  %2196 = vst [vmem:[#allocation3 + $0x30] sm:$0xff] %v2145_v40  ;;  %2197 = vst [vmem:[#allocation3 + $0x38] sm:$0xff] %v2146_v32  ;;  %vm14758_vm14 = vnez %v14506_v62 }
 0x305   :  { %v2149_v15 = vsel %vm14744_vm1, %v14742_v51, 0.0  ;;  %vm14750_vm0 = vnez %v14749_v53  ;;  %2198 = vst [vmem:[#allocation3 + $0x40] sm:$0xff] %v2147_v35  ;;  %vm11540_vm10 = vmand %vm14752_vm8, %vm14751_vm6  ;;  %v14755_v20 = vld [vmem:[#allocation80_spill] sm:$0xff]  ;;  %v14757_v26 = vld [vmem:[#allocation27_spill] sm:$0xff]  ;;  %vm14759_vm11 = vnez %v14510_v13  ;;  %vm14760_vm1 = vnez %v14515_v28 }
 0x306   :  { %v2151_v5 = vsel %vm14750_vm0, %v14748_v30, 0.0  ;;  %v2152_v51 = vsel %vm14756_vm3, %v14755_v20, 0.0  ;;  %v2153_v2 = vsel %vm14758_vm14, %v14757_v26, 0.0  ;;  %v2154_v29 = vsel %vm14759_vm11, %v11037_v33, 0.0  ;;  %2199 = vst [vmem:[#allocation3 + $0x48] sm:$0xff] %v2148_v7  ;;  %2200 = vst [vmem:[#allocation3 + $0x50] sm:$0xff] %v2149_v15 }
 0x307   :  { %v2155_v1 = vsel %vm14760_vm1, %v11043_v57, 0.0  ;;  %2201 = vst [vmem:[#allocation3 + $0x58] sm:$0xff] %v2150_v24  ;;  %2202 = vst [vmem:[#allocation3 + $0x60] sm:$0xff] %v2151_v5  ;;  %vm14761_vm15 = vcmp.le.s32.totalorder %v14546_v54, 17  ;;  %vm14762_vm0 = vcmp.ge.s32.totalorder %v14546_v54, 1  ;;  %v14765_v62 = vld [vmem:[#allocation63_spill] sm:$0xff]  ;;  %vm14766_vm8 = vnez %v14530_v38 }
 0x308   :  { %vm11560_vm6 = vmand %vm14762_vm0, %vm14761_vm15  ;;  %v2156_v33 = vsel %vm14766_vm8, %v14765_v62, 0.0  ;;  %v14767_v13 = vld [vmem:[#allocation64_spill] sm:$0xff]  ;;  %vm14768_vm3 = vnez %v14535_v9  ;;  %vm14769_vm14 = vnez %v14540_v58  ;;  %vm14770_vm11 = vnez %v14545_v8  ;;  %2203 = vst [vmem:[#allocation3 + $0x68] sm:$0xff] %v2152_v51  ;;  %v14775_v9 = vld [vmem:[#allocation65_spill] sm:$0xff] }
 0x309   :  { %v2157_v57 = vsel %vm14768_vm3, %v14767_v13, 0.0  ;;  %v2158_v28 = vsel %vm14769_vm14, %v11095_v3, 0.0  ;;  %v2159_v54 = vsel %vm14770_vm11, %v11101_v34, 0.0  ;;  %2204 = vst [vmem:[#allocation3 + $0x70] sm:$0xff] %v2153_v2  ;;  %2205 = vst [vmem:[#allocation3 + $0x78] sm:$0xff] %v2154_v29  ;;  %vm14771_vm1 = vcmp.le.s32.totalorder %v14575_v37, 17 }
 0x30a   :  { %2206 = vst [vmem:[#allocation3 + $0x80] sm:$0xff] %v2155_v1  ;;  %vm14772_vm15 = vcmp.ge.s32.totalorder %v14575_v37, 1  ;;  %vm14776_vm8 = vnez %v14559_v16  ;;  %v14777_v58 = vld [vmem:[#allocation68_spill] sm:$0xff]  ;;  %vm14778_vm3 = vnez %v14564_v52  ;;  %vm14779_vm14 = vnez %v14569_v36  ;;  %2207 = vst [vmem:[#allocation3 + $0x88] sm:$0xff] %v2156_v33  ;;  %v14785_v52 = vld [vmem:[#allocation69_spill] sm:$0xff] }
 0x30b   :  { %vm11580_vm0 = vmand %vm14772_vm15, %vm14771_vm1  ;;  %v2160_v3 = vsel %vm14776_vm8, %v14775_v9, 0.0  ;;  %v2161_v34 = vsel %vm14778_vm3, %v14777_v58, 0.0  ;;  %v2162_v8 = vsel %vm14779_vm14, %v11153_v50, 0.0  ;;  %vm14780_vm11 = vnez %v14574_v14  ;;  %2208 = vst [vmem:[#allocation3 + $0x90] sm:$0xff] %v2157_v57  ;;  %v14787_v36 = vld [vmem:[#allocation74_spill] sm:$0xff]  ;;  %v14822_v5 = vld [vmem:[#allocation36_spill] sm:$0xff] }
 0x30c   :  { %v2163_v37 = vsel %vm14780_vm11, %v11159_v55, 0.0  ;;  %2209 = vst [vmem:[#allocation3 + $0x98] sm:$0xff] %v2158_v28  ;;  %2210 = vst [vmem:[#allocation3 + $0xa0] sm:$0xff] %v2159_v54  ;;  %vm14781_vm1 = vcmp.le.s32.totalorder %v14603_v22, 17  ;;  %vm14782_vm15 = vcmp.ge.s32.totalorder %v14603_v22, 1  ;;  %v14783_v16 = vmov 0 }
 0x30d   :  { %vm11600_vm8 = vmand %vm14782_vm15, %vm14781_vm1  ;;  %vm14786_vm3 = vnez %v14587_v47  ;;  %vm14788_vm14 = vnez %v14592_v17  ;;  %vm14789_vm11 = vnez %v14597_v19  ;;  %v2167_v22 = vsel %vm14790_vm4, %v11217_v63, 0.0  ;;  %2211 = vst [vmem:[#allocation3 + $0xa8] sm:$0xff] %v2160_v3  ;;  %v14795_v17 = vld [vmem:[#allocation31_spill] sm:$0xff]  ;;  %v14797_v19 = vld [vmem:[#allocation45_spill] sm:$0xff] }
 0x30e   :  { %v14784_v16 = vsel %vm11600_vm8, 4294967295, %v14783_v16  ;;  %v2164_v50 = vsel %vm14786_vm3, %v14785_v52, 0.0  ;;  %v2165_v55 = vsel %vm14788_vm14, %v14787_v36, 0.0  ;;  %v2166_v14 = vsel %vm14789_vm11, %v11211_v61, 0.0  ;;  %2212 = vst [vmem:[#allocation3 + $0xb0] sm:$0xff] %v2161_v34  ;;  %2213 = vst [vmem:[#allocation3 + $0xb8] sm:$0xff] %v2162_v8 }
 0x30f   :  { %2214 = vst [vmem:[#allocation3 + $0xc0] sm:$0xff] %v2163_v37  ;;  %vm14791_vm1 = vcmp.le.s32.totalorder %v14630_v42, 17  ;;  %vm14792_vm15 = vcmp.ge.s32.totalorder %v14630_v42, 1  ;;  %v14793_v47 = vmov 0  ;;  %vm14796_vm14 = vnez %v14614_v11  ;;  %2215 = vst [vmem:[#allocation3 + $0xc8] sm:$0xff] %v2164_v50  ;;  %v14810_v40 = vld [vmem:[#allocation46_spill] sm:$0xff] }
 0x310   :  { %vm11620_vm3 = vmand %vm14792_vm15, %vm14791_vm1  ;;  %v2168_v61 = vsel %vm14796_vm14, %v14795_v17, 0.0  ;;  %vm14798_vm11 = vnez %v14619_v39  ;;  %vm14799_vm4 = vnez %v14624_v27  ;;  %vm14800_vm8 = vnez %v14629_v0  ;;  %2216 = vst [vmem:[#allocation3 + $0xd0] sm:$0xff] %v2165_v55  ;;  %v14806_v39 = vld [vmem:[#allocation32_spill] sm:$0xff]  ;;  %v14808_v27 = vld [vmem:[#allocation35_spill] sm:$0xff] }
 0x311   :  { %v14794_v47 = vsel %vm11620_vm3, 4294967295, %v14793_v47  ;;  %v2169_v63 = vsel %vm14798_vm11, %v14797_v19, 0.0  ;;  %v2170_v56 = vsel %vm14799_vm4, %v11269_v59, 0.0  ;;  %v2171_v42 = vsel %vm14800_vm8, %v11275_v10, 0.0  ;;  %2217 = vst [vmem:[#allocation3 + $0xd8] sm:$0xff] %v2166_v14  ;;  %2218 = vst [vmem:[#allocation3 + $0xe0] sm:$0xff] %v2167_v22 }
 0x312   :  { %vm14801_vm1 = vcmp.le.s32.totalorder %v14659_v41, 17  ;;  %vm14802_vm15 = vcmp.ge.s32.totalorder %v14659_v41, 1  ;;  %vm14805_vm11 = vnez %v14641_v4  ;;  %vm14807_vm4 = vnez %v14646_v31  ;;  %v14811_v32 = vld [vmem:[#allocation82_spill] sm:$0xff]  ;;  %2219 = vst [vmem:[#allocation3 + $0xe8] sm:$0xff] %v2168_v61  ;;  %2220 = vst [vmem:[#allocation3 + $0xf0] sm:$0xff] %v2169_v63  ;;  %v14817_v4 = vld [vmem:[#allocation33_spill] sm:$0xff] }
 0x313   :  { %vm11640_vm14 = vmand %vm14802_vm15, %vm14801_vm1  ;;  %v2172_v59 = vsel %vm14805_vm11, %v11281_v25, 0.0  ;;  %v2173_v10 = vsel %vm14807_vm4, %v14806_v39, 0.0  ;;  %vm14809_vm8 = vnez %v14808_v27  ;;  %vm14812_vm3 = vnez %v14811_v32  ;;  %2221 = vst [vmem:[#allocation3 + $0xf8] sm:$0xff] %v2170_v56  ;;  %v2492_v35 = vld [vmem:[#allocation3 + $0x19] ss:$2 sm:$0xff]  ;;  %v14823_v60 = vld [vmem:[#allocation37_spill] sm:$0xff] }
 0x314   :  { %v2174_v0 = vsel %vm14809_vm8, %v11327_v43, 0.0  ;;  %v2175_v41 = vsel %vm14812_vm3, %v14810_v40, 0.0  ;;  %2222 = vst [vmem:[#allocation3 + $0x100] sm:$0xff] %v2171_v42  ;;  %vm14813_vm1 = vcmp.le.s32.totalorder %v14681_v44, 17  ;;  %vm14814_vm15 = vcmp.ge.s32.totalorder %v14681_v44, 1  ;;  %v14818_v31 = vld [vmem:[#allocation34_spill] sm:$0xff] }
 0x315   :  { %vm11660_vm11 = vmand %vm14814_vm15, %vm14813_vm1  ;;  %v2176_v43 = vsel %vm11409_vm7, %v14817_v4, 0.0  ;;  %v2177_v7 = vsel %vm11417_vm12, %v14818_v31, 0.0  ;;  %v2178_v15 = vsel %vm11451_vm9, %v11385_v21, 0.0  ;;  %v2179_v44 = vsel %vm11480_vm2, %v11391_v45, 0.0  ;;  %2223 = vst [vmem:[#allocation3 + $0x108] sm:$0xff] %v2172_v59  ;;  %v14819_v24 = vld [vmem:[#allocation110_spill] sm:$0xff] }
 0x316   :  { %2224 = vst [vmem:[#allocation3 + $0x110] sm:$0xff] %v2173_v10  ;;  %2225 = vst [vmem:[#allocation3 + $0x118] sm:$0xff] %v2174_v0  ;;  %v2456_v48 = vld [vmem:[#allocation3 + $0x19] ss:$2 sm:$0xff]  ;;  %v2180_v30 = vsel %vm11500_vm13, %v14819_v24, 0.0  ;;  %v2182_v21 = vsel %vm11540_vm10, %v14822_v5, 0.0  ;;  %vm14826_vm9 = vnez %v14784_v16  ;;  %vm14828_vm7 = vnez %v14794_v47 }
 0x317   :  { %2226 = vst [vmem:[#allocation3 + $0x120] sm:$0xff] %v2175_v41  ;;  %v14821_v53 = vld [vmem:[#allocation14_spill] sm:$0xff]  ;;  %v2183_v45 = vsel %vm11560_vm6, %v14823_v60, 0.0  ;;  %2227 = vst [vmem:[#allocation3 + $0x128] sm:$0xff] %v2176_v43  ;;  %v14825_v26 = vld [vmem:[#allocation84_spill] sm:$0xff]  ;;  %v2496_v13 = vrot.slane %v2492_v35, 7 }
 0x318   :  { %v2181_v49 = vsel %vm11520_vm5, %v14821_v53, 0.0  ;;  %2228 = vst [vmem:[#allocation3 + $0x130] sm:$0xff] %v2177_v7  ;;  %2229 = vst [vmem:[#allocation3 + $0x138] sm:$0xff] %v2178_v15  ;;  %v2481_v23 = vld [vmem:[#allocation3 + $0x18] ss:$2 sm:$0xff]  ;;  %v2185_v18 = vsel %vm14826_vm9, %v14825_v26, 0.0 }
 0x319   :  { %2230 = vst [vmem:[#allocation3 + $0x140] sm:$0xff] %v2179_v44  ;;  %v14824_v20 = vld [vmem:[#allocation38_spill] sm:$0xff]  ;;  %v14827_v2 = vld [vmem:[#allocation85_spill] sm:$0xff]  ;;  %2231 = vst [vmem:[#allocation3 + $0x148] sm:$0xff] %v2180_v30  ;;  %v2461_v57 = vrot.slane %v2456_v48, 7  ;;  %v2485_v28 = vrot.slane %v2481_v23, 7 }
 0x31a   :  { %v2184_v51 = vsel %vm11580_vm0, %v14824_v20, 0.0  ;;  %v2186_v6 = vsel %vm14828_vm7, %v14827_v2, 0.0  ;;  %v14829_v29 = vld [vmem:[#allocation86_spill] sm:$0xff]  ;;  %2232 = vst [vmem:[#allocation3 + $0x150] sm:$0xff] %v2181_v49  ;;  %2233 = vst [vmem:[#allocation3 + $0x158] sm:$0xff] %v2182_v21  ;;  %v14830_v62 = vld [vmem:[#allocation111_spill] sm:$0xff] }
 0x31b   :  { %v2187_v1 = vsel %vm11640_vm14, %v14829_v29, 0.0  ;;  %2234 = vst [vmem:[#allocation3 + $0x160] sm:$0xff] %v2183_v45  ;;  %v2443_v12 = vld [vmem:[#allocation3 + $0x18] ss:$2 sm:$0xff]  ;;  %v2188_v33 = vsel %vm11660_vm11, %v14830_v62, 0.0  ;;  %2235 = vst [vmem:[#allocation3 + $0x168] sm:$0xff] %v2184_v51 }
 0x31c   :  { %2236 = vst [vmem:[#allocation3 + $0x170] sm:$0xff] %v2185_v18  ;;  %2237 = vst [vmem:[#allocation3 + $0x178] sm:$0xff] %v2186_v6  ;;  %v2603_v54 = vld [vmem:[#allocation3 + $0x49] ss:$2 sm:$0xff]  ;;  %v2448_v38 = vrot.slane %v2443_v12, 7  ;;  %vm2408_vm12 = vcmask 1040384  }
 0x31d   :  { %2238 = vst [vmem:[#allocation3 + $0x180] sm:$0xff] %v2187_v1  ;;  %2239 = vst [vmem:[#allocation3 + $0x188] sm:$0xff] %v2188_v33  ;;  %v2493_v9 = vld [vmem:[#allocation3 + $0x29] ss:$2 sm:$0x1]  ;;  %v2607_v3 = vrot.slane %v2603_v54, 7 }
 0x31e   :  { %2501 = vst [vmem:[#allocation2 + $0x220] sm:$0xfe] %v2496_v13  ;;  %2466 = vst [vmem:[#allocation2 + $0x378] sm:$0xfe] %v2461_v57  ;;  %v2497_v58 = vrot.slane %v2493_v9, 7  ;;  %v11712_v7 = vld [vmem:[#allocation2 + $0x18] sm:$0xff] }
 0x31f   :  { %2490 = vst [vmem:[#allocation2 + $0x160] sm:$0xfe] %v2485_v28  ;;  %v2458_v34 = vld [vmem:[#allocation3 + $0x29] ss:$2 sm:$0x1] }
 0x320   :  { %v2567_v8 = vld [vmem:[#allocation3 + $0x49] ss:$2 sm:$0xff]  ;;  %2453 = vst [vmem:[#allocation2 + $0x440] sm:$0xfe] %v2448_v38  ;;  %v2462_v37 = vrot.slane %v2458_v34, 7  ;;  %v2498_v50 = vsel %vm2408_vm12, %v2496_v13, %v2497_v58 }
 0x321   :  { %v2482_v16 = vld [vmem:[#allocation3 + $0x28] ss:$2 sm:$0x1]  ;;  %2612 = vst [vmem:[#allocation2 + $0xd0] sm:$0xfe] %v2607_v3  ;;  %v2572_v52 = vrot.slane %v2567_v8, 7 }
 0x322   :  { %v2486_v36 = vrot.slane %v2482_v16, 7  ;;  %v2445_v55 = vld [vmem:[#allocation3 + $0x28] ss:$2 sm:$0x1]  ;;  %2502 = vst [vmem:[#allocation2 + $0x270] sm:$0x3] %v2498_v50  ;;  %v2463_v22 = vsel %vm2408_vm12, %v2461_v57, %v2462_v37 }
 0x323   :  { %v2592_v14 = vld [vmem:[#allocation3 + $0x48] ss:$2 sm:$0xff]  ;;  %v2449_v47 = vrot.slane %v2445_v55, 7  ;;  %v2604_v17 = vld [vmem:[#allocation3 + $0x59] ss:$2 sm:$0x1] }
 0x324   :  { %2577 = vst [vmem:[#allocation2 + $0x4a0] sm:$0xfe] %v2572_v52  ;;  %v2596_v61 = vrot.slane %v2592_v14, 7  ;;  %2467 = vst [vmem:[#allocation2 + $0xd8] sm:$0x3] %v2463_v22  ;;  %v2487_v19 = vsel %vm2408_vm12, %v2485_v28, %v2486_v36  ;;  %v2608_v63 = vrot.slane %v2604_v17, 7 }
 0x325   :  { %v2593_v56 = vld [vmem:[#allocation3 + $0x58] ss:$2 sm:$0x1]  ;;  %v2554_v42 = vld [vmem:[#allocation3 + $0x48] ss:$2 sm:$0xff]  ;;  %v2450_v11 = vsel %vm2408_vm12, %v2448_v38, %v2449_v47 }
 0x326   :  { %2491 = vst [vmem:[#allocation2 + $0xb8] sm:$0x3] %v2487_v19  ;;  %v2597_v59 = vrot.slane %v2593_v56, 7  ;;  %2601 = vst [vmem:[#allocation2 + $0x258] sm:$0xfe] %v2596_v61  ;;  %v2559_v39 = vrot.slane %v2554_v42, 7  ;;  %v2609_v27 = vsel %vm2408_vm12, %v2607_v3, %v2608_v63 }
 0x327   :  { %v2569_v10 = vld [vmem:[#allocation3 + $0x59] ss:$2 sm:$0x1]  ;;  %2454 = vst [vmem:[#allocation2 + $0x60] sm:$0x3] %v2450_v11  ;;  %v3349_v41 = vld [vmem:[#allocation2 + $0x220] sm:$0xff] }
 0x328   :  { %v2573_v0 = vrot.slane %v2569_v10, 7  ;;  %v2556_v40 = vld [vmem:[#allocation3 + $0x58] ss:$2 sm:$0x1]  ;;  %v11708_v32 = vld [vmem:[#allocation3 + $0x79] ss:$2 sm:$0xff]  ;;  %v2598_v4 = vsel %vm2408_vm12, %v2596_v61, %v2597_v59  ;;  %3710 = vmatprep.mubr.f32.mxu1 %v3349_v41 }
 0x329   :  { %v3337_v35 = vld [vmem:[#allocation2 + $0x378] sm:$0xff]  ;;  %v3348_v25 = vld [vmem:[#allocation2 + $0x160] sm:$0xff]  ;;  %2613 = vst [vmem:[#allocation2 + $0x1d0] sm:$0x3] %v2609_v27  ;;  %2564 = vst [vmem:[#allocation2 + $0x458] sm:$0xfe] %v2559_v39 }
 0x32a   :  { %v2560_v43 = vrot.slane %v2556_v40, 7  ;;  %v2718_v31 = vrot.slane %v11708_v32, 7  ;;  %4930 = vst [vmem:[#allocation2 + $0x220] sm:$0xff] %v11712_v7  ;;  %4165 = vmatprep.mubr.f32.mxu0 %v3337_v35  ;;  %4918 = vst [vmem:[#allocation2 + $0x378] sm:$0xff] %v11712_v7  ;;  %v3336_v15 = vld [vmem:[#allocation2 + $0x440] sm:$0xff]  ;;  %v3367_v44 = vld [vmem:[#allocation2 + $0xd0] sm:$0xff]  ;;  %v2574_v48 = vsel %vm2408_vm12, %v2572_v52, %v2573_v0  ;;  %3711 = vmatmul.mubr.f32.gmra.mxu1 %v3348_v25 }
 0x32b   :  { %4929 = vst [vmem:[#allocation2 + $0x160] sm:$0xff] %v11712_v7  ;;  %2602 = vst [vmem:[#allocation2 + $0x4b0] sm:$0x3] %v2598_v4  ;;  %v2678_v24 = vld [vmem:[#allocation3 + $0x79] ss:$2 sm:$0xff]  ;;  %4166 = vmatmul.mubr.f32.vlgmr.msra.gmra.mxu0 %v3336_v15  ;;  %v3355_v21 = vld [vmem:[#allocation2 + $0x4a0] sm:$0xff] }
 0x32c   :  { %4917 = vst [vmem:[#allocation2 + $0x440] sm:$0xff] %v11712_v7  ;;  %4948 = vst [vmem:[#allocation2 + $0xd0] sm:$0xff] %v11712_v7  ;;  %v2561_v46 = vsel %vm2408_vm12, %v2559_v39, %v2560_v43  ;;  %v2680_v30 = vld [vmem:[#allocation3 + $0x89] ss:$2 sm:$0x1]  ;;  %v2683_v53 = vrot.slane %v2678_v24, 7 }
 0x32d   :  { %2578 = vst [vmem:[#allocation2 + $0x428] sm:$0x3] %v2574_v48  ;;  %2723 = vst [vmem:[#allocation2 + $0xc8] sm:$0xfe] %v2718_v31  ;;  %v2703_v49 = vld [vmem:[#allocation3 + $0x78] ss:$2 sm:$0xff] }
 0x32e   :  { %v3358_v5 = vld [vmem:[#allocation2 + $0x270] sm:$0xff]  ;;  %2565 = vst [vmem:[#allocation2 + $0x2e0] sm:$0x3] %v2561_v46  ;;  %v2684_v60 = vrot.slane %v2680_v30, 7  ;;  %v2707_v45 = vrot.slane %v2703_v49, 7  ;;  %v3346_v20 = vld [vmem:[#allocation2 + $0xd8] sm:$0xff] }
 0x32f   :  { %v2665_v23 = vld [vmem:[#allocation3 + $0x78] ss:$2 sm:$0xff]  ;;  %3715 = vmatprep.mubr.f32.mxu1 %v3358_v5  ;;  %4939 = vst [vmem:[#allocation2 + $0x270] sm:$0xff] %v11712_v7  ;;  %4936 = vst [vmem:[#allocation2 + $0x4a0] sm:$0xff] %v11712_v7  ;;  %4170 = vmatprep.mubr.f32.mxu0 %v3346_v20  ;;  %v3357_v18 = vld [vmem:[#allocation2 + $0xb8] sm:$0xff] }
 0x330   :  { %2688 = vst [vmem:[#allocation2 + $0x140] sm:$0xfe] %v2683_v53  ;;  %v2667_v51 = vld [vmem:[#allocation3 + $0x88] ss:$2 sm:$0x1]  ;;  %v2670_v26 = vrot.slane %v2665_v23, 7  ;;  %v2685_v6 = vsel %vm2408_vm12, %v2683_v53, %v2684_v60  ;;  %3716 = vmatmul.mubr.f32.gmra.mxu1 %v3357_v18 }
 0x331   :  { %4927 = vst [vmem:[#allocation2 + $0xd8] sm:$0xff] %v11712_v7  ;;  %v3366_v2 = vld [vmem:[#allocation2 + $0x258] sm:$0xff]  ;;  %2712 = vst [vmem:[#allocation2 + $0x4e0] sm:$0xfe] %v2707_v45  ;;  %v2671_v29 = vrot.slane %v2667_v51, 7  ;;  %v3345_v12 = vld [vmem:[#allocation2 + $0x60] sm:$0xff]  ;;  %3720 = vmatprep.mubr.f32.mxu1 %v3367_v44 }
 0x332   :  { %v2715_v1 = vld [vmem:[#allocation3 + $0x89] ss:$2 sm:$0x1]  ;;  %4938 = vst [vmem:[#allocation2 + $0xb8] sm:$0xff] %v11712_v7  ;;  %4947 = vst [vmem:[#allocation2 + $0x258] sm:$0xff] %v11712_v7  ;;  %4171 = vmatmul.mubr.f32.gmra.mxu0 %v3345_v12  ;;  %v3376_v50 = vld [vmem:[#allocation2 + $0x1d0] sm:$0xff] }
 0x333   :  { %2689 = vst [vmem:[#allocation2 + $0x278] sm:$0x3] %v2685_v6  ;;  %2675 = vst [vmem:[#allocation2 + $0x1f0] sm:$0xfe] %v2670_v26  ;;  %v2719_v62 = vrot.slane %v2715_v1, 7  ;;  %v3354_v13 = vld [vmem:[#allocation2 + $0x458] sm:$0xff]  ;;  %v2672_v57 = vsel %vm2408_vm12, %v2670_v26, %v2671_v29  ;;  %4175 = vmatprep.mubr.f32.mxu0 %v3355_v21 }
 0x334   :  { %v2704_v33 = vld [vmem:[#allocation3 + $0x88] ss:$2 sm:$0x1]  ;;  %4926 = vst [vmem:[#allocation2 + $0x60] sm:$0xff] %v11712_v7  ;;  %v2825_v54 = vld [vmem:[#allocation3 + $0xa9] ss:$2 sm:$0xff]  ;;  %3721 = vmatmul.mubr.f32.gmra.mxu1 %v3366_v2 }
 0x335   :  { %v2708_v28 = vrot.slane %v2704_v33, 7  ;;  %4935 = vst [vmem:[#allocation2 + $0x458] sm:$0xff] %v11712_v7  ;;  %2676 = vst [vmem:[#allocation2 + $0x118] sm:$0x3] %v2672_v57  ;;  %v2720_v38 = vsel %vm2408_vm12, %v2718_v31, %v2719_v62  ;;  %v2829_v9 = vrot.slane %v2825_v54, 7  ;;  %v3364_v34 = vld [vmem:[#allocation2 + $0x428] sm:$0xff]  ;;  %3725 = vmatprep.mubr.f32.mxu1 %v3376_v50 }
 0x336   :  { %v2789_v3 = vld [vmem:[#allocation3 + $0xa9] ss:$2 sm:$0xff]  ;;  %v2814_v58 = vld [vmem:[#allocation3 + $0xa8] ss:$2 sm:$0xff]  ;;  %2724 = vst [vmem:[#allocation2 + $0x208] sm:$0x3] %v2720_v38  ;;  %4176 = vmatmul.mubr.f32.gmra.mxu0 %v3354_v13 }
 0x337   :  { %v2709_v8 = vsel %vm2408_vm12, %v2707_v45, %v2708_v28  ;;  %v2794_v37 = vrot.slane %v2789_v3, 7  ;;  %v2818_v16 = vrot.slane %v2814_v58, 7  ;;  %v2776_v52 = vld [vmem:[#allocation3 + $0xa8] ss:$2 sm:$0xff]  ;;  %4945 = vst [vmem:[#allocation2 + $0x428] sm:$0xff] %v11712_v7  ;;  %4180 = vmatprep.mubr.f32.mxu0 %v3364_v34  ;;  %v3375_v63 = vld [vmem:[#allocation2 + $0x4b0] sm:$0xff] }
 0x338   :  { %v3363_v36 = vld [vmem:[#allocation2 + $0x2e0] sm:$0xff]  ;;  %2713 = vst [vmem:[#allocation2 + $0x3e0] sm:$0x3] %v2709_v8  ;;  %2834 = vst [vmem:[#allocation2 + $0x70] sm:$0xfe] %v2829_v9  ;;  %v2781_v55 = vrot.slane %v2776_v52, 7  ;;  %3726 = vmatmul.mubr.f32.gmra.mxu1 %v3375_v63 }
 0x339   :  { %v2826_v14 = vld [vmem:[#allocation3 + $0xb9] ss:$2 sm:$0x1]  ;;  %4944 = vst [vmem:[#allocation2 + $0x2e0] sm:$0xff] %v11712_v7  ;;  %v3373_v22 = vld [vmem:[#allocation2 + $0x140] sm:$0xff] }
 0x33a   :  { %2799 = vst [vmem:[#allocation2 + $0x80] sm:$0xfe] %v2794_v37  ;;  %2823 = vst [vmem:[#allocation2 + $0x240] sm:$0xfe] %v2818_v16  ;;  %v2830_v47 = vrot.slane %v2826_v14, 7  ;;  %v3372_v56 = vld [vmem:[#allocation2 + $0x1f0] sm:$0xff]  ;;  %4181 = vmatmul.mubr.f32.gmra.mxu0 %v3363_v36 }
 0x33b   :  { %v2791_v17 = vld [vmem:[#allocation3 + $0xb9] ss:$2 sm:$0x1]  ;;  %4954 = vst [vmem:[#allocation2 + $0x140] sm:$0xff] %v11712_v7  ;;  %2786 = vst [vmem:[#allocation2 + $0x2f8] sm:$0xfe] %v2781_v55  ;;  %4185 = vmatprep.mubr.f32.mxu0 %v3373_v22 }
 0x33c   :  { %v2795_v61 = vrot.slane %v2791_v17, 7  ;;  %v2815_v19 = vld [vmem:[#allocation3 + $0xb8] ss:$2 sm:$0x1]  ;;  %v2831_v42 = vsel %vm2408_vm12, %v2829_v9, %v2830_v47  ;;  %4953 = vst [vmem:[#allocation2 + $0x1f0] sm:$0xff] %v11712_v7  ;;  %v3384_v44 = vld [vmem:[#allocation2 + $0x4e0] sm:$0xff] }
 0x33d   :  { %v2819_v11 = vrot.slane %v2815_v19, 7  ;;  %v2778_v59 = vld [vmem:[#allocation3 + $0xb8] ss:$2 sm:$0x1]  ;;  %2835 = vst [vmem:[#allocation2 + $0x100] sm:$0x3] %v2831_v42 }
 0x33e   :  { %v3385_v39 = vld [vmem:[#allocation2 + $0xc8] sm:$0xff]  ;;  %v2796_v10 = vsel %vm2408_vm12, %v2794_v37, %v2795_v61  ;;  %v2782_v27 = vrot.slane %v2778_v59, 7  ;;  %v11740_v15 = vld [vmem:[#allocation3 + $0x109] ss:$2 sm:$0xff]  ;;  %4186 = vmatmul.mubr.f32.gmra.mxu0 %v3372_v56  ;;  %v3036_v1 = vld [vmem:[#allocation3 + $0x108] ss:$2 sm:$0xff] }
 0x33f   :  { %v2936_v0 = vld [vmem:[#allocation3 + $0xd9] ss:$2 sm:$0xff]  ;;  %3730 = vmatprep.mubr.f32.mxu1 %v3385_v39  ;;  %2800 = vst [vmem:[#allocation2 + $0x1e0] sm:$0x3] %v2796_v10  ;;  %v2820_v32 = vsel %vm2408_vm12, %v2818_v16, %v2819_v11  ;;  %v2925_v25 = vld [vmem:[#allocation3 + $0xd8] ss:$2 sm:$0xff] }
 0x340   :  { %v2900_v40 = vld [vmem:[#allocation3 + $0xd9] ss:$2 sm:$0xff]  ;;  %v2940_v41 = vrot.slane %v2936_v0, 7  ;;  %2824 = vst [vmem:[#allocation2 + $0x500] sm:$0x3] %v2820_v32  ;;  %v2783_v4 = vsel %vm2408_vm12, %v2781_v55, %v2782_v27  ;;  %v2929_v43 = vrot.slane %v2925_v25, 7  ;;  %3731 = vmatmul.mubr.f32.gmra.mxu1 %v3384_v44 }
 0x341   :  { %v2905_v35 = vrot.slane %v2900_v40, 7  ;;  %v2887_v31 = vld [vmem:[#allocation3 + $0xd8] ss:$2 sm:$0xff]  ;;  %2787 = vst [vmem:[#allocation2 + $0x1b8] sm:$0x3] %v2783_v4  ;;  %v3382_v49 = vld [vmem:[#allocation2 + $0x278] sm:$0xff] }
 0x342   :  { %2945 = vst [vmem:[#allocation2 + $0x2b8] sm:$0xfe] %v2940_v41  ;;  %v2892_v48 = vrot.slane %v2887_v31, 7  ;;  %v2937_v24 = vld [vmem:[#allocation3 + $0xe9] ss:$2 sm:$0x1]  ;;  %4190 = vmatprep.mubr.f32.mxu0 %v3382_v49 }
 0x343   :  { %2910 = vst [vmem:[#allocation2 + $0x128] sm:$0xfe] %v2905_v35  ;;  %v3394_v46 = vld [vmem:[#allocation2 + $0x208] sm:$0xff]  ;;  %2934 = vst [vmem:[#allocation2 + $0x110] sm:$0xfe] %v2929_v43  ;;  %v2941_v30 = vrot.slane %v2937_v24, 7 }
 0x344   :  { %v2902_v53 = vld [vmem:[#allocation3 + $0xe9] ss:$2 sm:$0x1]  ;;  %3735 = vmatprep.mubr.f32.mxu1 %v3394_v46  ;;  %2897 = vst [vmem:[#allocation2 + $0x338] sm:$0xfe] %v2892_v48  ;;  %v3051_v60 = vrot.slane %v11740_v15, 7 }
 0x345   :  { %v2906_v5 = vrot.slane %v2902_v53, 7  ;;  %v2926_v21 = vld [vmem:[#allocation3 + $0xe8] ss:$2 sm:$0x1]  ;;  %v2942_v45 = vsel %vm2408_vm12, %v2940_v41, %v2941_v30  ;;  %v3011_v51 = vld [vmem:[#allocation3 + $0x109] ss:$2 sm:$0xff] }
 0x346   :  { %v2930_v23 = vrot.slane %v2926_v21, 7  ;;  %v2889_v20 = vld [vmem:[#allocation3 + $0xe8] ss:$2 sm:$0x1]  ;;  %v3393_v26 = vld [vmem:[#allocation2 + $0x3e0] sm:$0xff]  ;;  %v3016_v29 = vrot.slane %v3011_v51, 7 }
 0x347   :  { %v3381_v18 = vld [vmem:[#allocation2 + $0x118] sm:$0xff]  ;;  %2946 = vst [vmem:[#allocation2 + $0x3b8] sm:$0x3] %v2942_v45  ;;  %v2907_v2 = vsel %vm2408_vm12, %v2905_v35, %v2906_v5  ;;  %v2893_v6 = vrot.slane %v2889_v20, 7  ;;  %3056 = vst [vmem:[#allocation2 + $0x340] sm:$0xfe] %v3051_v60  ;;  %3736 = vmatmul.mubr.f32.gmra.mxu1 %v3393_v26 }
 0x348   :  { %v3403_v12 = vld [vmem:[#allocation2 + $0x70] sm:$0xff]  ;;  %2911 = vst [vmem:[#allocation2 + $0x478] sm:$0x3] %v2907_v2  ;;  %v2931_v62 = vsel %vm2408_vm12, %v2929_v43, %v2930_v23  ;;  %v3040_v33 = vrot.slane %v3036_v1, 7  ;;  %v2998_v13 = vld [vmem:[#allocation3 + $0x108] ss:$2 sm:$0xff]  ;;  %4191 = vmatmul.mubr.f32.gmra.mxu0 %v3381_v18 }
 0x349   :  { %v3158_v57 = vld [vmem:[#allocation3 + $0x139] ss:$2 sm:$0xff]  ;;  %3740 = vmatprep.mubr.f32.mxu1 %v3403_v12  ;;  %v3391_v28 = vld [vmem:[#allocation2 + $0x80] sm:$0xff]  ;;  %2935 = vst [vmem:[#allocation2 + $0x368] sm:$0x3] %v2931_v62  ;;  %v2894_v54 = vsel %vm2408_vm12, %v2892_v48, %v2893_v6  ;;  %v3003_v38 = vrot.slane %v2998_v13, 7 }
 0x34a   :  { %3021 = vst [vmem:[#allocation2 + $0x418] sm:$0xfe] %v3016_v29  ;;  %v3048_v9 = vld [vmem:[#allocation3 + $0x119] ss:$2 sm:$0x1]  ;;  %v3162_v3 = vrot.slane %v3158_v57, 7  ;;  %4195 = vmatprep.mubr.f32.mxu0 %v3391_v28 }
 0x34b   :  { %v3402_v58 = vld [vmem:[#allocation2 + $0x240] sm:$0xff]  ;;  %v3390_v34 = vld [vmem:[#allocation2 + $0x2f8] sm:$0xff]  ;;  %2898 = vst [vmem:[#allocation2 + $0x468] sm:$0x3] %v2894_v54  ;;  %3045 = vst [vmem:[#allocation2 + $0x420] sm:$0xfe] %v3040_v33 }
 0x34c   :  { %v3052_v8 = vrot.slane %v3048_v9, 7  ;;  %v3412_v37 = vld [vmem:[#allocation2 + $0x100] sm:$0xff]  ;;  %3008 = vst [vmem:[#allocation2 + $0x348] sm:$0xfe] %v3003_v38  ;;  %3167 = vst [vmem:[#allocation2 + $0x3c8] sm:$0xfe] %v3162_v3  ;;  %3741 = vmatmul.mubr.f32.gmra.mxu1 %v3402_v58  ;;  %4196 = vmatmul.mubr.f32.gmra.mxu0 %v3390_v34 }
 0x34d   :  { %v3013_v16 = vld [vmem:[#allocation3 + $0x119] ss:$2 sm:$0x1]  ;;  %v3400_v50 = vld [vmem:[#allocation2 + $0x1e0] sm:$0xff]  ;;  %3745 = vmatprep.mubr.f32.mxu1 %v3412_v37  ;;  %v3147_v61 = vld [vmem:[#allocation3 + $0x138] ss:$2 sm:$0xff] }
 0x34e   :  { %v3122_v52 = vld [vmem:[#allocation3 + $0x139] ss:$2 sm:$0xff]  ;;  %v3053_v36 = vsel %vm2408_vm12, %v3051_v60, %v3052_v8  ;;  %v3017_v55 = vrot.slane %v3013_v16, 7  ;;  %v3037_v14 = vld [vmem:[#allocation3 + $0x118] ss:$2 sm:$0x1]  ;;  %4200 = vmatprep.mubr.f32.mxu0 %v3400_v50 }
 0x34f   :  { %v3127_v22 = vrot.slane %v3122_v52, 7  ;;  %3057 = vst [vmem:[#allocation2 + $0x410] sm:$0x3] %v3053_v36  ;;  %v3041_v47 = vrot.slane %v3037_v14, 7  ;;  %v3151_v56 = vrot.slane %v3147_v61, 7  ;;  %v3411_v11 = vld [vmem:[#allocation2 + $0x500] sm:$0xff] }
 0x350   :  { %v3000_v17 = vld [vmem:[#allocation3 + $0x118] ss:$2 sm:$0x1]  ;;  %v3018_v19 = vsel %vm2408_vm12, %v3016_v29, %v3017_v55  ;;  %v3159_v10 = vld [vmem:[#allocation3 + $0x149] ss:$2 sm:$0x1]  ;;  %3746 = vmatmul.mubr.f32.gmra.mxu1 %v3411_v11 }
 0x351   :  { %v3004_v63 = vrot.slane %v3000_v17, 7  ;;  %3132 = vst [vmem:[#allocation2 + $0x1e8] sm:$0xfe] %v3127_v22  ;;  %v3109_v42 = vld [vmem:[#allocation3 + $0x138] ss:$2 sm:$0xff]  ;;  %v3042_v59 = vsel %vm2408_vm12, %v3040_v33, %v3041_v47  ;;  %v3399_v27 = vld [vmem:[#allocation2 + $0x1b8] sm:$0xff] }
 0x352   :  { %3022 = vst [vmem:[#allocation2 + $0x48] sm:$0x3] %v3018_v19  ;;  %v3114_v39 = vrot.slane %v3109_v42, 7  ;;  %v3421_v0 = vld [vmem:[#allocation2 + $0x2b8] sm:$0xff]  ;;  %3046 = vst [vmem:[#allocation2 + $0x260] sm:$0x3] %v3042_v59  ;;  %4201 = vmatmul.mubr.f32.gmra.mxu0 %v3399_v27 }
 0x353   :  { %v3005_v40 = vsel %vm2408_vm12, %v3003_v38, %v3004_v63  ;;  %3156 = vst [vmem:[#allocation2 + $0x470] sm:$0xfe] %v3151_v56  ;;  %v3163_v32 = vrot.slane %v3159_v10, 7  ;;  %v3124_v41 = vld [vmem:[#allocation3 + $0x149] ss:$2 sm:$0x1]  ;;  %3750 = vmatprep.mubr.f32.mxu1 %v3421_v0 }
 0x354   :  { %v3409_v35 = vld [vmem:[#allocation2 + $0x128] sm:$0xff]  ;;  %3009 = vst [vmem:[#allocation2 + $0x2e8] sm:$0x3] %v3005_v40  ;;  %3119 = vst [vmem:[#allocation2 + $0x3a8] sm:$0xfe] %v3114_v39  ;;  %v3128_v25 = vrot.slane %v3124_v41, 7 }
 0x355   :  { %v3148_v4 = vld [vmem:[#allocation3 + $0x148] ss:$2 sm:$0x1]  ;;  %4205 = vmatprep.mubr.f32.mxu0 %v3409_v35  ;;  %v3164_v43 = vsel %vm2408_vm12, %v3162_v3, %v3163_v32  ;;  %v3420_v44 = vld [vmem:[#allocation2 + $0x110] sm:$0xff]  ;;  %v3269_v46 = vld [vmem:[#allocation3 + $0x169] ss:$2 sm:$0xff] }
 0x356   :  { %v3152_v31 = vrot.slane %v3148_v4, 7  ;;  %v3111_v15 = vld [vmem:[#allocation3 + $0x148] ss:$2 sm:$0x1]  ;;  %3168 = vst [vmem:[#allocation2 + $0xc0] sm:$0x3] %v3164_v43  ;;  %v3129_v48 = vsel %vm2408_vm12, %v3127_v22, %v3128_v25  ;;  %3751 = vmatmul.mubr.f32.gmra.mxu1 %v3420_v44 }
 0x357   :  { %v3115_v24 = vrot.slane %v3111_v15, 7  ;;  %v3233_v30 = vld [vmem:[#allocation3 + $0x169] ss:$2 sm:$0xff]  ;;  %3133 = vst [vmem:[#allocation2 + $0x4e8] sm:$0x3] %v3129_v48  ;;  %v3273_v21 = vrot.slane %v3269_v46, 7 }
 0x358   :  { %v3408_v53 = vld [vmem:[#allocation2 + $0x338] sm:$0xff]  ;;  %v3153_v5 = vsel %vm2408_vm12, %v3151_v56, %v3152_v31  ;;  %v3238_v60 = vrot.slane %v3233_v30, 7  ;;  %v3270_v6 = vld [vmem:[#allocation3 + $0x179] ss:$2 sm:$0x1]  ;;  %v3439_v12 = vld [vmem:[#allocation2 + $0x340] sm:$0xff] }
 0x359   :  { %v3430_v49 = vld [vmem:[#allocation2 + $0x3b8] sm:$0xff]  ;;  %4206 = vmatmul.mubr.f32.gmra.mxu0 %v3408_v53  ;;  %3157 = vst [vmem:[#allocation2 + $0x8] sm:$0x3] %v3153_v5  ;;  %v3116_v20 = vsel %vm2408_vm12, %v3114_v39, %v3115_v24  ;;  %3278 = vst [vmem:[#allocation2 + $0x90] sm:$0xfe] %v3273_v21  ;;  %v3429_v1 = vld [vmem:[#allocation2 + $0x368] sm:$0xff] }
 0x35a   :  { %v3258_v45 = vld [vmem:[#allocation3 + $0x168] ss:$2 sm:$0xff]  ;;  %3755 = vmatprep.mubr.f32.mxu1 %v3430_v49  ;;  %3120 = vst [vmem:[#allocation2 + $0x158] sm:$0x3] %v3116_v20  ;;  %3243 = vst [vmem:[#allocation2 + $0x150] sm:$0xfe] %v3238_v60 }
 0x35b   :  { %v3418_v23 = vld [vmem:[#allocation2 + $0x478] sm:$0xff]  ;;  %v3262_v51 = vrot.slane %v3258_v45, 7  ;;  %v3274_v62 = vrot.slane %v3270_v6, 7  ;;  %v3235_v33 = vld [vmem:[#allocation3 + $0x179] ss:$2 sm:$0x1]  ;;  %3756 = vmatmul.mubr.f32.gmra.mxu1 %v3429_v1 }
 0x35c   :  { %v3220_v26 = vld [vmem:[#allocation3 + $0x168] ss:$2 sm:$0xff]  ;;  %4210 = vmatprep.mubr.f32.mxu0 %v3418_v23  ;;  %v3417_v13 = vld [vmem:[#allocation2 + $0x468] sm:$0xff]  ;;  %v3239_v28 = vrot.slane %v3235_v33, 7  ;;  %3760 = vmatprep.mubr.f32.mxu1 %v3439_v12  ;;  %v3448_v47 = vld [vmem:[#allocation2 + $0x410] sm:$0xff] }
 0x35d   :  { %v2403_v18 = vld [vmem:[#allocation3] ss:$2 sm:$0xff]  ;;  %v3225_v2 = vrot.slane %v3220_v26, 7  ;;  %3267 = vst [vmem:[#allocation2 + $0x210] sm:$0xfe] %v3262_v51  ;;  %4211 = vmatmul.mubr.f32.gmra.mxu0 %v3417_v13  ;;  %v3275_v38 = vsel %vm2408_vm12, %v3273_v21, %v3274_v62  ;;  %v3438_v34 = vld [vmem:[#allocation2 + $0x420] sm:$0xff] }
 0x35e   :  { %v2409_v29 = vrot.slane %v2403_v18, 7  ;;  %v3427_v57 = vld [vmem:[#allocation2 + $0x418] sm:$0xff]  ;;  %v3259_v54 = vld [vmem:[#allocation3 + $0x178] ss:$2 sm:$0x1]  ;;  %v3240_v8 = vsel %vm2408_vm12, %v3238_v60, %v3239_v28  ;;  %v3447_v27 = vld [vmem:[#allocation2 + $0x260] sm:$0xff] }
 0x35f   :  { %3230 = vst [vmem:[#allocation2 + $0x358] sm:$0xfe] %v3225_v2  ;;  %v3263_v9 = vrot.slane %v3259_v54, 7  ;;  %v3222_v3 = vld [vmem:[#allocation3 + $0x178] ss:$2 sm:$0x1]  ;;  %4215 = vmatprep.mubr.f32.mxu0 %v3427_v57  ;;  %3761 = vmatmul.mubr.f32.gmra.mxu1 %v3438_v34 }
 0x360   :  { %2414 = vst [vmem:[#allocation2 + $0x18] sm:$0xfe] %v2409_v29  ;;  %v2515_v58 = vld [vmem:[#allocation3 + $0x30] ss:$2 sm:$0xff]  ;;  %3279 = vst [vmem:[#allocation2 + $0x448] sm:$0x3] %v3275_v38  ;;  %3765 = vmatprep.mubr.f32.mxu1 %v3448_v47 }
 0x361   :  { %v3226_v37 = vrot.slane %v3222_v3, 7  ;;  %v2405_v16 = vld [vmem:[#allocation3 + $0x10] ss:$2 sm:$0x1]  ;;  %v2520_v52 = vrot.slane %v2515_v58, 7  ;;  %v3426_v50 = vld [vmem:[#allocation2 + $0x348] sm:$0xff]  ;;  %v3264_v36 = vsel %vm2408_vm12, %v3262_v51, %v3263_v9 }
 0x362   :  { %3244 = vst [vmem:[#allocation2 + $0x4d0] sm:$0x3] %v3240_v8  ;;  %v2410_v55 = vrot.slane %v2405_v16, 7  ;;  %v2503_v14 = vld [vmem:[#allocation3 + $0x1a] ss:$2 sm:$0xff]  ;;  %4216 = vmatmul.mubr.f32.gmra.mxu0 %v3426_v50  ;;  %v3466_v60 = vld [vmem:[#allocation2 + $0xc0] sm:$0xff] }
 0x363   :  { %v2626_v22 = vld [vmem:[#allocation3 + $0x60] ss:$2 sm:$0xff]  ;;  %3268 = vst [vmem:[#allocation2 + $0x498] sm:$0x3] %v3264_v36  ;;  %v3227_v17 = vsel %vm2408_vm12, %v3225_v2, %v3226_v37  ;;  %2525 = vst [vmem:[#allocation2 + $0x360] sm:$0xfe] %v2520_v52  ;;  %3766 = vmatmul.mubr.f32.gmra.mxu1 %v3447_v27 }
 0x364   :  { %v2507_v61 = vrot.slane %v2503_v14, 7  ;;  %v2517_v19 = vld [vmem:[#allocation3 + $0x40] ss:$2 sm:$0x1]  ;;  %v2631_v63 = vrot.slane %v2626_v22, 7  ;;  %v3436_v56 = vld [vmem:[#allocation2 + $0x48] sm:$0xff]  ;;  %v2411_v42 = vsel %vm2408_vm12, %v2409_v29, %v2410_v55 }
 0x365   :  { %3231 = vst [vmem:[#allocation2] sm:$0x3] %v3227_v17  ;;  %v2521_v11 = vrot.slane %v2517_v19, 7  ;;  %4220 = vmatprep.mubr.f32.mxu0 %v3436_v56  ;;  %v3457_v59 = vld [vmem:[#allocation2 + $0x3c8] sm:$0xff]  ;;  %2415 = vst [vmem:[#allocation2 + $0x308] sm:$0x3] %v2411_v42 }
 0x366   :  { %2512 = vst [vmem:[#allocation2 + $0xa0] sm:$0xfe] %v2507_v61  ;;  %v2504_v39 = vld [vmem:[#allocation3 + $0x2a] ss:$2 sm:$0x1]  ;;  %v3445_v0 = vld [vmem:[#allocation2 + $0x1e8] sm:$0xff]  ;;  %3770 = vmatprep.mubr.f32.mxu1 %v3457_v59 }
 0x367   :  { %2636 = vst [vmem:[#allocation2 + $0x460] sm:$0xfe] %v2631_v63  ;;  %v2614_v10 = vld [vmem:[#allocation3 + $0x4a] ss:$2 sm:$0xff]  ;;  %v2522_v32 = vsel %vm2408_vm12, %v2520_v52, %v2521_v11  ;;  %v2508_v41 = vrot.slane %v2504_v39, 7  ;;  %v3456_v15 = vld [vmem:[#allocation2 + $0x470] sm:$0xff] }
 0x368   :  { %v11760_v40 = vld [vmem:[#allocation2 + $0x18] sm:$0xff]  ;;  %v2628_v35 = vld [vmem:[#allocation3 + $0x70] ss:$2 sm:$0x1]  ;;  %v3435_v25 = vld [vmem:[#allocation2 + $0x2e8] sm:$0xff]  ;;  %v2618_v31 = vrot.slane %v2614_v10, 7  ;;  %3771 = vmatmul.mubr.f32.gmra.mxu1 %v3456_v15 }
 0x369   :  { %4914 = vst [vmem:[#allocation2 + $0x18] sm:$0xff] %v11712_v7  ;;  %2526 = vst [vmem:[#allocation2 + $0x1a8] sm:$0x3] %v2522_v32  ;;  %v2632_v4 = vrot.slane %v2628_v35, 7  ;;  %4221 = vmatmul.mubr.f32.gmra.mxu0 %v3435_v25  ;;  %v2509_v44 = vsel %vm2408_vm12, %v2507_v61, %v2508_v41  ;;  %v2737_v24 = vld [vmem:[#allocation3 + $0x90] ss:$2 sm:$0xff]  ;;  %3775 = vmatprep.mubr.f32.mxu1 %v3466_v60 }
 0x36a   :  { %v2615_v43 = vld [vmem:[#allocation3 + $0x5a] ss:$2 sm:$0x1]  ;;  %4225 = vmatprep.mubr.f32.mxu0 %v3445_v0  ;;  %2513 = vst [vmem:[#allocation2 + $0x480] sm:$0x3] %v2509_v44  ;;  %v2742_v49 = vrot.slane %v2737_v24, 7 }
 0x36b   :  { %v2619_v48 = vrot.slane %v2615_v43, 7  ;;  %v2725_v46 = vld [vmem:[#allocation3 + $0x7a] ss:$2 sm:$0xff]  ;;  %v2633_v53 = vsel %vm2408_vm12, %v2631_v63, %v2632_v4  ;;  %2623 = vst [vmem:[#allocation2 + $0x88] sm:$0xfe] %v2618_v31  ;;  %v11766_v45 = vld [vmem:[#allocation2 + $0x360] sm:$0xff] }
 0x36c   :  { %v3444_v30 = vld [vmem:[#allocation2 + $0x3a8] sm:$0xff]  ;;  %v2729_v5 = vrot.slane %v2725_v46, 7  ;;  %v2739_v21 = vld [vmem:[#allocation3 + $0xa0] ss:$2 sm:$0x1]  ;;  %4932 = vst [vmem:[#allocation2 + $0x360] sm:$0xff] %v11712_v7 }
 0x36d   :  { %2637 = vst [vmem:[#allocation2 + $0x230] sm:$0x3] %v2633_v53  ;;  %v2620_v23 = vsel %vm2408_vm12, %v2618_v31, %v2619_v48  ;;  %v2743_v20 = vrot.slane %v2739_v21, 7  ;;  %v2726_v51 = vld [vmem:[#allocation3 + $0x8a] ss:$2 sm:$0x1]  ;;  %4226 = vmatmul.mubr.f32.gmra.mxu0 %v3444_v30 }
 0x36e   :  { %v3454_v26 = vld [vmem:[#allocation2 + $0x4e8] sm:$0xff]  ;;  %2624 = vst [vmem:[#allocation2 + $0x2c0] sm:$0x3] %v2620_v23  ;;  %2747 = vst [vmem:[#allocation2 + $0x330] sm:$0xfe] %v2742_v49  ;;  %v2730_v18 = vrot.slane %v2726_v51, 7 }
 0x36f   :  { %2734 = vst [vmem:[#allocation2 + $0x3d8] sm:$0xfe] %v2729_v5  ;;  %v2848_v2 = vld [vmem:[#allocation3 + $0xc0] ss:$2 sm:$0xff]  ;;  %v3465_v29 = vld [vmem:[#allocation2 + $0x8] sm:$0xff]  ;;  %v11772_v12 = vld [vmem:[#allocation2 + $0xa0] sm:$0xff]  ;;  %v2744_v33 = vsel %vm2408_vm12, %v2742_v49, %v2743_v20  ;;  %4230 = vmatprep.mubr.f32.mxu0 %v3454_v26 }
 0x370   :  { %v2836_v6 = vld [vmem:[#allocation3 + $0xaa] ss:$2 sm:$0xff]  ;;  %v2853_v13 = vrot.slane %v2848_v2, 7  ;;  %v3475_v54 = vld [vmem:[#allocation2 + $0x90] sm:$0xff]  ;;  %4931 = vst [vmem:[#allocation2 + $0xa0] sm:$0xff] %v11712_v7  ;;  %v2731_v38 = vsel %vm2408_vm12, %v2729_v5, %v2730_v18  ;;  %3776 = vmatmul.mubr.f32.gmra.mxu1 %v3465_v29 }
 0x371   :  { %v11770_v1 = vld [vmem:[#allocation2 + $0x308] sm:$0xff]  ;;  %v11774_v62 = vld [vmem:[#allocation2 + $0x460] sm:$0xff]  ;;  %v2840_v57 = vrot.slane %v2836_v6, 7  ;;  %v3453_v28 = vld [vmem:[#allocation2 + $0x158] sm:$0xff]  ;;  %2748 = vst [vmem:[#allocation2 + $0x268] sm:$0x3] %v2744_v33  ;;  %3780 = vmatprep.mubr.f32.mxu1 %v3475_v54 }
 0x372   :  { %4923 = vst [vmem:[#allocation2 + $0x308] sm:$0xff] %v11712_v7  ;;  %4950 = vst [vmem:[#allocation2 + $0x460] sm:$0xff] %v11712_v7  ;;  %v2850_v9 = vld [vmem:[#allocation3 + $0xd0] ss:$2 sm:$0x1]  ;;  %v3463_v58 = vld [vmem:[#allocation2 + $0x150] sm:$0xff]  ;;  %4231 = vmatmul.mubr.f32.gmra.mxu0 %v3453_v28 }
 0x373   :  { %v2837_v3 = vld [vmem:[#allocation3 + $0xba] ss:$2 sm:$0x1]  ;;  %2735 = vst [vmem:[#allocation2 + $0x28] sm:$0x3] %v2731_v38  ;;  %v2854_v8 = vrot.slane %v2850_v9, 7  ;;  %4235 = vmatprep.mubr.f32.mxu0 %v3463_v58 }
 0x374   :  { %v11781_v34 = vld [vmem:[#allocation2 + $0x1a8] sm:$0xff]  ;;  %2858 = vst [vmem:[#allocation2 + $0x4b8] sm:$0xfe] %v2853_v13  ;;  %2845 = vst [vmem:[#allocation2 + $0x4c8] sm:$0xfe] %v2840_v57  ;;  %v2841_v37 = vrot.slane %v2837_v3, 7 }
 0x375   :  { %v2959_v16 = vld [vmem:[#allocation3 + $0xf0] ss:$2 sm:$0xff]  ;;  %4941 = vst [vmem:[#allocation2 + $0x1a8] sm:$0xff] %v11712_v7  ;;  %v2961_v36 = vld [vmem:[#allocation3 + $0x100] ss:$2 sm:$0x1]  ;;  %v2855_v22 = vsel %vm2408_vm12, %v2853_v13, %v2854_v8 }
 0x376   :  { %v2964_v52 = vrot.slane %v2959_v16, 7  ;;  %v2947_v50 = vld [vmem:[#allocation3 + $0xda] ss:$2 sm:$0xff]  ;;  %v11784_v55 = vld [vmem:[#allocation2 + $0x480] sm:$0xff]  ;;  %v2842_v47 = vsel %vm2408_vm12, %v2840_v57, %v2841_v37  ;;  %v2965_v61 = vrot.slane %v2961_v36, 7  ;;  %v11806_v57 = vpop.f32.mrf.mxu1 }
 0x377   :  { %v11786_v14 = vld [vmem:[#allocation2 + $0x88] sm:$0xff]  ;;  %v2951_v17 = vrot.slane %v2947_v50, 7  ;;  %v3070_v19 = vld [vmem:[#allocation3 + $0x120] ss:$2 sm:$0xff]  ;;  %4940 = vst [vmem:[#allocation2 + $0x480] sm:$0xff] %v11712_v7  ;;  %v3471_v15 = vld [vmem:[#allocation2] sm:$0xff] }
 0x378   :  { %4949 = vst [vmem:[#allocation2 + $0x88] sm:$0xff] %v11712_v7  ;;  %2859 = vst [vmem:[#allocation2 + $0xf8] sm:$0x3] %v2855_v22  ;;  %v2948_v63 = vld [vmem:[#allocation3 + $0xea] ss:$2 sm:$0x1]  ;;  %v2966_v59 = vsel %vm2408_vm12, %v2964_v52, %v2965_v61  ;;  %v3704_v37 = vpop.f32.mrf.mxu1 }
 0x379   :  { %2846 = vst [vmem:[#allocation2 + $0x438] sm:$0x3] %v2842_v47  ;;  %2969 = vst [vmem:[#allocation2 + $0x170] sm:$0xfe] %v2964_v52  ;;  %v3075_v56 = vrot.slane %v3070_v19, 7  ;;  %v3474_v42 = vld [vmem:[#allocation2 + $0x210] sm:$0xff] }
 0x37a   :  { %v3462_v11 = vld [vmem:[#allocation2 + $0x358] sm:$0xff]  ;;  %2956 = vst [vmem:[#allocation2 + $0x3d0] sm:$0xfe] %v2951_v17  ;;  %v2952_v39 = vrot.slane %v2948_v63, 7  ;;  %3781 = vmatmul.mubr.f32.gmra.mxu1 %v3474_v42  ;;  %v3484_v27 = vld [vmem:[#allocation2 + $0x448] sm:$0xff]  ;;  %v3472_v41 = vld [vmem:[#allocation2 + $0x4d0] sm:$0xff] }
 0x37b   :  { %v3294_v10 = vld [vmem:[#allocation3 + $0x190] ss:$2 sm:$0x1]  ;;  %2970 = vst [vmem:[#allocation2 + $0x138] sm:$0x3] %v2966_v59  ;;  %4236 = vmatmul.mubr.f32.gmra.mxu0 %v3462_v11  ;;  %3785 = vmatprep.mubr.f32.mxu1 %v3484_v27  ;;  %v3483_v31 = vld [vmem:[#allocation2 + $0x498] sm:$0xff] }
 0x37c   :  { %3080 = vst [vmem:[#allocation2 + $0x350] sm:$0xfe] %v3075_v56  ;;  %v3058_v0 = vld [vmem:[#allocation3 + $0x10a] ss:$2 sm:$0xff]  ;;  %v2953_v35 = vsel %vm2408_vm12, %v2951_v17, %v2952_v39  ;;  %4240 = vmatprep.mubr.f32.mxu0 %v3472_v41  ;;  %v3298_v48 = vrot.slane %v3294_v10, 7  ;;  %v3570_v6 = vld [vmem:[%s13798_s2 + $0x270] sm:$0xff]  ;;  %v11817_v17 = vpop.f32.mrf.mxu1 }
 0x37d   :  { %v3072_v32 = vld [vmem:[#allocation3 + $0x130] ss:$2 sm:$0x1]  ;;  %v3062_v25 = vrot.slane %v3058_v0, 7  ;;  %2957 = vst [vmem:[#allocation2 + $0x3e8] sm:$0x3] %v2953_v35 }
 0x37e   :  { %v3076_v4 = vrot.slane %v3072_v32, 7  ;;  %v3059_v43 = vld [vmem:[#allocation3 + $0x11a] ss:$2 sm:$0x1]  ;;  %v3292_v53 = vld [vmem:[#allocation3 + $0x180] ss:$2 sm:$0xff]  ;;  %3786 = vmatmul.mubr.f32.gmra.mxu1 %v3483_v31  ;;  %v3709_v39 = vpop.f32.mrf.mxu1 }
 0x37f   :  { %v3063_v44 = vrot.slane %v3059_v43, 7  ;;  %3067 = vst [vmem:[#allocation2 + $0x1a0] sm:$0xfe] %v3062_v25  ;;  %v3181_v46 = vld [vmem:[#allocation3 + $0x150] ss:$2 sm:$0xff]  ;;  %v3297_v23 = vrot.slane %v3292_v53, 7  ;;  %4241 = vmatmul.mubr.f32.gmra.mxu0 %v3471_v15  ;;  %3855 = vmatprep.mubr.f32.mxu1 %v11760_v40 }
 0x380   :  { %v3077_v24 = vsel %vm2408_vm12, %v3075_v56, %v3076_v4  ;;  %v3169_v30 = vld [vmem:[#allocation3 + $0x13a] ss:$2 sm:$0xff]  ;;  %v3186_v5 = vrot.slane %v3181_v46, 7  ;;  %v3170_v26 = vld [vmem:[#allocation3 + $0x14a] ss:$2 sm:$0x1]  ;;  %4245 = vmatprep.mubr.f32.mxu0 %v11712_v7 }
 0x381   :  { %3081 = vst [vmem:[#allocation2 + $0x248] sm:$0x3] %v3077_v24  ;;  %v3064_v49 = vsel %vm2408_vm12, %v3062_v25, %v3063_v44  ;;  %v3173_v21 = vrot.slane %v3169_v30, 7  ;;  %v3183_v60 = vld [vmem:[#allocation3 + $0x160] ss:$2 sm:$0x1]  ;;  %v3299_v2 = vsel %vm2408_vm12, %v3297_v23, %v3298_v48 }
 0x382   :  { %3068 = vst [vmem:[#allocation2 + $0x188] sm:$0x3] %v3064_v49  ;;  %v3187_v20 = vrot.slane %v3183_v60, 7  ;;  %v3571_v51 = vld [vmem:[%s13798_s2 + $0x278] sm:$0xff]  ;;  %3191 = vst [vmem:[#allocation2 + $0xf0] sm:$0xfe] %v3186_v5  ;;  %3856 = vmatmul.mubr.f32.vlgmr.msra.gmra.mxu1 %v11712_v7 }
 0x383   :  { %3178 = vst [vmem:[#allocation2 + $0x2d0] sm:$0xfe] %v3173_v21  ;;  %3302 = vst [vmem:[#allocation2 + $0x98] sm:$0xfe] %v3297_v23  ;;  %v3280_v18 = vld [vmem:[#allocation3 + $0x16a] ss:$2 sm:$0xff]  ;;  %3947 = vmatpush1.msra.mxu1 %v3571_v51  ;;  %3860 = vmatprep.mubr.f32.mxu1 %v11770_v1 }
 0x384   :  { %v3188_v40 = vsel %vm2408_vm12, %v3186_v5, %v3187_v20  ;;  %v3174_v29 = vrot.slane %v3170_v26, 7  ;;  %v3284_v33 = vrot.slane %v3280_v18, 7  ;;  %3303 = vst [vmem:[#allocation2 + $0x290] sm:$0x3] %v3299_v2  ;;  %v2430_v13 = vld [vmem:[#allocation3 + $0x2] ss:$2 sm:$0xff]  ;;  %3948 = vmatprep.subr.mxu1 %v11712_v7  ;;  %4246 = vmatmul.mubr.f32.gmra.mxu0 %v11712_v7 }
 0x385   :  { %3192 = vst [vmem:[#allocation2 + $0x288] sm:$0x3] %v3188_v40  ;;  %v3281_v28 = vld [vmem:[#allocation3 + $0x17a] ss:$2 sm:$0x1]  ;;  %v2435_v54 = vrot.slane %v2430_v13, 7  ;;  %3949 = vmatpush1.msra.mxu1 %v3570_v6  ;;  %4250 = vmatprep.mubr.f32.mxu0 %v11712_v7 }
 0x386   :  { %v2417_v38 = vld [vmem:[#allocation3 + $0x1] ss:$2 sm:$0xff]  ;;  %v3175_v9 = vsel %vm2408_vm12, %v3173_v21, %v3174_v29  ;;  %3289 = vst [vmem:[#allocation2 + $0x430] sm:$0xfe] %v3284_v33  ;;  %v3285_v3 = vrot.slane %v3281_v28, 7  ;;  %v3569_v16 = vld [vmem:[%s13798_s2 + $0x268] sm:$0xff]  ;;  %3861 = vmatmul.mubr.f32.gmra.mxu1 %v11712_v7  ;;  %3950 = vmatprep.subr.mxu1 %v11712_v7 }
 0x387   :  { %v2422_v58 = vrot.slane %v2417_v38, 7  ;;  %v2432_v8 = vld [vmem:[#allocation3 + $0x12] ss:$2 sm:$0x1]  ;;  %3179 = vst [vmem:[#allocation2 + $0x58] sm:$0x3] %v3175_v9  ;;  %3865 = vmatprep.mubr.f32.mxu1 %v11766_v45  ;;  %3951 = vmatpush1.msra.mxu1 %v3569_v16 }
 0x388   :  { %2440 = vst [vmem:[#allocation2 + $0x328] sm:$0xfe] %v2435_v54  ;;  %v2436_v52 = vrot.slane %v2432_v8, 7  ;;  %v2419_v50 = vld [vmem:[#allocation3 + $0x11] ss:$2 sm:$0x1]  ;;  %v3286_v1 = vsel %vm2408_vm12, %v3284_v33, %v3285_v3  ;;  %3952 = vmatprep.subr.mxu1 %v11712_v7  ;;  %4251 = vmatmul.mubr.f32.gmra.mxu0 %v11712_v7 }
 0x389   :  { %2427 = vst [vmem:[#allocation2 + $0x450] sm:$0xfe] %v2422_v58  ;;  %v2423_v36 = vrot.slane %v2419_v50, 7  ;;  %v2541_v22 = vld [vmem:[#allocation3 + $0x32] ss:$2 sm:$0xff]  ;;  %v3567_v10 = vld [vmem:[%s13798_s2 + $0x258] sm:$0xff]  ;;  %5430 = vmatprep.mubr.f32.mxu0 %v11712_v7 }
 0x38a   :  { %v2528_v47 = vld [vmem:[#allocation3 + $0x31] ss:$2 sm:$0xff]  ;;  %3290 = vst [vmem:[#allocation2 + $0x1b0] sm:$0x3] %v3286_v1  ;;  %v2437_v19 = vsel %vm2408_vm12, %v2435_v54, %v2436_v52  ;;  %v2546_v63 = vrot.slane %v2541_v22, 7  ;;  %3866 = vmatmul.mubr.f32.gmra.mxu1 %v11772_v12  ;;  %v3566_v25 = vld [vmem:[%s13798_s2 + $0x250] sm:$0xff] }
 0x38b   :  { %v3568_v61 = vld [vmem:[%s13798_s2 + $0x260] sm:$0xff]  ;;  %v2533_v56 = vrot.slane %v2528_v47, 7  ;;  %v2543_v42 = vld [vmem:[#allocation3 + $0x42] ss:$2 sm:$0x1]  ;;  %v2424_v11 = vsel %vm2408_vm12, %v2422_v58, %v2423_v36  ;;  %3870 = vmatprep.mubr.f32.mxu1 %v11781_v34  ;;  %v11844_v24 = vld [vmem:[#allocation2 + $0x108] sm:$0xff] }
 0x38c   :  { %2441 = vst [vmem:[#allocation2 + $0x398] sm:$0x3] %v2437_v19  ;;  %v2547_v59 = vrot.slane %v2543_v42, 7  ;;  %2428 = vst [vmem:[#allocation2 + $0x2a8] sm:$0x3] %v2424_v11  ;;  %3953 = vmatpush1.msra.mxu1 %v3568_v61  ;;  %v3564_v5 = vld [vmem:[%s13798_s2 + $0x240] sm:$0xff] }
 0x38d   :  { %2551 = vst [vmem:[#allocation2 + $0x380] sm:$0xfe] %v2546_v63  ;;  %2538 = vst [vmem:[#allocation2 + $0x4f8] sm:$0xfe] %v2533_v56  ;;  %v2652_v0 = vld [vmem:[#allocation3 + $0x62] ss:$2 sm:$0xff]  ;;  %3954 = vmatprep.subr.mxu1 %v11712_v7 }
 0x38e   :  { %v2530_v27 = vld [vmem:[#allocation3 + $0x41] ss:$2 sm:$0x1]  ;;  %v2548_v45 = vsel %vm2408_vm12, %v2546_v63, %v2547_v59  ;;  %v2654_v41 = vld [vmem:[#allocation3 + $0x72] ss:$2 sm:$0x1]  ;;  %3955 = vmatpush1.msra.mxu1 %v3567_v10 }
 0x38f   :  { %v2534_v32 = vrot.slane %v2530_v27, 7  ;;  %v2657_v35 = vrot.slane %v2652_v0, 7  ;;  %2552 = vst [vmem:[#allocation2 + $0x38] sm:$0x3] %v2548_v45  ;;  %v2658_v4 = vrot.slane %v2654_v41, 7  ;;  %v11841_v15 = vld [vmem:[#allocation2 + $0x328] sm:$0xff]  ;;  %3956 = vmatprep.subr.mxu1 %v11844_v24  ;;  %3871 = vmatmul.mubr.f32.gmra.mxu1 %v11784_v55 }
 0x390   :  { %v2639_v43 = vld [vmem:[#allocation3 + $0x61] ss:$2 sm:$0xff]  ;;  %v2763_v31 = vld [vmem:[#allocation3 + $0x92] ss:$2 sm:$0xff]  ;;  %4916 = vst [vmem:[#allocation2 + $0x328] sm:$0xff] %v11844_v24  ;;  %3957 = vmatpush1.msra.mxu1 %v3566_v25  ;;  %3875 = vmatprep.mubr.f32.mxu1 %v11774_v62 }
 0x391   :  { %v2535_v44 = vsel %vm2408_vm12, %v2533_v56, %v2534_v32  ;;  %2662 = vst [vmem:[#allocation2 + $0xe8] sm:$0xfe] %v2657_v35  ;;  %v2641_v48 = vld [vmem:[#allocation3 + $0x71] ss:$2 sm:$0x1]  ;;  %v2644_v12 = vrot.slane %v2639_v43, 7  ;;  %v2659_v34 = vsel %vm2408_vm12, %v2657_v35, %v2658_v4  ;;  %3958 = vmatprep.subr.mxu1 %v11844_v24 }
 0x392   :  { %v3565_v7 = vld [vmem:[%s13798_s2 + $0x248] sm:$0xff]  ;;  %v11851_v46 = vld [vmem:[#allocation2 + $0x450] sm:$0xff]  ;;  %2539 = vst [vmem:[#allocation2 + $0x2a0] sm:$0x3] %v2535_v44  ;;  %v2645_v30 = vrot.slane %v2641_v48, 7  ;;  %v2768_v53 = vrot.slane %v2763_v31, 7 }
 0x393   :  { %v2750_v49 = vld [vmem:[#allocation3 + $0x91] ss:$2 sm:$0xff]  ;;  %4915 = vst [vmem:[#allocation2 + $0x450] sm:$0xff] %v11844_v24  ;;  %2663 = vst [vmem:[#allocation2 + $0x298] sm:$0x3] %v2659_v34  ;;  %v3563_v23 = vld [vmem:[%s13798_s2 + $0x238] sm:$0xff]  ;;  %3959 = vmatpush1.msra.mxu1 %v3565_v7 }
 0x394   :  { %2649 = vst [vmem:[#allocation2 + $0x2d8] sm:$0xfe] %v2644_v12  ;;  %v2755_v21 = vrot.slane %v2750_v49, 7  ;;  %v2765_v60 = vld [vmem:[#allocation3 + $0xa2] ss:$2 sm:$0x1]  ;;  %v2646_v51 = vsel %vm2408_vm12, %v2644_v12, %v2645_v30  ;;  %3960 = vmatprep.subr.mxu1 %v11844_v24  ;;  %3876 = vmatmul.mubr.f32.gmra.mxu1 %v11786_v14 }
 0x395   :  { %v11863_v20 = vld [vmem:[#allocation2 + $0x398] sm:$0xff]  ;;  %2773 = vst [vmem:[#allocation2 + $0x1c0] sm:$0xfe] %v2768_v53  ;;  %v2769_v26 = vrot.slane %v2765_v60, 7  ;;  %v11868_v2 = vld [vmem:[#allocation2 + $0x2a8] sm:$0xff]  ;;  %v11870_v55 = vld [vmem:[#allocation2 + $0x380] sm:$0xff]  ;;  %3961 = vmatpush1.msra.mxu1 %v3564_v5 }
 0x396   :  { %v2752_v18 = vld [vmem:[#allocation3 + $0xa1] ss:$2 sm:$0x1]  ;;  %4925 = vst [vmem:[#allocation2 + $0x398] sm:$0xff] %v11844_v24  ;;  %v11872_v6 = vld [vmem:[#allocation2 + $0x4f8] sm:$0xff]  ;;  %4924 = vst [vmem:[#allocation2 + $0x2a8] sm:$0xff] %v11844_v24  ;;  %3962 = vmatprep.subr.mxu1 %v11844_v24 }
 0x397   :  { %2650 = vst [vmem:[#allocation2 + $0x238] sm:$0x3] %v2646_v51  ;;  %2760 = vst [vmem:[#allocation2 + $0x180] sm:$0xfe] %v2755_v21  ;;  %v2756_v40 = vrot.slane %v2752_v18, 7  ;;  %v3378_v29 = vld [vmem:[#allocation2 + $0x230] sm:$0xff]  ;;  %v2770_v62 = vsel %vm2408_vm12, %v2768_v53, %v2769_v26  ;;  %3963 = vmatpush1.msra.mxu1 %v3563_v23 }
 0x398   :  { %v3562_v33 = vld [vmem:[%s13798_s2 + $0x230] sm:$0xff]  ;;  %4934 = vst [vmem:[#allocation2 + $0x380] sm:$0xff] %v11844_v24  ;;  %4933 = vst [vmem:[#allocation2 + $0x4f8] sm:$0xff] %v11844_v24  ;;  %v11882_v38 = vld [vmem:[#allocation2 + $0x38] sm:$0xff]  ;;  %3880 = vmatprep.mubr.f32.mxu1 %v3378_v29  ;;  %3964 = vmatprep.subr.mxu1 %v11844_v24 }
 0x399   :  { %v2874_v13 = vld [vmem:[#allocation3 + $0xc2] ss:$2 sm:$0xff]  ;;  %v2861_v28 = vld [vmem:[#allocation3 + $0xc1] ss:$2 sm:$0xff]  ;;  %v2985_v54 = vld [vmem:[#allocation3 + $0xf2] ss:$2 sm:$0xff]  ;;  %v2757_v9 = vsel %vm2408_vm12, %v2755_v21, %v2756_v40  ;;  %3965 = vmatpush1.msra.mxu1 %v3562_v33 }
 0x39a   :  { %2774 = vst [vmem:[#allocation2 + $0x490] sm:$0x3] %v2770_v62  ;;  %v2879_v3 = vrot.slane %v2874_v13, 7  ;;  %v2866_v58 = vrot.slane %v2861_v28, 7  ;;  %4943 = vst [vmem:[#allocation2 + $0x38] sm:$0xff] %v11844_v24  ;;  %v11888_v37 = vld [vmem:[#allocation2 + $0xe8] sm:$0xff]  ;;  %3966 = vmatprep.subr.mxu1 %v11844_v24 }
 0x39b   :  { %v2876_v8 = vld [vmem:[#allocation3 + $0xd2] ss:$2 sm:$0x1]  ;;  %2761 = vst [vmem:[#allocation2 + $0x30] sm:$0x3] %v2757_v9  ;;  %v2990_v50 = vrot.slane %v2985_v54, 7 }
 0x39c   :  { %v2880_v16 = vrot.slane %v2876_v8, 7  ;;  %v2863_v52 = vld [vmem:[#allocation3 + $0xd1] ss:$2 sm:$0x1]  ;;  %4952 = vst [vmem:[#allocation2 + $0xe8] sm:$0xff] %v11844_v24  ;;  %v3561_v47 = vld [vmem:[%s13798_s2 + $0x228] sm:$0xff] }
 0x39d   :  { %v11890_v1 = vld [vmem:[#allocation2 + $0x2a0] sm:$0xff]  ;;  %2884 = vst [vmem:[#allocation2 + $0x318] sm:$0xfe] %v2879_v3  ;;  %2871 = vst [vmem:[#allocation2 + $0x3f8] sm:$0xfe] %v2866_v58  ;;  %v2867_v36 = vrot.slane %v2863_v52, 7  ;;  %3967 = vmatpush1.msra.mxu1 %v3561_v47 }
 0x39e   :  { %v2972_v14 = vld [vmem:[#allocation3 + $0xf1] ss:$2 sm:$0xff]  ;;  %v3096_v22 = vld [vmem:[#allocation3 + $0x122] ss:$2 sm:$0xff]  ;;  %4942 = vst [vmem:[#allocation2 + $0x2a0] sm:$0xff] %v11844_v24  ;;  %v2881_v19 = vsel %vm2408_vm12, %v2879_v3, %v2880_v16  ;;  %3968 = vmatprep.subr.mxu1 %v11844_v24 }
 0x39f   :  { %v11898_v61 = vld [vmem:[#allocation2 + $0x2d8] sm:$0xff]  ;;  %2995 = vst [vmem:[#allocation2 + $0xb0] sm:$0xfe] %v2990_v50  ;;  %v2977_v63 = vrot.slane %v2972_v14, 7  ;;  %v3377_v42 = vld [vmem:[#allocation2 + $0x2c0] sm:$0xff]  ;;  %v2868_v11 = vsel %vm2408_vm12, %v2866_v58, %v2867_v36  ;;  %v3101_v10 = vrot.slane %v3096_v22, 7 }
 0x3a0   :  { %v2987_v56 = vld [vmem:[#allocation3 + $0x102] ss:$2 sm:$0x1]  ;;  %4951 = vst [vmem:[#allocation2 + $0x2d8] sm:$0xff] %v11844_v24  ;;  %2885 = vst [vmem:[#allocation2 + $0x250] sm:$0x3] %v2881_v19  ;;  %3881 = vmatmul.mubr.f32.gmra.mxu1 %v3377_v42 }
 0x3a1   :  { %v2991_v59 = vrot.slane %v2987_v56, 7  ;;  %v2974_v39 = vld [vmem:[#allocation3 + $0x101] ss:$2 sm:$0x1]  ;;  %v3560_v0 = vld [vmem:[%s13798_s2 + $0x220] sm:$0xff]  ;;  %v3559_v44 = vld [vmem:[%s13798_s2 + $0x218] sm:$0xff] }
 0x3a2   :  { %v3387_v27 = vld [vmem:[#allocation2 + $0x330] sm:$0xff]  ;;  %2872 = vst [vmem:[#allocation2 + $0x178] sm:$0x3] %v2868_v11  ;;  %2982 = vst [vmem:[#allocation2 + $0x198] sm:$0xfe] %v2977_v63  ;;  %v2978_v45 = vrot.slane %v2974_v39, 7  ;;  %3969 = vmatpush1.msra.mxu1 %v3560_v0 }
 0x3a3   :  { %v3083_v32 = vld [vmem:[#allocation3 + $0x121] ss:$2 sm:$0xff]  ;;  %v11907_v41 = vld [vmem:[#allocation3 + $0x192] ss:$2 sm:$0x1]  ;;  %3885 = vmatprep.mubr.f32.mxu1 %v3387_v27  ;;  %v2992_v25 = vsel %vm2408_vm12, %v2990_v50, %v2991_v59  ;;  %v3396_v5 = vld [vmem:[#allocation2 + $0x268] sm:$0xff]  ;;  %3970 = vmatprep.subr.mxu1 %v11844_v24 }
 0x3a4   :  { %v11909_v35 = vld [vmem:[#allocation3 + $0x191] ss:$2 sm:$0x1]  ;;  %3106 = vst [vmem:[#allocation2 + $0x168] sm:$0xfe] %v3101_v10  ;;  %v3088_v4 = vrot.slane %v3083_v32, 7  ;;  %v2979_v48 = vsel %vm2408_vm12, %v2977_v63, %v2978_v45  ;;  %3971 = vmatpush1.msra.mxu1 %v3559_v44 }
 0x3a5   :  { %v3098_v43 = vld [vmem:[#allocation3 + $0x132] ss:$2 sm:$0x1]  ;;  %2996 = vst [vmem:[#allocation2 + $0x3f0] sm:$0x3] %v2992_v25  ;;  %v3386_v30 = vld [vmem:[#allocation2 + $0x3d8] sm:$0xff]  ;;  %3972 = vmatprep.subr.mxu1 %v11844_v24 }
 0x3a6   :  { %v3207_v31 = vld [vmem:[#allocation3 + $0x152] ss:$2 sm:$0xff]  ;;  %v3102_v12 = vrot.slane %v3098_v43, 7  ;;  %v3085_v7 = vld [vmem:[#allocation3 + $0x131] ss:$2 sm:$0x1]  ;;  %3886 = vmatmul.mubr.f32.gmra.mxu1 %v3386_v30 }
 0x3a7   :  { %v3212_v34 = vrot.slane %v3207_v31, 7  ;;  %2983 = vst [vmem:[#allocation2 + $0x200] sm:$0x3] %v2979_v48  ;;  %3093 = vst [vmem:[#allocation2 + $0x68] sm:$0xfe] %v3088_v4  ;;  %v3089_v53 = vrot.slane %v3085_v7, 7  ;;  %3890 = vmatprep.mubr.f32.mxu1 %v3396_v5 }
 0x3a8   :  { %v3194_v49 = vld [vmem:[#allocation3 + $0x151] ss:$2 sm:$0xff]  ;;  %v3558_v21 = vld [vmem:[%s13798_s2 + $0x210] sm:$0xff]  ;;  %v3103_v60 = vsel %vm2408_vm12, %v3101_v10, %v3102_v12  ;;  %v3324_v29 = vrot.slane %v11907_v41, 7  ;;  %v3311_v33 = vrot.slane %v11909_v35, 7  ;;  %v3405_v52 = vld [vmem:[#allocation2 + $0x4b8] sm:$0xff] }
 0x3a9   :  { %3217 = vst [vmem:[#allocation2 + $0x148] sm:$0xfe] %v3212_v34  ;;  %v3199_v23 = vrot.slane %v3194_v49, 7  ;;  %v3209_v51 = vld [vmem:[#allocation3 + $0x162] ss:$2 sm:$0x1]  ;;  %v3090_v26 = vsel %vm2408_vm12, %v3088_v4, %v3089_v53  ;;  %3973 = vmatpush1.msra.mxu1 %v3558_v21 }
 0x3aa   :  { %3107 = vst [vmem:[#allocation2 + $0xe0] sm:$0x3] %v3103_v60  ;;  %v3213_v18 = vrot.slane %v3209_v51, 7  ;;  %v3196_v40 = vld [vmem:[#allocation3 + $0x161] ss:$2 sm:$0x1]  ;;  %3974 = vmatprep.subr.mxu1 %v11844_v24 }
 0x3ab   :  { %v3557_v62 = vld [vmem:[%s13798_s2 + $0x208] sm:$0xff]  ;;  %3094 = vst [vmem:[#allocation2 + $0x228] sm:$0x3] %v3090_v26  ;;  %3204 = vst [vmem:[#allocation2 + $0x1d8] sm:$0xfe] %v3199_v23  ;;  %v3200_v13 = vrot.slane %v3196_v40, 7 }
 0x3ac   :  { %v3318_v28 = vld [vmem:[#allocation3 + $0x182] ss:$2 sm:$0xff]  ;;  %v3305_v54 = vld [vmem:[#allocation3 + $0x181] ss:$2 sm:$0xff]  ;;  %v3395_v9 = vld [vmem:[#allocation2 + $0x28] sm:$0xff]  ;;  %v3214_v58 = vsel %vm2408_vm12, %v3212_v34, %v3213_v18  ;;  %3975 = vmatpush1.msra.mxu1 %v3557_v62 }
 0x3ad   :  { %v3556_v3 = vld [vmem:[%s13798_s2 + $0x200] sm:$0xff]  ;;  %v3323_v8 = vrot.slane %v3318_v28, 7  ;;  %v3310_v16 = vrot.slane %v3305_v54, 7  ;;  %3891 = vmatmul.mubr.f32.gmra.mxu1 %v3395_v9  ;;  %3218 = vst [vmem:[#allocation2 + $0x300] sm:$0x3] %v3214_v58  ;;  %v3201_v50 = vsel %vm2408_vm12, %v3199_v23, %v3200_v13  ;;  %3976 = vmatprep.subr.mxu1 %v11844_v24  ;;  %v3587_v42 = vld [vmem:[%s13798_s2 + $0x2f8] sm:$0xff] }
 0x3ae   :  { %v2469_v36 = vld [vmem:[#allocation3 + $0x1a] ss:$2 sm:$0xff]  ;;  %v2471_v14 = vld [vmem:[#allocation3 + $0x2a] ss:$2 sm:$0x1]  ;;  %3895 = vmatprep.mubr.f32.mxu1 %v3405_v52  ;;  %3977 = vmatpush1.msra.mxu1 %v3556_v3  ;;  %v3584_v23 = vld [vmem:[%s13798_s2 + $0x2e0] sm:$0xff] }
 0x3af   :  { %3205 = vst [vmem:[#allocation2 + $0x4c0] sm:$0x3] %v3201_v50  ;;  %3328 = vst [vmem:[#allocation2 + $0x20] sm:$0xfe] %v3323_v8  ;;  %v3325_v22 = vsel %vm2408_vm12, %v3323_v8, %v3324_v29  ;;  %v3312_v47 = vsel %vm2408_vm12, %v3310_v16, %v3311_v33  ;;  %v2474_v19 = vrot.slane %v2469_v36, 7  ;;  %v2475_v63 = vrot.slane %v2471_v14, 7  ;;  %3978 = vmatprep.subr.mxu1 %v11844_v24 }
 0x3b0   :  { %3315 = vst [vmem:[#allocation2 + $0x78] sm:$0xfe] %v3310_v16  ;;  %v2580_v56 = vld [vmem:[#allocation3 + $0x4a] ss:$2 sm:$0xff]  ;;  %v3586_v11 = vld [vmem:[%s13798_s2 + $0x2f0] sm:$0xff]  ;;  %3979 = vmatpush2.msra.mxu1 %v3587_v42 }
 0x3b1   :  { %3329 = vst [vmem:[#allocation2 + $0x280] sm:$0x3] %v3325_v22  ;;  %3316 = vst [vmem:[#allocation2 + $0x400] sm:$0x3] %v3312_v47  ;;  %v2585_v59 = vrot.slane %v2580_v56, 7  ;;  %v3404_v10 = vld [vmem:[#allocation2 + $0x4c8] sm:$0xff]  ;;  %v2476_v27 = vsel %vm2408_vm12, %v2474_v19, %v2475_v63  ;;  %3980 = vmatprep.subr.mxu1 %v11844_v24 }
 0x3b2   :  { %v2582_v39 = vld [vmem:[#allocation3 + $0x5a] ss:$2 sm:$0x1]  ;;  %2479 = vst [vmem:[#allocation2 + $0x108] sm:$0xfe] %v2474_v19  ;;  %3896 = vmatmul.mubr.f32.gmra.mxu1 %v3404_v10  ;;  %v3414_v41 = vld [vmem:[#allocation2 + $0xf8] sm:$0xff] }
 0x3b3   :  { %v2586_v0 = vrot.slane %v2582_v39, 7  ;;  %v2691_v45 = vld [vmem:[#allocation3 + $0x7a] ss:$2 sm:$0xff]  ;;  %v2802_v32 = vld [vmem:[#allocation3 + $0xaa] ss:$2 sm:$0xff]  ;;  %3900 = vmatprep.mubr.f32.mxu1 %v3414_v41  ;;  %3981 = vmatpush2.msra.mxu1 %v3586_v11 }
 0x3b4   :  { %2480 = vst [vmem:[#allocation2 + $0x388] sm:$0x3] %v2476_v27  ;;  %2590 = vst [vmem:[#allocation2 + $0x390] sm:$0xfe] %v2585_v59  ;;  %v2696_v25 = vrot.slane %v2691_v45, 7  ;;  %v2807_v4 = vrot.slane %v2802_v32, 7  ;;  %3982 = vmatprep.subr.mxu1 %v11844_v24 }
 0x3b5   :  { %v2693_v35 = vld [vmem:[#allocation3 + $0x8a] ss:$2 sm:$0x1]  ;;  %v3585_v43 = vld [vmem:[%s13798_s2 + $0x2e8] sm:$0xff]  ;;  %v2587_v31 = vsel %vm2408_vm12, %v2585_v59, %v2586_v0  ;;  %v3423_v60 = vld [vmem:[#allocation2 + $0x170] sm:$0xff] }
 0x3b6   :  { %v2697_v44 = vrot.slane %v2693_v35, 7  ;;  %v2804_v48 = vld [vmem:[#allocation3 + $0xba] ss:$2 sm:$0x1]  ;;  %2591 = vst [vmem:[#allocation2 + $0x3a0] sm:$0x3] %v2587_v31  ;;  %3983 = vmatpush2.msra.mxu1 %v3585_v43 }
 0x3b7   :  { %2701 = vst [vmem:[#allocation2 + $0x1c8] sm:$0xfe] %v2696_v25  ;;  %2812 = vst [vmem:[#allocation2 + $0xa8] sm:$0xfe] %v2807_v4  ;;  %v2808_v12 = vrot.slane %v2804_v48, 7  ;;  %v3413_v30 = vld [vmem:[#allocation2 + $0x438] sm:$0xff]  ;;  %3984 = vmatprep.subr.mxu1 %v11844_v24 }
 0x3b8   :  { %v2913_v7 = vld [vmem:[#allocation3 + $0xda] ss:$2 sm:$0xff]  ;;  %v2915_v34 = vld [vmem:[#allocation3 + $0xea] ss:$2 sm:$0x1]  ;;  %v2698_v53 = vsel %vm2408_vm12, %v2696_v25, %v2697_v44  ;;  %3901 = vmatmul.mubr.f32.gmra.mxu1 %v3413_v30  ;;  %v3580_v10 = vld [vmem:[%s13798_s2 + $0x2c0] sm:$0xff] }
 0x3b9   :  { %v2918_v49 = vrot.slane %v2913_v7, 7  ;;  %v2919_v5 = vrot.slane %v2915_v34, 7  ;;  %v3024_v21 = vld [vmem:[#allocation3 + $0x10a] ss:$2 sm:$0xff]  ;;  %2702 = vst [vmem:[#allocation2 + $0x370] sm:$0x3] %v2698_v53  ;;  %v2809_v51 = vsel %vm2408_vm12, %v2807_v4, %v2808_v12  ;;  %3905 = vmatprep.mubr.f32.mxu1 %v3423_v60  ;;  %3985 = vmatpush2.msra.mxu1 %v3584_v23 }
 0x3ba   :  { %v3029_v26 = vrot.slane %v3024_v21, 7  ;;  %v3422_v18 = vld [vmem:[#allocation2 + $0x3d0] sm:$0xff]  ;;  %v3583_v40 = vld [vmem:[%s13798_s2 + $0x2d8] sm:$0xff]  ;;  %2813 = vst [vmem:[#allocation2 + $0x2f0] sm:$0x3] %v2809_v51  ;;  %v11965_v13 = vld [vmem:[#allocation2 + $0x108] sm:$0xff]  ;;  %3986 = vmatprep.subr.mxu1 %v11844_v24 }
 0x3bb   :  { %2923 = vst [vmem:[#allocation2 + $0x508] sm:$0xfe] %v2918_v49  ;;  %v2920_v29 = vsel %vm2408_vm12, %v2918_v49, %v2919_v5  ;;  %v3026_v33 = vld [vmem:[#allocation3 + $0x11a] ss:$2 sm:$0x1]  ;;  %v3582_v62 = vld [vmem:[%s13798_s2 + $0x2d0] sm:$0xff]  ;;  %3987 = vmatpush2.msra.mxu1 %v3583_v40 }
 0x3bc   :  { %2924 = vst [vmem:[#allocation2 + $0x218] sm:$0x3] %v2920_v29  ;;  %3034 = vst [vmem:[#allocation2 + $0x130] sm:$0xfe] %v3029_v26  ;;  %v3030_v28 = vrot.slane %v3026_v33, 7  ;;  %v11968_v3 = vld [vmem:[#allocation2 + $0x388] sm:$0xff]  ;;  %3906 = vmatmul.mubr.f32.gmra.mxu1 %v3422_v18  ;;  %3988 = vmatprep.subr.mxu1 %v11844_v24 }
 0x3bd   :  { %v3135_v54 = vld [vmem:[#allocation3 + $0x13a] ss:$2 sm:$0xff]  ;;  %v3246_v9 = vld [vmem:[#allocation3 + $0x16a] ss:$2 sm:$0xff]  ;;  %4919 = vst [vmem:[#allocation2 + $0x108] sm:$0xff] %v11844_v24  ;;  %4928 = vst [vmem:[#allocation2 + $0x388] sm:$0xff] %v11844_v24  ;;  %3989 = vmatpush2.msra.mxu1 %v3582_v62 }
 0x3be   :  { %v11970_v58 = vld [vmem:[#allocation2 + $0x390] sm:$0xff]  ;;  %v3140_v8 = vrot.slane %v3135_v54, 7  ;;  %v3137_v16 = vld [vmem:[#allocation3 + $0x14a] ss:$2 sm:$0x1]  ;;  %v3031_v50 = vsel %vm2408_vm12, %v3029_v26, %v3030_v28  ;;  %v3251_v14 = vrot.slane %v3246_v9, 7  ;;  %3990 = vmatprep.subr.mxu1 %v11844_v24 }
 0x3bf   :  { %v3432_v52 = vld [vmem:[#allocation2 + $0x138] sm:$0xff]  ;;  %4937 = vst [vmem:[#allocation2 + $0x390] sm:$0xff] %v11844_v24  ;;  %v3141_v36 = vrot.slane %v3137_v16, 7  ;;  %v3248_v22 = vld [vmem:[#allocation3 + $0x17a] ss:$2 sm:$0x1] }
 0x3c0   :  { %3910 = vmatprep.mubr.f32.mxu1 %v3432_v52  ;;  %v11976_v47 = vld [vmem:[#allocation2 + $0x3a0] sm:$0xff]  ;;  %v11978_v19 = vld [vmem:[#allocation2 + $0x1c8] sm:$0xff]  ;;  %3035 = vst [vmem:[#allocation2 + $0x408] sm:$0x3] %v3031_v50  ;;  %3145 = vst [vmem:[#allocation2 + $0x50] sm:$0xfe] %v3140_v8 }
 0x3c1   :  { %v3252_v63 = vrot.slane %v3248_v22, 7  ;;  %v3581_v56 = vld [vmem:[%s13798_s2 + $0x2c8] sm:$0xff]  ;;  %4946 = vst [vmem:[#allocation2 + $0x3a0] sm:$0xff] %v11844_v24  ;;  %4955 = vst [vmem:[#allocation2 + $0x1c8] sm:$0xff] %v11844_v24  ;;  %v3142_v42 = vsel %vm2408_vm12, %v3140_v8, %v3141_v36  ;;  %v3441_v39 = vld [vmem:[#allocation2 + $0x350] sm:$0xff] }
 0x3c2   :  { %3256 = vst [vmem:[#allocation2 + $0x320] sm:$0xfe] %v3251_v14  ;;  %v3431_v11 = vld [vmem:[#allocation2 + $0x3e8] sm:$0xff]  ;;  %3146 = vst [vmem:[#allocation2 + $0x4a8] sm:$0x3] %v3142_v42  ;;  %3991 = vmatpush2.msra.mxu1 %v3581_v56  ;;  %v3579_v27 = vld [vmem:[%s13798_s2 + $0x2b8] sm:$0xff] }
 0x3c3   :  { %v3253_v59 = vsel %vm2408_vm12, %v3251_v14, %v3252_v63  ;;  %3911 = vmatmul.mubr.f32.gmra.mxu1 %v3431_v11  ;;  %3992 = vmatprep.subr.mxu1 %v11844_v24  ;;  %v3440_v0 = vld [vmem:[#allocation2 + $0x1a0] sm:$0xff]  ;;  %v3450_v45 = vld [vmem:[#allocation2 + $0x248] sm:$0xff]  ;;  %v3578_v32 = vld [vmem:[%s13798_s2 + $0x2b0] sm:$0xff] }
 0x3c4   :  { %3257 = vst [vmem:[#allocation2 + $0x40] sm:$0x3] %v3253_v59  ;;  %3915 = vmatprep.mubr.f32.mxu1 %v3441_v39  ;;  %3993 = vmatpush2.msra.mxu1 %v3580_v10  ;;  %v3577_v41 = vld [vmem:[%s13798_s2 + $0x2a8] sm:$0xff]  ;;  %v3459_v25 = vld [vmem:[#allocation2 + $0xf0] sm:$0xff]  ;;  %v3576_v4 = vld [vmem:[%s13798_s2 + $0x2a0] sm:$0xff] }
 0x3c5   :  { %3994 = vmatprep.subr.mxu1 %v11844_v24  ;;  %v3449_v35 = vld [vmem:[#allocation2 + $0x188] sm:$0xff]  ;;  %v3575_v43 = vld [vmem:[%s13798_s2 + $0x298] sm:$0xff]  ;;  %v3458_v31 = vld [vmem:[#allocation2 + $0x2d0] sm:$0xff] }
 0x3c6   :  { %3995 = vmatpush2.msra.mxu1 %v3579_v27  ;;  %v3468_v44 = vld [vmem:[#allocation2 + $0x288] sm:$0xff]  ;;  %v3574_v48 = vld [vmem:[%s13798_s2 + $0x290] sm:$0xff]  ;;  %v3467_v7 = vld [vmem:[#allocation2 + $0x58] sm:$0xff] }
 0x3c7   :  { %3916 = vmatmul.mubr.f32.gmra.mxu1 %v3440_v0  ;;  %3996 = vmatprep.subr.mxu1 %v11844_v24  ;;  %v3573_v12 = vld [vmem:[%s13798_s2 + $0x288] sm:$0xff]  ;;  %v3477_v34 = vld [vmem:[#allocation2 + $0x98] sm:$0xff]  ;;  %v3572_v30 = vld [vmem:[%s13798_s2 + $0x280] sm:$0xff] }
 0x3c8   :  { %3920 = vmatprep.mubr.f32.mxu1 %v3450_v45  ;;  %3997 = vmatpush2.msra.mxu1 %v3578_v32  ;;  %v3635_v53 = vld [vmem:[%s13798_s2 + $0x478] sm:$0xff]  ;;  %v3476_v49 = vld [vmem:[#allocation2 + $0x430] sm:$0xff]  ;;  %v3633_v23 = vld [vmem:[%s13798_s2 + $0x468] sm:$0xff] }
 0x3c9   :  { %3998 = vmatprep.subr.mxu1 %v11844_v24  ;;  %v3486_v5 = vld [vmem:[#allocation2 + $0x290] sm:$0xff]  ;;  %v3632_v51 = vld [vmem:[%s13798_s2 + $0x460] sm:$0xff]  ;;  %v3621_v62 = vld [vmem:[%s13798_s2 + $0x408] sm:$0xff] }
 0x3ca   :  { %3999 = vmatpush2.msra.mxu1 %v3577_v41  ;;  %v3485_v21 = vld [vmem:[#allocation2 + $0x1b0] sm:$0xff]  ;;  %v3624_v26 = vld [vmem:[%s13798_s2 + $0x420] sm:$0xff]  ;;  %v3407_v9 = vld [vmem:[#allocation2 + $0x318] sm:$0xff] }
 0x3cb   :  { %3921 = vmatmul.mubr.f32.gmra.mxu1 %v3449_v35  ;;  %4000 = vmatprep.subr.mxu1 %v11844_v24  ;;  %v3634_v60 = vld [vmem:[%s13798_s2 + $0x470] sm:$0xff]  ;;  %v3389_v18 = vld [vmem:[#allocation2 + $0x1c0] sm:$0xff]  ;;  %v3406_v8 = vld [vmem:[#allocation2 + $0x3f8] sm:$0xff] }
 0x3cc   :  { %3925 = vmatprep.mubr.f32.mxu1 %v3459_v25  ;;  %4001 = vmatpush2.msra.mxu1 %v3576_v4  ;;  %v3388_v40 = vld [vmem:[#allocation2 + $0x180] sm:$0xff]  ;;  %v3622_v29 = vld [vmem:[%s13798_s2 + $0x410] sm:$0xff]  ;;  %v3415_v52 = vld [vmem:[#allocation2 + $0x178] sm:$0xff] }
 0x3cd   :  { %4002 = vmatprep.subr.mxu1 %v11844_v24  ;;  %v3398_v33 = vld [vmem:[#allocation2 + $0x490] sm:$0xff]  ;;  %v3620_v54 = vld [vmem:[%s13798_s2 + $0x400] sm:$0xff]  ;;  %v3424_v36 = vld [vmem:[#allocation2 + $0x198] sm:$0xff] }
 0x3ce   :  { %4003 = vmatpush2.msra.mxu1 %v3575_v43  ;;  %v3397_v28 = vld [vmem:[#allocation2 + $0x30] sm:$0xff]  ;;  %v3433_v22 = vld [vmem:[#allocation2 + $0x200] sm:$0xff]  ;;  %v3443_v63 = vld [vmem:[#allocation2 + $0x168] sm:$0xff] }
 0x3cf   :  { %3926 = vmatmul.mubr.f32.gmra.mxu1 %v3458_v31  ;;  %4004 = vmatprep.subr.mxu1 %v11844_v24  ;;  %v3416_v16 = vld [vmem:[#allocation2 + $0x250] sm:$0xff]  ;;  %v3442_v56 = vld [vmem:[#allocation2 + $0x68] sm:$0xff]  ;;  %v3452_v42 = vld [vmem:[#allocation2 + $0xe0] sm:$0xff] }
 0x3d0   :  { %3930 = vmatprep.mubr.f32.mxu1 %v3468_v44  ;;  %4005 = vmatpush2.msra.mxu1 %v3574_v48  ;;  %v3425_v50 = vld [vmem:[#allocation2 + $0xb0] sm:$0xff]  ;;  %v3451_v11 = vld [vmem:[#allocation2 + $0x228] sm:$0xff]  ;;  %v3460_v39 = vld [vmem:[#allocation2 + $0x1d8] sm:$0xff] }
 0x3d1   :  { %4006 = vmatprep.subr.mxu1 %v11844_v24  ;;  %v3434_v14 = vld [vmem:[#allocation2 + $0x3f0] sm:$0xff]  ;;  %v3461_v59 = vld [vmem:[#allocation2 + $0x148] sm:$0xff]  ;;  %v3470_v0 = vld [vmem:[#allocation2 + $0x300] sm:$0xff] }
 0x3d2   :  { %4007 = vmatpush2.msra.mxu1 %v3573_v12  ;;  %v3469_v41 = vld [vmem:[#allocation2 + $0x4c0] sm:$0xff]  ;;  %v3478_v44 = vld [vmem:[#allocation2 + $0x78] sm:$0xff] }
 0x3d3   :  { %3931 = vmatmul.mubr.f32.gmra.mxu1 %v3467_v7  ;;  %4008 = vmatprep.subr.mxu1 %v11844_v24  ;;  %v3479_v25 = vld [vmem:[#allocation2 + $0x20] sm:$0xff] }
 0x3d4   :  { %3935 = vmatprep.mubr.f32.mxu1 %v3477_v34  ;;  %4009 = vmatpush2.msra.mxu1 %v3572_v30  ;;  %v3488_v12 = vld [vmem:[#allocation2 + $0x280] sm:$0xff] }
 0x3d5   :  { %7337 = vmatprep.subr.mxu1 %v3635_v53 }
 0x3d7   :  { %3936 = vmatmul.mubr.f32.gmra.mxu1 %v3476_v49 }
 0x3d8   :  { %3940 = vmatprep.mubr.f32.mxu1 %v3486_v5 }
 0x3db   :  { %3941 = vmatmul.mubr.f32.gmra.mxu1 %v3485_v21 }
 0x3dc   :  { %4010 = vmatprep.mubr.f32.mxu1 %v11841_v15  ;;  %v3631_v15 = vld [vmem:[%s13798_s2 + $0x458] sm:$0xff] }
 0x3df   :  { %4011 = vmatmul.mubr.f32.vlgmr.msra.gmra.mxu1 %v11851_v46  ;;  %v3630_v46 = vld [vmem:[%s13798_s2 + $0x450] sm:$0xff] }
 0x3e0   :  { %7338 = vmatpush3.msra.mxu1 %v3635_v53  ;;  %4015 = vmatprep.mubr.f32.mxu1 %v11863_v20  ;;  %v3629_v20 = vld [vmem:[%s13798_s2 + $0x448] sm:$0xff]  ;;  %v3487_v53 = vld [vmem:[#allocation2 + $0x400] sm:$0xff] }
 0x3e1   :  { %7339 = vmatprep.subr.mxu1 %v3634_v60 }
 0x3e2   :  { %7340 = vmatpush3.msra.mxu1 %v3634_v60 }
 0x3e3   :  { %4016 = vmatmul.mubr.f32.gmra.mxu1 %v11868_v2  ;;  %7341 = vmatprep.subr.mxu1 %v3633_v23  ;;  %v3628_v2 = vld [vmem:[%s13798_s2 + $0x440] sm:$0xff] }
 0x3e4   :  { %4020 = vmatprep.mubr.f32.mxu1 %v11870_v55  ;;  %7342 = vmatpush3.msra.mxu1 %v3633_v23  ;;  %v3627_v55 = vld [vmem:[%s13798_s2 + $0x438] sm:$0xff] }
 0x3e5   :  { %7343 = vmatprep.subr.mxu1 %v3632_v51 }
 0x3e6   :  { %7344 = vmatpush3.msra.mxu1 %v3632_v51 }
 0x3e7   :  { %4021 = vmatmul.mubr.f32.gmra.mxu1 %v11872_v6  ;;  %7345 = vmatprep.subr.mxu1 %v3631_v15  ;;  %v3626_v6 = vld [vmem:[%s13798_s2 + $0x430] sm:$0xff] }
 0x3e8   :  { %4025 = vmatprep.mubr.f32.mxu1 %v11882_v38  ;;  %7346 = vmatpush3.msra.mxu1 %v3631_v15  ;;  %v3380_v38 = vld [vmem:[#allocation2 + $0x298] sm:$0xff] }
 0x3e9   :  { %7347 = vmatprep.subr.mxu1 %v3630_v46 }
 0x3ea   :  { %7348 = vmatpush3.msra.mxu1 %v3630_v46  ;;  %v12083_v10 = vpop.f32.mrf.mxu1 }
 0x3eb   :  { %4026 = vmatmul.mubr.f32.gmra.mxu1 %v11890_v1  ;;  %7349 = vmatprep.subr.mxu1 %v3629_v20  ;;  %v3379_v1 = vld [vmem:[#allocation2 + $0x238] sm:$0xff]  ;;  %v12085_v27 = vpop.f32.mrf.mxu0 }
 0x3ec   :  { %4030 = vmatprep.mubr.f32.mxu1 %v11888_v37  ;;  %7350 = vmatpush3.msra.mxu1 %v3629_v20  ;;  %v3625_v37 = vld [vmem:[%s13798_s2 + $0x428] sm:$0xff]  ;;  %v3714_v45 = vpop.f32.mrf.mxu1 }
 0x3ed   :  { %7351 = vmatprep.subr.mxu1 %v3628_v2  ;;  %v4169_v32 = vpop.f32.mrf.mxu0 }
 0x3ee   :  { %7352 = vmatpush3.msra.mxu1 %v3628_v2 }
 0x3ef   :  { %4031 = vmatmul.mubr.f32.gmra.mxu1 %v11898_v61  ;;  %7353 = vmatprep.subr.mxu1 %v3627_v55  ;;  %v3623_v61 = vld [vmem:[%s13798_s2 + $0x418] sm:$0xff] }
 0x3f0   :  { %4035 = vmatprep.mubr.f32.mxu1 %v3380_v38  ;;  %7354 = vmatpush3.msra.mxu1 %v3627_v55  ;;  %v12087_v35 = vpop.f32.mrf.mxu1 }
 0x3f1   :  { %7355 = vmatprep.subr.mxu1 %v3626_v6 }
 0x3f2   :  { %7356 = vmatpush3.msra.mxu1 %v3626_v6  ;;  %v12089_v4 = vpop.f32.mrf.mxu0  ;;  %v3719_v43 = vpop.f32.mrf.mxu1  ;;  %v3383_v6 = vld [vmem:[#allocation2 + $0x370] sm:$0xff] }
 0x3f3   :  { %4036 = vmatmul.mubr.f32.gmra.mxu1 %v3379_v1  ;;  %7357 = vmatprep.subr.mxu1 %v3625_v37 }
 0x3f4   :  { %4040 = vmatprep.mubr.f32.mxu1 %v3389_v18  ;;  %7358 = vmatpush3.msra.mxu1 %v3625_v37  ;;  %v4174_v31 = vpop.f32.mrf.mxu0  ;;  %v12091_v48 = vpop.f32.mrf.mxu1 }
 0x3f5   :  { %7359 = vmatprep.subr.mxu1 %v3624_v26 }
 0x3f6   :  { %7360 = vmatpush3.msra.mxu1 %v3624_v26  ;;  %v12093_v7 = vpop.f32.mrf.mxu0  ;;  %v3724_v34 = vpop.f32.mrf.mxu1  ;;  %v3401_v26 = vld [vmem:[#allocation2 + $0x2f0] sm:$0xff] }
 0x3f7   :  { %4041 = vmatmul.mubr.f32.gmra.mxu1 %v3388_v40  ;;  %7361 = vmatprep.subr.mxu1 %v3623_v61 }
 0x3f8   :  { %4045 = vmatprep.mubr.f32.mxu1 %v3398_v33  ;;  %7362 = vmatpush3.msra.mxu1 %v3623_v61  ;;  %v4179_v30 = vpop.f32.mrf.mxu0  ;;  %v12095_v49 = vpop.f32.mrf.mxu1 }
 0x3f9   :  { %7363 = vmatprep.subr.mxu1 %v3622_v29 }
 0x3fa   :  { %7364 = vmatpush3.msra.mxu1 %v3622_v29  ;;  %v12097_v5 = vpop.f32.mrf.mxu0  ;;  %v3729_v21 = vpop.f32.mrf.mxu1  ;;  %v3419_v29 = vld [vmem:[#allocation2 + $0x218] sm:$0xff] }
 0x3fb   :  { %4046 = vmatmul.mubr.f32.gmra.mxu1 %v3397_v28  ;;  %7365 = vmatprep.subr.mxu1 %v3621_v62 }
 0x3fc   :  { %4050 = vmatprep.mubr.f32.mxu1 %v3407_v9  ;;  %7366 = vmatpush3.msra.mxu1 %v3621_v62  ;;  %v4184_v60 = vpop.f32.mrf.mxu0  ;;  %v3428_v62 = vld [vmem:[#allocation2 + $0x130] sm:$0xff] }
 0x3fd   :  { %7367 = vmatprep.subr.mxu1 %v3620_v54 }
 0x3fe   :  { %7368 = vmatpush3.msra.mxu1 %v3620_v54  ;;  %v12103_v51 = vpop.f32.mrf.mxu0 }
 0x3ff   :  { %4051 = vmatmul.mubr.f32.gmra.mxu1 %v3406_v8  ;;  %v3437_v8 = vld [vmem:[#allocation2 + $0x408] sm:$0xff] }
 0x400   :  { %4055 = vmatprep.mubr.f32.mxu1 %v3416_v16  ;;  %v12100_v23 = vpop.f32.mrf.mxu1  ;;  %v4189_v46 = vpop.f32.mrf.mxu0 }
 0x402   :  { %v3734_v15 = vpop.f32.mrf.mxu1 }
 0x403   :  { %4056 = vmatmul.mubr.f32.gmra.mxu1 %v3415_v52  ;;  %v3446_v52 = vld [vmem:[#allocation2 + $0x50] sm:$0xff] }
 0x404   :  { %4060 = vmatprep.mubr.f32.mxu1 %v3425_v50 }
 0x407   :  { %4061 = vmatmul.mubr.f32.gmra.mxu1 %v3424_v36  ;;  %v12106_v20 = vpop.f32.mrf.mxu1 }
 0x408   :  { %4065 = vmatprep.mubr.f32.mxu1 %v3434_v14  ;;  %v12109_v2 = vpop.f32.mrf.mxu0 }
 0x40a   :  { %v4194_v55 = vpop.f32.mrf.mxu0 }
 0x40b   :  { %4066 = vmatmul.mubr.f32.gmra.mxu1 %v3433_v22  ;;  %v3455_v22 = vld [vmem:[#allocation2 + $0x4a8] sm:$0xff] }
 0x40c   :  { %4070 = vmatprep.mubr.f32.mxu1 %v3443_v63  ;;  %v12114_v37 = vpop.f32.mrf.mxu0 }
 0x40e   :  { %v4199_v1 = vpop.f32.mrf.mxu0 }
 0x40f   :  { %4071 = vmatmul.mubr.f32.gmra.mxu1 %v3442_v56  ;;  %v3464_v56 = vld [vmem:[#allocation2 + $0x320] sm:$0xff] }
 0x410   :  { %4075 = vmatprep.mubr.f32.mxu1 %v3452_v42 }
 0x412   :  { %v12118_v61 = vpop.f32.mrf.mxu0 }
 0x413   :  { %4076 = vmatmul.mubr.f32.gmra.mxu1 %v3451_v11 }
 0x414   :  { %4080 = vmatprep.mubr.f32.mxu1 %v3461_v59  ;;  %v4204_v40 = vpop.f32.mrf.mxu0 }
 0x417   :  { %4081 = vmatmul.mubr.f32.gmra.mxu1 %v3460_v39  ;;  %v3473_v39 = vld [vmem:[#allocation2 + $0x40] sm:$0xff] }
 0x418   :  { %4085 = vmatprep.mubr.f32.mxu1 %v3470_v0 }
 0x419   :  { %v12122_v28 = vpop.f32.mrf.mxu0 }
 0x41b   :  { %4086 = vmatmul.mubr.f32.gmra.mxu1 %v3469_v41  ;;  %v4209_v9 = vpop.f32.mrf.mxu0 }
 0x41c   :  { %4090 = vmatprep.mubr.f32.mxu1 %v3479_v25 }
 0x41d   :  { %v12126_v50 = vpop.f32.mrf.mxu0 }
 0x41f   :  { %4091 = vmatmul.mubr.f32.gmra.mxu1 %v3478_v44  ;;  %v4214_v14 = vpop.f32.mrf.mxu0 }
 0x420   :  { %4095 = vmatprep.mubr.f32.mxu1 %v3488_v12 }
 0x422   :  { %v12130_v42 = vpop.f32.mrf.mxu0 }
 0x423   :  { %4096 = vmatmul.mubr.f32.gmra.mxu1 %v3487_v53 }
 0x424   :  { %7369 = vmatprep.mubr.f32.mxu1 %v11965_v13  ;;  %v3739_v13 = vpop.f32.mrf.mxu1  ;;  %v4219_v59 = vpop.f32.mrf.mxu0 }
 0x426   :  { %v12112_v38 = vpop.f32.mrf.mxu1 }
 0x427   :  { %7370 = vmatmul.mubr.f32.vlgmr.msra.gmra.mxu1 %v11968_v3  ;;  %v3392_v3 = vld [vmem:[#allocation2 + $0xa8] sm:$0xff] }
 0x428   :  { %7372 = vmatprep.mubr.f32.mxu1 %v11970_v58  ;;  %v3744_v58 = vpop.f32.mrf.mxu1 }
 0x429   :  { %v12134_v45 = vpop.f32.mrf.mxu0 }
 0x42a   :  { %v12116_v18 = vpop.f32.mrf.mxu1 }
 0x42b   :  { %7373 = vmatmul.mubr.f32.gmra.mxu1 %v11976_v47  ;;  %v3410_v47 = vld [vmem:[#allocation2 + $0x508] sm:$0xff]  ;;  %v4224_v41 = vpop.f32.mrf.mxu0 }
 0x42c   :  { %7375 = vmatprep.mubr.f32.mxu1 %v11978_v19  ;;  %v3749_v19 = vpop.f32.mrf.mxu1 }
 0x42d   :  { %v12140_v43 = vpop.f32.mrf.mxu0 }
 0x42e   :  { %v12120_v33 = vpop.f32.mrf.mxu1 }
 0x42f   :  { %7376 = vmatmul.mubr.f32.gmra.mxu1 %v3383_v6  ;;  %v4229_v44 = vpop.f32.mrf.mxu0 }
 0x430   :  { %7378 = vmatprep.mubr.f32.mxu1 %v3392_v3  ;;  %v3754_v54 = vpop.f32.mrf.mxu1 }
 0x432   :  { %v12124_v16 = vpop.f32.mrf.mxu1  ;;  %v12144_v34 = vpop.f32.mrf.mxu0 }
 0x433   :  { %7379 = vmatmul.mubr.f32.gmra.mxu1 %v3401_v26  ;;  %14831 = vst [vmem:[#allocation40_spill] sm:$0xff] %v12144_v34 }
 0x434   :  { %7381 = vmatprep.mubr.f32.mxu1 %v3410_v47  ;;  %v3759_v36 = vpop.f32.mrf.mxu1  ;;  %v4234_v53 = vpop.f32.mrf.mxu0 }
 0x436   :  { %v12128_v63 = vpop.f32.mrf.mxu1 }
 0x437   :  { %7382 = vmatmul.mubr.f32.gmra.mxu1 %v3419_v29 }
 0x438   :  { %7384 = vmatprep.mubr.f32.mxu1 %v3428_v62  ;;  %v3764_v11 = vpop.f32.mrf.mxu1 }
 0x43a   :  { %v12132_v0 = vpop.f32.mrf.mxu1 }
 0x43b   :  { %7385 = vmatmul.mubr.f32.gmra.mxu1 %v3437_v8  ;;  %v12148_v60 = vpop.f32.mrf.mxu0 }
 0x43c   :  { %7387 = vmatprep.mubr.f32.mxu1 %v3446_v52  ;;  %v3769_v32 = vpop.f32.mrf.mxu1  ;;  %14832 = vst [vmem:[#allocation87_spill] sm:$0xff] %v12148_v60 }
 0x43d   :  { %v4239_v46 = vpop.f32.mrf.mxu0 }
 0x43e   :  { %v12137_v25 = vpop.f32.mrf.mxu1 }
 0x43f   :  { %7388 = vmatmul.mubr.f32.gmra.mxu1 %v3455_v22  ;;  %v12152_v55 = vpop.f32.mrf.mxu0 }
 0x440   :  { %7390 = vmatprep.mubr.f32.mxu1 %v3464_v56  ;;  %v3774_v31 = vpop.f32.mrf.mxu1  ;;  %14834 = vst [vmem:[#allocation89_spill] sm:$0xff] %v12152_v55 }
 0x441   :  { %v4244_v6 = vpop.f32.mrf.mxu0 }
 0x442   :  { %v12142_v12 = vpop.f32.mrf.mxu1 }
 0x443   :  { %7391 = vmatmul.mubr.f32.gmra.mxu1 %v3473_v39 }
 0x444   :  { %7393 = vmatprep.mubr.f32.mxu1 %v11844_v24  ;;  %v3779_v30 = vpop.f32.mrf.mxu1  ;;  %v12154_v40 = vpop.f32.mrf.mxu0 }
 0x445   :  { %14835 = vst [vmem:[#allocation90_spill] sm:$0xff] %v12154_v40 }
 0x446   :  { %v12146_v21 = vpop.f32.mrf.mxu1  ;;  %v4249_v62 = vpop.f32.mrf.mxu0 }
 0x447   :  { %7394 = vmatmul.mubr.f32.gmra.mxu1 %v11844_v24 }
 0x448   :  { %v3784_v15 = vpop.f32.mrf.mxu1  ;;  %v12156_v9 = vpop.f32.mrf.mxu0 }
 0x449   :  { %14836 = vst [vmem:[#allocation112_spill] sm:$0xff] %v12156_v9 }
 0x44a   :  { %v12150_v13 = vpop.f32.mrf.mxu1  ;;  %v4254_v52 = vpop.f32.mrf.mxu0 }
 0x44b   :  { %14833 = vst [vmem:[#allocation88_spill] sm:$0xff] %v12150_v13 }
 0x44c   :  { %v3789_v24 = vpop.f32.mrf.mxu1 }
 0x44e   :  { %v3857_v3 = vpop.f32.mrf.mxu1 }
 0x450   :  { %v3859_v58 = vpop.f32.mrf.mxu1 }
 0x452   :  { %v3862_v1 = vpop.f32.mrf.mxu1 }
 0x454   :  { %v3864_v26 = vpop.f32.mrf.mxu1 }
 0x456   :  { %v3867_v47 = vpop.f32.mrf.mxu1 }
 0x458   :  { %v3869_v19 = vpop.f32.mrf.mxu1 }
 0x45a   :  { %v3872_v29 = vpop.f32.mrf.mxu1 }
 0x45c   :  { %v3874_v54 = vpop.f32.mrf.mxu1 }
 0x45e   :  { %v3877_v8 = vpop.f32.mrf.mxu1 }
 0x460   :  { %v3879_v36 = vpop.f32.mrf.mxu1 }
 0x462   :  { %v3882_v14 = vpop.f32.mrf.mxu1 }
 0x464   :  { %v3884_v22 = vpop.f32.mrf.mxu1 }
 0x466   :  { %v12158_v56 = vpop.f32.mrf.mxu1 }
 0x468   :  { %v3889_v11 = vpop.f32.mrf.mxu1 }
 0x46d   :  { %v12160_v59 = vpop.f32.mrf.mxu1 }
 0x46f   :  { %v3894_v39 = vpop.f32.mrf.mxu1 }
 0x472   :  { %v12162_v32 = vpop.f32.mrf.mxu1 }
 0x474   :  { %v3899_v41 = vpop.f32.mrf.mxu1 }
 0x475   :  { %v3858_v41 = vadd.f32 %v3857_v3, %v11806_v57  ;;  %v3878_v57 = vadd.f32 %v3877_v8, %v12091_v48 }
 0x478   :  { %v12164_v31 = vpop.f32.mrf.mxu1 }
 0x47a   :  { %v3904_v44 = vpop.f32.mrf.mxu1 }
 0x47c   :  { %v12166_v30 = vpop.f32.mrf.mxu1 }
 0x47e   :  { %v3909_v53 = vpop.f32.mrf.mxu1 }
 0x483   :  { %v12168_v15 = vpop.f32.mrf.mxu1 }
 0x485   :  { %v3914_v46 = vpop.f32.mrf.mxu1 }
 0x487   :  { %v12170_v24 = vpop.f32.mrf.mxu1 }
 0x489   :  { %v3919_v6 = vpop.f32.mrf.mxu1 }
 0x48a   :  { %v3863_v6 = vadd.f32 %v3862_v1, %v11817_v17  ;;  %v3883_v17 = vadd.f32 %v3882_v14, %v12095_v49 }
 0x48b   :  { %v12172_v58 = vpop.f32.mrf.mxu1 }
 0x48d   :  { %v3924_v26 = vpop.f32.mrf.mxu1 }
 0x48f   :  { %v12174_v19 = vpop.f32.mrf.mxu1 }
 0x491   :  { %v3929_v62 = vpop.f32.mrf.mxu1 }
 0x492   :  { %v3868_v62 = vadd.f32 %v3867_v47, %v12083_v10 }
 0x493   :  { %v12176_v54 = vpop.f32.mrf.mxu1 }
 0x495   :  { %v3934_v52 = vpop.f32.mrf.mxu1 }
 0x497   :  { %v12178_v36 = vpop.f32.mrf.mxu1 }
 0x499   :  { %v3939_v22 = vpop.f32.mrf.mxu1 }
 0x49a   :  { %v3873_v22 = vadd.f32 %v3872_v29, %v12087_v35 }
 0x49b   :  { %v12180_v11 = vpop.f32.mrf.mxu1 }
 0x49c   :  { %14837 = vst [vmem:[#allocation41_spill] sm:$0xff] %v12180_v11 }
 0x49d   :  { %v3944_v39 = vpop.f32.mrf.mxu1 }
 0x49f   :  { %v4012_v44 = vpop.f32.mrf.mxu1 }
 0x4a0   :  { %v4013_v53 = vadd.f32 %v4012_v44, %v3858_v41 }
 0x4a1   :  { %v4014_v46 = vpop.f32.mrf.mxu1 }
 0x4a3   :  { %v4017_v26 = vpop.f32.mrf.mxu1 }
 0x4a4   :  { %v4018_v9 = vadd.f32 %v4017_v26, %v3863_v6 }
 0x4a5   :  { %v4019_v40 = vpop.f32.mrf.mxu1 }
 0x4a7   :  { %v4022_v55 = vpop.f32.mrf.mxu1 }
 0x4a8   :  { %v4023_v52 = vadd.f32 %v4022_v55, %v3868_v62 }
 0x4a9   :  { %v4024_v60 = vpop.f32.mrf.mxu1 }
 0x4ab   :  { %v4027_v13 = vpop.f32.mrf.mxu1 }
 0x4ac   :  { %v4028_v11 = vadd.f32 %v4027_v13, %v3873_v22 }
 0x4ad   :  { %v4029_v39 = vpop.f32.mrf.mxu1 }
 0x4af   :  { %v4032_v3 = vpop.f32.mrf.mxu1 }
 0x4b0   :  { %v4033_v41 = vadd.f32 %v4032_v3, %v3878_v57 }
 0x4b1   :  { %v4034_v44 = vpop.f32.mrf.mxu1 }
 0x4b3   :  { %v4037_v1 = vpop.f32.mrf.mxu1 }
 0x4b4   :  { %v4038_v46 = vadd.f32 %v4037_v1, %v3883_v17 }
 0x4b5   :  { %v4039_v40 = vpop.f32.mrf.mxu1 }
 0x4b7   :  { %v4042_v6 = vpop.f32.mrf.mxu1 }
 0x4b9   :  { %v4044_v10 = vpop.f32.mrf.mxu1 }
 0x4bb   :  { %v4047_v47 = vpop.f32.mrf.mxu1 }
 0x4bd   :  { %v4049_v55 = vpop.f32.mrf.mxu1 }
 0x4bf   :  { %v4052_v60 = vpop.f32.mrf.mxu1 }
 0x4c1   :  { %v4054_v26 = vpop.f32.mrf.mxu1 }
 0x4c3   :  { %v4057_v35 = vpop.f32.mrf.mxu1 }
 0x4c5   :  { %v4059_v29 = vpop.f32.mrf.mxu1 }
 0x4c6   :  { %v4168_v29 = vadd.f32 %v12085_v27, %v4013_v53 }
 0x4c7   :  { %v4062_v13 = vpop.f32.mrf.mxu1 }
 0x4c9   :  { %v4064_v62 = vpop.f32.mrf.mxu1 }
 0x4cb   :  { %v4067_v22 = vpop.f32.mrf.mxu1 }
 0x4cd   :  { %v4069_v48 = vpop.f32.mrf.mxu1 }
 0x4ce   :  { %v4173_v48 = vadd.f32 %v12089_v4, %v4018_v9  ;;  %v3893_v4 = vadd.f32 %v12160_v59, %v12106_v20  ;;  %v3903_v20 = vadd.f32 %v12164_v31, %v12116_v18  ;;  %v3913_v18 = vadd.f32 %v12168_v15, %v12124_v16  ;;  %v5237_v16 = vld [vmem:[%s13799_s3 + $0x78] sm:$0xff]  ;;  %v5252_v15 = vld [vmem:[%s13799_s3 + $0xf0] sm:$0xff] }
 0x4cf   :  { %v12188_v8 = vpop.f32.mrf.mxu1 }
 0x4d1   :  { %v4074_v39 = vpop.f32.mrf.mxu1 }
 0x4d3   :  { %v12190_v57 = vpop.f32.mrf.mxu1 }
 0x4d5   :  { %v4079_v49 = vpop.f32.mrf.mxu1 }
 0x4d7   :  { %v12192_v14 = vpop.f32.mrf.mxu1 }
 0x4d9   :  { %v4084_v3 = vpop.f32.mrf.mxu1 }
 0x4da   :  { %v4178_v3 = vadd.f32 %v12093_v7, %v4023_v52  ;;  %v4188_v52 = vadd.f32 %v12103_v51, %v4033_v41 }
 0x4db   :  { %v12194_v44 = vpop.f32.mrf.mxu1 }
 0x4dd   :  { %v4089_v17 = vpop.f32.mrf.mxu1 }
 0x4df   :  { %v12196_v1 = vpop.f32.mrf.mxu1 }
 0x4e1   :  { %v4094_v40 = vpop.f32.mrf.mxu1 }
 0x4e2   :  { %v3888_v40 = vadd.f32 %v12158_v56, %v12100_v23  ;;  %v3898_v23 = vadd.f32 %v12162_v32, %v12112_v38  ;;  %v3908_v38 = vadd.f32 %v12166_v30, %v12120_v33  ;;  %v3918_v33 = vadd.f32 %v12170_v24, %v12128_v63  ;;  %v5236_v24 = vld [vmem:[%s13799_s3 + $0x70] sm:$0xff] }
 0x4e3   :  { %v12198_v10 = vpop.f32.mrf.mxu1 }
 0x4e4   :  { %14838 = vst [vmem:[#allocation91_spill] sm:$0xff] %v12198_v10  ;;  %v4183_v10 = vadd.f32 %v12097_v5, %v4028_v11  ;;  %v4043_v53 = vadd.f32 %v4042_v6, %v3888_v40  ;;  %v4193_v5 = vadd.f32 %v12109_v2, %v4038_v46  ;;  %v4053_v6 = vadd.f32 %v4052_v60, %v3898_v23 }
 0x4e5   :  { %v4099_v55 = vpop.f32.mrf.mxu1  ;;  %v4058_v2 = vadd.f32 %v4057_v35, %v3903_v20  ;;  %v4063_v60 = vadd.f32 %v4062_v13, %v3908_v38  ;;  %v4068_v35 = vadd.f32 %v4067_v22, %v3913_v18  ;;  %v5251_v22 = vld [vmem:[%s13799_s3 + $0xe8] sm:$0xff]  ;;  %v5233_v20 = vld [vmem:[%s13799_s3 + $0x58] sm:$0xff] }
 0x4e6   :  { %v4198_v41 = vadd.f32 %v12114_v37, %v4043_v53  ;;  %v5235_v53 = vld [vmem:[%s13799_s3 + $0x68] sm:$0xff] }
 0x4e7   :  { %v7371_v26 = vpop.f32.mrf.mxu1  ;;  %v4213_v13 = vadd.f32 %v12126_v50, %v4058_v2  ;;  %v4073_v50 = vadd.f32 %v12188_v8, %v3918_v33  ;;  %v5250_v8 = vld [vmem:[%s13799_s3 + $0xe0] sm:$0xff]  ;;  %v14842_v18 = vld [vmem:[#allocation87_spill] sm:$0xff] }
 0x4e8   :  { %v12204_v34 = vadd.f32 %v7371_v26, %v4173_v48  ;;  %v14841_v2 = vld [vmem:[#allocation41_spill] sm:$0xff] }
 0x4e9   :  { %v4322_v62 = vpop.f32.mrf.mxu1 }
 0x4ea   :  { %v12202_v39 = vadd.f32 %v4322_v62, %v4168_v29  ;;  %v4048_v29 = vadd.f32 %v4047_v47, %v3893_v4 }
 0x4eb   :  { %v7374_v49 = vpop.f32.mrf.mxu1 }
 0x4ec   :  { %v4413_v55 = vadd.f32 %v12204_v34, %v12202_v39  ;;  %v12216_v26 = vadd.f32 %v7374_v49, %v4183_v10  ;;  %v4203_v46 = vadd.f32 %v12118_v61, %v4048_v29  ;;  %v5253_v61 = vld [vmem:[%s13799_s3 + $0xf8] sm:$0xff] }
 0x4ed   :  { %v4332_v17 = vpop.f32.mrf.mxu1  ;;  %6945 = vmatprep.subr.mxu0 %v5253_v61 }
 0x4ee   :  { %v12212_v27 = vadd.f32 %v4332_v17, %v4178_v3  ;;  %v4208_v3 = vadd.f32 %v12122_v28, %v4053_v6  ;;  %v3923_v17 = vadd.f32 %v12172_v58, %v12132_v0  ;;  %6946 = vmatpush3.msra.mxu0 %v5237_v16  ;;  %v3928_v0 = vadd.f32 %v12174_v19, %v12137_v25  ;;  %v14839_v6 = vld [vmem:[#allocation40_spill] sm:$0xff]  ;;  %v5231_v16 = vld [vmem:[%s13799_s3 + $0x48] sm:$0xff] }
 0x4ef   :  { %v7377_v9 = vpop.f32.mrf.mxu1  ;;  %6947 = vmatprep.subr.mxu0 %v5252_v15  ;;  %v3933_v25 = vadd.f32 %v12176_v54, %v12142_v12  ;;  %v3938_v12 = vadd.f32 %v12178_v36, %v12146_v21  ;;  %v5232_v21 = vld [vmem:[%s13799_s3 + $0x50] sm:$0xff]  ;;  %v5269_v36 = vld [vmem:[%s13799_s3 + $0x178] sm:$0xff]  ;;  %v5267_v15 = vld [vmem:[%s13799_s3 + $0x168] sm:$0xff] }
 0x4f0   :  { %v4414_v7 = vadd.f32 %v4413_v55, %v12212_v27  ;;  %v12228_v10 = vadd.f32 %v7377_v9, %v4193_v5  ;;  %v4218_v9 = vadd.f32 %v12130_v42, %v4063_v60  ;;  %6948 = vmatpush3.msra.mxu0 %v5236_v24  ;;  %v4083_v19 = vadd.f32 %v12192_v14, %v3928_v0  ;;  %v5247_v60 = vld [vmem:[%s13799_s3 + $0xc8] sm:$0xff]  ;;  %v5282_v24 = vld [vmem:[%s13799_s3 + $0x1e0] sm:$0xff]  ;;  %v5245_v0 = vld [vmem:[%s13799_s3 + $0xb8] sm:$0xff] }
 0x4f1   :  { %v4342_v56 = vpop.f32.mrf.mxu1  ;;  %6949 = vmatprep.subr.mxu0 %v5251_v22  ;;  %v4088_v54 = vadd.f32 %v12194_v44, %v3933_v25  ;;  %v5284_v44 = vld [vmem:[%s13799_s3 + $0x1f0] sm:$0xff]  ;;  %v4093_v33 = vadd.f32 %v12196_v1, %v3938_v12  ;;  %v5246_v1 = vld [vmem:[%s13799_s3 + $0xc0] sm:$0xff]  ;;  %v5265_v25 = vld [vmem:[%s13799_s3 + $0x158] sm:$0xff] }
 0x4f2   :  { %v12223_v11 = vadd.f32 %v4342_v56, %v4188_v52  ;;  %v4415_v62 = vadd.f32 %v4414_v7, %v12216_v26  ;;  %v4078_v7 = vadd.f32 %v12190_v57, %v3923_v17  ;;  %v4223_v52 = vadd.f32 %v12134_v45, %v4068_v35  ;;  %v5234_v56 = vld [vmem:[%s13799_s3 + $0x60] sm:$0xff]  ;;  %6950 = vmatpush3.msra.mxu0 %v5235_v53  ;;  %v5249_v45 = vld [vmem:[%s13799_s3 + $0xd8] sm:$0xff]  ;;  %v14844_v17 = vld [vmem:[#allocation91_spill] sm:$0xff] }
 0x4f3   :  { %v7380_v59 = vpop.f32.mrf.mxu1  ;;  %6951 = vmatprep.subr.mxu0 %v5250_v8  ;;  %v14843_v35 = vld [vmem:[#allocation89_spill] sm:$0xff]  ;;  %v14845_v8 = vld [vmem:[#allocation90_spill] sm:$0xff] }
 0x4f4   :  { %v4416_v51 = vadd.f32 %v4415_v62, %v12223_v11  ;;  %v12240_v49 = vadd.f32 %v7380_v59, %v4203_v46  ;;  %v4228_v62 = vadd.f32 %v12140_v43, %v4073_v50  ;;  %6952 = vmatpush3.msra.mxu0 %v5234_v56  ;;  %v5248_v59 = vld [vmem:[%s13799_s3 + $0xd0] sm:$0xff]  ;;  %v5285_v43 = vld [vmem:[%s13799_s3 + $0x1f8] sm:$0xff] }
 0x4f5   :  { %v4352_v32 = vpop.f32.mrf.mxu1  ;;  %6953 = vmatprep.subr.mxu0 %v5249_v45  ;;  %6992 = vmatprep.subr.mxu1 %v5285_v43  ;;  %v5229_v56 = vld [vmem:[%s13799_s3 + $0x38] sm:$0xff]  ;;  %v5280_v45 = vld [vmem:[%s13799_s3 + $0x1d0] sm:$0xff]  ;;  %v5279_v43 = vld [vmem:[%s13799_s3 + $0x1c8] sm:$0xff] }
 0x4f6   :  { %v12235_v47 = vadd.f32 %v4352_v32, %v4198_v41  ;;  %v4417_v48 = vadd.f32 %v4416_v51, %v12228_v10  ;;  %v4233_v51 = vadd.f32 %v14839_v6, %v4078_v7  ;;  %v14840_v32 = vld [vmem:[#allocation88_spill] sm:$0xff]  ;;  %6954 = vmatpush3.msra.mxu0 %v5233_v20  ;;  %6993 = vmatpush3.msra.mxu1 %v5269_v36  ;;  %v5242_v36 = vld [vmem:[%s13799_s3 + $0xa0] sm:$0xff] }
 0x4f7   :  { %v7383_v31 = vpop.f32.mrf.mxu1  ;;  %v3943_v46 = vadd.f32 %v14841_v2, %v14840_v32  ;;  %6955 = vmatprep.subr.mxu0 %v5248_v59  ;;  %6994 = vmatprep.subr.mxu1 %v5284_v44  ;;  %v4248_v7 = vadd.f32 %v14845_v8, %v4093_v33  ;;  %v5243_v59 = vld [vmem:[%s13799_s3 + $0xa8] sm:$0xff]  ;;  %v5278_v44 = vld [vmem:[%s13799_s3 + $0x1c0] sm:$0xff]  ;;  %v5276_v33 = vld [vmem:[%s13799_s3 + $0x1b0] sm:$0xff] }
 0x4f8   :  { %v4418_v37 = vadd.f32 %v4417_v48, %v12235_v47  ;;  %v12268_v55 = vadd.f32 %v7383_v31, %v4213_v13  ;;  %v4238_v31 = vadd.f32 %v14842_v18, %v4083_v19  ;;  %v4243_v13 = vadd.f32 %v14843_v35, %v4088_v54  ;;  %6956 = vmatpush3.msra.mxu0 %v5232_v21  ;;  %v5228_v54 = vld [vmem:[%s13799_s3 + $0x30] sm:$0xff]  ;;  %v5263_v21 = vld [vmem:[%s13799_s3 + $0x148] sm:$0xff]  ;;  %v5226_v2 = vld [vmem:[%s13799_s3 + $0x20] sm:$0xff] }
 0x4f9   :  { %v4362_v30 = vpop.f32.mrf.mxu1  ;;  %6957 = vmatprep.subr.mxu0 %v5247_v60  ;;  %v5277_v18 = vld [vmem:[%s13799_s3 + $0x1b8] sm:$0xff]  ;;  %v5239_v35 = vld [vmem:[%s13799_s3 + $0x88] sm:$0xff] }
 0x4fa   :  { %v12256_v28 = vadd.f32 %v4362_v30, %v4208_v3  ;;  %v4419_v63 = vadd.f32 %v4418_v37, %v12240_v49  ;;  %v5268_v37 = vld [vmem:[%s13799_s3 + $0x170] sm:$0xff]  ;;  %v5283_v3 = vld [vmem:[%s13799_s3 + $0x1e8] sm:$0xff]  ;;  %6958 = vmatpush3.msra.mxu0 %v5231_v16  ;;  %v5225_v60 = vld [vmem:[%s13799_s3 + $0x18] sm:$0xff] }
 0x4fb   :  { %v7386_v40 = vpop.f32.mrf.mxu1  ;;  %6995 = vmatpush3.msra.mxu1 %v5268_v37  ;;  %6959 = vmatprep.subr.mxu0 %v5246_v1  ;;  %v5261_v37 = vld [vmem:[%s13799_s3 + $0x138] sm:$0xff]  ;;  %v5224_v16 = vld [vmem:[%s13799_s3 + $0x10] sm:$0xff]  ;;  %v5223_v1 = vld [vmem:[%s13799_s3 + $0x8] sm:$0xff] }
 0x4fc   :  { %v4420_v4 = vadd.f32 %v4419_v63, %v12256_v28  ;;  %v12294_v57 = vadd.f32 %v7386_v40, %v4223_v52  ;;  %v4098_v40 = vadd.f32 %v14844_v17, %v3943_v46  ;;  %6996 = vmatprep.subr.mxu1 %v5283_v3  ;;  %v5262_v46 = vld [vmem:[%s13799_s3 + $0x140] sm:$0xff]  ;;  %v5240_v3 = vld [vmem:[%s13799_s3 + $0x90] sm:$0xff]  ;;  %v5273_v8 = vld [vmem:[%s13799_s3 + $0x198] sm:$0xff] }
 0x4fd   :  { %v4372_v58 = vpop.f32.mrf.mxu1  ;;  %6997 = vmatpush3.msra.mxu1 %v5267_v15  ;;  %v5260_v15 = vld [vmem:[%s13799_s3 + $0x130] sm:$0xff]  ;;  %v5238_v17 = vld [vmem:[%s13799_s3 + $0x80] sm:$0xff] }
 0x4fe   :  { %v12282_v23 = vadd.f32 %v4372_v58, %v4218_v9  ;;  %v4421_v42 = vadd.f32 %v4420_v4, %v12268_v55  ;;  %v5230_v4 = vld [vmem:[%s13799_s3 + $0x40] sm:$0xff]  ;;  %v5281_v58 = vld [vmem:[%s13799_s3 + $0x1d8] sm:$0xff]  ;;  %6998 = vmatprep.subr.mxu1 %v5282_v24  ;;  %v5259_v24 = vld [vmem:[%s13799_s3 + $0x128] sm:$0xff] }
 0x4ff   :  { %v7389_v29 = vpop.f32.mrf.mxu1  ;;  %v5266_v9 = vld [vmem:[%s13799_s3 + $0x160] sm:$0xff]  ;;  %6960 = vmatpush3.msra.mxu0 %v5230_v4 }
 0x500   :  { %v4422_v5 = vadd.f32 %v4421_v42, %v12282_v23  ;;  %v12336_v30 = vadd.f32 %v7389_v29, %v4233_v51  ;;  %v5244_v29 = vld [vmem:[%s13799_s3 + $0xb0] sm:$0xff]  ;;  %6999 = vmatpush3.msra.mxu1 %v5266_v9  ;;  %6961 = vmatprep.subr.mxu0 %v5245_v0  ;;  %v5222_v4 = vld [vmem:[%s13799_s3] sm:$0xff] }
 0x501   :  { %v4382_v14 = vpop.f32.mrf.mxu1  ;;  %7000 = vmatprep.subr.mxu1 %v5281_v58  ;;  %6962 = vmatpush3.msra.mxu0 %v5229_v56  ;;  %v5258_v9 = vld [vmem:[%s13799_s3 + $0x120] sm:$0xff]  ;;  %v5301_v58 = vld [vmem:[%s13799_s3 + $0x278] sm:$0xff] }
 0x502   :  { %v12311_v41 = vadd.f32 %v4382_v14, %v4228_v62  ;;  %v4423_v38 = vadd.f32 %v4422_v5, %v12294_v57  ;;  %v14846_v5 = vld [vmem:[#allocation112_spill] sm:$0xff]  ;;  %7001 = vmatpush3.msra.mxu1 %v5265_v25  ;;  %6963 = vmatprep.subr.mxu0 %v5244_v29 }
 0x503   :  { %v7392_v48 = vpop.f32.mrf.mxu1  ;;  %v4253_v62 = vadd.f32 %v14846_v5, %v4098_v40  ;;  %v5264_v14 = vld [vmem:[%s13799_s3 + $0x150] sm:$0xff]  ;;  %7002 = vmatprep.subr.mxu1 %v5280_v45  ;;  %6964 = vmatpush3.msra.mxu0 %v5228_v54  ;;  %v5274_v40 = vld [vmem:[%s13799_s3 + $0x1a0] sm:$0xff]  ;;  %v5315_v45 = vld [vmem:[%s13799_s3 + $0x2e8] sm:$0xff] }
 0x504   :  { %v4424_v61 = vadd.f32 %v4423_v38, %v12311_v41  ;;  %v12369_v52 = vadd.f32 %v7392_v48, %v4243_v13  ;;  %v5227_v38 = vld [vmem:[%s13799_s3 + $0x28] sm:$0xff]  ;;  %7003 = vmatpush3.msra.mxu1 %v5264_v14  ;;  %6965 = vmatprep.subr.mxu0 %v5243_v59  ;;  %v5241_v48 = vld [vmem:[%s13799_s3 + $0x98] sm:$0xff]  ;;  %v12485_v25 = vld [vmem:[#allocation2 + $0x10] sm:$0xff] }
 0x505   :  { %v4392_v63 = vpop.f32.mrf.mxu1  ;;  %7004 = vmatprep.subr.mxu1 %v5279_v43  ;;  %6966 = vmatpush3.msra.mxu0 %v5227_v38  ;;  %v5275_v13 = vld [vmem:[%s13799_s3 + $0x1a8] sm:$0xff]  ;;  %v5272_v29 = vld [vmem:[%s13799_s3 + $0x190] sm:$0xff]  ;;  %v5298_v54 = vld [vmem:[%s13799_s3 + $0x260] sm:$0xff] }
 0x506   :  { %v12353_v22 = vadd.f32 %v4392_v63, %v4238_v31  ;;  %v4425_v50 = vadd.f32 %v4424_v61, %v12336_v30  ;;  %7005 = vmatpush3.msra.mxu1 %v5263_v21  ;;  %6967 = vmatprep.subr.mxu0 %v5242_v36  ;;  %v5313_v43 = vld [vmem:[%s13799_s3 + $0x2d8] sm:$0xff]  ;;  %v5312_v38 = vld [vmem:[%s13799_s3 + $0x2d0] sm:$0xff] }
 0x507   :  { %v7395_v53 = vpop.f32.mrf.mxu1  ;;  %7006 = vmatprep.subr.mxu1 %v5278_v44  ;;  %6968 = vmatpush3.msra.mxu0 %v5226_v2  ;;  %v5256_v21 = vld [vmem:[%s13799_s3 + $0x110] sm:$0xff] }
 0x508   :  { %v4426_v42 = vadd.f32 %v4425_v50, %v12353_v22  ;;  %v12400_v6 = vadd.f32 %v7395_v53, %v4253_v62  ;;  %7007 = vmatpush3.msra.mxu1 %v5262_v46  ;;  %6969 = vmatprep.subr.mxu0 %v5241_v48  ;;  %v5317_v53 = vld [vmem:[%s13799_s3 + $0x2f8] sm:$0xff]  ;;  %v5299_v62 = vld [vmem:[%s13799_s3 + $0x268] sm:$0xff]  ;;  %v5296_v2 = vld [vmem:[%s13799_s3 + $0x250] sm:$0xff] }
 0x509   :  { %v4402_v19 = vpop.f32.mrf.mxu1  ;;  %7008 = vmatprep.subr.mxu1 %v5277_v18  ;;  %6970 = vmatpush3.msra.mxu0 %v5225_v60  ;;  %v5271_v46 = vld [vmem:[%s13799_s3 + $0x188] sm:$0xff] }
 0x50a   :  { %v12385_v20 = vadd.f32 %v4402_v19, %v4248_v7  ;;  %v4427_v12 = vadd.f32 %v4426_v42, %v12369_v52  ;;  %7009 = vmatpush3.msra.mxu1 %v5261_v37  ;;  %6971 = vmatprep.subr.mxu0 %v5240_v3  ;;  %v5316_v7 = vld [vmem:[%s13799_s3 + $0x2f0] sm:$0xff]  ;;  %v5257_v42 = vld [vmem:[%s13799_s3 + $0x118] sm:$0xff]  ;;  %v5311_v48 = vld [vmem:[%s13799_s3 + $0x2c8] sm:$0xff] }
 0x50b   :  { %7010 = vmatprep.subr.mxu1 %v5276_v33  ;;  %6972 = vmatpush3.msra.mxu0 %v5224_v16  ;;  %v5300_v19 = vld [vmem:[%s13799_s3 + $0x270] sm:$0xff]  ;;  %v5295_v60 = vld [vmem:[%s13799_s3 + $0x248] sm:$0xff]  ;;  %v5270_v37 = vld [vmem:[%s13799_s3 + $0x180] sm:$0xff] }
 0x50c   :  { %v4428_v51 = vadd.f32 %v4427_v12, %v12385_v20  ;;  %7011 = vmatpush3.msra.mxu1 %v5260_v15  ;;  %6973 = vmatprep.subr.mxu0 %v5239_v35  ;;  %v5314_v12 = vld [vmem:[%s13799_s3 + $0x2e0] sm:$0xff] }
 0x50d   :  { %7012 = vmatprep.subr.mxu1 %v5275_v13  ;;  %6974 = vmatpush3.msra.mxu0 %v5223_v1  ;;  %v5310_v3 = vld [vmem:[%s13799_s3 + $0x2c0] sm:$0xff]  ;;  %v5309_v13 = vld [vmem:[%s13799_s3 + $0x2b8] sm:$0xff] }
 0x50e   :  { %v4429_v32 = vadd.f32 %v4428_v51, %v12400_v6  ;;  %7013 = vmatpush3.msra.mxu1 %v5259_v24  ;;  %6975 = vmatprep.subr.mxu0 %v5238_v17  ;;  %v5297_v51 = vld [vmem:[%s13799_s3 + $0x258] sm:$0xff]  ;;  %v5254_v15 = vld [vmem:[%s13799_s3 + $0x100] sm:$0xff] }
 0x50f   :  { %7014 = vmatprep.subr.mxu1 %v5274_v40  ;;  %6976 = vmatpush3.msra.mxu0 %v5222_v4  ;;  %v5294_v35 = vld [vmem:[%s13799_s3 + $0x240] sm:$0xff]  ;;  %v5293_v40 = vld [vmem:[%s13799_s3 + $0x238] sm:$0xff] }
 0x510   :  { %v4430_v31 = vrot.slane %v4429_v32, 4  ;;  %7015 = vmatpush3.msra.mxu1 %v5258_v9  ;;  %5431 = vmatmul.mubr.f32.vlgmr.msra.gmra.mxu0 %v12485_v25 }
 0x511   :  { %7039 = vmatprep.subr.mxu0 %v5317_v53  ;;  %7016 = vmatprep.subr.mxu1 %v5273_v8 }
 0x512   :  { %v4431_v61 = vadd.f32 %v4430_v31, %v4429_v32  ;;  %7040 = vmatpush3.msra.mxu0 %v5301_v58  ;;  %7017 = vmatpush3.msra.mxu1 %v5257_v42  ;;  %v5255_v31 = vld [vmem:[%s13799_s3 + $0x108] sm:$0xff] }
 0x513   :  { %7041 = vmatprep.subr.mxu0 %v5316_v7  ;;  %7018 = vmatprep.subr.mxu1 %v5272_v29  ;;  %v5307_v58 = vld [vmem:[%s13799_s3 + $0x2a8] sm:$0xff] }
 0x514   :  { %v4432_v63 = vrot.slane %v4431_v61, 2  ;;  %7042 = vmatpush3.msra.mxu0 %v5300_v19  ;;  %7019 = vmatpush3.msra.mxu1 %v5256_v21  ;;  %v5306_v19 = vld [vmem:[%s13799_s3 + $0x2a0] sm:$0xff] }
 0x515   :  { %7043 = vmatprep.subr.mxu0 %v5315_v45  ;;  %7020 = vmatprep.subr.mxu1 %v5271_v46 }
 0x516   :  { %v4433_v50 = vadd.f32 %v4432_v63, %v4431_v61  ;;  %7044 = vmatpush3.msra.mxu0 %v5299_v62  ;;  %7021 = vmatpush3.msra.mxu1 %v5255_v31  ;;  %v5349_v63 = vld [vmem:[%s13799_s3 + $0x3f8] sm:$0xff]  ;;  %v5287_v31 = vld [vmem:[%s13799_s3 + $0x208] sm:$0xff] }
 0x517   :  { %7045 = vmatprep.subr.mxu0 %v5314_v12  ;;  %7022 = vmatprep.subr.mxu1 %v5270_v37  ;;  %v5290_v12 = vld [vmem:[%s13799_s3 + $0x220] sm:$0xff] }
 0x518   :  { %v4434_v0 = vrot.slane %v4433_v50, 1  ;;  %7046 = vmatpush3.msra.mxu0 %v5298_v54  ;;  %7023 = vmatpush3.msra.mxu1 %v5254_v15  ;;  %v5305_v54 = vld [vmem:[%s13799_s3 + $0x298] sm:$0xff] }
 0x519   :  { %7047 = vmatprep.subr.mxu0 %v5313_v43  ;;  %7086 = vmatprep.subr.mxu1 %v5349_v63 }
 0x51a   :  { %v4435_v56 = vadd.f32 %v4434_v0, %v4433_v50  ;;  %7048 = vmatpush3.msra.mxu0 %v5297_v51  ;;  %v5308_v50 = vld [vmem:[%s13799_s3 + $0x2b0] sm:$0xff]  ;;  %v5289_v51 = vld [vmem:[%s13799_s3 + $0x218] sm:$0xff] }
 0x51b   :  { %7049 = vmatprep.subr.mxu0 %v5312_v38  ;;  %v5292_v0 = vld [vmem:[%s13799_s3 + $0x230] sm:$0xff] }
 0x51c   :  { %v12497_v5 = vmul.f32 0.012345679, %v4435_v56  ;;  %7050 = vmatpush3.msra.mxu0 %v5296_v2  ;;  %v5291_v56 = vld [vmem:[%s13799_s3 + $0x228] sm:$0xff]  ;;  %v5304_v38 = vld [vmem:[%s13799_s3 + $0x290] sm:$0xff] }
 0x51d   :  { %7051 = vmatprep.subr.mxu0 %v5311_v48  ;;  %v5303_v2 = vld [vmem:[%s13799_s3 + $0x288] sm:$0xff] }
 0x51e   :  { %v4438_v14 = vsub.f32 %v12202_v39, %v12497_v5  ;;  %v4439_v59 = vsub.f32 %v12204_v34, %v12497_v5  ;;  %v4440_v36 = vsub.f32 %v12212_v27, %v12497_v5  ;;  %v4441_v18 = vsub.f32 %v12216_v26, %v12497_v5  ;;  %7052 = vmatpush3.msra.mxu0 %v5295_v60  ;;  %v5302_v60 = vld [vmem:[%s13799_s3 + $0x280] sm:$0xff] }
 0x51f   :  { %v4442_v33 = vsub.f32 %v12223_v11, %v12497_v5  ;;  %v4443_v1 = vsub.f32 %v12228_v10, %v12497_v5  ;;  %7053 = vmatprep.subr.mxu0 %v5310_v3  ;;  %v4444_v4 = vsub.f32 %v12235_v47, %v12497_v5  ;;  %v4445_v8 = vsub.f32 %v12240_v49, %v12497_v5 }
 0x520   :  { %v4456_v44 = vmul.f32 %v4438_v14, %v4438_v14  ;;  %v4457_v32 = vmul.f32 %v4439_v59, %v4439_v59  ;;  %v4458_v61 = vmul.f32 %v4440_v36, %v4440_v36  ;;  %v4459_v24 = vmul.f32 %v4441_v18, %v4441_v18  ;;  %7054 = vmatpush3.msra.mxu0 %v5294_v35 }
 0x521   :  { %v4460_v9 = vmul.f32 %v4442_v33, %v4442_v33  ;;  %7055 = vmatprep.subr.mxu0 %v5309_v13  ;;  %v4461_v7 = vmul.f32 %v4443_v1, %v4443_v1  ;;  %v4446_v29 = vsub.f32 %v12256_v28, %v12497_v5  ;;  %v4462_v45 = vmul.f32 %v4444_v4, %v4444_v4 }
 0x522   :  { %v4474_v16 = vadd.f32 %v4457_v32, %v4456_v44  ;;  %7056 = vmatpush3.msra.mxu0 %v5293_v40  ;;  %v4447_v14 = vsub.f32 %v12268_v55, %v12497_v5  ;;  %v4463_v59 = vmul.f32 %v4445_v8, %v4445_v8  ;;  %v4448_v21 = vsub.f32 %v12282_v23, %v12497_v5  ;;  %v5288_v32 = vld [vmem:[%s13799_s3 + $0x210] sm:$0xff] }
 0x523   :  { %7057 = vmatprep.subr.mxu0 %v5308_v50  ;;  %v4464_v36 = vmul.f32 %v4446_v29, %v4446_v29  ;;  %v4449_v46 = vsub.f32 %v12294_v57, %v12497_v5  ;;  %v4450_v37 = vsub.f32 %v12311_v41, %v12497_v5  ;;  %v4452_v13 = vsub.f32 %v12353_v22, %v12497_v5 }
 0x524   :  { %v4475_v17 = vadd.f32 %v4474_v16, %v4458_v61  ;;  %7058 = vmatpush3.msra.mxu0 %v5292_v0  ;;  %v4465_v48 = vmul.f32 %v4447_v14, %v4447_v14  ;;  %v4466_v3 = vmul.f32 %v4448_v21, %v4448_v21  ;;  %v5286_v61 = vld [vmem:[%s13799_s3 + $0x200] sm:$0xff]  ;;  %v4451_v16 = vsub.f32 %v12336_v30, %v12497_v5 }
 0x525   :  { %7059 = vmatprep.subr.mxu0 %v5307_v58  ;;  %v4467_v15 = vmul.f32 %v4449_v46, %v4449_v46  ;;  %v4468_v63 = vmul.f32 %v4450_v37, %v4450_v37  ;;  %v4454_v50 = vsub.f32 %v12385_v20, %v12497_v5  ;;  %v4470_v4 = vmul.f32 %v4452_v13, %v4452_v13  ;;  %v14848_v46 = vld [vmem:[#allocation54_spill] sm:$0xff] }
 0x526   :  { %v4476_v53 = vadd.f32 %v4475_v17, %v4459_v24  ;;  %7060 = vmatpush3.msra.mxu0 %v5291_v56  ;;  %v4453_v24 = vsub.f32 %v12369_v52, %v12497_v5  ;;  %v4469_v17 = vmul.f32 %v4451_v16, %v4451_v16  ;;  %v14852_v16 = vld [vmem:[#allocation72_spill] sm:$0xff] }
 0x527   :  { %7061 = vmatprep.subr.mxu0 %v5306_v19  ;;  %v4472_v8 = vmul.f32 %v4454_v50, %v4454_v50  ;;  %v14856_v50 = vld [vmem:[#allocation47_spill] sm:$0xff] }
 0x528   :  { %v4477_v42 = vadd.f32 %v4476_v53, %v4460_v9  ;;  %7062 = vmatpush3.msra.mxu0 %v5290_v12  ;;  %v4455_v53 = vsub.f32 %v12400_v6, %v12497_v5  ;;  %v4471_v0 = vmul.f32 %v4453_v24, %v4453_v24  ;;  %v14855_v24 = vld [vmem:[#allocation58_spill] sm:$0xff] }
 0x529   :  { %7063 = vmatprep.subr.mxu0 %v5305_v54  ;;  %v4497_v54 = vmul.f32 63.0, %v12497_v5 }
 0x52a   :  { %v4478_v62 = vadd.f32 %v4477_v42, %v4461_v7  ;;  %7064 = vmatpush3.msra.mxu0 %v5289_v51  ;;  %v4473_v42 = vmul.f32 %v4455_v53, %v4455_v53 }
 0x52b   :  { %7065 = vmatprep.subr.mxu0 %v5304_v38 }
 0x52c   :  { %v4479_v43 = vadd.f32 %v4478_v62, %v4462_v45  ;;  %7066 = vmatpush3.msra.mxu0 %v5288_v32  ;;  %v14847_v32 = vld [vmem:[#allocation53_spill] sm:$0xff] }
 0x52d   :  { %7067 = vmatprep.subr.mxu0 %v5303_v2  ;;  %v4644_v2 = vand.u32 15, %v14847_v32 }
 0x52e   :  { %v4480_v44 = vadd.f32 %v4479_v43, %v4463_v59  ;;  %7068 = vmatpush3.msra.mxu0 %v5287_v31  ;;  %v4498_v43 = vmul.f32 %v4497_v54, %v12497_v5  ;;  %v14863_v54 = vld [vmem:[#allocation73_spill] sm:$0xff] }
 0x52f   :  { %7069 = vmatprep.subr.mxu0 %v5302_v60  ;;  %v14850_v60 = vld [vmem:[#allocation56_spill] sm:$0xff]  ;;  %vm12740_vm4 = vcmp.le.s32.totalorder %v4644_v2, 9 }
 0x530   :  { %v4481_v18 = vadd.f32 %v4480_v44, %v4464_v36  ;;  %7070 = vmatpush3.msra.mxu0 %v5286_v61  ;;  %v4411_v44 = vld [vmem:[%s13801_s5 + $0x1] sm:$0x1]  ;;  %v4665_v37 = vand.u32 15, %v14850_v60 }
 0x531   :  { %7396 = vmatprep.subr.mxu0 %v12485_v25 }
 0x532   :  { %v4482_v33 = vadd.f32 %v4481_v18, %v4465_v48  ;;  %v4651_v48 = vand.u32 15, %v14848_v46  ;;  %v14849_v18 = vld [vmem:[#allocation55_spill] sm:$0xff]  ;;  %vm12756_vm9 = vcmp.ge.s32.totalorder %v4665_v37, 1 }
 0x533   :  { %v4658_v31 = vand.u32 15, %v14849_v18 }
 0x534   :  { %v4483_v35 = vadd.f32 %v4482_v33, %v4466_v3  ;;  %v14851_v33 = vld [vmem:[#allocation57_spill] sm:$0xff]  ;;  %vm12708_vm0 = vcmp.ge.s32.totalorder %v4651_v48, 1 }
 0x535   :  { %v4672_v61 = vand.u32 15, %v14851_v33  ;;  %vm12712_vm3 = vcmp.le.s32.totalorder %v4658_v31, 9 }
 0x536   :  { %v4484_v1 = vadd.f32 %v4483_v35, %v4467_v15  ;;  %v4721_v15 = vand.u32 15, %v14852_v16  ;;  %v14853_v35 = vld [vmem:[#allocation50_spill] sm:$0xff] }
 0x537   :  { %v4623_v13 = vand.u32 15, %v14853_v35 }
 0x538   :  { %v4485_v40 = vadd.f32 %v4484_v1, %v4468_v63  ;;  %v14854_v63 = vld [vmem:[#allocation51_spill] sm:$0xff]  ;;  %vm12664_vm2 = vcmp.ge.s32.totalorder %v4721_v15, 1 }
 0x539   :  { %v4630_v1 = vand.u32 15, %v14854_v63  ;;  %vm12668_vm13 = vcmp.ge.s32.totalorder %v4623_v13, 1 }
 0x53a   :  { %v4486_v9 = vadd.f32 %v4485_v40, %v4469_v17  ;;  %v4679_v17 = vand.u32 15, %v14855_v24 }
 0x53b   :  { %vm12672_vm5 = vcmp.le.s32.totalorder %v4630_v1, 9 }
 0x53c   :  { %v4487_v58 = vadd.f32 %v4486_v9, %v4470_v4  ;;  %v4609_v4 = vand.u32 15, %v14856_v50  ;;  %v14857_v9 = vld [vmem:[#allocation49_spill] sm:$0xff]  ;;  %vm12744_vm7 = vcmp.ge.s32.totalorder %v4679_v17, 1 }
 0x53d   :  { %v4616_v53 = vand.u32 15, %v14857_v9 }
 0x53e   :  { %v4488_v7 = vadd.f32 %v4487_v58, %v4471_v0  ;;  %v14858_v0 = vld [vmem:[#allocation59_spill] sm:$0xff]  ;;  %vm12683_vm10 = vcmp.ge.s32.totalorder %v4609_v4, 1 }
 0x53f   :  { %v4686_v58 = vand.u32 15, %v14858_v0  ;;  %vm12687_vm6 = vcmp.le.s32.totalorder %v4616_v53, 9 }
 0x540   :  { %v4489_v56 = vadd.f32 %v4488_v7, %v4472_v8  ;;  %v14859_v8 = vld [vmem:[#allocation60_spill] sm:$0xff] }
 0x541   :  { %v4693_v7 = vand.u32 15, %v14859_v8 }
 0x542   :  { %v4490_v19 = vadd.f32 %v4489_v56, %v4473_v42  ;;  %v14860_v42 = vld [vmem:[#allocation67_spill] sm:$0xff] }
 0x543   :  { %v4700_v56 = vand.u32 15, %v14860_v42 }
 0x544   :  { %v4491_v29 = vrot.slane %v4490_v19, 4 }
 0x546   :  { %v4492_v45 = vadd.f32 %v4491_v29, %v4490_v19  ;;  %v14861_v19 = vld [vmem:[#allocation70_spill] sm:$0xff] }
 0x547   :  { %v4707_v29 = vand.u32 15, %v14861_v19 }
 0x548   :  { %v4493_v62 = vrot.slane %v4492_v45, 2 }
 0x54a   :  { %v4494_v12 = vadd.f32 %v4493_v62, %v4492_v45  ;;  %v4412_v45 = vld [vmem:[%s13802_s6 + $0x1] sm:$0x1]  ;;  %v14862_v62 = vld [vmem:[#allocation71_spill] sm:$0xff] }
 0x54c   :  { %v4495_v14 = vrot.slane %v4494_v12, 1 }
 0x54e   :  { %v4496_v59 = vadd.f32 %v4495_v14, %v4494_v12  ;;  %v4714_v12 = vand.u32 15, %v14862_v62  ;;  %v4728_v14 = vand.u32 15, %v14863_v54  ;;  %v5347_v62 = vld [vmem:[%s13799_s3 + $0x3e8] sm:$0xff] }
 0x550   :  { %v4499_v51 = vsub.f32 %v4496_v59, %v4498_v43  ;;  %v14864_v43 = vld [vmem:[#allocation101_spill] sm:$0xff] }
 0x552   :  { %v4500_v38 = vmul.f32 0.012345679, %v4499_v51 }
 0x554   :  { %v4501_v21 = vmax.f32 %v4500_v38, 0.0 }
 0x556   :  { %v4502_v36 = vadd.f32 1e-05, %v4501_v21 }
 0x558   :  { %7591 = vrsqrt.f32 %v4502_v36 }
 0x565   :  { %v7592_v3 = vpop.eup %7591 }
 0x566   :  { %v4504_v40 = vmul.f32 %v7592_v3, %v4411_v44  ;;  %v14871_v44 = vld [vmem:[#allocation52_spill] sm:$0xff] }
 0x567   :  { %v4637_v32 = vand.u32 15, %v14871_v44 }
 0x568   :  { %v4505_v59 = vmul.f32 %v4504_v40, %v12497_v5  ;;  %v12662_v51 = vrot.slane %v4504_v40, %v14864_v43 }
 0x569   :  { %vm12736_vm14 = vcmp.ge.s32.totalorder %v4637_v32, 1 }
 0x56a   :  { %v4506_v46 = vsub.f32 %v4412_v45, %v4505_v59  ;;  %v4527_v5 = vmul.f32 %v12662_v51, %v12385_v20  ;;  %v4513_v18 = vmul.f32 %v12662_v51, %v12212_v27  ;;  %v4514_v3 = vmul.f32 %v12662_v51, %v12216_v26 }
 0x56b   :  { %v4511_v13 = vmul.f32 %v12662_v51, %v12202_v39  ;;  %v4512_v20 = vmul.f32 %v12662_v51, %v12204_v34  ;;  %v4517_v27 = vmul.f32 %v12662_v51, %v12235_v47  ;;  %v4518_v26 = vmul.f32 %v12662_v51, %v12240_v49 }
 0x56c   :  { %v12700_v1 = vrot.slane %v4506_v46, %v14864_v43  ;;  %v4515_v24 = vmul.f32 %v12662_v51, %v12223_v11  ;;  %v4516_v40 = vmul.f32 %v12662_v51, %v12228_v10  ;;  %v4521_v39 = vmul.f32 %v12662_v51, %v12282_v23 }
 0x56d   :  { %v4522_v49 = vmul.f32 %v12662_v51, %v12294_v57  ;;  %v4519_v11 = vmul.f32 %v12662_v51, %v12256_v28  ;;  %v12722_v10 = vmul.f32 %v12662_v51, %v12268_v55  ;;  %v12726_v23 = vmul.f32 %v12662_v51, %v12353_v22 }
 0x56e   :  { %v4549_v48 = vadd.f32 %v12700_v1, %v4527_v5  ;;  %v4535_v31 = vadd.f32 %v12700_v1, %v4513_v18  ;;  %v4536_v4 = vadd.f32 %v12700_v1, %v4514_v3  ;;  %v4533_v53 = vadd.f32 %v12700_v1, %v4511_v13 }
 0x56f   :  { %v4534_v57 = vadd.f32 %v12700_v1, %v4512_v20  ;;  %v4539_v28 = vadd.f32 %v12700_v1, %v4517_v27  ;;  %v4540_v0 = vadd.f32 %v12700_v1, %v4518_v26  ;;  %v4537_v55 = vadd.f32 %v12700_v1, %v4515_v24 }
 0x570   :  { %v14880_v45 = vmov 0  ;;  %v14882_v22 = vmov 0  ;;  %vm4567_vm8 = vcmp.ge.f32.partialorder %v4549_v48, 0.0  ;;  %v4585_v59 = vmul.f32 0.01, %v4549_v48 }
 0x571   :  { %v14881_v45 = vsel %vm12736_vm14, 4294967295, %v14880_v45  ;;  %v14883_v22 = vsel %vm12740_vm4, 4294967295, %v14882_v22  ;;  %vm4553_vm1 = vcmp.ge.f32.partialorder %v4535_v31, 0.0  ;;  %vm4554_vm15 = vcmp.ge.f32.partialorder %v4536_v4, 0.0 }
 0x572   :  { %v4571_v46 = vmul.f32 0.01, %v4535_v31  ;;  %v4572_v5 = vmul.f32 0.01, %v4536_v4  ;;  %vm4551_vm11 = vcmp.ge.f32.partialorder %v4533_v53, 0.0  ;;  %v4603_v32 = vsel %vm4567_vm8, %v4549_v48, %v4585_v59 }
 0x573   :  { %v4569_v3 = vmul.f32 0.01, %v4533_v53  ;;  %v4570_v13 = vmul.f32 0.01, %v4534_v57  ;;  %vm4557_vm12 = vcmp.ge.f32.partialorder %v4539_v28, 0.0  ;;  %vm12748_vm14 = vcmp.le.s32.totalorder %v4686_v58, 9 }
 0x574   :  { %v4891_v20 = vsel %vm12664_vm2, %v4603_v32, 0.0  ;;  %v4589_v27 = vsel %vm4553_vm1, %v4535_v31, %v4571_v46  ;;  %v4590_v26 = vsel %vm4554_vm15, %v4536_v4, %v4572_v5  ;;  %vm4558_vm4 = vcmp.ge.f32.partialorder %v4540_v0, 0.0 }
 0x575   :  { %4909 = vst [vmem:[#allocation4 + $0x80] sm:$0xff] %v4891_v20  ;;  %v4877_v24 = vsel %vm12668_vm13, %v4589_v27, 0.0  ;;  %v4878_v58 = vsel %vm12672_vm5, %v4590_v26, 0.0  ;;  %v4587_v48 = vsel %vm4551_vm11, %v4533_v53, %v4569_v3  ;;  %vm14890_vm8 = vcmp.ge.f32.partialorder %v4534_v57, 0.0 }
 0x576   :  { %v4588_v38 = vsel %vm14890_vm8, %v4534_v57, %v4570_v13  ;;  %4895 = vst [vmem:[#allocation4 + $0x10] sm:$0xff] %v4877_v24  ;;  %4896 = vst [vmem:[#allocation4 + $0x18] sm:$0xff] %v4878_v58  ;;  %v4875_v60 = vsel %vm12683_vm10, %v4587_v48, 0.0  ;;  %v4575_v31 = vmul.f32 0.01, %v4539_v28  ;;  %v4538_v21 = vadd.f32 %v12700_v1, %v4516_v40 }
 0x577   :  { %v4876_v37 = vsel %vm12687_vm6, %v4588_v38, 0.0  ;;  %v4576_v4 = vmul.f32 0.01, %v4540_v0  ;;  %4893 = vst [vmem:[#allocation4] sm:$0xff] %v4875_v60  ;;  %vm4555_vm2 = vcmp.ge.f32.partialorder %v4537_v55, 0.0  ;;  %v4543_v53 = vadd.f32 %v12700_v1, %v4521_v39 }
 0x578   :  { %4894 = vst [vmem:[#allocation4 + $0x8] sm:$0xff] %v4876_v37  ;;  %v4573_v36 = vmul.f32 0.01, %v4537_v55  ;;  %vm12774_vm13 = vcmp.le.s32.totalorder %v4672_v61, 9  ;;  %v4593_v16 = vsel %vm4557_vm12, %v4539_v28, %v4575_v31  ;;  %v4544_v59 = vadd.f32 %v12700_v1, %v4522_v49 }
 0x579   :  { %v4594_v15 = vsel %vm4558_vm4, %v4540_v0, %v4576_v4  ;;  %v4541_v46 = vadd.f32 %v12700_v1, %v4519_v11  ;;  %v4881_v40 = vsel %vm12708_vm0, %v4593_v16, 0.0  ;;  %vm4556_vm5 = vcmp.ge.f32.partialorder %v4538_v21, 0.0 }
 0x57a   :  { %v4882_v39 = vsel %vm12712_vm3, %v4594_v15, 0.0  ;;  %v4574_v33 = vmul.f32 0.01, %v4538_v21  ;;  %4899 = vst [vmem:[#allocation4 + $0x30] sm:$0xff] %v4881_v40  ;;  %v4591_v61 = vsel %vm4555_vm2, %v4537_v55, %v4573_v36  ;;  %vm4561_vm10 = vcmp.ge.f32.partialorder %v4543_v53, 0.0 }
 0x57b   :  { %4900 = vst [vmem:[#allocation4 + $0x38] sm:$0xff] %v4882_v39  ;;  %vm4562_vm6 = vcmp.ge.f32.partialorder %v4544_v59, 0.0  ;;  %v4579_v28 = vmul.f32 0.01, %v4543_v53  ;;  %vm12788_vm4 = vcmp.ge.s32.totalorder %v4707_v29, 1  ;;  %vm12794_vm0 = vcmp.le.s32.totalorder %v4714_v12, 9 }
 0x57c   :  { %v4592_v47 = vsel %vm4556_vm5, %v4538_v21, %v4574_v33  ;;  %vm14897_vm3 = vnez %v14881_v45  ;;  %v4580_v0 = vmul.f32 0.01, %v4544_v59  ;;  %v4542_v55 = vadd.f32 %v12700_v1, %v12722_v10  ;;  %v5333_v33 = vld [vmem:[%s13799_s3 + $0x378] sm:$0xff] }
 0x57d   :  { %v4879_v11 = vsel %vm14897_vm3, %v4591_v61, 0.0  ;;  %vm14898_vm1 = vnez %v14883_v22  ;;  %v4597_v29 = vsel %vm4561_vm10, %v4543_v53, %v4579_v28  ;;  %vm4559_vm15 = vcmp.ge.f32.partialorder %v4541_v46, 0.0  ;;  %v4996_v12 = vld [vmem:[#allocation4 + $0x11] ss:$2 sm:$0x1f] }
 0x57e   :  { %v4880_v19 = vsel %vm14898_vm1, %v4592_v47, 0.0  ;;  %4897 = vst [vmem:[#allocation4 + $0x20] sm:$0xff] %v4879_v11  ;;  %v4577_v5 = vmul.f32 0.01, %v4541_v46  ;;  %vm12806_vm11 = vcmp.ge.s32.totalorder %v4693_v7, 1  ;;  %v4598_v32 = vsel %vm4562_vm6, %v4544_v59, %v4580_v0  ;;  %v5348_v47 = vld [vmem:[%s13799_s3 + $0x3f0] sm:$0xff] }
 0x57f   :  { %v4991_v45 = vld [vmem:[#allocation4 + $0x10] ss:$2 sm:$0x1f]  ;;  %4898 = vst [vmem:[#allocation4 + $0x28] sm:$0xff] %v4880_v19  ;;  %v4526_v10 = vmul.f32 %v12662_v51, %v12369_v52  ;;  %v4547_v22 = vadd.f32 %v12700_v1, %v12726_v23  ;;  %v4523_v3 = vmul.f32 %v12662_v51, %v12311_v41  ;;  %vm12819_vm12 = vcmp.le.s32.totalorder %v4700_v56, 9 }
 0x580   :  { %v4998_v7 = vrot.slane %v4996_v12, 7  ;;  %v4956_v13 = vld [vmem:[#allocation4] ss:$2 sm:$0x1f]  ;;  %v4993_v20 = vrot.slane %v4991_v45, 7  ;;  %v4885_v27 = vsel %vm12744_vm7, %v4597_v29, 0.0  ;;  %v4595_v26 = vsel %vm4559_vm15, %v4541_v46, %v4577_v5 }
 0x581   :  { %v4958_v52 = vrot.slane %v4956_v13, 7  ;;  %v5001_v24 = vld [vmem:[#allocation4 + $0x12] ss:$2 sm:$0x1f]  ;;  %v4886_v23 = vsel %vm12748_vm14, %v4598_v32, 0.0  ;;  %4903 = vst [vmem:[#allocation4 + $0x50] sm:$0xff] %v4885_v27  ;;  %v4548_v41 = vadd.f32 %v12700_v1, %v4526_v10  ;;  %v4524_v2 = vmul.f32 %v12662_v51, %v12336_v30 }
 0x582   :  { %vm4560_vm8 = vcmp.ge.f32.partialorder %v4542_v55, 0.0  ;;  %5000 = vst [vmem:[#allocation2 + $0x310] sm:$0x3e] %v4998_v7  ;;  %4995 = vst [vmem:[#allocation2 + $0x488] sm:$0x3e] %v4993_v20  ;;  %v5003_v42 = vrot.slane %v5001_v24, 7  ;;  %v4545_v38 = vadd.f32 %v12700_v1, %v4523_v3  ;;  %v4528_v60 = vmul.f32 %v12662_v51, %v12400_v6 }
 0x583   :  { %4904 = vst [vmem:[#allocation4 + $0x58] sm:$0xff] %v4886_v23  ;;  %v4578_v56 = vmul.f32 0.01, %v4542_v55  ;;  %v4883_v58 = vsel %vm12756_vm9, %v4595_v26, 0.0  ;;  %vm4565_vm2 = vcmp.ge.f32.partialorder %v4547_v22, 0.0  ;;  %vm4566_vm14 = vcmp.ge.f32.partialorder %v4548_v41, 0.0 }
 0x584   :  { %4960 = vst [vmem:[#allocation2 + $0x18] sm:$0x3e] %v4958_v52  ;;  %v5047_v18 = vld [vmem:[#allocation4 + $0x31] ss:$2 sm:$0x1f]  ;;  %4901 = vst [vmem:[#allocation4 + $0x40] sm:$0xff] %v4883_v58  ;;  %v4546_v15 = vadd.f32 %v12700_v1, %v4524_v2  ;;  %v4550_v51 = vadd.f32 %v12700_v1, %v4528_v60 }
 0x585   :  { %v5042_v48 = vld [vmem:[#allocation4 + $0x30] ss:$2 sm:$0x1f]  ;;  %v5049_v37 = vrot.slane %v5047_v18, 7  ;;  %5005 = vst [vmem:[#allocation2 + $0x4f0] sm:$0x3e] %v5003_v42  ;;  %v4596_v4 = vsel %vm4560_vm8, %v4542_v55, %v4578_v56 }
 0x586   :  { %v5044_v31 = vrot.slane %v5042_v48, 7  ;;  %v5052_v17 = vld [vmem:[#allocation4 + $0x32] ss:$2 sm:$0x1f]  ;;  %v4884_v21 = vsel %vm12774_vm13, %v4596_v4, 0.0  ;;  %vm4563_vm9 = vcmp.ge.f32.partialorder %v4545_v38, 0.0 }
 0x587   :  { %v5054_v36 = vrot.slane %v5052_v17, 7  ;;  %v4583_v53 = vmul.f32 0.01, %v4547_v22  ;;  %v4584_v16 = vmul.f32 0.01, %v4548_v41  ;;  %4902 = vst [vmem:[#allocation4 + $0x48] sm:$0xff] %v4884_v21 }
 0x588   :  { %5051 = vst [vmem:[#allocation2 + $0x220] sm:$0x3e] %v5049_v37  ;;  %v5007_v30 = vld [vmem:[#allocation4 + $0x20] ss:$2 sm:$0x1f]  ;;  %vm12842_vm7 = vcmp.le.s32.totalorder %v4728_v14, 9 }
 0x589   :  { %5046 = vst [vmem:[#allocation2 + $0x160] sm:$0x3e] %v5044_v31  ;;  %v4581_v6 = vmul.f32 0.01, %v4545_v38  ;;  %v5009_v57 = vrot.slane %v5007_v30, 7  ;;  %v4601_v46 = vsel %vm4565_vm2, %v4547_v22, %v4583_v53  ;;  %v4602_v40 = vsel %vm4566_vm14, %v4548_v41, %v4584_v16  ;;  %v5187_v61 = vld [vmem:[#allocation2 + $0x310] sm:$0xff] }
 0x58a   :  { %5056 = vst [vmem:[#allocation2 + $0xa0] sm:$0x3e] %v5054_v36  ;;  %v4968_v39 = vld [vmem:[#allocation4 + $0x2] ss:$2 sm:$0x1f]  ;;  %v4889_v1 = vsel %vm12788_vm4, %v4601_v46, 0.0  ;;  %5435 = vmatprep.mubr.f32.mxu0 %v5187_v61 }
 0x58b   :  { %v4890_v54 = vsel %vm12794_vm0, %v4602_v40, 0.0  ;;  %vm4564_vm13 = vcmp.ge.f32.partialorder %v4546_v15, 0.0  ;;  %v4582_v14 = vmul.f32 0.01, %v4546_v15  ;;  %v5186_v28 = vld [vmem:[#allocation2 + $0x488] sm:$0xff]  ;;  %4907 = vst [vmem:[#allocation4 + $0x70] sm:$0xff] %v4889_v1  ;;  %v4599_v0 = vsel %vm4563_vm9, %v4545_v38, %v4581_v6 }
 0x58c   :  { %5011 = vst [vmem:[#allocation2 + $0x308] sm:$0x3e] %v5009_v57  ;;  %v5098_v11 = vld [vmem:[#allocation4 + $0x51] ss:$2 sm:$0x1f]  ;;  %4908 = vst [vmem:[#allocation4 + $0x78] sm:$0xff] %v4890_v54  ;;  %5436 = vmatmul.mubr.f32.gmra.mxu0 %v5186_v28 }
 0x58d   :  { %vm4568_vm5 = vcmp.ge.f32.partialorder %v4550_v51, 0.0  ;;  %5988 = vst [vmem:[#allocation2 + $0x310] sm:$0xff] %v12485_v25  ;;  %v5180_v49 = vld [vmem:[#allocation2 + $0x18] sm:$0xff]  ;;  %5987 = vst [vmem:[#allocation2 + $0x488] sm:$0xff] %v12485_v25  ;;  %v5100_v34 = vrot.slane %v5098_v11, 7  ;;  %v4600_v19 = vsel %vm4564_vm13, %v4546_v15, %v4582_v14  ;;  %v4887_v29 = vsel %vm12806_vm11, %v4599_v0, 0.0 }
 0x58e   :  { %v5093_v55 = vld [vmem:[#allocation4 + $0x50] ss:$2 sm:$0x1f]  ;;  %5520 = vmatprep.mubr.f32.mxu1 %v5180_v49  ;;  %5981 = vst [vmem:[#allocation2 + $0x18] sm:$0xff] %v12485_v25  ;;  %v5188_v5 = vld [vmem:[#allocation2 + $0x4f0] sm:$0xff]  ;;  %v4888_v45 = vsel %vm12819_vm12, %v4600_v19, 0.0 }
 0x58f   :  { %v5095_v12 = vrot.slane %v5093_v55, 7  ;;  %4905 = vst [vmem:[#allocation4 + $0x60] sm:$0xff] %v4887_v29  ;;  %v5103_v32 = vld [vmem:[#allocation4 + $0x52] ss:$2 sm:$0x1f]  ;;  %5521 = vmatmul.mubr.f32.vlgmr.msra.gmra.mxu1 %v12485_v25  ;;  %v5332_v10 = vld [vmem:[%s13799_s3 + $0x370] sm:$0xff] }
 0x590   :  { %5989 = vst [vmem:[#allocation2 + $0x4f0] sm:$0xff] %v12485_v25  ;;  %5102 = vst [vmem:[#allocation2 + $0x270] sm:$0x3e] %v5100_v34  ;;  %v5105_v22 = vrot.slane %v5103_v32, 7  ;;  %v4586_v3 = vmul.f32 0.01, %v4550_v51  ;;  %7087 = vmatpush3.msra.mxu1 %v5333_v33 }
 0x591   :  { %4906 = vst [vmem:[#allocation4 + $0x68] sm:$0xff] %v4888_v45  ;;  %v4970_v8 = vrot.slane %v4968_v39, 7  ;;  %v5196_v7 = vld [vmem:[#allocation2 + $0x220] sm:$0xff]  ;;  %v5058_v20 = vld [vmem:[#allocation4 + $0x40] ss:$2 sm:$0x1f]  ;;  %7088 = vmatprep.subr.mxu1 %v5348_v47 }
 0x592   :  { %v5195_v13 = vld [vmem:[#allocation2 + $0x160] sm:$0xff]  ;;  %5097 = vst [vmem:[#allocation2 + $0xb8] sm:$0x3e] %v5095_v12  ;;  %5440 = vmatprep.mubr.f32.mxu0 %v5196_v7  ;;  %5997 = vst [vmem:[#allocation2 + $0x220] sm:$0xff] %v12485_v25  ;;  %v5331_v27 = vld [vmem:[%s13799_s3 + $0x368] sm:$0xff]  ;;  %v5060_v26 = vrot.slane %v5058_v20, 7  ;;  %v4604_v24 = vsel %vm4568_vm5, %v4550_v51, %v4586_v3  ;;  %7089 = vmatpush3.msra.mxu1 %v5332_v10 }
 0x593   :  { %5996 = vst [vmem:[#allocation2 + $0x160] sm:$0xff] %v12485_v25  ;;  %v12880_v52 = vld [vmem:[#allocation2 + $0xa0] sm:$0xff]  ;;  %5107 = vst [vmem:[#allocation2 + $0x480] sm:$0x3e] %v5105_v22  ;;  %5441 = vmatmul.mubr.f32.gmra.mxu0 %v5195_v13  ;;  %v4892_v42 = vsel %vm12842_vm7, %v4604_v24, 0.0  ;;  %v5189_v18 = vld [vmem:[#allocation2 + $0x308] sm:$0xff]  ;;  %7090 = vmatprep.subr.mxu1 %v5347_v62 }
 0x594   :  { %4972 = vst [vmem:[#allocation2 + $0x328] sm:$0x3e] %v4970_v8  ;;  %v4962_v23 = vld [vmem:[#allocation4 + $0x1] ss:$2 sm:$0x1f]  ;;  %v5346_v41 = vld [vmem:[%s13799_s3 + $0x3e0] sm:$0xff]  ;;  %5525 = vmatprep.mubr.f32.mxu1 %v5189_v18  ;;  %7091 = vmatpush3.msra.mxu1 %v5331_v27 }
 0x595   :  { %5998 = vst [vmem:[#allocation2 + $0xa0] sm:$0xff] %v12485_v25  ;;  %v4964_v56 = vrot.slane %v4962_v23, 7  ;;  %v5019_v58 = vld [vmem:[#allocation4 + $0x22] ss:$2 sm:$0x1f]  ;;  %v5330_v48 = vld [vmem:[%s13799_s3 + $0x360] sm:$0xff]  ;;  %5526 = vmatmul.mubr.f32.gmra.mxu1 %v5188_v5  ;;  %7092 = vmatprep.subr.mxu1 %v5346_v41 }
 0x596   :  { %5062 = vst [vmem:[#allocation2 + $0x360] sm:$0x3e] %v5060_v26  ;;  %v5149_v2 = vld [vmem:[#allocation4 + $0x71] ss:$2 sm:$0x1f]  ;;  %4910 = vst [vmem:[#allocation4 + $0x88] sm:$0xff] %v4892_v42  ;;  %7093 = vmatpush3.msra.mxu1 %v5330_v48 }
 0x597   :  { %v5021_v38 = vrot.slane %v5019_v58, 7  ;;  %5990 = vst [vmem:[#allocation2 + $0x308] sm:$0xff] %v12485_v25  ;;  %v5345_v60 = vld [vmem:[%s13799_s3 + $0x3d8] sm:$0xff]  ;;  %v5151_v37 = vrot.slane %v5149_v2, 7  ;;  %4966 = vst [vmem:[#allocation2 + $0x450] sm:$0x3e] %v4964_v56 }
 0x598   :  { %v5144_v31 = vld [vmem:[#allocation4 + $0x70] ss:$2 sm:$0x1f]  ;;  %v5205_v36 = vld [vmem:[#allocation2 + $0x270] sm:$0xff]  ;;  %7094 = vmatprep.subr.mxu1 %v5345_v60  ;;  %v5343_v57 = vld [vmem:[%s13799_s3 + $0x3c8] sm:$0xff]  ;;  %vm14039_vm10 = vmmov 0  }
 0x599   :  { %v5329_v4 = vld [vmem:[%s13799_s3 + $0x358] sm:$0xff]  ;;  %v5146_v17 = vrot.slane %v5144_v31, 7  ;;  %5023 = vst [vmem:[#allocation2 + $0x398] sm:$0x3e] %v5021_v38  ;;  %5153 = vst [vmem:[#allocation2 + $0xd0] sm:$0x3e] %v5151_v37  ;;  %5445 = vmatprep.mubr.f32.mxu0 %v5205_v36 }
 0x59a   :  { %v5154_v21 = vld [vmem:[#allocation4 + $0x72] ss:$2 sm:$0x1f]  ;;  %v5109_v53 = vld [vmem:[#allocation4 + $0x60] ss:$2 sm:$0x1f]  ;;  %7095 = vmatpush3.msra.mxu1 %v5329_v4 }
 0x59b   :  { %v5344_v16 = vld [vmem:[%s13799_s3 + $0x3d0] sm:$0xff]  ;;  %v5156_v30 = vrot.slane %v5154_v21, 7  ;;  %v5204_v15 = vld [vmem:[#allocation2 + $0xb8] sm:$0xff]  ;;  %v5111_v6 = vrot.slane %v5109_v53, 7  ;;  %5148 = vst [vmem:[#allocation2 + $0x258] sm:$0x3e] %v5146_v17 }
 0x59c   :  { %v5328_v51 = vld [vmem:[%s13799_s3 + $0x350] sm:$0xff]  ;;  %v4980_v59 = vld [vmem:[#allocation4 + $0x11] ss:$2 sm:$0x1f]  ;;  %5446 = vmatmul.mubr.f32.gmra.mxu0 %v5204_v15  ;;  %v5182_v46 = vld [vmem:[#allocation2 + $0x328] sm:$0xff]  ;;  %7096 = vmatprep.subr.mxu1 %v5344_v16 }
 0x59d   :  { %5158 = vst [vmem:[#allocation2 + $0x88] sm:$0x3e] %v5156_v30  ;;  %v4982_v40 = vrot.slane %v4980_v59, 7  ;;  %v5013_v39 = vld [vmem:[#allocation4 + $0x21] ss:$2 sm:$0x1f]  ;;  %7097 = vmatpush3.msra.mxu1 %v5328_v51 }
 0x59e   :  { %5113 = vst [vmem:[#allocation2 + $0x1a8] sm:$0x3e] %v5111_v6  ;;  %5983 = vst [vmem:[#allocation2 + $0x328] sm:$0xff] %v12485_v25  ;;  %v5015_v33 = vrot.slane %v5013_v39, 7  ;;  %v5198_v54 = vld [vmem:[#allocation2 + $0x360] sm:$0xff]  ;;  %v5327_v14 = vld [vmem:[%s13799_s3 + $0x348] sm:$0xff]  ;;  %7098 = vmatprep.subr.mxu1 %v5343_v57 }
 0x59f   :  { %v5070_v1 = vld [vmem:[#allocation4 + $0x42] ss:$2 sm:$0x1f]  ;;  %4984 = vst [vmem:[#allocation2 + $0x378] sm:$0x3e] %v4982_v40  ;;  %5530 = vmatprep.mubr.f32.mxu1 %v5198_v54  ;;  %5999 = vst [vmem:[#allocation2 + $0x360] sm:$0xff] %v12485_v25  ;;  %7099 = vmatpush3.msra.mxu1 %v5327_v14 }
 0x5a0   :  { %v5160_v61 = vld [vmem:[#allocation4 + $0x80] ss:$2 sm:$0x1f]  ;;  %v5072_v28 = vrot.slane %v5070_v1, 7  ;;  %v5342_v11 = vld [vmem:[%s13799_s3 + $0x3c0] sm:$0xff]  ;;  %5531 = vmatmul.mubr.f32.gmra.mxu1 %v12880_v52  ;;  %v5191_v55 = vld [vmem:[#allocation2 + $0x398] sm:$0xff] }
 0x5a1   :  { %v5162_v47 = vrot.slane %v5160_v61, 7  ;;  %v5181_v0 = vld [vmem:[#allocation2 + $0x450] sm:$0xff]  ;;  %5017 = vst [vmem:[#allocation2 + $0x2a8] sm:$0x3e] %v5015_v33  ;;  %v5326_v34 = vld [vmem:[%s13799_s3 + $0x340] sm:$0xff]  ;;  %v5341_v12 = vld [vmem:[%s13799_s3 + $0x3b8] sm:$0xff]  ;;  %7100 = vmatprep.subr.mxu1 %v5342_v11 }
 0x5a2   :  { %v5064_v49 = vld [vmem:[#allocation4 + $0x41] ss:$2 sm:$0x1f]  ;;  %5982 = vst [vmem:[#allocation2 + $0x450] sm:$0xff] %v12485_v25  ;;  %5074 = vst [vmem:[#allocation2 + $0x380] sm:$0x3e] %v5072_v28  ;;  %7101 = vmatpush3.msra.mxu1 %v5326_v34 }
 0x5a3   :  { %v5066_v19 = vrot.slane %v5064_v49, 7  ;;  %v5121_v29 = vld [vmem:[#allocation4 + $0x62] ss:$2 sm:$0x1f]  ;;  %5164 = vst [vmem:[#allocation2 + $0x460] sm:$0x3e] %v5162_v47  ;;  %7102 = vmatprep.subr.mxu1 %v5341_v12 }
 0x5a4   :  { %v5214_v5 = vld [vmem:[#allocation2 + $0xd0] sm:$0xff]  ;;  %5992 = vst [vmem:[#allocation2 + $0x398] sm:$0xff] %v12485_v25  ;;  %v5123_v45 = vrot.slane %v5121_v29, 7  ;;  %v5213_v10 = vld [vmem:[#allocation2 + $0x258] sm:$0xff]  ;;  %v5206_v23 = vld [vmem:[#allocation2 + $0x480] sm:$0xff] }
 0x5a5   :  { %v5115_v32 = vld [vmem:[#allocation4 + $0x61] ss:$2 sm:$0x1f]  ;;  %5450 = vmatprep.mubr.f32.mxu0 %v5214_v5  ;;  %v5325_v62 = vld [vmem:[%s13799_s3 + $0x338] sm:$0xff]  ;;  %5068 = vst [vmem:[#allocation2 + $0x4f8] sm:$0x3e] %v5066_v19 }
 0x5a6   :  { %v5117_v22 = vrot.slane %v5115_v32, 7  ;;  %v5172_v3 = vld [vmem:[#allocation4 + $0x82] ss:$2 sm:$0x1f]  ;;  %5451 = vmatmul.mubr.f32.gmra.mxu0 %v5213_v10  ;;  %v5365_v8 = vld [vmem:[%s13799_s3 + $0x478] sm:$0xff]  ;;  %7103 = vmatpush3.msra.mxu1 %v5325_v62  ;;  %v5338_v57 = vld [vmem:[%s13799_s3 + $0x3a0] sm:$0xff] }
 0x5a7   :  { %v5340_v7 = vld [vmem:[%s13799_s3 + $0x3b0] sm:$0xff]  ;;  %5125 = vst [vmem:[#allocation2 + $0x38] sm:$0x3e] %v5123_v45  ;;  %v5174_v13 = vrot.slane %v5172_v3, 7  ;;  %v5207_v27 = vld [vmem:[#allocation2 + $0x1a8] sm:$0xff]  ;;  %5610 = vmatprep.mubr.f32.mxu0 %v5182_v46  ;;  %v5184_v41 = vld [vmem:[#allocation2 + $0x378] sm:$0xff] }
 0x5a8   :  { %v4974_v20 = vld [vmem:[#allocation4 + $0x10] ss:$2 sm:$0x1f]  ;;  %v5324_v26 = vld [vmem:[%s13799_s3 + $0x330] sm:$0xff]  ;;  %5119 = vst [vmem:[#allocation2 + $0x2a0] sm:$0x3e] %v5117_v22  ;;  %5535 = vmatprep.mubr.f32.mxu1 %v5207_v27  ;;  %7104 = vmatprep.subr.mxu1 %v5340_v7 }
 0x5a9   :  { %v4976_v52 = vrot.slane %v4974_v20, 7  ;;  %v5166_v24 = vld [vmem:[#allocation4 + $0x81] ss:$2 sm:$0x1f]  ;;  %5176 = vst [vmem:[#allocation2 + $0xe8] sm:$0x3e] %v5174_v13  ;;  %5536 = vmatmul.mubr.f32.gmra.mxu1 %v5206_v23 }
 0x5aa   :  { %v5168_v42 = vrot.slane %v5166_v24, 7  ;;  %v5031_v56 = vld [vmem:[#allocation4 + $0x31] ss:$2 sm:$0x1f]  ;;  %5985 = vst [vmem:[#allocation2 + $0x378] sm:$0xff] %v12485_v25  ;;  %v5190_v58 = vld [vmem:[#allocation2 + $0x2a8] sm:$0xff]  ;;  %5611 = vmatmul.mubr.f32.vlgmr.msra.gmra.mxu0 %v5181_v0  ;;  %7105 = vmatpush3.msra.mxu1 %v5324_v26 }
 0x5ab   :  { %4978 = vst [vmem:[#allocation2 + $0x440] sm:$0x3e] %v4976_v52  ;;  %v5033_v18 = vrot.slane %v5031_v56, 7  ;;  %v5025_v48 = vld [vmem:[#allocation4 + $0x30] ss:$2 sm:$0x1f]  ;;  %7397 = vmatpush3.msra.mxu0 %v5365_v8  ;;  %5615 = vmatprep.mubr.f32.mxu0 %v5191_v55 }
 0x5ac   :  { %v5364_v2 = vld [vmem:[%s13799_s3 + $0x470] sm:$0xff]  ;;  %5991 = vst [vmem:[#allocation2 + $0x2a8] sm:$0xff] %v12485_v25  ;;  %v5200_v38 = vld [vmem:[#allocation2 + $0x380] sm:$0xff]  ;;  %5170 = vst [vmem:[#allocation2 + $0x2d8] sm:$0x3e] %v5168_v42  ;;  %v5027_v60 = vrot.slane %v5025_v48, 7  ;;  %7398 = vmatprep.subr.mxu0 %v12485_v25 }
 0x5ad   :  { %v5082_v37 = vld [vmem:[#allocation4 + $0x51] ss:$2 sm:$0x1f]  ;;  %v5339_v4 = vld [vmem:[%s13799_s3 + $0x3a8] sm:$0xff]  ;;  %6001 = vst [vmem:[#allocation2 + $0x380] sm:$0xff] %v12485_v25  ;;  %7399 = vmatpush3.msra.mxu0 %v5364_v2  ;;  %v12953_v51 = vld [vmem:[#allocation2 + $0x10] sm:$0xff] }
 0x5ae   :  { %v5216_v31 = vld [vmem:[#allocation2 + $0x460] sm:$0xff]  ;;  %5035 = vst [vmem:[#allocation2 + $0xd8] sm:$0x3e] %v5033_v18  ;;  %v5084_v17 = vrot.slane %v5082_v37, 7  ;;  %v5215_v36 = vld [vmem:[#allocation2 + $0x88] sm:$0xff]  ;;  %v5199_v53 = vld [vmem:[#allocation2 + $0x4f8] sm:$0xff]  ;;  %7106 = vmatprep.subr.mxu1 %v5339_v4  ;;  %7400 = vmatprep.subr.mxu0 %v12953_v51 }
 0x5af   :  { %v5076_v21 = vld [vmem:[#allocation4 + $0x50] ss:$2 sm:$0x1f]  ;;  %5540 = vmatprep.mubr.f32.mxu1 %v5216_v31  ;;  %5029 = vst [vmem:[#allocation2 + $0x60] sm:$0x3e] %v5027_v60  ;;  %v5323_v15 = vld [vmem:[%s13799_s3 + $0x328] sm:$0xff]  ;;  %5616 = vmatmul.mubr.f32.gmra.mxu0 %v5190_v58 }
 0x5b0   :  { %v5078_v16 = vrot.slane %v5076_v21, 7  ;;  %v5133_v30 = vld [vmem:[#allocation4 + $0x71] ss:$2 sm:$0x1f]  ;;  %5541 = vmatmul.mubr.f32.gmra.mxu1 %v5215_v36  ;;  %v5363_v6 = vld [vmem:[%s13799_s3 + $0x468] sm:$0xff]  ;;  %6000 = vst [vmem:[#allocation2 + $0x4f8] sm:$0xff] %v12953_v51  ;;  %5620 = vmatprep.mubr.f32.mxu0 %v5200_v38 }
 0x5b1   :  { %5086 = vst [vmem:[#allocation2 + $0x4a0] sm:$0x3e] %v5084_v17  ;;  %v5135_v25 = vrot.slane %v5133_v30, 7  ;;  %v5127_v59 = vld [vmem:[#allocation4 + $0x70] ss:$2 sm:$0x1f]  ;;  %5700 = vmatprep.mubr.f32.mxu1 %v5184_v41  ;;  %7107 = vmatpush3.msra.mxu1 %v5323_v15 }
 0x5b2   :  { %5080 = vst [vmem:[#allocation2 + $0x458] sm:$0x3e] %v5078_v16  ;;  %v5129_v46 = vrot.slane %v5127_v59, 7  ;;  %v4986_v40 = vld [vmem:[#allocation4 + $0x12] ss:$2 sm:$0x1f]  ;;  %7401 = vmatpush3.msra.mxu0 %v5363_v6  ;;  %7108 = vmatprep.subr.mxu1 %v5338_v57 }
 0x5b3   :  { %v5322_v39 = vld [vmem:[%s13799_s3 + $0x320] sm:$0xff]  ;;  %5137 = vst [vmem:[#allocation2 + $0x428] sm:$0x3e] %v5135_v25  ;;  %v4988_v1 = vrot.slane %v4986_v40, 7  ;;  %v5337_v14 = vld [vmem:[%s13799_s3 + $0x398] sm:$0xff]  ;;  %7402 = vmatprep.subr.mxu0 %v12953_v51  ;;  %v5336_v29 = vld [vmem:[%s13799_s3 + $0x390] sm:$0xff]  ;;  %5621 = vmatmul.mubr.f32.gmra.mxu0 %v5199_v53 }
 0x5b4   :  { %v5362_v33 = vld [vmem:[%s13799_s3 + $0x460] sm:$0xff]  ;;  %5131 = vst [vmem:[#allocation2 + $0x2e0] sm:$0x3e] %v5129_v46  ;;  %7109 = vmatpush3.msra.mxu1 %v5322_v39  ;;  %v5321_v49 = vld [vmem:[%s13799_s3 + $0x318] sm:$0xff]  ;;  %v5320_v12 = vld [vmem:[%s13799_s3 + $0x310] sm:$0xff] }
 0x5b5   :  { %v5037_v54 = vld [vmem:[#allocation4 + $0x32] ss:$2 sm:$0x1f]  ;;  %4990 = vst [vmem:[#allocation2 + $0x108] sm:$0x3e] %v4988_v1  ;;  %7403 = vmatpush3.msra.mxu0 %v5362_v33  ;;  %7110 = vmatprep.subr.mxu1 %v5337_v14  ;;  %v5360_v45 = vld [vmem:[%s13799_s3 + $0x450] sm:$0xff] }
 0x5b6   :  { %v12969_v61 = vld [vmem:[#allocation2 + $0x440] sm:$0xff]  ;;  %v5039_v28 = vrot.slane %v5037_v54, 7  ;;  %v5361_v34 = vld [vmem:[%s13799_s3 + $0x458] sm:$0xff]  ;;  %7404 = vmatprep.subr.mxu0 %v12953_v51  ;;  %7111 = vmatpush3.msra.mxu1 %v5321_v49  ;;  %v5335_v62 = vld [vmem:[%s13799_s3 + $0x388] sm:$0xff] }
 0x5b7   :  { %v5088_v47 = vld [vmem:[#allocation4 + $0x52] ss:$2 sm:$0x1f]  ;;  %5984 = vst [vmem:[#allocation2 + $0x440] sm:$0xff] %v12953_v51  ;;  %7405 = vmatpush3.msra.mxu0 %v5361_v34  ;;  %7112 = vmatprep.subr.mxu1 %v5336_v29  ;;  %v5319_v3 = vld [vmem:[%s13799_s3 + $0x308] sm:$0xff]  ;;  %v5356_v56 = vld [vmem:[%s13799_s3 + $0x430] sm:$0xff] }
 0x5b8   :  { %v5090_v11 = vrot.slane %v5088_v47, 7  ;;  %v5139_v0 = vld [vmem:[#allocation4 + $0x72] ss:$2 sm:$0x1f]  ;;  %5041 = vst [vmem:[#allocation2 + $0x388] sm:$0x3e] %v5039_v28  ;;  %7406 = vmatprep.subr.mxu0 %v12953_v51  ;;  %7113 = vmatpush3.msra.mxu1 %v5320_v12 }
 0x5b9   :  { %v5193_v55 = vld [vmem:[#allocation2 + $0xd8] sm:$0xff]  ;;  %v5141_v19 = vrot.slane %v5139_v0, 7  ;;  %v5192_v5 = vld [vmem:[#allocation2 + $0x60] sm:$0xff]  ;;  %v5359_v8 = vld [vmem:[%s13799_s3 + $0x448] sm:$0xff]  ;;  %7407 = vmatpush3.msra.mxu0 %v5360_v45  ;;  %7114 = vmatprep.subr.mxu1 %v5335_v62 }
 0x5ba   :  { %5994 = vst [vmem:[#allocation2 + $0xd8] sm:$0xff] %v12953_v51  ;;  %5092 = vst [vmem:[#allocation2 + $0x390] sm:$0x3e] %v5090_v11  ;;  %v5202_v32 = vld [vmem:[#allocation2 + $0x4a0] sm:$0xff]  ;;  %v5209_v10 = vld [vmem:[#allocation2 + $0x38] sm:$0xff]  ;;  %7408 = vmatprep.subr.mxu0 %v12953_v51  ;;  %7115 = vmatpush3.msra.mxu1 %v5319_v3 }
 0x5bb   :  { %5993 = vst [vmem:[#allocation2 + $0x60] sm:$0xff] %v12953_v51  ;;  %5143 = vst [vmem:[#allocation2 + $0x3a0] sm:$0x3e] %v5141_v19  ;;  %v5201_v22 = vld [vmem:[#allocation2 + $0x458] sm:$0xff]  ;;  %5625 = vmatprep.mubr.f32.mxu0 %v5209_v10  ;;  %v5208_v7 = vld [vmem:[#allocation2 + $0x2a0] sm:$0xff]  ;;  %7409 = vmatpush3.msra.mxu0 %v5359_v8 }
 0x5bc   :  { %6003 = vst [vmem:[#allocation2 + $0x4a0] sm:$0xff] %v12953_v51  ;;  %6002 = vst [vmem:[#allocation2 + $0x458] sm:$0xff] %v12953_v51  ;;  %v5334_v13 = vld [vmem:[%s13799_s3 + $0x380] sm:$0xff]  ;;  %v5185_v20 = vld [vmem:[#allocation2 + $0x108] sm:$0xff]  ;;  %5626 = vmatmul.mubr.f32.gmra.mxu0 %v5208_v7  ;;  %7410 = vmatprep.subr.mxu0 %v12953_v51 }
 0x5bd   :  { %v5318_v27 = vld [vmem:[%s13799_s3 + $0x300] sm:$0xff]  ;;  %5986 = vst [vmem:[#allocation2 + $0x108] sm:$0xff] %v12953_v51  ;;  %v5218_v52 = vld [vmem:[#allocation2 + $0xe8] sm:$0xff]  ;;  %7116 = vmatprep.subr.mxu1 %v5334_v13  ;;  %v5357_v41 = vld [vmem:[%s13799_s3 + $0x438] sm:$0xff] }
 0x5be   :  { %v5358_v24 = vld [vmem:[%s13799_s3 + $0x440] sm:$0xff]  ;;  %5630 = vmatprep.mubr.f32.mxu0 %v5218_v52  ;;  %7117 = vmatpush3.msra.mxu1 %v5318_v27  ;;  %v5217_v42 = vld [vmem:[#allocation2 + $0x2d8] sm:$0xff]  ;;  %v5355_v58 = vld [vmem:[%s13799_s3 + $0x428] sm:$0xff] }
 0x5bf   :  { %v5194_v26 = vld [vmem:[#allocation2 + $0x388] sm:$0xff]  ;;  %7411 = vmatpush3.msra.mxu0 %v5358_v24  ;;  %5701 = vmatmul.mubr.f32.vlgmr.msra.gmra.mxu1 %v12969_v61  ;;  %v5354_v18 = vld [vmem:[%s13799_s3 + $0x420] sm:$0xff]  ;;  %v5353_v48 = vld [vmem:[%s13799_s3 + $0x418] sm:$0xff] }
 0x5c0   :  { %5995 = vst [vmem:[#allocation2 + $0x388] sm:$0xff] %v12953_v51  ;;  %7412 = vmatprep.subr.mxu0 %v12953_v51  ;;  %5631 = vmatmul.mubr.f32.gmra.mxu0 %v5217_v42  ;;  %v5211_v2 = vld [vmem:[#allocation2 + $0x428] sm:$0xff]  ;;  %v5352_v38 = vld [vmem:[%s13799_s3 + $0x410] sm:$0xff]  ;;  %v5210_v60 = vld [vmem:[#allocation2 + $0x2e0] sm:$0xff] }
 0x5c1   :  { %v5203_v23 = vld [vmem:[#allocation2 + $0x390] sm:$0xff]  ;;  %5705 = vmatprep.mubr.f32.mxu1 %v5193_v55  ;;  %7413 = vmatpush3.msra.mxu0 %v5357_v41  ;;  %v5351_v37 = vld [vmem:[%s13799_s3 + $0x408] sm:$0xff]  ;;  %v5350_v31 = vld [vmem:[%s13799_s3 + $0x400] sm:$0xff] }
 0x5c2   :  { %6004 = vst [vmem:[#allocation2 + $0x390] sm:$0xff] %v12953_v51  ;;  %7414 = vmatprep.subr.mxu0 %v12953_v51  ;;  %7428 = vmatprep.mubr.msk.f32.mxu0 %vm14039_vm10, %v12953_v51  ;;  %v5212_v4 = vld [vmem:[#allocation2 + $0x3a0] sm:$0xff]  ;;  %v6182_v28 = vld [vmem:[%s13800_s4 + $0xf8] sm:$0xff]  ;;  %v6181_v11 = vld [vmem:[%s13800_s4 + $0xf0] sm:$0xff] }
 0x5c3   :  { %7415 = vmatpush3.msra.mxu0 %v5356_v56  ;;  %5706 = vmatmul.mubr.f32.gmra.mxu1 %v5192_v5  ;;  %v6166_v47 = vld [vmem:[%s13800_s4 + $0x78] sm:$0xff]  ;;  %v6165_v49 = vld [vmem:[%s13800_s4 + $0x70] sm:$0xff]  ;;  %v6180_v34 = vld [vmem:[%s13800_s4 + $0xe8] sm:$0xff] }
 0x5c4   :  { %7416 = vmatprep.subr.mxu0 %v12953_v51  ;;  %5710 = vmatprep.mubr.f32.mxu1 %v5202_v32  ;;  %v6164_v55 = vld [vmem:[%s13800_s4 + $0x68] sm:$0xff]  ;;  %v6179_v29 = vld [vmem:[%s13800_s4 + $0xe0] sm:$0xff]  ;;  %v6178_v45 = vld [vmem:[%s13800_s4 + $0xd8] sm:$0xff] }
 0x5c5   :  { %7417 = vmatpush3.msra.mxu0 %v5355_v58  ;;  %7154 = vmatprep.subr.mxu1 %v6182_v28  ;;  %v6163_v12 = vld [vmem:[%s13800_s4 + $0x60] sm:$0xff]  ;;  %v6162_v32 = vld [vmem:[%s13800_s4 + $0x58] sm:$0xff]  ;;  %v6177_v62 = vld [vmem:[%s13800_s4 + $0xd0] sm:$0xff] }
 0x5c6   :  { %7418 = vmatprep.subr.mxu0 %v12953_v51  ;;  %7155 = vmatpush3.msra.mxu1 %v6166_v47  ;;  %v6161_v3 = vld [vmem:[%s13800_s4 + $0x50] sm:$0xff]  ;;  %v6176_v8 = vld [vmem:[%s13800_s4 + $0xc8] sm:$0xff]  ;;  %v6214_v7 = vld [vmem:[%s13800_s4 + $0x1f8] sm:$0xff] }
 0x5c7   :  { %7419 = vmatpush3.msra.mxu0 %v5354_v18  ;;  %5711 = vmatmul.mubr.f32.gmra.mxu1 %v5201_v22  ;;  %v6160_v13 = vld [vmem:[%s13800_s4 + $0x48] sm:$0xff]  ;;  %v6213_v27 = vld [vmem:[%s13800_s4 + $0x1f0] sm:$0xff]  ;;  %v6175_v52 = vld [vmem:[%s13800_s4 + $0xc0] sm:$0xff] }
 0x5c8   :  { %7420 = vmatprep.subr.mxu0 %v12953_v51  ;;  %5715 = vmatprep.mubr.f32.mxu1 %v5211_v2  ;;  %v6197_v24 = vld [vmem:[%s13800_s4 + $0x170] sm:$0xff]  ;;  %v6159_v41 = vld [vmem:[%s13800_s4 + $0x40] sm:$0xff]  ;;  %v6212_v42 = vld [vmem:[%s13800_s4 + $0x1e8] sm:$0xff] }
 0x5c9   :  { %7421 = vmatpush3.msra.mxu0 %v5353_v48  ;;  %7156 = vmatprep.subr.mxu1 %v6181_v11  ;;  %v6196_v56 = vld [vmem:[%s13800_s4 + $0x168] sm:$0xff]  ;;  %v6174_v18 = vld [vmem:[%s13800_s4 + $0xb8] sm:$0xff]  ;;  %v6211_v48 = vld [vmem:[%s13800_s4 + $0x1e0] sm:$0xff] }
 0x5ca   :  { %7422 = vmatprep.subr.mxu0 %v12953_v51  ;;  %7157 = vmatpush3.msra.mxu1 %v6165_v49  ;;  %v6158_v2 = vld [vmem:[%s13800_s4 + $0x38] sm:$0xff]  ;;  %v6157_v28 = vld [vmem:[%s13800_s4 + $0x30] sm:$0xff]  ;;  %v6172_v49 = vld [vmem:[%s13800_s4 + $0xa8] sm:$0xff] }
 0x5cb   :  { %7423 = vmatpush3.msra.mxu0 %v5352_v38  ;;  %5716 = vmatmul.mubr.f32.gmra.mxu1 %v5210_v60  ;;  %v6195_v38 = vld [vmem:[%s13800_s4 + $0x160] sm:$0xff]  ;;  %v6194_v47 = vld [vmem:[%s13800_s4 + $0x158] sm:$0xff] }
 0x5cc   :  { %7424 = vmatprep.subr.mxu0 %v12953_v51  ;;  %5720 = vmatprep.mubr.f32.mxu1 %v12953_v51 }
 0x5cd   :  { %7425 = vmatpush3.msra.mxu0 %v5351_v37  ;;  %7158 = vmatprep.subr.mxu1 %v6180_v34  ;;  %v6173_v37 = vld [vmem:[%s13800_s4 + $0xb0] sm:$0xff] }
 0x5ce   :  { %7426 = vmatprep.subr.mxu0 %v12953_v51  ;;  %7159 = vmatpush3.msra.mxu1 %v6164_v55  ;;  %v6209_v34 = vld [vmem:[%s13800_s4 + $0x1d0] sm:$0xff]  ;;  %v6156_v55 = vld [vmem:[%s13800_s4 + $0x28] sm:$0xff] }
 0x5cf   :  { %7427 = vmatpush3.msra.mxu0 %v5350_v31  ;;  %5721 = vmatmul.mubr.f32.gmra.mxu1 %v12953_v51  ;;  %v6210_v31 = vld [vmem:[%s13800_s4 + $0x1d8] sm:$0xff] }
 0x5d0   :  { %7429 = vmatmul.mubr.f32.vlgmr.msra.gmra.mxu0 %v5185_v20  ;;  %6359 = vmatprep.mubr.f32.mxu1 %v12953_v51  ;;  %v13064_v17 = vpop.f32.mrf.mxu0  ;;  %v6198_v20 = vld [vmem:[%s13800_s4 + $0x178] sm:$0xff] }
 0x5d1   :  { %7431 = vmatprep.mubr.msk.f32.mxu0 %vm14039_vm10, %v12953_v51  ;;  %7160 = vmatprep.subr.mxu1 %v6179_v29  ;;  %v6193_v29 = vld [vmem:[%s13800_s4 + $0x150] sm:$0xff] }
 0x5d2   :  { %v13066_v21 = vpop.f32.mrf.mxu0  ;;  %7161 = vmatpush3.msra.mxu1 %v6163_v12  ;;  %7195 = vmatprep.subr.mxu0 %v6214_v7 }
 0x5d3   :  { %7162 = vmatprep.subr.mxu1 %v6178_v45  ;;  %7196 = vmatpush3.msra.mxu0 %v6198_v20  ;;  %v6171_v45 = vld [vmem:[%s13800_s4 + $0xa0] sm:$0xff] }
 0x5d4   :  { %7432 = vmatmul.mubr.f32.gmra.mxu0 %v5194_v26  ;;  %7163 = vmatpush3.msra.mxu1 %v6162_v32  ;;  %v6208_v32 = vld [vmem:[%s13800_s4 + $0x1c8] sm:$0xff]  ;;  %v6207_v20 = vld [vmem:[%s13800_s4 + $0x1c0] sm:$0xff] }
 0x5d5   :  { %7434 = vmatprep.mubr.msk.f32.mxu0 %vm14039_vm10, %v12953_v51  ;;  %7164 = vmatprep.subr.mxu1 %v6177_v62 }
 0x5d6   :  { %7165 = vmatpush3.msra.mxu1 %v6161_v3  ;;  %7197 = vmatprep.subr.mxu0 %v6213_v27  ;;  %v6155_v3 = vld [vmem:[%s13800_s4 + $0x20] sm:$0xff]  ;;  %v6154_v27 = vld [vmem:[%s13800_s4 + $0x18] sm:$0xff] }
 0x5d7   :  { %7166 = vmatprep.subr.mxu1 %v6176_v8  ;;  %7198 = vmatpush3.msra.mxu0 %v6197_v24  ;;  %v6192_v8 = vld [vmem:[%s13800_s4 + $0x148] sm:$0xff] }
 0x5d8   :  { %7435 = vmatmul.mubr.f32.gmra.mxu0 %v5203_v23  ;;  %7167 = vmatpush3.msra.mxu1 %v6160_v13  ;;  %v6170_v13 = vld [vmem:[%s13800_s4 + $0x98] sm:$0xff] }
 0x5d9   :  { %7437 = vmatprep.mubr.msk.f32.mxu0 %vm14039_vm10, %v12953_v51  ;;  %7168 = vmatprep.subr.mxu1 %v6175_v52  ;;  %v6191_v52 = vld [vmem:[%s13800_s4 + $0x140] sm:$0xff] }
 0x5da   :  { %7199 = vmatprep.subr.mxu0 %v6212_v42  ;;  %7169 = vmatpush3.msra.mxu1 %v6159_v41  ;;  %v6169_v41 = vld [vmem:[%s13800_s4 + $0x90] sm:$0xff]  ;;  %v6206_v42 = vld [vmem:[%s13800_s4 + $0x1b8] sm:$0xff] }
 0x5db   :  { %7200 = vmatpush3.msra.mxu0 %v6196_v56  ;;  %7170 = vmatprep.subr.mxu1 %v6174_v18  ;;  %v6153_v18 = vld [vmem:[%s13800_s4 + $0x10] sm:$0xff] }
 0x5dc   :  { %7438 = vmatmul.mubr.f32.gmra.mxu0 %v5212_v4  ;;  %7201 = vmatprep.subr.mxu0 %v6211_v48  ;;  %v6190_v48 = vld [vmem:[%s13800_s4 + $0x138] sm:$0xff] }
 0x5dd   :  { %7440 = vmatprep.mubr.msk.f32.mxu0 %vm14039_vm10, %v12953_v51  ;;  %7171 = vmatpush3.msra.mxu1 %v6158_v2  ;;  %v6168_v2 = vld [vmem:[%s13800_s4 + $0x88] sm:$0xff] }
 0x5de   :  { %7202 = vmatpush3.msra.mxu0 %v6195_v38  ;;  %7172 = vmatprep.subr.mxu1 %v6173_v37  ;;  %v6205_v38 = vld [vmem:[%s13800_s4 + $0x1b0] sm:$0xff] }
 0x5df   :  { %7203 = vmatprep.subr.mxu0 %v6210_v31  ;;  %7173 = vmatpush3.msra.mxu1 %v6157_v28  ;;  %v6152_v31 = vld [vmem:[%s13800_s4 + $0x8] sm:$0xff]  ;;  %v6189_v28 = vld [vmem:[%s13800_s4 + $0x130] sm:$0xff] }
 0x5e0   :  { %7441 = vmatmul.mubr.f32.gmra.mxu0 %v12953_v51  ;;  %7174 = vmatprep.subr.mxu1 %v6172_v49  ;;  %v6167_v49 = vld [vmem:[%s13800_s4 + $0x80] sm:$0xff] }
 0x5e1   :  { %7204 = vmatpush3.msra.mxu0 %v6194_v47  ;;  %7175 = vmatpush3.msra.mxu1 %v6156_v55 }
 0x5e2   :  { %7205 = vmatprep.subr.mxu0 %v6209_v34  ;;  %7176 = vmatprep.subr.mxu1 %v6171_v45  ;;  %v6204_v34 = vld [vmem:[%s13800_s4 + $0x1a8] sm:$0xff]  ;;  %v6979_v45 = vadd.f32 %v13066_v21, %v13064_v17  ;;  %v6230_v17 = vld [vmem:[%s13800_s4 + $0x278] sm:$0xff]  ;;  %v6203_v21 = vld [vmem:[%s13800_s4 + $0x1a0] sm:$0xff] }
 0x5e3   :  { %7206 = vmatpush3.msra.mxu0 %v6193_v29  ;;  %7177 = vmatpush3.msra.mxu1 %v6155_v3 }
 0x5e4   :  { %7207 = vmatprep.subr.mxu0 %v6208_v32  ;;  %7178 = vmatprep.subr.mxu1 %v6170_v13 }
 0x5e5   :  { %7208 = vmatpush3.msra.mxu0 %v6192_v8  ;;  %7179 = vmatpush3.msra.mxu1 %v6154_v27 }
 0x5e6   :  { %7209 = vmatprep.subr.mxu0 %v6207_v20  ;;  %7180 = vmatprep.subr.mxu1 %v6169_v41 }
 0x5e7   :  { %7210 = vmatpush3.msra.mxu0 %v6191_v52  ;;  %7181 = vmatpush3.msra.mxu1 %v6153_v18 }
 0x5e8   :  { %7211 = vmatprep.subr.mxu0 %v6206_v42  ;;  %7182 = vmatprep.subr.mxu1 %v6168_v2 }
 0x5e9   :  { %7212 = vmatpush3.msra.mxu0 %v6190_v48  ;;  %7183 = vmatpush3.msra.mxu1 %v6152_v31 }
 0x5ea   :  { %7213 = vmatprep.subr.mxu0 %v6205_v38  ;;  %7184 = vmatprep.subr.mxu1 %v6167_v49 }
 0x5eb   :  { %7214 = vmatpush3.msra.mxu0 %v6189_v28 }
 0x5ec   :  { %7215 = vmatprep.subr.mxu0 %v6204_v34 }
 0x64c   :  { %v13068_v36 = vpop.f32.mrf.mxu0 }
 0x64e   :  { %v13072_v16 = vpop.f32.mrf.mxu0 }
 0x64f   :  { %v13070_v53 = vpop.f32.mrf.mxu1 }
 0x651   :  { %v13076_v15 = vpop.f32.mrf.mxu1 }
 0x652   :  { %v7026_v47 = vadd.f32 %v13076_v15, %v13070_v53  ;;  %v6151_v53 = vld [vmem:[%s13800_s4] sm:$0xff]  ;;  %v6188_v15 = vld [vmem:[%s13800_s4 + $0x128] sm:$0xff] }
 0x653   :  { %v13074_v30 = vpop.f32.mrf.mxu0  ;;  %7185 = vmatpush3.msra.mxu1 %v6151_v53  ;;  %7216 = vmatpush3.msra.mxu0 %v6188_v15  ;;  %v6226_v53 = vld [vmem:[%s13800_s4 + $0x258] sm:$0xff]  ;;  %v6199_v15 = vld [vmem:[%s13800_s4 + $0x180] sm:$0xff] }
 0x654   :  { %v5523_v13 = vadd.f32 %v7026_v47, %v6979_v45  ;;  %6360 = vmatmul.mubr.f32.vlgmr.msra.gmra.mxu1 %v12953_v51  ;;  %7217 = vmatprep.subr.mxu0 %v6203_v21 }
 0x655   :  { %v13078_v6 = vpop.f32.mrf.mxu0  ;;  %v13080_v25 = vpop.f32.mrf.mxu1 }
 0x657   :  { %v13086_v46 = vpop.f32.mrf.mxu1 }
 0x658   :  { %v7029_v55 = vadd.f32 %v13086_v46, %v13080_v25  ;;  %v6246_v25 = vld [vmem:[%s13800_s4 + $0x2f8] sm:$0xff]  ;;  %v6982_v46 = vadd.f32 %v13072_v16, %v13068_v36  ;;  %v6245_v16 = vld [vmem:[%s13800_s4 + $0x2f0] sm:$0xff] }
 0x659   :  { %7236 = vmatprep.subr.mxu1 %v6246_v25 }
 0x65a   :  { %v5528_v20 = vadd.f32 %v7029_v55, %v6982_v46  ;;  %7237 = vmatpush3.msra.mxu1 %v6230_v17  ;;  %v6278_v17 = vld [vmem:[%s13800_s4 + $0x3f8] sm:$0xff] }
 0x65b   :  { %7238 = vmatprep.subr.mxu1 %v6245_v16  ;;  %v6240_v16 = vld [vmem:[%s13800_s4 + $0x2c8] sm:$0xff] }
 0x65c   :  { %v13082_v59 = vpop.f32.mrf.mxu0 }
 0x65e   :  { %v13084_v57 = vpop.f32.mrf.mxu0 }
 0x65f   :  { %v6988_v42 = vadd.f32 %v13084_v57, %v13082_v59 }
 0x660   :  { %v13090_v39 = vpop.f32.mrf.mxu1 }
 0x662   :  { %v13096_v54 = vpop.f32.mrf.mxu1 }
 0x663   :  { %v7032_v32 = vadd.f32 %v13096_v54, %v13090_v39  ;;  %v6187_v39 = vld [vmem:[%s13800_s4 + $0x120] sm:$0xff]  ;;  %v6985_v54 = vadd.f32 %v13078_v6, %v13074_v30 }
 0x664   :  { %7218 = vmatpush3.msra.mxu0 %v6187_v39 }
 0x666   :  { %v13088_v40 = vpop.f32.mrf.mxu0 }
 0x668   :  { %v13092_v33 = vpop.f32.mrf.mxu0 }
 0x669   :  { %v13100_v61 = vpop.f32.mrf.mxu1 }
 0x66a   :  { %v13094_v1 = vpop.f32.mrf.mxu0 }
 0x66b   :  { %v13122_v19 = vpop.f32.mrf.mxu1 }
 0x66c   :  { %v13098_v14 = vpop.f32.mrf.mxu0  ;;  %v7035_v27 = vadd.f32 %v13122_v19, %v13100_v61  ;;  %v6244_v61 = vld [vmem:[%s13800_s4 + $0x2e8] sm:$0xff]  ;;  %v6186_v19 = vld [vmem:[%s13800_s4 + $0x118] sm:$0xff] }
 0x66d   :  { %v7073_v41 = vadd.f32 %v13098_v14, %v13094_v1  ;;  %v5533_v1 = vadd.f32 %v7032_v32, %v6985_v54  ;;  %v6224_v54 = vld [vmem:[%s13800_s4 + $0x248] sm:$0xff] }
 0x66e   :  { %v5538_v48 = vadd.f32 %v7035_v27, %v6988_v42 }
 0x66f   :  { %v13111_v0 = vpop.f32.mrf.mxu0 }
 0x670   :  { %v13138_v10 = vpop.f32.mrf.mxu1 }
 0x671   :  { %v13127_v5 = vpop.f32.mrf.mxu0 }
 0x672   :  { %v13163_v26 = vpop.f32.mrf.mxu1  ;;  %v7076_v36 = vadd.f32 %v13127_v5, %v13111_v0  ;;  %v6229_v0 = vld [vmem:[%s13800_s4 + $0x270] sm:$0xff]  ;;  %v6202_v5 = vld [vmem:[%s13800_s4 + $0x198] sm:$0xff] }
 0x673   :  { %v13143_v22 = vpop.f32.mrf.mxu0  ;;  %7239 = vmatpush3.msra.mxu1 %v6229_v0  ;;  %7219 = vmatprep.subr.mxu0 %v6202_v5  ;;  %v7038_v2 = vadd.f32 %v13163_v26, %v13138_v10  ;;  %v6242_v10 = vld [vmem:[%s13800_s4 + $0x2d8] sm:$0xff]  ;;  %v6184_v26 = vld [vmem:[%s13800_s4 + $0x108] sm:$0xff]  ;;  %v6223_v5 = vld [vmem:[%s13800_s4 + $0x240] sm:$0xff] }
 0x674   :  { %v5618_v18 = vadd.f32 %v7076_v36, %v5528_v20  ;;  %7240 = vmatprep.subr.mxu1 %v6244_v61  ;;  %7220 = vmatpush3.msra.mxu0 %v6186_v19  ;;  %v6222_v19 = vld [vmem:[%s13800_s4 + $0x238] sm:$0xff] }
 0x675   :  { %v13171_v23 = vpop.f32.mrf.mxu0 }
 0x676   :  { %v7079_v30 = vadd.f32 %v13171_v23, %v13143_v22 }
 0x678   :  { %v5623_v31 = vadd.f32 %v7079_v30, %v5533_v1 }
 0x67c   :  { %v13204_v4 = vpop.f32.mrf.mxu0 }
 0x67e   :  { %v13234_v62 = vpop.f32.mrf.mxu0 }
 0x67f   :  { %v13182_v58 = vpop.f32.mrf.mxu1  ;;  %v7082_v14 = vadd.f32 %v13234_v62, %v13204_v4  ;;  %v6243_v4 = vld [vmem:[%s13800_s4 + $0x2e0] sm:$0xff]  ;;  %v6185_v62 = vld [vmem:[%s13800_s4 + $0x110] sm:$0xff] }
 0x680   :  { %v13264_v56 = vpop.f32.mrf.mxu0 }
 0x681   :  { %v13196_v60 = vpop.f32.mrf.mxu1  ;;  %v5628_v47 = vadd.f32 %v7082_v14, %v5538_v48  ;;  %v6237_v14 = vld [vmem:[%s13800_s4 + $0x2b0] sm:$0xff]  ;;  %v6234_v48 = vld [vmem:[%s13800_s4 + $0x298] sm:$0xff] }
 0x682   :  { %v13296_v29 = vpop.f32.mrf.mxu0  ;;  %v7120_v59 = vadd.f32 %v13196_v60, %v13182_v58  ;;  %v6227_v60 = vld [vmem:[%s13800_s4 + $0x260] sm:$0xff] }
 0x683   :  { %v13212_v11 = vpop.f32.mrf.mxu1  ;;  %v7085_v49 = vadd.f32 %v13296_v29, %v13264_v56  ;;  %v6183_v56 = vld [vmem:[%s13800_s4 + $0x100] sm:$0xff] }
 0x685   :  { %v13226_v12 = vpop.f32.mrf.mxu1 }
 0x686   :  { %v7123_v6 = vadd.f32 %v13226_v12, %v13212_v11  ;;  %v6228_v11 = vld [vmem:[%s13800_s4 + $0x268] sm:$0xff]  ;;  %v6201_v12 = vld [vmem:[%s13800_s4 + $0x190] sm:$0xff] }
 0x687   :  { %v13242_v7 = vpop.f32.mrf.mxu1  ;;  %7241 = vmatpush3.msra.mxu1 %v6228_v11  ;;  %7221 = vmatprep.subr.mxu0 %v6201_v12  ;;  %v6236_v12 = vld [vmem:[%s13800_s4 + $0x2a8] sm:$0xff] }
 0x688   :  { %v5708_v28 = vadd.f32 %v7123_v6, %v5618_v18  ;;  %7242 = vmatprep.subr.mxu1 %v6243_v4  ;;  %7222 = vmatpush3.msra.mxu0 %v6185_v62  ;;  %v6238_v6 = vld [vmem:[%s13800_s4 + $0x2b8] sm:$0xff]  ;;  %v6220_v18 = vld [vmem:[%s13800_s4 + $0x228] sm:$0xff]  ;;  %v6219_v4 = vld [vmem:[%s13800_s4 + $0x220] sm:$0xff] }
 0x689   :  { %v13256_v24 = vpop.f32.mrf.mxu1  ;;  %7243 = vmatpush3.msra.mxu1 %v6227_v60  ;;  %v6217_v60 = vld [vmem:[%s13800_s4 + $0x210] sm:$0xff] }
 0x68a   :  { %v7126_v57 = vadd.f32 %v13256_v24, %v13242_v7  ;;  %v6200_v7 = vld [vmem:[%s13800_s4 + $0x188] sm:$0xff]  ;;  %v5613_v24 = vadd.f32 %v7073_v41, %v5523_v13  ;;  %7244 = vmatprep.subr.mxu1 %v6242_v10  ;;  %v6231_v10 = vld [vmem:[%s13800_s4 + $0x280] sm:$0xff] }
 0x68b   :  { %v13278_v37 = vpop.f32.mrf.mxu1  ;;  %7223 = vmatprep.subr.mxu0 %v6200_v7  ;;  %7245 = vmatpush3.msra.mxu1 %v6226_v53 }
 0x68c   :  { %v5703_v45 = vadd.f32 %v7120_v59, %v5613_v24  ;;  %7224 = vmatpush3.msra.mxu0 %v6184_v26  ;;  %v6232_v24 = vld [vmem:[%s13800_s4 + $0x288] sm:$0xff]  ;;  %v6215_v26 = vld [vmem:[%s13800_s4 + $0x200] sm:$0xff] }
 0x68d   :  { %v7128_v3 = vpop.f32.mrf.mxu1  ;;  %7225 = vmatprep.subr.mxu0 %v6199_v15 }
 0x68e   :  { %v7129_v38 = vadd.f32 %v7128_v3, %v13278_v37  ;;  %v6991_v37 = vadd.f32 %v13092_v33, %v13088_v40  ;;  %v5713_v40 = vadd.f32 %v7126_v57, %v5623_v31  ;;  %v6241_v33 = vld [vmem:[%s13800_s4 + $0x2d0] sm:$0xff]  ;;  %7226 = vmatpush3.msra.mxu0 %v6183_v56  ;;  %v6235_v57 = vld [vmem:[%s13800_s4 + $0x2a0] sm:$0xff]  ;;  %v6216_v31 = vld [vmem:[%s13800_s4 + $0x208] sm:$0xff] }
 0x68f   :  { %v7130_v22 = vpop.f32.mrf.mxu1  ;;  %v6225_v3 = vld [vmem:[%s13800_s4 + $0x250] sm:$0xff]  ;;  %7246 = vmatprep.subr.mxu1 %v6241_v33  ;;  %7277 = vmatprep.subr.mxu0 %v6278_v17 }
 0x690   :  { %v13313_v8 = vpop.f32.mrf.mxu0  ;;  %v5543_v29 = vadd.f32 %v7038_v2, %v6991_v37  ;;  %v5718_v32 = vadd.f32 %v7129_v38, %v5628_v47  ;;  %7247 = vmatpush3.msra.mxu1 %v6225_v3  ;;  %v6218_v2 = vld [vmem:[%s13800_s4 + $0x218] sm:$0xff] }
 0x691   :  { %v7131_v34 = vpop.f32.mrf.mxu1  ;;  %v13412_v21 = vadd.f32 %v13313_v8, %v5703_v45  ;;  %7248 = vmatprep.subr.mxu1 %v6240_v16 }
 0x692   :  { %v7430_v52 = vpop.f32.mrf.mxu0  ;;  %v7132_v13 = vadd.f32 %v7131_v34, %v7130_v22  ;;  %v5633_v20 = vadd.f32 %v7085_v49, %v5543_v29  ;;  %7249 = vmatpush3.msra.mxu1 %v6224_v54 }
 0x693   :  { %v6239_v52 = vld [vmem:[%s13800_s4 + $0x2c0] sm:$0xff] }
 0x694   :  { %v5797_v23 = vpop.f32.mrf.mxu0  ;;  %v5723_v30 = vadd.f32 %v7132_v13, %v5633_v20  ;;  %7250 = vmatprep.subr.mxu1 %v6239_v52 }
 0x695   :  { %v13397_v25 = vadd.f32 %v5797_v23, %v5708_v28  ;;  %7251 = vmatpush3.msra.mxu1 %v6223_v5  ;;  %v6221_v23 = vld [vmem:[%s13800_s4 + $0x230] sm:$0xff] }
 0x696   :  { %v7433_v58 = vpop.f32.mrf.mxu0  ;;  %7252 = vmatprep.subr.mxu1 %v6238_v6  ;;  %v5816_v6 = vld [vmem:[%s13801_s5 + $0x2] sm:$0x1] }
 0x697   :  { %v5818_v8 = vadd.f32 %v13397_v25, %v13412_v21  ;;  %7253 = vmatpush3.msra.mxu1 %v6222_v19  ;;  %v6233_v58 = vld [vmem:[%s13800_s4 + $0x290] sm:$0xff] }
 0x698   :  { %v5802_v55 = vpop.f32.mrf.mxu0  ;;  %7254 = vmatprep.subr.mxu1 %v6237_v14  ;;  %v13498_v14 = vand.u32 7, %v14857_v9 }
 0x699   :  { %v13414_v36 = vadd.f32 %v5802_v55, %v5713_v40  ;;  %7255 = vmatpush3.msra.mxu1 %v6221_v23  ;;  %v13504_v23 = vand.u32 7, %v14853_v35 }
 0x69a   :  { %v7436_v46 = vpop.f32.mrf.mxu0  ;;  %7256 = vmatprep.subr.mxu1 %v6236_v12  ;;  %vm5954_vm4 = vcmp.ge.s32.totalorder %v13498_v14, 1  ;;  %vm5959_vm1 = vcmp.le.s32.totalorder %v13498_v14, 5 }
 0x69b   :  { %v5819_v41 = vadd.f32 %v5818_v8, %v13414_v36  ;;  %7257 = vmatpush3.msra.mxu1 %v6220_v18  ;;  %v5918_v18 = vand.u32 7, %v14854_v63  ;;  %vm5955_vm0 = vcmp.ge.s32.totalorder %v13504_v23, 1  ;;  %vm5960_vm11 = vcmp.le.s32.totalorder %v13504_v23, 5  ;;  %vm13547_vm9 = vmand %vm5954_vm4, %vm5959_vm1 }
 0x69c   :  { %v5807_v39 = vpop.f32.mrf.mxu0  ;;  %7258 = vmatprep.subr.mxu1 %v6235_v57  ;;  %v5925_v57 = vand.u32 7, %v14871_v44 }
 0x69d   :  { %v13424_v27 = vadd.f32 %v5807_v39, %v5718_v32  ;;  %7259 = vmatpush3.msra.mxu1 %v6219_v4  ;;  %vm13520_vm15 = vcmp.ge.s32.totalorder %v5918_v18, 1  ;;  %vm13525_vm12 = vcmp.le.s32.totalorder %v5918_v18, 5 }
 0x69e   :  { %v7439_v0 = vpop.f32.mrf.mxu0  ;;  %7260 = vmatprep.subr.mxu1 %v6234_v48  ;;  %vm13535_vm2 = vcmp.ge.s32.totalorder %v5925_v57, 1  ;;  %vm13539_vm14 = vcmp.le.s32.totalorder %v5925_v57, 5  ;;  %vm5966_vm1 = vmand %vm13520_vm15, %vm13525_vm12  ;;  %v6277_v57 = vld [vmem:[%s13800_s4 + $0x3f0] sm:$0xff]  ;;  %vm6755_vm15 = vcmp.le.s32.totalorder %v13498_v14, 3  ;;  %vm6756_vm12 = vcmp.le.s32.totalorder %v13504_v23, 3  ;;  %v6773_v14 = vld [vmem:[%s13803_s7 + $0x8] sm:$0xff] }
 0x69f   :  { %v5820_v42 = vadd.f32 %v5819_v41, %v13424_v27  ;;  %7261 = vmatpush3.msra.mxu1 %v6218_v2 }
 0x6a0   :  { %v5812_v61 = vpop.f32.mrf.mxu0  ;;  %7262 = vmatprep.subr.mxu1 %v6233_v58  ;;  %v6275_v58 = vld [vmem:[%s13800_s4 + $0x3e0] sm:$0xff] }
 0x6a1   :  { %v13440_v1 = vadd.f32 %v5812_v61, %v5723_v30  ;;  %7263 = vmatpush3.msra.mxu1 %v6217_v60 }
 0x6a2   :  { %v7442_v22 = vpop.f32.mrf.mxu0  ;;  %7264 = vmatprep.subr.mxu1 %v6232_v24 }
 0x6a3   :  { %v5821_v11 = vadd.f32 %v5820_v42, %v13440_v1  ;;  %7265 = vmatpush3.msra.mxu1 %v6216_v31  ;;  %v13495_v42 = vand.u32 7, %v14856_v50  ;;  %v5817_v22 = vld [vmem:[%s13802_s6 + $0x2] sm:$0x1] }
 0x6a4   :  { %7266 = vmatprep.subr.mxu1 %v6231_v10 }
 0x6a5   :  { %v5822_v59 = vrot.slane %v5821_v11, 4  ;;  %7267 = vmatpush3.msra.mxu1 %v6215_v26  ;;  %vm14038_vm6 = vcmp.ge.s32.totalorder %v13495_v42, 1  ;;  %vm5958_vm3 = vcmp.le.s32.totalorder %v13495_v42, 5 }
 0x6a6   :  { %7443 = vmatprep.subr.mxu1 %v12953_v51  ;;  %vm13531_vm8 = vmand %vm14038_vm6, %vm5958_vm3 }
 0x6a7   :  { %v5823_v62 = vadd.f32 %v5822_v59, %v5821_v11  ;;  %vm13553_vm3 = vmand %vm5955_vm0, %vm5960_vm11 }
 0x6a8   :  { %vm5967_vm11 = vmand %vm13535_vm2, %vm13539_vm14 }
 0x6a9   :  { %v5824_v38 = vrot.slane %v5823_v62, 2 }
 0x6ab   :  { %v5825_v7 = vadd.f32 %v5824_v38, %v5823_v62  ;;  %v6260_v38 = vld [vmem:[%s13800_s4 + $0x368] sm:$0xff] }
 0x6ad   :  { %v5826_v28 = vrot.slane %v5825_v7, 1 }
 0x6af   :  { %v5827_v37 = vadd.f32 %v5826_v28, %v5825_v7 }
 0x6b1   :  { %v5829_v47 = vmul.f32 0.04, %v5827_v37 }
 0x6b3   :  { %v5830_v49 = vsub.f32 %v13412_v21, %v5829_v47  ;;  %v5831_v34 = vsub.f32 %v13397_v25, %v5829_v47  ;;  %v5832_v55 = vsub.f32 %v13414_v36, %v5829_v47  ;;  %v5833_v53 = vsub.f32 %v13424_v27, %v5829_v47 }
 0x6b4   :  { %v5834_v40 = vsub.f32 %v13440_v1, %v5829_v47  ;;  %v5850_v54 = vmul.f32 15.0, %v5829_v47 }
 0x6b5   :  { %v5835_v15 = vmul.f32 %v5830_v49, %v5830_v49  ;;  %v5836_v45 = vmul.f32 %v5831_v34, %v5831_v34  ;;  %v5837_v33 = vmul.f32 %v5832_v55, %v5832_v55  ;;  %v5838_v29 = vmul.f32 %v5833_v53, %v5833_v53 }
 0x6b6   :  { %v5839_v32 = vmul.f32 %v5834_v40, %v5834_v40  ;;  %v5851_v52 = vmul.f32 %v5850_v54, %v5829_v47 }
 0x6b7   :  { %v5840_v56 = vadd.f32 %v5836_v45, %v5835_v15 }
 0x6b9   :  { %v5841_v46 = vadd.f32 %v5840_v56, %v5837_v33 }
 0x6bb   :  { %v5842_v3 = vadd.f32 %v5841_v46, %v5838_v29 }
 0x6bd   :  { %v5843_v17 = vadd.f32 %v5842_v3, %v5839_v32 }
 0x6bf   :  { %v5844_v51 = vrot.slane %v5843_v17, 4 }
 0x6c1   :  { %v5845_v13 = vadd.f32 %v5844_v51, %v5843_v17 }
 0x6c3   :  { %v5846_v16 = vrot.slane %v5845_v13, 2 }
 0x6c5   :  { %v5847_v39 = vadd.f32 %v5846_v16, %v5845_v13 }
 0x6c7   :  { %v5848_v20 = vrot.slane %v5847_v39, 1 }
 0x6c9   :  { %v5849_v8 = vadd.f32 %v5848_v20, %v5847_v39 }
 0x6cb   :  { %v5852_v0 = vsub.f32 %v5849_v8, %v5851_v52 }
 0x6cd   :  { %v5853_v5 = vmul.f32 0.04, %v5852_v0 }
 0x6cf   :  { %v5854_v41 = vmax.f32 %v5853_v5, 0.0 }
 0x6d1   :  { %v5855_v30 = vadd.f32 1e-05, %v5854_v41 }
 0x6d3   :  { %7593 = vrsqrt.f32 %v5855_v30 }
 0x6e0   :  { %v7594_v61 = vpop.eup %7593 }
 0x6e1   :  { %v5857_v19 = vmul.f32 %v7594_v61, %v5816_v6 }
 0x6e3   :  { %v5858_v11 = vmul.f32 %v5857_v19, %v5829_v47  ;;  %v5863_v12 = vrot.slane %v5857_v19, %v14864_v43 }
 0x6e5   :  { %v5859_v59 = vsub.f32 %v5817_v22, %v5858_v11  ;;  %v5864_v50 = vmul.f32 %v5863_v12, %v13412_v21  ;;  %v5865_v35 = vmul.f32 %v5863_v12, %v13397_v25  ;;  %v5866_v9 = vmul.f32 %v5863_v12, %v13414_v36  ;;  %v6262_v11 = vld [vmem:[%s13800_s4 + $0x378] sm:$0xff] }
 0x6e6   :  { %v5867_v63 = vmul.f32 %v5863_v12, %v13424_v27  ;;  %v5868_v4 = vmul.f32 %v5863_v12, %v13440_v1 }
 0x6e7   :  { %v5872_v44 = vrot.slane %v5859_v59, %v14864_v43 }
 0x6e9   :  { %v5873_v48 = vadd.f32 %v5872_v44, %v5864_v50  ;;  %v5874_v25 = vadd.f32 %v5872_v44, %v5865_v35  ;;  %v5875_v2 = vadd.f32 %v5872_v44, %v5866_v9  ;;  %v5876_v36 = vadd.f32 %v5872_v44, %v5867_v63  ;;  %v13577_v63 = vld [vmem:[#allocation2 + $0x10] sm:$0xff] }
 0x6ea   :  { %v5877_v1 = vadd.f32 %v5872_v44, %v5868_v4  ;;  %v6261_v44 = vld [vmem:[%s13800_s4 + $0x370] sm:$0xff] }
 0x6eb   :  { %vm5878_vm7 = vcmp.ge.f32.partialorder %v5873_v48, 0.0  ;;  %vm5879_vm13 = vcmp.ge.f32.partialorder %v5874_v25, 0.0  ;;  %vm5880_vm5 = vcmp.ge.f32.partialorder %v5875_v2, 0.0  ;;  %vm5881_vm6 = vcmp.ge.f32.partialorder %v5876_v36, 0.0 }
 0x6ec   :  { %vm5882_vm10 = vcmp.ge.f32.partialorder %v5877_v1, 0.0  ;;  %v5883_v24 = vmul.f32 0.01, %v5873_v48  ;;  %v5884_v31 = vmul.f32 0.01, %v5874_v25 }
 0x6ed   :  { %v5885_v28 = vmul.f32 0.01, %v5875_v2  ;;  %v5886_v10 = vmul.f32 0.01, %v5876_v36  ;;  %v5887_v26 = vmul.f32 0.01, %v5877_v1 }
 0x6ee   :  { %v5888_v37 = vsel %vm5878_vm7, %v5873_v48, %v5883_v24  ;;  %v5889_v47 = vsel %vm5879_vm13, %v5874_v25, %v5884_v31  ;;  %v6276_v48 = vld [vmem:[%s13800_s4 + $0x3e8] sm:$0xff]  ;;  %vm6758_vm13 = vmand %vm5954_vm4, %vm6755_vm15 }
 0x6ef   :  { %v5890_v49 = vsel %vm5880_vm5, %v5875_v2, %v5885_v28  ;;  %v5891_v34 = vsel %vm5881_vm6, %v5876_v36, %v5886_v10  ;;  %v5892_v55 = vsel %vm5882_vm10, %v5877_v1, %v5887_v26  ;;  %v5968_v53 = vsel %vm13531_vm8, %v5888_v37, 0.0  ;;  %v6259_v37 = vld [vmem:[%s13800_s4 + $0x360] sm:$0xff]  ;;  %vm6759_vm5 = vmand %vm5955_vm0, %vm6756_vm12 }
 0x6f0   :  { %v5969_v15 = vsel %vm13547_vm9, %v5889_v47, 0.0  ;;  %v5970_v45 = vsel %vm13553_vm3, %v5890_v49, 0.0  ;;  %v5971_v40 = vsel %vm5966_vm1, %v5891_v34, 0.0  ;;  %v5972_v33 = vsel %vm5967_vm11, %v5892_v55, 0.0  ;;  %5973 = vst [vmem:[#allocation5] sm:$0xff] %v5968_v53  ;;  %v6274_v55 = vld [vmem:[%s13800_s4 + $0x3d8] sm:$0xff] }
 0x6f1   :  { %5974 = vst [vmem:[#allocation5 + $0x8] sm:$0xff] %v5969_v15  ;;  %5975 = vst [vmem:[#allocation5 + $0x10] sm:$0xff] %v5970_v45  ;;  %v6258_v45 = vld [vmem:[%s13800_s4 + $0x358] sm:$0xff]  ;;  %vm14919_vm10 = vmmov 0   ;;  %vm6754_vm6 = vcmp.le.s32.totalorder %v13495_v42, 3  ;;  %vm14920_vm8 = vcmp.ge.s32.totalorder %v13495_v42, 1 }
 0x6f2   :  { %5976 = vst [vmem:[#allocation5 + $0x18] sm:$0xff] %v5971_v40  ;;  %5977 = vst [vmem:[#allocation5 + $0x20] sm:$0xff] %v5972_v33  ;;  %v6907_v42 = vld [vmem:[%s13803_s7 + $0x30] sm:$0xff] }
 0x6f3   :  { %vm13752_vm2 = vmand %vm14920_vm8, %vm6754_vm6 }
 0x6f7   :  { %v6005_v56 = vld [vmem:[#allocation5] ss:$2 sm:$0x7]  ;;  %v6011_v19 = vld [vmem:[#allocation5 + $0x1] ss:$2 sm:$0x7] }
 0x6f8   :  { %v6017_v29 = vld [vmem:[#allocation5 + $0x2] ss:$2 sm:$0x7]  ;;  %v6045_v46 = vld [vmem:[#allocation5 + $0x9] ss:$2 sm:$0x7] }
 0x6f9   :  { %v6007_v32 = vrot.slane %v6005_v56, 7  ;;  %v6019_v3 = vrot.slane %v6017_v29, 7  ;;  %v6047_v17 = vrot.slane %v6045_v46, 7  ;;  %v6040_v51 = vld [vmem:[#allocation5 + $0x8] ss:$2 sm:$0x7] }
 0x6fa   :  { %v6042_v13 = vrot.slane %v6040_v51, 7  ;;  %v6096_v16 = vld [vmem:[#allocation5 + $0x19] ss:$2 sm:$0x7]  ;;  %v6013_v12 = vrot.slane %v6011_v19, 7  ;;  %v6294_v29 = vld [vmem:[%s13800_s4 + $0x478] sm:$0xff] }
 0x6fb   :  { %6009 = vst [vmem:[#allocation2 + $0x18] sm:$0xe] %v6007_v32  ;;  %6021 = vst [vmem:[#allocation2 + $0x328] sm:$0xe] %v6019_v3  ;;  %v6098_v39 = vrot.slane %v6096_v16, 7  ;;  %v6273_v3 = vld [vmem:[%s13800_s4 + $0x3d0] sm:$0xff] }
 0x6fc   :  { %6049 = vst [vmem:[#allocation2 + $0x310] sm:$0xe] %v6047_v17  ;;  %v6056_v54 = vld [vmem:[#allocation5 + $0x10] ss:$2 sm:$0x7]  ;;  %v6257_v51 = vld [vmem:[%s13800_s4 + $0x350] sm:$0xff] }
 0x6fd   :  { %6044 = vst [vmem:[#allocation2 + $0x488] sm:$0xe] %v6042_v13  ;;  %v6058_v20 = vrot.slane %v6056_v54, 7  ;;  %v6091_v8 = vld [vmem:[#allocation5 + $0x18] ss:$2 sm:$0x7] }
 0x6fe   :  { %6100 = vst [vmem:[#allocation2 + $0x220] sm:$0xe] %v6098_v39  ;;  %v6093_v52 = vrot.slane %v6091_v8, 7  ;;  %v6050_v0 = vld [vmem:[#allocation5 + $0xa] ss:$2 sm:$0x7] }
 0x6ff   :  { %6060 = vst [vmem:[#allocation2 + $0x308] sm:$0xe] %v6058_v20  ;;  %v6052_v5 = vrot.slane %v6050_v0, 7  ;;  %v6107_v41 = vld [vmem:[#allocation5 + $0x20] ss:$2 sm:$0x7] }
 0x700   :  { %6095 = vst [vmem:[#allocation2 + $0x160] sm:$0xe] %v6093_v52  ;;  %v6109_v30 = vrot.slane %v6107_v41, 7  ;;  %v6101_v6 = vld [vmem:[#allocation5 + $0x1a] ss:$2 sm:$0x7] }
 0x701   :  { %6054 = vst [vmem:[#allocation2 + $0x4f0] sm:$0xe] %v6052_v5  ;;  %v6103_v61 = vrot.slane %v6101_v6, 7  ;;  %v6068_v18 = vld [vmem:[#allocation5 + $0x12] ss:$2 sm:$0x7] }
 0x702   :  { %v6127_v22 = vld [vmem:[#allocation2 + $0x18] sm:$0xff]  ;;  %6111 = vst [vmem:[#allocation2 + $0x360] sm:$0xe] %v6109_v30  ;;  %v6070_v50 = vrot.slane %v6068_v18, 7  ;;  %6015 = vst [vmem:[#allocation2 + $0x450] sm:$0xe] %v6013_v12 }
 0x703   :  { %v6134_v59 = vld [vmem:[#allocation2 + $0x310] sm:$0xff]  ;;  %6439 = vmatprep.mubr.f32.mxu0 %v6127_v22  ;;  %6105 = vst [vmem:[#allocation2 + $0xa0] sm:$0xe] %v6103_v61  ;;  %v6029_v35 = vld [vmem:[#allocation5 + $0x9] ss:$2 sm:$0x7] }
 0x704   :  { %6364 = vmatprep.mubr.f32.mxu1 %v6134_v59  ;;  %v6133_v9 = vld [vmem:[#allocation2 + $0x488] sm:$0xff]  ;;  %6440 = vmatmul.mubr.f32.vlgmr.msra.gmra.mxu0 %v13577_v63  ;;  %v6031_v4 = vrot.slane %v6029_v35, 7  ;;  %6072 = vst [vmem:[#allocation2 + $0x398] sm:$0xe] %v6070_v50  ;;  %v6293_v16 = vld [vmem:[%s13800_s4 + $0x470] sm:$0xff]  ;;  %v6271_v52 = vld [vmem:[%s13800_s4 + $0x3c0] sm:$0xff] }
 0x705   :  { %v6062_v62 = vld [vmem:[#allocation5 + $0x11] ss:$2 sm:$0x7]  ;;  %6365 = vmatmul.mubr.f32.gmra.mxu1 %v6133_v9  ;;  %7278 = vmatpush3.msra.mxu0 %v6262_v11  ;;  %v6143_v21 = vld [vmem:[#allocation2 + $0x220] sm:$0xff]  ;;  %v6270_v30 = vld [vmem:[%s13800_s4 + $0x3b8] sm:$0xff] }
 0x706   :  { %v6064_v25 = vrot.slane %v6062_v62, 7  ;;  %v6119_v2 = vld [vmem:[#allocation5 + $0x22] ss:$2 sm:$0x7]  ;;  %6369 = vmatprep.mubr.f32.mxu1 %v6143_v21  ;;  %v6136_v36 = vld [vmem:[#allocation2 + $0x308] sm:$0xff]  ;;  %7279 = vmatprep.subr.mxu0 %v6277_v57  ;;  %v6255_v0 = vld [vmem:[%s13800_s4 + $0x340] sm:$0xff] }
 0x707   :  { %6033 = vst [vmem:[#allocation2 + $0x378] sm:$0xe] %v6031_v4  ;;  %v6121_v27 = vrot.slane %v6119_v2, 7  ;;  %v6113_v1 = vld [vmem:[#allocation5 + $0x21] ss:$2 sm:$0x7]  ;;  %6444 = vmatprep.mubr.f32.mxu0 %v6136_v36  ;;  %7280 = vmatpush3.msra.mxu0 %v6261_v44 }
 0x708   :  { %6066 = vst [vmem:[#allocation2 + $0x2a8] sm:$0xe] %v6064_v25  ;;  %v6115_v60 = vrot.slane %v6113_v1, 7  ;;  %v6023_v7 = vld [vmem:[#allocation5 + $0x8] ss:$2 sm:$0x7]  ;;  %7281 = vmatprep.subr.mxu0 %v6276_v48 }
 0x709   :  { %v6142_v24 = vld [vmem:[#allocation2 + $0x160] sm:$0xff]  ;;  %v6135_v31 = vld [vmem:[#allocation2 + $0x4f0] sm:$0xff]  ;;  %6123 = vst [vmem:[#allocation2 + $0x380] sm:$0xe] %v6121_v27  ;;  %v6025_v28 = vrot.slane %v6023_v7, 7  ;;  %7282 = vmatpush3.msra.mxu0 %v6260_v38  ;;  %v6129_v34 = vld [vmem:[#allocation2 + $0x328] sm:$0xff] }
 0x70a   :  { %v6080_v10 = vld [vmem:[#allocation5 + $0x19] ss:$2 sm:$0x7]  ;;  %6370 = vmatmul.mubr.f32.gmra.mxu1 %v6142_v24  ;;  %6445 = vmatmul.mubr.f32.gmra.mxu0 %v6135_v31  ;;  %v6145_v26 = vld [vmem:[#allocation2 + $0x360] sm:$0xff]  ;;  %6117 = vst [vmem:[#allocation2 + $0x4f8] sm:$0xe] %v6115_v60 }
 0x70b   :  { %v6082_v47 = vrot.slane %v6080_v10, 7  ;;  %v6074_v49 = vld [vmem:[#allocation5 + $0x18] ss:$2 sm:$0x7]  ;;  %6449 = vmatprep.mubr.f32.mxu0 %v6145_v26  ;;  %6027 = vst [vmem:[#allocation2 + $0x440] sm:$0xe] %v6025_v28  ;;  %6519 = vmatprep.mubr.f32.mxu1 %v6129_v34 }
 0x70c   :  { %v6076_v53 = vrot.slane %v6074_v49, 7  ;;  %v6035_v15 = vld [vmem:[#allocation5 + $0xa] ss:$2 sm:$0x7]  ;;  %7283 = vmatprep.subr.mxu0 %v6275_v58  ;;  %v6128_v32 = vld [vmem:[#allocation2 + $0x450] sm:$0xff]  ;;  %v6138_v17 = vld [vmem:[#allocation2 + $0x398] sm:$0xff] }
 0x70d   :  { %6084 = vst [vmem:[#allocation2 + $0xd8] sm:$0xe] %v6082_v47  ;;  %v6037_v40 = vrot.slane %v6035_v15, 7  ;;  %v6086_v33 = vld [vmem:[#allocation5 + $0x1a] ss:$2 sm:$0x7]  ;;  %7284 = vmatpush3.msra.mxu0 %v6259_v37 }
 0x70e   :  { %v6144_v56 = vld [vmem:[#allocation2 + $0xa0] sm:$0xff]  ;;  %6078 = vst [vmem:[#allocation2 + $0x60] sm:$0xe] %v6076_v53  ;;  %v6088_v46 = vrot.slane %v6086_v33, 7  ;;  %7285 = vmatprep.subr.mxu0 %v6274_v55  ;;  %6520 = vmatmul.mubr.f32.vlgmr.msra.gmra.mxu1 %v6128_v32  ;;  %v6131_v13 = vld [vmem:[#allocation2 + $0x378] sm:$0xff]  ;;  %v6272_v39 = vld [vmem:[%s13800_s4 + $0x3c8] sm:$0xff] }
 0x70f   :  { %6450 = vmatmul.mubr.f32.gmra.mxu0 %v6144_v56  ;;  %6039 = vst [vmem:[#allocation2 + $0x108] sm:$0xe] %v6037_v40  ;;  %7444 = vmatpush3.msra.mxu1 %v6294_v29  ;;  %v6256_v54 = vld [vmem:[%s13800_s4 + $0x348] sm:$0xff]  ;;  %v6291_v41 = vld [vmem:[%s13800_s4 + $0x460] sm:$0xff]  ;;  %v6254_v6 = vld [vmem:[%s13800_s4 + $0x338] sm:$0xff] }
 0x710   :  { %7286 = vmatpush3.msra.mxu0 %v6258_v45  ;;  %6090 = vst [vmem:[#allocation2 + $0x388] sm:$0xe] %v6088_v46  ;;  %6524 = vmatprep.mubr.f32.mxu1 %v6138_v17  ;;  %v6292_v20 = vld [vmem:[%s13800_s4 + $0x468] sm:$0xff]  ;;  %v6147_v5 = vld [vmem:[#allocation2 + $0x380] sm:$0xff]  ;;  %v6290_v61 = vld [vmem:[%s13800_s4 + $0x458] sm:$0xff] }
 0x711   :  { %7287 = vmatprep.subr.mxu0 %v6273_v3  ;;  %6599 = vmatprep.mubr.f32.mxu0 %v6131_v13  ;;  %v6137_v8 = vld [vmem:[#allocation2 + $0x2a8] sm:$0xff]  ;;  %v6146_v19 = vld [vmem:[#allocation2 + $0x4f8] sm:$0xff]  ;;  %v6269_v22 = vld [vmem:[%s13800_s4 + $0x3b0] sm:$0xff] }
 0x712   :  { %7445 = vmatprep.subr.mxu1 %v13577_v63  ;;  %7288 = vmatpush3.msra.mxu0 %v6257_v51  ;;  %v6253_v11 = vld [vmem:[%s13800_s4 + $0x330] sm:$0xff]  ;;  %v6268_v18 = vld [vmem:[%s13800_s4 + $0x3a8] sm:$0xff]  ;;  %v6267_v50 = vld [vmem:[%s13800_s4 + $0x3a0] sm:$0xff] }
 0x713   :  { %7446 = vmatpush3.msra.mxu1 %v6293_v16  ;;  %7289 = vmatprep.subr.mxu0 %v6272_v39  ;;  %v6289_v12 = vld [vmem:[%s13800_s4 + $0x450] sm:$0xff]  ;;  %v6252_v59 = vld [vmem:[%s13800_s4 + $0x328] sm:$0xff]  ;;  %v6251_v35 = vld [vmem:[%s13800_s4 + $0x320] sm:$0xff] }
 0x714   :  { %7447 = vmatprep.subr.mxu1 %v13577_v63  ;;  %6525 = vmatmul.mubr.f32.gmra.mxu1 %v6137_v8  ;;  %v6288_v57 = vld [vmem:[%s13800_s4 + $0x448] sm:$0xff]  ;;  %v6287_v9 = vld [vmem:[%s13800_s4 + $0x440] sm:$0xff]  ;;  %v6266_v44 = vld [vmem:[%s13800_s4 + $0x398] sm:$0xff]  ;;  %v7186_v49 = vpop.f32.mrf.mxu1 }
 0x715   :  { %7290 = vmatpush3.msra.mxu0 %v6256_v54  ;;  %7448 = vmatpush3.msra.mxu1 %v6292_v20  ;;  %v6250_v4 = vld [vmem:[%s13800_s4 + $0x318] sm:$0xff]  ;;  %v6265_v21 = vld [vmem:[%s13800_s4 + $0x390] sm:$0xff]  ;;  %v6264_v2 = vld [vmem:[%s13800_s4 + $0x388] sm:$0xff] }
 0x716   :  { %6529 = vmatprep.mubr.f32.mxu1 %v6147_v5  ;;  %7291 = vmatprep.subr.mxu0 %v6271_v52  ;;  %v6286_v62 = vld [vmem:[%s13800_s4 + $0x438] sm:$0xff]  ;;  %v6249_v48 = vld [vmem:[%s13800_s4 + $0x310] sm:$0xff]  ;;  %v6248_v36 = vld [vmem:[%s13800_s4 + $0x308] sm:$0xff]  ;;  %v7187_v34 = vpop.f32.mrf.mxu1 }
 0x717   :  { %7449 = vmatprep.subr.mxu1 %v13577_v63  ;;  %7292 = vmatpush3.msra.mxu0 %v6255_v0  ;;  %v6285_v25 = vld [vmem:[%s13800_s4 + $0x430] sm:$0xff]  ;;  %v6284_v27 = vld [vmem:[%s13800_s4 + $0x428] sm:$0xff]  ;;  %v6263_v1 = vld [vmem:[%s13800_s4 + $0x380] sm:$0xff]  ;;  %v7188_v5 = vadd.f32 %v7187_v34, %v7186_v49 }
 0x718   :  { %7450 = vmatpush3.msra.mxu1 %v6291_v41  ;;  %7293 = vmatprep.subr.mxu0 %v6270_v30  ;;  %v6247_v38 = vld [vmem:[%s13800_s4 + $0x300] sm:$0xff]  ;;  %v6282_v60 = vld [vmem:[%s13800_s4 + $0x418] sm:$0xff]  ;;  %v6281_v31 = vld [vmem:[%s13800_s4 + $0x410] sm:$0xff] }
 0x719   :  { %7451 = vmatprep.subr.mxu1 %v13577_v63  ;;  %6530 = vmatmul.mubr.f32.gmra.mxu1 %v6146_v19  ;;  %v6283_v58 = vld [vmem:[%s13800_s4 + $0x420] sm:$0xff]  ;;  %v6140_v24 = vld [vmem:[#allocation2 + $0xd8] sm:$0xff]  ;;  %v6280_v28 = vld [vmem:[%s13800_s4 + $0x408] sm:$0xff] }
 0x71a   :  { %7294 = vmatpush3.msra.mxu0 %v6254_v6  ;;  %7452 = vmatpush3.msra.mxu1 %v6290_v61  ;;  %v6130_v7 = vld [vmem:[#allocation2 + $0x440] sm:$0xff]  ;;  %v6132_v37 = vld [vmem:[#allocation2 + $0x108] sm:$0xff] }
 0x71b   :  { %7295 = vmatprep.subr.mxu0 %v6269_v22  ;;  %7453 = vmatprep.subr.mxu1 %v13577_v63  ;;  %v6139_v10 = vld [vmem:[#allocation2 + $0x60] sm:$0xff]  ;;  %v6141_v47 = vld [vmem:[#allocation2 + $0x388] sm:$0xff] }
 0x71c   :  { %7296 = vmatpush3.msra.mxu0 %v6253_v11  ;;  %7454 = vmatpush3.msra.mxu1 %v6289_v12  ;;  %v6279_v26 = vld [vmem:[%s13800_s4 + $0x400] sm:$0xff] }
 0x71d   :  { %7297 = vmatprep.subr.mxu0 %v6268_v18  ;;  %7455 = vmatprep.subr.mxu1 %v13577_v63 }
 0x71e   :  { %7298 = vmatpush3.msra.mxu0 %v6252_v59  ;;  %7456 = vmatpush3.msra.mxu1 %v6288_v57 }
 0x71f   :  { %7299 = vmatprep.subr.mxu0 %v6267_v50  ;;  %7457 = vmatprep.subr.mxu1 %v13577_v63 }
 0x720   :  { %7300 = vmatpush3.msra.mxu0 %v6251_v35  ;;  %7458 = vmatpush3.msra.mxu1 %v6287_v9 }
 0x721   :  { %7301 = vmatprep.subr.mxu0 %v6266_v44  ;;  %7459 = vmatprep.subr.mxu1 %v13577_v63 }
 0x722   :  { %7302 = vmatpush3.msra.mxu0 %v6250_v4  ;;  %7460 = vmatpush3.msra.mxu1 %v6286_v62 }
 0x723   :  { %7303 = vmatprep.subr.mxu0 %v6265_v21  ;;  %7461 = vmatprep.subr.mxu1 %v13577_v63 }
 0x724   :  { %7304 = vmatpush3.msra.mxu0 %v6249_v48  ;;  %7462 = vmatpush3.msra.mxu1 %v6285_v25 }
 0x725   :  { %7305 = vmatprep.subr.mxu0 %v6264_v2  ;;  %7463 = vmatprep.subr.mxu1 %v13577_v63 }
 0x726   :  { %7306 = vmatpush3.msra.mxu0 %v6248_v36  ;;  %7464 = vmatpush3.msra.mxu1 %v6284_v27 }
 0x727   :  { %7307 = vmatprep.subr.mxu0 %v6263_v1  ;;  %7465 = vmatprep.subr.mxu1 %v13577_v63 }
 0x728   :  { %7308 = vmatpush3.msra.mxu0 %v6247_v38  ;;  %7466 = vmatpush3.msra.mxu1 %v6283_v58 }
 0x729   :  { %6600 = vmatmul.mubr.f32.vlgmr.msra.gmra.mxu0 %v6130_v7  ;;  %7467 = vmatprep.subr.mxu1 %v13577_v63 }
 0x72a   :  { %6604 = vmatprep.mubr.f32.mxu0 %v6140_v24  ;;  %7468 = vmatpush3.msra.mxu1 %v6282_v60 }
 0x72b   :  { %7469 = vmatprep.subr.mxu1 %v13577_v63  ;;  %7475 = vmatprep.mubr.msk.f32.mxu1 %vm14919_vm10, %v13577_v63 }
 0x72c   :  { %7470 = vmatpush3.msra.mxu1 %v6281_v31 }
 0x72d   :  { %6605 = vmatmul.mubr.f32.gmra.mxu0 %v6139_v10  ;;  %7471 = vmatprep.subr.mxu1 %v13577_v63 }
 0x72e   :  { %7472 = vmatpush3.msra.mxu1 %v6280_v28  ;;  %6609 = vmatprep.mubr.f32.mxu0 %v13577_v63 }
 0x72f   :  { %7473 = vmatprep.subr.mxu1 %v13577_v63 }
 0x730   :  { %7474 = vmatpush3.msra.mxu1 %v6279_v26 }
 0x731   :  { %6610 = vmatmul.mubr.f32.gmra.mxu0 %v13577_v63  ;;  %7476 = vmatmul.mubr.f32.vlgmr.msra.gmra.mxu1 %v6132_v37 }
 0x732   :  { %7478 = vmatprep.mubr.msk.f32.mxu1 %vm14919_vm10, %v13577_v63 }
 0x735   :  { %7479 = vmatmul.mubr.f32.gmra.mxu1 %v6141_v47 }
 0x736   :  { %7481 = vmatprep.mubr.msk.f32.mxu1 %vm14919_vm10, %v13577_v63 }
 0x739   :  { %7482 = vmatmul.mubr.f32.gmra.mxu1 %v13577_v63 }
 0x7c4   :  { %v7227_v15 = vpop.f32.mrf.mxu0 }
 0x7c5   :  { %v7189_v55 = vpop.f32.mrf.mxu1 }
 0x7c6   :  { %v7228_v40 = vpop.f32.mrf.mxu0 }
 0x7c7   :  { %v7190_v53 = vpop.f32.mrf.mxu1  ;;  %v7229_v20 = vadd.f32 %v7228_v40, %v7227_v15 }
 0x7c8   :  { %v7191_v52 = vadd.f32 %v7190_v53, %v7189_v55 }
 0x7c9   :  { %v6442_v11 = vadd.f32 %v7229_v20, %v7188_v5 }
 0x7ca   :  { %v7192_v45 = vpop.f32.mrf.mxu1  ;;  %v7230_v56 = vpop.f32.mrf.mxu0 }
 0x7cc   :  { %v7193_v33 = vpop.f32.mrf.mxu1  ;;  %v7231_v46 = vpop.f32.mrf.mxu0 }
 0x7cd   :  { %v7232_v63 = vadd.f32 %v7231_v46, %v7230_v56  ;;  %v7194_v59 = vadd.f32 %v7193_v33, %v7192_v45 }
 0x7ce   :  { %v7268_v29 = vpop.f32.mrf.mxu1 }
 0x7cf   :  { %v7233_v3 = vpop.f32.mrf.mxu0  ;;  %v6447_v6 = vadd.f32 %v7232_v63, %v7191_v52 }
 0x7d0   :  { %v7269_v32 = vpop.f32.mrf.mxu1 }
 0x7d1   :  { %v7234_v51 = vpop.f32.mrf.mxu0  ;;  %v7270_v19 = vadd.f32 %v7269_v32, %v7268_v29 }
 0x7d2   :  { %v7235_v61 = vadd.f32 %v7234_v51, %v7233_v3 }
 0x7d3   :  { %v6522_v62 = vadd.f32 %v7270_v19, %v6442_v11 }
 0x7d4   :  { %v7271_v17 = vpop.f32.mrf.mxu1  ;;  %v6452_v4 = vadd.f32 %v7235_v61, %v7194_v59 }
 0x7d6   :  { %v7272_v13 = vpop.f32.mrf.mxu1 }
 0x7d7   :  { %v7273_v0 = vadd.f32 %v7272_v13, %v7271_v17 }
 0x7d9   :  { %v7274_v39 = vpop.f32.mrf.mxu1  ;;  %v6527_v57 = vadd.f32 %v7273_v0, %v6447_v6  ;;  %v6695_v0 = vld [vmem:[%s13801_s5 + $0x3] sm:$0x1] }
 0x7db   :  { %v7275_v41 = vpop.f32.mrf.mxu1 }
 0x7dc   :  { %v7276_v50 = vadd.f32 %v7275_v41, %v7274_v39 }
 0x7de   :  { %v6532_v2 = vadd.f32 %v7276_v50, %v6452_v4 }
 0x7e9   :  { %v7309_v16 = vpop.f32.mrf.mxu0 }
 0x7eb   :  { %v7310_v54 = vpop.f32.mrf.mxu0 }
 0x7ec   :  { %v7311_v35 = vadd.f32 %v7310_v54, %v7309_v16 }
 0x7ed   :  { %v7312_v8 = vpop.f32.mrf.mxu0 }
 0x7ee   :  { %v6602_v36 = vadd.f32 %v7311_v35, %v6522_v62  ;;  %v6908_v62 = vld [vmem:[%s13803_s7 + $0x38] sm:$0xff] }
 0x7ef   :  { %v7313_v30 = vpop.f32.mrf.mxu0 }
 0x7f0   :  { %v7314_v22 = vadd.f32 %v7313_v30, %v7312_v8  ;;  %v6696_v30 = vld [vmem:[%s13802_s6 + $0x3] sm:$0x1] }
 0x7f1   :  { %v7315_v12 = vpop.f32.mrf.mxu0  ;;  %v6681_v18 = vpop.f32.mrf.mxu1 }
 0x7f2   :  { %v6607_v48 = vadd.f32 %v7314_v22, %v6527_v57  ;;  %v6682_v38 = vadd.f32 %v6681_v18, %v6602_v36 }
 0x7f3   :  { %v7316_v9 = vpop.f32.mrf.mxu0  ;;  %v7477_v44 = vpop.f32.mrf.mxu1 }
 0x7f4   :  { %v7317_v21 = vadd.f32 %v7316_v9, %v7315_v12 }
 0x7f5   :  { %v6686_v25 = vpop.f32.mrf.mxu1 }
 0x7f6   :  { %v6687_v27 = vadd.f32 %v6686_v25, %v6607_v48  ;;  %v6612_v58 = vadd.f32 %v7317_v21, %v6532_v2  ;;  %v6772_v21 = vld [vmem:[%s13803_s7] sm:$0xff]  ;;  %v6904_v25 = vld [vmem:[%s13803_s7 + $0x18] sm:$0xff] }
 0x7f7   :  { %v7480_v1 = vpop.f32.mrf.mxu1  ;;  %v6905_v2 = vld [vmem:[%s13803_s7 + $0x20] sm:$0xff] }
 0x7f8   :  { %v6697_v7 = vadd.f32 %v6687_v27, %v6682_v38 }
 0x7f9   :  { %v6691_v60 = vpop.f32.mrf.mxu1 }
 0x7fa   :  { %v6692_v24 = vadd.f32 %v6691_v60, %v6612_v58  ;;  %v6774_v58 = vld [vmem:[%s13803_s7 + $0x10] sm:$0xff] }
 0x7fb   :  { %v7483_v31 = vpop.f32.mrf.mxu1 }
 0x7fc   :  { %v6698_v28 = vadd.f32 %v6697_v7, %v6692_v24 }
 0x7fe   :  { %v6699_v10 = vrot.slane %v6698_v28, 4 }
 0x800   :  { %v6700_v26 = vadd.f32 %v6699_v10, %v6698_v28  ;;  %v6906_v28 = vld [vmem:[%s13803_s7 + $0x28] sm:$0xff] }
 0x802   :  { %v6701_v37 = vrot.slane %v6700_v26, 2 }
 0x804   :  { %v6702_v47 = vadd.f32 %v6701_v37, %v6700_v26 }
 0x806   :  { %v6703_v49 = vrot.slane %v6702_v47, 1 }
 0x808   :  { %v6704_v34 = vadd.f32 %v6703_v49, %v6702_v47 }
 0x80a   :  { %v6706_v55 = vmul.f32 0.11111111, %v6704_v34 }
 0x80c   :  { %v6707_v53 = vsub.f32 %v6682_v38, %v6706_v55  ;;  %v6708_v15 = vsub.f32 %v6687_v27, %v6706_v55  ;;  %v6709_v45 = vsub.f32 %v6692_v24, %v6706_v55  ;;  %v6721_v13 = vmul.f32 15.0, %v6706_v55 }
 0x80e   :  { %v6710_v40 = vmul.f32 %v6707_v53, %v6707_v53  ;;  %v6711_v33 = vmul.f32 %v6708_v15, %v6708_v15  ;;  %v6712_v56 = vmul.f32 %v6709_v45, %v6709_v45  ;;  %v6722_v54 = vmul.f32 %v6721_v13, %v6706_v55 }
 0x810   :  { %v6713_v29 = vadd.f32 %v6711_v33, %v6710_v40 }
 0x812   :  { %v6714_v46 = vadd.f32 %v6713_v29, %v6712_v56 }
 0x814   :  { %v6715_v32 = vrot.slane %v6714_v46, 4 }
 0x816   :  { %v6716_v3 = vadd.f32 %v6715_v32, %v6714_v46 }
 0x818   :  { %v6717_v17 = vrot.slane %v6716_v3, 2 }
 0x81a   :  { %v6718_v51 = vadd.f32 %v6717_v17, %v6716_v3 }
 0x81c   :  { %v6719_v16 = vrot.slane %v6718_v51, 1 }
 0x81e   :  { %v6720_v39 = vadd.f32 %v6719_v16, %v6718_v51 }
 0x820   :  { %v6723_v63 = vsub.f32 %v6720_v39, %v6722_v54 }
 0x822   :  { %v6724_v20 = vmul.f32 0.11111111, %v6723_v63 }
 0x824   :  { %v6725_v8 = vmax.f32 %v6724_v20, 0.0 }
 0x826   :  { %v6726_v52 = vadd.f32 1e-05, %v6725_v8 }
 0x828   :  { %7595 = vrsqrt.f32 %v6726_v52 }
 0x835   :  { %v7596_v5 = vpop.eup %7595 }
 0x836   :  { %v6728_v41 = vmul.f32 %v7596_v5, %v6695_v0 }
 0x838   :  { %v6729_v6 = vmul.f32 %v6728_v41, %v6706_v55  ;;  %v6734_v61 = vrot.slane %v6728_v41, %v14864_v43  ;;  %v14923_v41 = vlaneseq }
 0x83a   :  { %v6730_v19 = vsub.f32 %v6696_v30, %v6729_v6  ;;  %v6735_v22 = vmul.f32 %v6734_v61, %v6682_v38  ;;  %v6736_v11 = vmul.f32 %v6734_v61, %v6687_v27  ;;  %v6737_v12 = vmul.f32 %v6734_v61, %v6692_v24  ;;  %v6909_v38 = vld [vmem:[%s13803_s7 + $0x40] sm:$0xff] }
 0x83b   :  { %v6770_v30 = vand.u32 127, %v14923_v41  ;;  %v6771_v61 = vld [vmem:[%s13804_s8] sm:$0x1]  ;;  %s7606_s8 = scalar_lea.vmem %s6846_s15, 16 }
 0x83c   :  { %v6741_v18 = vrot.slane %v6730_v19, %v14864_v43  ;;  %p7607_p0 = scmp.ne.s32.totalorder %s6846_s15, %s7606_s8  ;;  %p7612_p2 = scmp.lt.s32.totalorder %s7610_s16, %s7606_s8 }
 0x83d   :  { %vm6788_vm4 = vcmp.eq.s32.totalorder %v6770_v30, 0  ;;  %vm6808_vm0 = vcmp.eq.s32.totalorder %v6770_v30, 1  ;;  %vm6828_vm3 = vcmp.eq.s32.totalorder %v6770_v30, 2 }
 0x83e   :  { %v6742_v59 = vadd.f32 %v6741_v18, %v6735_v22  ;;  %v6743_v57 = vadd.f32 %v6741_v18, %v6736_v11  ;;  %v6744_v50 = vadd.f32 %v6741_v18, %v6737_v12  ;;  %p7613_p3 = por %p7612_p2, %p7611_p1 }
 0x840   :  { %vm6747_vm14 = vcmp.ge.f32.partialorder %v6744_v50, 0.0  ;;  %v6750_v9 = vmul.f32 0.01, %v6744_v50  ;;  %vm6745_vm9 = vcmp.ge.f32.partialorder %v6742_v59, 0.0  ;;  %vm6746_vm7 = vcmp.ge.f32.partialorder %v6743_v57, 0.0  ;;  %p7614_p4 = pnand %p7613_p3, %p7607_p0 }
 0x841   :  { %v6748_v43 = vmul.f32 0.01, %v6742_v59  ;;  %v6749_v44 = vmul.f32 0.01, %v6743_v57 }
 0x842   :  { %v6753_v4 = vsel %vm6747_vm14, %v6744_v50, %v6750_v9 }
 0x843   :  { %v6751_v48 = vsel %vm6745_vm9, %v6742_v59, %v6748_v43  ;;  %v6752_v23 = vsel %vm6746_vm7, %v6743_v57, %v6749_v44  ;;  %v6762_v1 = vsel %vm6759_vm5, %v6753_v4, 0.0 }
 0x844   :  { %v6760_v36 = vsel %vm13752_vm2, %v6751_v48, 0.0  ;;  %v6761_v27 = vsel %vm6758_vm13, %v6752_v23, 0.0  ;;  %v6817_v37 = vmul.f32 %v6909_v38, %v6762_v1  ;;  %v6777_v49 = vmul.f32 %v6774_v58, %v6762_v1 }
 0x845   :  { %v6815_v60 = vmul.f32 %v6907_v42, %v6760_v36  ;;  %v6816_v7 = vmul.f32 %v6908_v62, %v6761_v27  ;;  %v6775_v24 = vmul.f32 %v6772_v21, %v6760_v36  ;;  %v6776_v31 = vmul.f32 %v6773_v14, %v6761_v27 }
 0x846   :  { %v6795_v10 = vmul.f32 %v6904_v25, %v6760_v36  ;;  %v6796_v26 = vmul.f32 %v6905_v2, %v6761_v27  ;;  %v6797_v55 = vmul.f32 %v6906_v28, %v6762_v1 }
 0x847   :  { %v6818_v47 = vadd.f32 %v6816_v7, %v6815_v60  ;;  %v6778_v34 = vadd.f32 %v6776_v31, %v6775_v24 }
 0x848   :  { %v6798_v53 = vadd.f32 %v6796_v26, %v6795_v10 }
 0x849   :  { %v6819_v15 = vadd.f32 %v6818_v47, %v6817_v37  ;;  %v6779_v45 = vadd.f32 %v6778_v34, %v6777_v49 }
 0x84a   :  { %v6799_v40 = vadd.f32 %v6798_v53, %v6797_v55 }
 0x84b   :  { %v6820_v33 = vrot.slane %v6819_v15, 4  ;;  %v6780_v56 = vrot.slane %v6779_v45, 4 }
 0x84c   :  { %v6800_v29 = vrot.slane %v6799_v40, 4 }
 0x84d   :  { %v6821_v46 = vadd.f32 %v6820_v33, %v6819_v15  ;;  %v6781_v32 = vadd.f32 %v6780_v56, %v6779_v45 }
 0x84e   :  { %v6801_v3 = vadd.f32 %v6800_v29, %v6799_v40 }
 0x84f   :  { %v6822_v17 = vrot.slane %v6821_v46, 2  ;;  %v6782_v51 = vrot.slane %v6781_v32, 2 }
 0x850   :  { %v6802_v13 = vrot.slane %v6801_v3, 2 }
 0x851   :  { %v6823_v16 = vadd.f32 %v6822_v17, %v6821_v46  ;;  %v6783_v39 = vadd.f32 %v6782_v51, %v6781_v32 }
 0x852   :  { %v6803_v54 = vadd.f32 %v6802_v13, %v6801_v3 }
 0x853   :  { %v6824_v63 = vrot.slane %v6823_v16, 1  ;;  %v6784_v20 = vrot.slane %v6783_v39, 1 }
 0x854   :  { %v6804_v0 = vrot.slane %v6803_v54, 1 }
 0x855   :  { %v6825_v8 = vadd.f32 %v6824_v63, %v6823_v16  ;;  %v6785_v52 = vadd.f32 %v6784_v20, %v6783_v39 }
 0x856   :  { %v6805_v5 = vadd.f32 %v6804_v0, %v6803_v54 }
 0x857   :  { %6826 = vadd.xlane.f32.xlu1 %v6825_v8  ;;  %6786 = vadd.xlane.f32.xlu0 %v6785_v52 }
 0x85b   :  { %6806 = vadd.xlane.f32.xlu0 %v6805_v5 }
 0x8e0   :  { %v6787_v6 = vpop.xlane.xlu0 %6786  ;;  %v6827_v22 = vpop.xlane.xlu1 %6826 }
 0x8e1   :  { %v6789_v19 = vsel %vm6788_vm4, %v6787_v6, 0.0  ;;  %v6829_v57 = vsel %vm6828_vm3, %v6827_v22, 0.0 }
 0x8e2   :  { %v6790_v11 = vadd.f32 %v6789_v19, %v6771_v61 }
 0x8e4   :  { %v6807_v12 = vpop.xlane.xlu0 %6806 }
 0x8e5   :  { %v6809_v18 = vsel %vm6808_vm0, %v6807_v12, 0.0 }
 0x8e6   :  { %v6810_v59 = vadd.f32 %v6809_v18, %v6790_v11 }
 0x8e8   :  { %v6830_v50 = vadd.f32 %v6829_v57, %v6810_v59 }
 0x8ea   :  { %v6832_v35 = vmin.f32 %v6830_v50, 0.0  ;;  %vm6831_vm1 = vcmp.gt.f32.partialorder %v6830_v50, 0.0 }
 0x8ec   :  { %v6833_v9 = vmul.f32 1.442695, %v6832_v35 }
 0x8ee   :  { %7597 = vpow2.f32 %v6833_v9 }
 0x8fb   :  { %v7598_v43 = vpop.eup %7597 }
 0x8fc   :  { %v6910_v44 = vadd.f32 -1.0, %v7598_v43 }
 0x8fe   :  { %v6836_v42 = vsel %vm6831_vm1, %v6830_v50, %v6910_v44 }
 0x8ff   :  { %v6837_v4 = vadd.f32 1.0, %v6836_v42 }
 0x901   :  { %6838 = vst [vmem:[#allocation7] sm:$0x1] %v6837_v4 }
 0x902   :  { %7617 = shalt.err (!%p7614_p4)
}
 0x903   :  { %6848 = dma.vmem_to_hbm [thread:$0]  %s6846_s15, 16, %s13805_s9, [#allocation8]  }
 0x904   :  { %7626 = dma.done.wait [#allocation8], 16  }
 0x905   :  { %7627 = vsyncadd [#allocation8], 4294967280 }
 0x906   :  { %6852 = vsyncpa [#allocation8], 1 }

</bundles_post_ra>
